<compile_context>
chip_gen: v7x
topology: tpu7x:2x2x1
jax: 0.10.0
libtpu: 0.0.40
codegen_flags: <defaults>
</compile_context>

<pallas_src>
import functools

import jax
import jax.numpy as jnp
from jax import lax
from jax.experimental import pallas as pl
from jax.experimental.pallas import tpu as pltpu


_ACC_BYTES = 128 * 1024      # f32 matmul accumulator budget per tile
_PATCH_BYTES = 512 * 1024    # bf16 im2col patch budget per tile


# ----------------------------------------------------------------------------
# Fused kernel: conv1..conv3 (+LeakyReLU) + classifier, one image per grid step
# ----------------------------------------------------------------------------
def _fused_disc_kernel(x_ref, w1_ref, b1_ref, w2_ref, b2_ref, w3_ref, b3_ref,
                       w4_ref, b4_ref, o_ref, bufa_ref, bufb_ref,
                       *, H, W, c_in, ndf1, ndf2, neg_slope, trs):
    """Refs (one grid step == one image):
      x_ref  : (H+2, W, c_in)            bf16  top/bottom zero-padded input
      w1_ref : (9*c_in, ndf1)            bf16  conv1 weights, (kh,kw,ci) flat
      w2_ref : (3, 3*ndf1, ndf2)         bf16  conv2 weights, (kh)(kw,ci)
      w3_ref : (9*ndf2, ndf2)            bf16  conv3 weights, (kh,kw,ci) flat
      w4_ref : (9, ndf2)                 f32   classifier weights, (kh*kw, ci)
      bX_ref : (1, CoutX)                f32   biases (b4 is (1, 1))
      o_ref  : (H, W)                    f32   classifier map (lane-dense)
      bufa   : (H+2, W, max(ndf1,ndf2))  bf16  conv1 act, reused for conv3 act
      bufb   : (H+2, W, ndf2)            bf16  conv2 act
    """
    tr1, tr2, tr3, tr4 = trs

    # Zero the top/bottom halo rows of both scratches.  Interior rows are
    # fully rewritten for every image; width halos do not exist (they are
    # synthesized at read time).  Not guarded on program_id==0: with a
    # core-sharded "parallel" grid the second core never sees step 0.
    for buf in (bufa_ref, bufb_ref):
        c = buf.shape[-1]
        zrow = jnp.zeros((1, W, c), buf.dtype)
        buf[0:1, :, :] = zrow
        buf[H + 1:H + 2, :, :] = zrow

    def taps(rows):
        """(tr, W, c) -> (kw=0, kw=1, kw=2) taps with zero edge columns."""
        t, _, c = rows.shape
        zc = jnp.zeros((t, 1, c), rows.dtype)
        left = jnp.concatenate([zc, rows[:, :W - 1, :]], axis=1)   # col j-1
        right = jnp.concatenate([rows[:, 1:, :], zc], axis=1)      # col j+1
        return left, rows, right

    def conv3x3_mxu(load_rows, cin, cout, tr, w_taps, w_flat, bias, store,
                    lrelu):
        """3x3 conv (stride 1), row-tiled.  If `w_flat` is given: one merged
        K = 9*cin matmul per tile; otherwise 3 matmuls of K = 3*cin."""
        n_tiles = H // tr

        def patch_for(r0, dh):
            l, c, r = taps(load_rows(r0 + dh, tr))
            return jnp.concatenate([l, c, r], axis=-1)        # (tr, W, 3*cin)

        def tile_body(t, carry):
            r0 = t * tr
            if tr % 8 == 0:
                r0 = pl.multiple_of(r0, 8)
            if w_flat is not None:                            # merged kh taps
                patch = jnp.concatenate(
                    [patch_for(r0, dh) for dh in range(3)],
                    axis=-1).reshape(tr * W, 9 * cin)
                acc = jnp.dot(patch, w_flat,
                              preferred_element_type=jnp.float32)
            else:                                             # per-kh matmuls
                acc = jnp.zeros((tr * W, cout), jnp.float32)
                for dh in range(3):
                    acc = acc + jnp.dot(
                        patch_for(r0, dh).reshape(tr * W, 3 * cin),
                        w_taps[dh], preferred_element_type=jnp.float32)
            acc = acc + bias                                  # f32 bias
            if lrelu:
                acc = jnp.where(acc > 0, acc, neg_slope * acc)
            store(r0, acc.reshape(tr, W, cout))
            return carry

        lax.fori_loop(0, n_tiles, tile_body, 0, unroll=True)

    def read_from(buf_ref, cin):
        return lambda r, n: buf_ref[pl.ds(r, n), :, 0:cin]

    def store_into(buf_ref, cout):
        def store(r0, act):
            buf_ref[pl.ds(r0 + 1, act.shape[0]), :, 0:cout] = (
                act.astype(buf_ref.dtype))
        return store

    # conv1: full 3x3 im2col, single K = 9*c_in matmul per tile.
    conv3x3_mxu(lambda r, n: x_ref[pl.ds(r, n), :, :], c_in, ndf1, tr1,
                None, w1_ref[...], b1_ref[...],
                store_into(bufa_ref, ndf1), True)

    # conv2: K = 3*ndf1 per kh tap (exact multiple of the MXU depth).
    w2_taps = (w2_ref[0], w2_ref[1], w2_ref[2])               # hoisted loads
    conv3x3_mxu(read_from(bufa_ref, ndf1), ndf1, ndf2, tr2,
                w2_taps, None, b2_ref[...],
                store_into(bufb_ref, ndf2), True)

    # conv3: merged kh taps (K = 9*ndf2); writes back into bufa[:, :, :ndf2].
    conv3x3_mxu(read_from(bufb_ref, ndf2), ndf2, ndf2, tr3,
                None, w3_ref[...], b3_ref[...],
                store_into(bufa_ref, ndf2), True)

    # classifier (Cout = 1): VPU/XLU -- 9 channel-weighted taps + lane reduce.
    w4_all = w4_ref[...]                                      # (9, ndf2) f32
    w4_rows = [w4_all[k:k + 1, :] for k in range(9)]          # (1, ndf2) each
    b4 = b4_ref[...]                                          # (1, 1) f32
    load3 = read_from(bufa_ref, ndf2)
    n_tiles4 = H // tr4

    def cls_tile(t, carry):
        r0 = t * tr4
        if tr4 % 8 == 0:
            r0 = pl.multiple_of(r0, 8)
        acc = jnp.zeros((tr4, W, ndf2), jnp.float32)
        for dh in range(3):
            tap3 = taps(load3(r0 + dh, tr4))
            for dw in range(3):
                acc = acc + tap3[dw].astype(jnp.float32) * w4_rows[dh * 3 + dw]
        o_ref[pl.ds(r0, tr4), :] = acc.sum(axis=-1) + b4      # (tr4, W) f32
        return carry

    lax.fori_loop(0, n_tiles4, cls_tile, 0, unroll=True)


def _pick_tr(H, W, k_depth, cout):
    """Rows/tile: f32 acc <= 128 KiB, bf16 patch <= 512 KiB, divides H."""
    cap = min(H,
              max(1, _ACC_BYTES // (W * cout * 4)),
              max(1, _PATCH_BYTES // (W * max(1, k_depth) * 2)))
    while H % cap:
        cap -= 1
    return cap


# ----------------------------------------------------------------------------
# Module wrapper: FCDiscriminator_img forward (NCHW in / NCHW out)
# ----------------------------------------------------------------------------
def fc_discriminator_img(x_nchw, params, *, neg_slope=0.2):
    x = jnp.transpose(x_nchw, (0, 2, 3, 1))                   # NCHW -> NHWC
    N, H, W, c_in = x.shape
    ndf1 = params["w1"].shape[-1]
    ndf2 = params["w2"].shape[-1]
    assert W % 8 == 0, "kernel assumes W is a multiple of 8 (sublane tiling)"

    # Only top/bottom halo rows are padded in HBM; width halos are synthesized
    # in-register.  bf16 inputs for the MXU.
    x_pad = jnp.pad(x.astype(jnp.bfloat16), ((0, 0), (1, 1), (0, 0), (0, 0)))

    # Weights pre-shaped exactly as the kernel consumes them (HWIO flattening).
    w1 = params["w1"].reshape(9 * c_in, ndf1).astype(jnp.bfloat16)
    w2 = params["w2"].reshape(3, 3 * ndf1, ndf2).astype(jnp.bfloat16)
    w3 = params["w3"].reshape(9 * ndf2, ndf2).astype(jnp.bfloat16)
    w4 = params["w4"].reshape(9, ndf2).astype(jnp.float32)    # VPU classifier
    b1 = params["b1"].reshape(1, -1).astype(jnp.float32)
    b2 = params["b2"].reshape(1, -1).astype(jnp.float32)
    b3 = params["b3"].reshape(1, -1).astype(jnp.float32)
    b4 = params["b4"].reshape(1, 1).astype(jnp.float32)

    trs = (_pick_tr(H, W, 9 * c_in, ndf1),    # conv1 (merged 3x3 im2col)
           _pick_tr(H, W, 3 * ndf1, ndf2),    # conv2 (per-kh taps)
           _pick_tr(H, W, 9 * ndf2, ndf2),    # conv3 (merged kh taps)
           _pick_tr(H, W, 1, ndf2))           # classifier VPU accumulator

    kernel = functools.partial(
        _fused_disc_kernel, H=H, W=W, c_in=c_in, ndf1=ndf1, ndf2=ndf2,
        neg_slope=neg_slope, trs=trs)

    c_a = max(ndf1, ndf2)                                     # ping-pong buf A

    flops = int(2 * 9 * H * W * N *
                (c_in * ndf1 + ndf1 * ndf2 + ndf2 * ndf2 + ndf2))
    bytes_accessed = int(x_pad.size * 2 +
                         (w1.size + w2.size + w3.size) * 2 + w4.size * 4 +
                         (b1.size + b2.size + b3.size + b4.size) * 4 +
                         N * H * W * 4)

    out = pl.pallas_call(
        kernel,
        out_shape=jax.ShapeDtypeStruct((N, H, W), jnp.float32),
        grid_spec=pltpu.PrefetchScalarGridSpec(
            num_scalar_prefetch=0,
            grid=(N,),                                        # one image/step
            in_specs=[
                pl.BlockSpec((None, H + 2, W, c_in), lambda n: (n, 0, 0, 0)),
                pl.BlockSpec((9 * c_in, ndf1), lambda n: (0, 0)),
                pl.BlockSpec((1, ndf1), lambda n: (0, 0)),
                pl.BlockSpec((3, 3 * ndf1, ndf2), lambda n: (0, 0, 0)),
                pl.BlockSpec((1, ndf2), lambda n: (0, 0)),
                pl.BlockSpec((9 * ndf2, ndf2), lambda n: (0, 0)),
                pl.BlockSpec((1, ndf2), lambda n: (0, 0)),
                pl.BlockSpec((9, ndf2), lambda n: (0, 0)),
                pl.BlockSpec((1, 1), lambda n: (0, 0)),
            ],
            out_specs=pl.BlockSpec((None, H, W), lambda n: (n, 0, 0)),
            scratch_shapes=[
                pltpu.VMEM((H + 2, W, c_a), jnp.bfloat16),    # conv1/conv3 act
                pltpu.VMEM((H + 2, W, ndf2), jnp.bfloat16),   # conv2 act
            ]),
        compiler_params=pltpu.CompilerParams(
            dimension_semantics=("parallel",),
            vmem_limit_bytes=48 * 1024 * 1024),               # v7x-safe budget
        cost_estimate=pl.CostEstimate(
            flops=flops, transcendentals=0, bytes_accessed=bytes_accessed),
    )(x_pad, w1, b1, w2, b2, w3, b3, w4, b4)

    return out[:, None, :, :]                                 # (N, 1, H, W)


# ----------------------------------------------------------------------------
# Parameters (HWIO weights) and a pure-JAX reference with the same bf16 math
# ----------------------------------------------------------------------------
def init_params(key, num_classes, ndf1=256, ndf2=128):
    shapes = [(num_classes, ndf1), (ndf1, ndf2), (ndf2, ndf2), (ndf2, 1)]
    params = {}
    keys = jax.random.split(key, len(shapes))
    for i, ((cin, cout), k) in enumerate(zip(shapes, keys), start=1):
        kw, kb = jax.random.split(k)
        fan_in = cin * 9
        params[f"w{i}"] = (jax.random.normal(kw, (3, 3, cin, cout), jnp.float32)
                           * (2.0 / fan_in) ** 0.5)
        params[f"b{i}"] = jax.random.normal(kb, (cout,), jnp.float32) * 0.01
    return params


def _ref_forward(x_nchw, params, neg_slope=0.2):
    """Same math as the kernel: bf16 inputs/weights with f32 accumulation for
    conv1-3, f32 classifier weights applied to the bf16 activations."""
    x = jnp.transpose(x_nchw, (0, 2, 3, 1)).astype(jnp.bfloat16)

    def conv(h, w, b):
        y = lax.conv_general_dilated(
            h, w, window_strides=(1, 1), padding=((1, 1), (1, 1)),
            dimension_numbers=("NHWC", "HWIO", "NHWC"),
            preferred_element_type=jnp.float32)
        return y + b[None, None, None, :]

    for i in (1, 2, 3):
        y = conv(x, params[f"w{i}"].astype(jnp.bfloat16), params[f"b{i}"])
        y = jnp.where(y > 0, y, neg_slope * y)
        x = y.astype(jnp.bfloat16)
    y = conv(x.astype(jnp.float32), params["w4"], params["b4"])
    return jnp.transpose(y, (0, 3, 1, 2))


if __name__ == "__main__":
    key = jax.random.PRNGKey(0)
    k_x, k_p = jax.random.split(key)

    N, num_classes, H, W = 2, 4, 16, 16
    x = jax.random.normal(k_x, (N, num_classes, H, W), jnp.float32)
    params = init_params(k_p, num_classes, ndf1=256, ndf2=128)

    out = jax.block_until_ready(jax.jit(fc_discriminator_img)(x, params))
    assert out.shape == (N, 1, H, W), out.shape

    ref = jax.block_until_ready(jax.jit(_ref_forward)(x, params))
    err = float(jnp.max(jnp.abs(out - ref)))
    assert jnp.allclose(out, ref, atol=1e-2, rtol=1e-2), err

    print("KERNEL_OK")
</pallas_src>

<mosaic_0001>
module attributes {stable_mosaic.version = 11 : i64} {
  func.func @_fused_disc_kernel(%arg0: i32, %arg1: memref<1x18x16x4xbf16, #tpu.memory_space<vmem>>, %arg2: memref<36x256xbf16, #tpu.memory_space<vmem>>, %arg3: memref<1x256xf32, #tpu.memory_space<vmem>>, %arg4: memref<3x768x128xbf16, #tpu.memory_space<vmem>>, %arg5: memref<1x128xf32, #tpu.memory_space<vmem>>, %arg6: memref<1152x128xbf16, #tpu.memory_space<vmem>>, %arg7: memref<1x128xf32, #tpu.memory_space<vmem>>, %arg8: memref<9x128xf32, #tpu.memory_space<vmem>>, %arg9: memref<1x1xf32, #tpu.memory_space<vmem>>, %arg10: memref<1x16x16xf32, #tpu.memory_space<vmem>>, %arg11: memref<18x16x256xbf16, #tpu.memory_space<vmem>>, %arg12: memref<18x16x128xbf16, #tpu.memory_space<vmem>>) attributes {dimension_semantics = [#tpu.dimension_semantics<parallel>], iteration_bounds = array<i64: 2>, scalar_prefetch = 0 : i64, scratch_operands = 2 : i64, tpu.core_type = #tpu.core_type<tc>, window_params = [{transform_indices = @transform_0, window_bounds = array<i64: 1, 18, 16, 4>}, {pipeline_mode = #tpu.pipeline_mode<synchronous>, transform_indices = @transform_1, window_bounds = array<i64: 36, 256>}, {pipeline_mode = #tpu.pipeline_mode<synchronous>, transform_indices = @transform_2, window_bounds = array<i64: 1, 256>}, {pipeline_mode = #tpu.pipeline_mode<synchronous>, transform_indices = @transform_3, window_bounds = array<i64: 3, 768, 128>}, {pipeline_mode = #tpu.pipeline_mode<synchronous>, transform_indices = @transform_4, window_bounds = array<i64: 1, 128>}, {pipeline_mode = #tpu.pipeline_mode<synchronous>, transform_indices = @transform_5, window_bounds = array<i64: 1152, 128>}, {pipeline_mode = #tpu.pipeline_mode<synchronous>, transform_indices = @transform_6, window_bounds = array<i64: 1, 128>}, {pipeline_mode = #tpu.pipeline_mode<synchronous>, transform_indices = @transform_7, window_bounds = array<i64: 9, 128>}, {pipeline_mode = #tpu.pipeline_mode<synchronous>, transform_indices = @transform_8, window_bounds = array<i64: 1, 1>}, {transform_indices = @transform_9, window_bounds = array<i64: 1, 16, 16>}]} {
    %cst = arith.constant 0.000000e+00 : bf16
    %0 = vector.broadcast %cst : bf16 to vector<1x16x256xbf16>
    %c0 = arith.constant 0 : index
    %c0_0 = arith.constant 0 : index
    %c0_1 = arith.constant 0 : index
    %1 = vector.load %arg11[%c0, %c0_0, %c0_1] : memref<18x16x256xbf16, #tpu.memory_space<vmem>>, vector<1x16x256xbf16>
    tpu.vector_store %arg11[%c0, %c0_0, %c0_1], %0 {strides = array<i32>} : memref<18x16x256xbf16, #tpu.memory_space<vmem>>, vector<1x16x256xbf16>,
    %c17 = arith.constant 17 : index
    %c0_2 = arith.constant 0 : index
    %c0_3 = arith.constant 0 : index
    %2 = vector.load %arg11[%c17, %c0_2, %c0_3] : memref<18x16x256xbf16, #tpu.memory_space<vmem>>, vector<1x16x256xbf16>
    tpu.vector_store %arg11[%c17, %c0_2, %c0_3], %0 {strides = array<i32>} : memref<18x16x256xbf16, #tpu.memory_space<vmem>>, vector<1x16x256xbf16>,
    %cst_4 = arith.constant 0.000000e+00 : bf16
    %3 = vector.broadcast %cst_4 : bf16 to vector<1x16x128xbf16>
    %c0_5 = arith.constant 0 : index
    %c0_6 = arith.constant 0 : index
    %c0_7 = arith.constant 0 : index
    %4 = vector.load %arg12[%c0_5, %c0_6, %c0_7] : memref<18x16x128xbf16, #tpu.memory_space<vmem>>, vector<1x16x128xbf16>
    tpu.vector_store %arg12[%c0_5, %c0_6, %c0_7], %3 {strides = array<i32>} : memref<18x16x128xbf16, #tpu.memory_space<vmem>>, vector<1x16x128xbf16>,
    %c17_8 = arith.constant 17 : index
    %c0_9 = arith.constant 0 : index
    %c0_10 = arith.constant 0 : index
    %5 = vector.load %arg12[%c17_8, %c0_9, %c0_10] : memref<18x16x128xbf16, #tpu.memory_space<vmem>>, vector<1x16x128xbf16>
    tpu.vector_store %arg12[%c17_8, %c0_9, %c0_10], %3 {strides = array<i32>} : memref<18x16x128xbf16, #tpu.memory_space<vmem>>, vector<1x16x128xbf16>,
    %c0_11 = arith.constant 0 : index
    %c0_12 = arith.constant 0 : index
    %6 = vector.load %arg2[%c0_11, %c0_12] : memref<36x256xbf16, #tpu.memory_space<vmem>>, vector<36x256xbf16>
    %c0_13 = arith.constant 0 : index
    %c0_14 = arith.constant 0 : index
    %7 = vector.load %arg3[%c0_13, %c0_14] : memref<1x256xf32, #tpu.memory_space<vmem>>, vector<1x256xf32>
    %c0_i32 = arith.constant 0 : i32
    %c8_i32 = arith.constant 8 : i32
    %8 = arith.muli %c0_i32, %c8_i32 : i32
    %9 = tpu.assume_multiple %8, 8 : i32
    %c0_i32_15 = arith.constant 0 : i32
    %10 = arith.addi %9, %c0_i32_15 : i32
    %c0_16 = arith.constant 0 : index
    %11 = arith.index_cast %10 : i32 to index
    %c0_17 = arith.constant 0 : index
    %c0_18 = arith.constant 0 : index
    %12 = vector.load %arg1[%c0_16, %11, %c0_17, %c0_18] : memref<1x18x16x4xbf16, #tpu.memory_space<vmem>>, vector<1x8x16x4xbf16>
    %13 = vector.shape_cast %12 : vector<1x8x16x4xbf16> to vector<8x16x4xbf16>
    %cst_19 = arith.constant 0.000000e+00 : bf16
    %14 = vector.broadcast %cst_19 : bf16 to vector<8x1x4xbf16>
    %15 = vector.extract_strided_slice %13 {offsets = [0, 0, 0], sizes = [8, 15, 4], strides = [1, 1, 1]} : vector<8x16x4xbf16> to vector<8x15x4xbf16>
    %16 = tpu.concatenate %14, %15 in 1 : vector<8x1x4xbf16>, vector<8x15x4xbf16> -> vector<8x16x4xbf16>
    %17 = vector.extract_strided_slice %13 {offsets = [0, 1, 0], sizes = [8, 15, 4], strides = [1, 1, 1]} : vector<8x16x4xbf16> to vector<8x15x4xbf16>
    %18 = tpu.concatenate %17, %14 in 1 : vector<8x15x4xbf16>, vector<8x1x4xbf16> -> vector<8x16x4xbf16>
    %19 = tpu.concatenate %16, %13, %18 in 2 : vector<8x16x4xbf16>, vector<8x16x4xbf16>, vector<8x16x4xbf16> -> vector<8x16x12xbf16>
    %c1_i32 = arith.constant 1 : i32
    %20 = arith.addi %9, %c1_i32 : i32
    %c0_20 = arith.constant 0 : index
    %21 = arith.index_cast %20 : i32 to index
    %c0_21 = arith.constant 0 : index
    %c0_22 = arith.constant 0 : index
    %22 = vector.load %arg1[%c0_20, %21, %c0_21, %c0_22] : memref<1x18x16x4xbf16, #tpu.memory_space<vmem>>, vector<1x8x16x4xbf16>
    %23 = vector.shape_cast %22 : vector<1x8x16x4xbf16> to vector<8x16x4xbf16>
    %cst_23 = arith.constant 0.000000e+00 : bf16
    %24 = vector.broadcast %cst_23 : bf16 to vector<8x1x4xbf16>
    %25 = vector.extract_strided_slice %23 {offsets = [0, 0, 0], sizes = [8, 15, 4], strides = [1, 1, 1]} : vector<8x16x4xbf16> to vector<8x15x4xbf16>
    %26 = tpu.concatenate %24, %25 in 1 : vector<8x1x4xbf16>, vector<8x15x4xbf16> -> vector<8x16x4xbf16>
    %27 = vector.extract_strided_slice %23 {offsets = [0, 1, 0], sizes = [8, 15, 4], strides = [1, 1, 1]} : vector<8x16x4xbf16> to vector<8x15x4xbf16>
    %28 = tpu.concatenate %27, %24 in 1 : vector<8x15x4xbf16>, vector<8x1x4xbf16> -> vector<8x16x4xbf16>
    %29 = tpu.concatenate %26, %23, %28 in 2 : vector<8x16x4xbf16>, vector<8x16x4xbf16>, vector<8x16x4xbf16> -> vector<8x16x12xbf16>
    %c2_i32 = arith.constant 2 : i32
    %30 = arith.addi %9, %c2_i32 : i32
    %c0_24 = arith.constant 0 : index
    %31 = arith.index_cast %30 : i32 to index
    %c0_25 = arith.constant 0 : index
    %c0_26 = arith.constant 0 : index
    %32 = vector.load %arg1[%c0_24, %31, %c0_25, %c0_26] : memref<1x18x16x4xbf16, #tpu.memory_space<vmem>>, vector<1x8x16x4xbf16>
    %33 = vector.shape_cast %32 : vector<1x8x16x4xbf16> to vector<8x16x4xbf16>
    %cst_27 = arith.constant 0.000000e+00 : bf16
    %34 = vector.broadcast %cst_27 : bf16 to vector<8x1x4xbf16>
    %35 = vector.extract_strided_slice %33 {offsets = [0, 0, 0], sizes = [8, 15, 4], strides = [1, 1, 1]} : vector<8x16x4xbf16> to vector<8x15x4xbf16>
    %36 = tpu.concatenate %34, %35 in 1 : vector<8x1x4xbf16>, vector<8x15x4xbf16> -> vector<8x16x4xbf16>
    %37 = vector.extract_strided_slice %33 {offsets = [0, 1, 0], sizes = [8, 15, 4], strides = [1, 1, 1]} : vector<8x16x4xbf16> to vector<8x15x4xbf16>
    %38 = tpu.concatenate %37, %34 in 1 : vector<8x15x4xbf16>, vector<8x1x4xbf16> -> vector<8x16x4xbf16>
    %39 = tpu.concatenate %36, %33, %38 in 2 : vector<8x16x4xbf16>, vector<8x16x4xbf16>, vector<8x16x4xbf16> -> vector<8x16x12xbf16>
    %40 = tpu.concatenate %19, %29, %39 in 2 : vector<8x16x12xbf16>, vector<8x16x12xbf16>, vector<8x16x12xbf16> -> vector<8x16x36xbf16>
    %41 = vector.shape_cast %40 : vector<8x16x36xbf16> to vector<128x36xbf16>
    %cst_28 = arith.constant dense<0.000000e+00> : vector<128x256xf32>
    %42 = tpu.matmul %41, %6, %cst_28 {dimension_numbers = #tpu.dot_dimension_numbers<[1], [0], [0], [1], [0, 0, 1, 1], [], []>} : vector<128x36xbf16>, vector<36x256xbf16>, vector<128x256xf32> -> vector<128x256xf32>
    %43 = vector.broadcast %7 : vector<1x256xf32> to vector<128x256xf32>
    %44 = arith.addf %42, %43 : vector<128x256xf32>
    %cst_29 = arith.constant 0.000000e+00 : f32
    %45 = vector.broadcast %cst_29 : f32 to vector<128x256xf32>
    %46 = arith.cmpf ogt, %44, %45 : vector<128x256xf32>
    %cst_30 = arith.constant 2.000000e-01 : f32
    %47 = vector.broadcast %cst_30 : f32 to vector<128x256xf32>
    %48 = arith.mulf %47, %44 : vector<128x256xf32>
    %49 = arith.select %46, %44, %48 : vector<128x256xi1>, vector<128x256xf32>
    %50 = vector.shape_cast %49 : vector<128x256xf32> to vector<8x16x256xf32>
    %51 = arith.truncf %50 : vector<8x16x256xf32> to vector<8x16x256xbf16>
    %c1_i32_31 = arith.constant 1 : i32
    %52 = arith.addi %9, %c1_i32_31 : i32
    %53 = arith.index_cast %52 : i32 to index
    %c0_32 = arith.constant 0 : index
    %c0_33 = arith.constant 0 : index
    %54 = vector.load %arg11[%53, %c0_32, %c0_33] : memref<18x16x256xbf16, #tpu.memory_space<vmem>>, vector<8x16x256xbf16>
    tpu.vector_store %arg11[%53, %c0_32, %c0_33], %51 {strides = array<i32>} : memref<18x16x256xbf16, #tpu.memory_space<vmem>>, vector<8x16x256xbf16>,
    %c1_i32_34 = arith.constant 1 : i32
    %c8_i32_35 = arith.constant 8 : i32
    %55 = arith.muli %c1_i32_34, %c8_i32_35 : i32
    %56 = tpu.assume_multiple %55, 8 : i32
    %c0_i32_36 = arith.constant 0 : i32
    %57 = arith.addi %56, %c0_i32_36 : i32
    %c0_37 = arith.constant 0 : index
    %58 = arith.index_cast %57 : i32 to index
    %c0_38 = arith.constant 0 : index
    %c0_39 = arith.constant 0 : index
    %59 = vector.load %arg1[%c0_37, %58, %c0_38, %c0_39] : memref<1x18x16x4xbf16, #tpu.memory_space<vmem>>, vector<1x8x16x4xbf16>
    %60 = vector.shape_cast %59 : vector<1x8x16x4xbf16> to vector<8x16x4xbf16>
    %cst_40 = arith.constant 0.000000e+00 : bf16
    %61 = vector.broadcast %cst_40 : bf16 to vector<8x1x4xbf16>
    %62 = vector.extract_strided_slice %60 {offsets = [0, 0, 0], sizes = [8, 15, 4], strides = [1, 1, 1]} : vector<8x16x4xbf16> to vector<8x15x4xbf16>
    %63 = tpu.concatenate %61, %62 in 1 : vector<8x1x4xbf16>, vector<8x15x4xbf16> -> vector<8x16x4xbf16>
    %64 = vector.extract_strided_slice %60 {offsets = [0, 1, 0], sizes = [8, 15, 4], strides = [1, 1, 1]} : vector<8x16x4xbf16> to vector<8x15x4xbf16>
    %65 = tpu.concatenate %64, %61 in 1 : vector<8x15x4xbf16>, vector<8x1x4xbf16> -> vector<8x16x4xbf16>
    %66 = tpu.concatenate %63, %60, %65 in 2 : vector<8x16x4xbf16>, vector<8x16x4xbf16>, vector<8x16x4xbf16> -> vector<8x16x12xbf16>
    %c1_i32_41 = arith.constant 1 : i32
    %67 = arith.addi %56, %c1_i32_41 : i32
    %c0_42 = arith.constant 0 : index
    %68 = arith.index_cast %67 : i32 to index
    %c0_43 = arith.constant 0 : index
    %c0_44 = arith.constant 0 : index
    %69 = vector.load %arg1[%c0_42, %68, %c0_43, %c0_44] : memref<1x18x16x4xbf16, #tpu.memory_space<vmem>>, vector<1x8x16x4xbf16>
    %70 = vector.shape_cast %69 : vector<1x8x16x4xbf16> to vector<8x16x4xbf16>
    %cst_45 = arith.constant 0.000000e+00 : bf16
    %71 = vector.broadcast %cst_45 : bf16 to vector<8x1x4xbf16>
    %72 = vector.extract_strided_slice %70 {offsets = [0, 0, 0], sizes = [8, 15, 4], strides = [1, 1, 1]} : vector<8x16x4xbf16> to vector<8x15x4xbf16>
    %73 = tpu.concatenate %71, %72 in 1 : vector<8x1x4xbf16>, vector<8x15x4xbf16> -> vector<8x16x4xbf16>
    %74 = vector.extract_strided_slice %70 {offsets = [0, 1, 0], sizes = [8, 15, 4], strides = [1, 1, 1]} : vector<8x16x4xbf16> to vector<8x15x4xbf16>
    %75 = tpu.concatenate %74, %71 in 1 : vector<8x15x4xbf16>, vector<8x1x4xbf16> -> vector<8x16x4xbf16>
    %76 = tpu.concatenate %73, %70, %75 in 2 : vector<8x16x4xbf16>, vector<8x16x4xbf16>, vector<8x16x4xbf16> -> vector<8x16x12xbf16>
    %c2_i32_46 = arith.constant 2 : i32
    %77 = arith.addi %56, %c2_i32_46 : i32
    %c0_47 = arith.constant 0 : index
    %78 = arith.index_cast %77 : i32 to index
    %c0_48 = arith.constant 0 : index
    %c0_49 = arith.constant 0 : index
    %79 = vector.load %arg1[%c0_47, %78, %c0_48, %c0_49] : memref<1x18x16x4xbf16, #tpu.memory_space<vmem>>, vector<1x8x16x4xbf16>
    %80 = vector.shape_cast %79 : vector<1x8x16x4xbf16> to vector<8x16x4xbf16>
    %cst_50 = arith.constant 0.000000e+00 : bf16
    %81 = vector.broadcast %cst_50 : bf16 to vector<8x1x4xbf16>
    %82 = vector.extract_strided_slice %80 {offsets = [0, 0, 0], sizes = [8, 15, 4], strides = [1, 1, 1]} : vector<8x16x4xbf16> to vector<8x15x4xbf16>
    %83 = tpu.concatenate %81, %82 in 1 : vector<8x1x4xbf16>, vector<8x15x4xbf16> -> vector<8x16x4xbf16>
    %84 = vector.extract_strided_slice %80 {offsets = [0, 1, 0], sizes = [8, 15, 4], strides = [1, 1, 1]} : vector<8x16x4xbf16> to vector<8x15x4xbf16>
    %85 = tpu.concatenate %84, %81 in 1 : vector<8x15x4xbf16>, vector<8x1x4xbf16> -> vector<8x16x4xbf16>
    %86 = tpu.concatenate %83, %80, %85 in 2 : vector<8x16x4xbf16>, vector<8x16x4xbf16>, vector<8x16x4xbf16> -> vector<8x16x12xbf16>
    %87 = tpu.concatenate %66, %76, %86 in 2 : vector<8x16x12xbf16>, vector<8x16x12xbf16>, vector<8x16x12xbf16> -> vector<8x16x36xbf16>
    %88 = vector.shape_cast %87 : vector<8x16x36xbf16> to vector<128x36xbf16>
    %cst_51 = arith.constant dense<0.000000e+00> : vector<128x256xf32>
    %89 = tpu.matmul %88, %6, %cst_51 {dimension_numbers = #tpu.dot_dimension_numbers<[1], [0], [0], [1], [0, 0, 1, 1], [], []>} : vector<128x36xbf16>, vector<36x256xbf16>, vector<128x256xf32> -> vector<128x256xf32>
    %90 = vector.broadcast %7 : vector<1x256xf32> to vector<128x256xf32>
    %91 = arith.addf %89, %90 : vector<128x256xf32>
    %cst_52 = arith.constant 0.000000e+00 : f32
    %92 = vector.broadcast %cst_52 : f32 to vector<128x256xf32>
    %93 = arith.cmpf ogt, %91, %92 : vector<128x256xf32>
    %cst_53 = arith.constant 2.000000e-01 : f32
    %94 = vector.broadcast %cst_53 : f32 to vector<128x256xf32>
    %95 = arith.mulf %94, %91 : vector<128x256xf32>
    %96 = arith.select %93, %91, %95 : vector<128x256xi1>, vector<128x256xf32>
    %97 = vector.shape_cast %96 : vector<128x256xf32> to vector<8x16x256xf32>
    %98 = arith.truncf %97 : vector<8x16x256xf32> to vector<8x16x256xbf16>
    %c1_i32_54 = arith.constant 1 : i32
    %99 = arith.addi %56, %c1_i32_54 : i32
    %100 = arith.index_cast %99 : i32 to index
    %c0_55 = arith.constant 0 : index
    %c0_56 = arith.constant 0 : index
    %101 = vector.load %arg11[%100, %c0_55, %c0_56] : memref<18x16x256xbf16, #tpu.memory_space<vmem>>, vector<8x16x256xbf16>
    tpu.vector_store %arg11[%100, %c0_55, %c0_56], %98 {strides = array<i32>} : memref<18x16x256xbf16, #tpu.memory_space<vmem>>, vector<8x16x256xbf16>,
    %c2_i32_57 = arith.constant 2 : i32
    %c0_58 = arith.constant 0 : index
    %c0_59 = arith.constant 0 : index
    %c0_60 = arith.constant 0 : index
    %102 = vector.load %arg4[%c0_58, %c0_59, %c0_60] : memref<3x768x128xbf16, #tpu.memory_space<vmem>>, vector<1x768x128xbf16>
    %103 = vector.shape_cast %102 : vector<1x768x128xbf16> to vector<768x128xbf16>
    %c1 = arith.constant 1 : index
    %c0_61 = arith.constant 0 : index
    %c0_62 = arith.constant 0 : index
    %104 = vector.load %arg4[%c1, %c0_61, %c0_62] : memref<3x768x128xbf16, #tpu.memory_space<vmem>>, vector<1x768x128xbf16>
    %105 = vector.shape_cast %104 : vector<1x768x128xbf16> to vector<768x128xbf16>
    %c2 = arith.constant 2 : index
    %c0_63 = arith.constant 0 : index
    %c0_64 = arith.constant 0 : index
    %106 = vector.load %arg4[%c2, %c0_63, %c0_64] : memref<3x768x128xbf16, #tpu.memory_space<vmem>>, vector<1x768x128xbf16>
    %107 = vector.shape_cast %106 : vector<1x768x128xbf16> to vector<768x128xbf16>
    %c0_65 = arith.constant 0 : index
    %c0_66 = arith.constant 0 : index
    %108 = vector.load %arg5[%c0_65, %c0_66] : memref<1x128xf32, #tpu.memory_space<vmem>>, vector<1x128xf32>
    %c0_i32_67 = arith.constant 0 : i32
    %c16_i32 = arith.constant 16 : i32
    %109 = arith.muli %c0_i32_67, %c16_i32 : i32
    %110 = tpu.assume_multiple %109, 8 : i32
    %cst_68 = arith.constant 0.000000e+00 : f32
    %111 = vector.broadcast %cst_68 : f32 to vector<256x128xf32>
    %c0_i32_69 = arith.constant 0 : i32
    %112 = arith.addi %110, %c0_i32_69 : i32
    %113 = arith.index_cast %112 : i32 to index
    %c0_70 = arith.constant 0 : index
    %c0_71 = arith.constant 0 : index
    %114 = vector.load %arg11[%113, %c0_70, %c0_71] : memref<18x16x256xbf16, #tpu.memory_space<vmem>>, vector<16x16x256xbf16>
    %cst_72 = arith.constant 0.000000e+00 : bf16
    %115 = vector.broadcast %cst_72 : bf16 to vector<16x1x256xbf16>
    %116 = vector.extract_strided_slice %114 {offsets = [0, 0, 0], sizes = [16, 15, 256], strides = [1, 1, 1]} : vector<16x16x256xbf16> to vector<16x15x256xbf16>
    %117 = tpu.concatenate %115, %116 in 1 : vector<16x1x256xbf16>, vector<16x15x256xbf16> -> vector<16x16x256xbf16>
    %118 = vector.extract_strided_slice %114 {offsets = [0, 1, 0], sizes = [16, 15, 256], strides = [1, 1, 1]} : vector<16x16x256xbf16> to vector<16x15x256xbf16>
    %119 = tpu.concatenate %118, %115 in 1 : vector<16x15x256xbf16>, vector<16x1x256xbf16> -> vector<16x16x256xbf16>
    %120 = tpu.concatenate %117, %114, %119 in 2 : vector<16x16x256xbf16>, vector<16x16x256xbf16>, vector<16x16x256xbf16> -> vector<16x16x768xbf16>
    %121 = vector.shape_cast %120 : vector<16x16x768xbf16> to vector<256x768xbf16>
    %cst_73 = arith.constant dense<0.000000e+00> : vector<256x128xf32>
    %122 = tpu.matmul %121, %103, %cst_73 {dimension_numbers = #tpu.dot_dimension_numbers<[1], [0], [0], [1], [0, 0, 1, 1], [], []>} : vector<256x768xbf16>, vector<768x128xbf16>, vector<256x128xf32> -> vector<256x128xf32>
    %123 = arith.addf %111, %122 : vector<256x128xf32>
    %c1_i32_74 = arith.constant 1 : i32
    %124 = arith.addi %110, %c1_i32_74 : i32
    %125 = arith.index_cast %124 : i32 to index
    %c0_75 = arith.constant 0 : index
    %c0_76 = arith.constant 0 : index
    %126 = vector.load %arg11[%125, %c0_75, %c0_76] : memref<18x16x256xbf16, #tpu.memory_space<vmem>>, vector<16x16x256xbf16>
    %cst_77 = arith.constant 0.000000e+00 : bf16
    %127 = vector.broadcast %cst_77 : bf16 to vector<16x1x256xbf16>
    %128 = vector.extract_strided_slice %126 {offsets = [0, 0, 0], sizes = [16, 15, 256], strides = [1, 1, 1]} : vector<16x16x256xbf16> to vector<16x15x256xbf16>
    %129 = tpu.concatenate %127, %128 in 1 : vector<16x1x256xbf16>, vector<16x15x256xbf16> -> vector<16x16x256xbf16>
    %130 = vector.extract_strided_slice %126 {offsets = [0, 1, 0], sizes = [16, 15, 256], strides = [1, 1, 1]} : vector<16x16x256xbf16> to vector<16x15x256xbf16>
    %131 = tpu.concatenate %130, %127 in 1 : vector<16x15x256xbf16>, vector<16x1x256xbf16> -> vector<16x16x256xbf16>
    %132 = tpu.concatenate %129, %126, %131 in 2 : vector<16x16x256xbf16>, vector<16x16x256xbf16>, vector<16x16x256xbf16> -> vector<16x16x768xbf16>
    %133 = vector.shape_cast %132 : vector<16x16x768xbf16> to vector<256x768xbf16>
    %cst_78 = arith.constant dense<0.000000e+00> : vector<256x128xf32>
    %134 = tpu.matmul %133, %105, %cst_78 {dimension_numbers = #tpu.dot_dimension_numbers<[1], [0], [0], [1], [0, 0, 1, 1], [], []>} : vector<256x768xbf16>, vector<768x128xbf16>, vector<256x128xf32> -> vector<256x128xf32>
    %135 = arith.addf %123, %134 : vector<256x128xf32>
    %c2_i32_79 = arith.constant 2 : i32
    %136 = arith.addi %110, %c2_i32_79 : i32
    %137 = arith.index_cast %136 : i32 to index
    %c0_80 = arith.constant 0 : index
    %c0_81 = arith.constant 0 : index
    %138 = vector.load %arg11[%137, %c0_80, %c0_81] : memref<18x16x256xbf16, #tpu.memory_space<vmem>>, vector<16x16x256xbf16>
    %cst_82 = arith.constant 0.000000e+00 : bf16
    %139 = vector.broadcast %cst_82 : bf16 to vector<16x1x256xbf16>
    %140 = vector.extract_strided_slice %138 {offsets = [0, 0, 0], sizes = [16, 15, 256], strides = [1, 1, 1]} : vector<16x16x256xbf16> to vector<16x15x256xbf16>
    %141 = tpu.concatenate %139, %140 in 1 : vector<16x1x256xbf16>, vector<16x15x256xbf16> -> vector<16x16x256xbf16>
    %142 = vector.extract_strided_slice %138 {offsets = [0, 1, 0], sizes = [16, 15, 256], strides = [1, 1, 1]} : vector<16x16x256xbf16> to vector<16x15x256xbf16>
    %143 = tpu.concatenate %142, %139 in 1 : vector<16x15x256xbf16>, vector<16x1x256xbf16> -> vector<16x16x256xbf16>
    %144 = tpu.concatenate %141, %138, %143 in 2 : vector<16x16x256xbf16>, vector<16x16x256xbf16>, vector<16x16x256xbf16> -> vector<16x16x768xbf16>
    %145 = vector.shape_cast %144 : vector<16x16x768xbf16> to vector<256x768xbf16>
    %cst_83 = arith.constant dense<0.000000e+00> : vector<256x128xf32>
    %146 = tpu.matmul %145, %107, %cst_83 {dimension_numbers = #tpu.dot_dimension_numbers<[1], [0], [0], [1], [0, 0, 1, 1], [], []>} : vector<256x768xbf16>, vector<768x128xbf16>, vector<256x128xf32> -> vector<256x128xf32>
    %147 = arith.addf %135, %146 : vector<256x128xf32>
    %148 = vector.broadcast %108 : vector<1x128xf32> to vector<256x128xf32>
    %149 = arith.addf %147, %148 : vector<256x128xf32>
    %cst_84 = arith.constant 0.000000e+00 : f32
    %150 = vector.broadcast %cst_84 : f32 to vector<256x128xf32>
    %151 = arith.cmpf ogt, %149, %150 : vector<256x128xf32>
    %cst_85 = arith.constant 2.000000e-01 : f32
    %152 = vector.broadcast %cst_85 : f32 to vector<256x128xf32>
    %153 = arith.mulf %152, %149 : vector<256x128xf32>
    %154 = arith.select %151, %149, %153 : vector<256x128xi1>, vector<256x128xf32>
    %155 = vector.shape_cast %154 : vector<256x128xf32> to vector<16x16x128xf32>
    %156 = arith.truncf %155 : vector<16x16x128xf32> to vector<16x16x128xbf16>
    %c1_i32_86 = arith.constant 1 : i32
    %157 = arith.addi %110, %c1_i32_86 : i32
    %158 = arith.index_cast %157 : i32 to index
    %c0_87 = arith.constant 0 : index
    %c0_88 = arith.constant 0 : index
    %159 = vector.load %arg12[%158, %c0_87, %c0_88] : memref<18x16x128xbf16, #tpu.memory_space<vmem>>, vector<16x16x128xbf16>
    tpu.vector_store %arg12[%158, %c0_87, %c0_88], %156 {strides = array<i32>} : memref<18x16x128xbf16, #tpu.memory_space<vmem>>, vector<16x16x128xbf16>,
    %c1_i32_89 = arith.constant 1 : i32
    %c0_90 = arith.constant 0 : index
    %c0_91 = arith.constant 0 : index
    %160 = vector.load %arg6[%c0_90, %c0_91] : memref<1152x128xbf16, #tpu.memory_space<vmem>>, vector<1152x128xbf16>
    %c0_92 = arith.constant 0 : index
    %c0_93 = arith.constant 0 : index
    %161 = vector.load %arg7[%c0_92, %c0_93] : memref<1x128xf32, #tpu.memory_space<vmem>>, vector<1x128xf32>
    %c0_i32_94 = arith.constant 0 : i32
    %c8_i32_95 = arith.constant 8 : i32
    %162 = arith.muli %c0_i32_94, %c8_i32_95 : i32
    %163 = tpu.assume_multiple %162, 8 : i32
    %c0_i32_96 = arith.constant 0 : i32
    %164 = arith.addi %163, %c0_i32_96 : i32
    %165 = arith.index_cast %164 : i32 to index
    %c0_97 = arith.constant 0 : index
    %c0_98 = arith.constant 0 : index
    %166 = vector.load %arg12[%165, %c0_97, %c0_98] : memref<18x16x128xbf16, #tpu.memory_space<vmem>>, vector<8x16x128xbf16>
    %cst_99 = arith.constant 0.000000e+00 : bf16
    %167 = vector.broadcast %cst_99 : bf16 to vector<8x1x128xbf16>
    %168 = vector.extract_strided_slice %166 {offsets = [0, 0, 0], sizes = [8, 15, 128], strides = [1, 1, 1]} : vector<8x16x128xbf16> to vector<8x15x128xbf16>
    %169 = tpu.concatenate %167, %168 in 1 : vector<8x1x128xbf16>, vector<8x15x128xbf16> -> vector<8x16x128xbf16>
    %170 = vector.extract_strided_slice %166 {offsets = [0, 1, 0], sizes = [8, 15, 128], strides = [1, 1, 1]} : vector<8x16x128xbf16> to vector<8x15x128xbf16>
    %171 = tpu.concatenate %170, %167 in 1 : vector<8x15x128xbf16>, vector<8x1x128xbf16> -> vector<8x16x128xbf16>
    %172 = tpu.concatenate %169, %166, %171 in 2 : vector<8x16x128xbf16>, vector<8x16x128xbf16>, vector<8x16x128xbf16> -> vector<8x16x384xbf16>
    %c1_i32_100 = arith.constant 1 : i32
    %173 = arith.addi %163, %c1_i32_100 : i32
    %174 = arith.index_cast %173 : i32 to index
    %c0_101 = arith.constant 0 : index
    %c0_102 = arith.constant 0 : index
    %175 = vector.load %arg12[%174, %c0_101, %c0_102] : memref<18x16x128xbf16, #tpu.memory_space<vmem>>, vector<8x16x128xbf16>
    %cst_103 = arith.constant 0.000000e+00 : bf16
    %176 = vector.broadcast %cst_103 : bf16 to vector<8x1x128xbf16>
    %177 = vector.extract_strided_slice %175 {offsets = [0, 0, 0], sizes = [8, 15, 128], strides = [1, 1, 1]} : vector<8x16x128xbf16> to vector<8x15x128xbf16>
    %178 = tpu.concatenate %176, %177 in 1 : vector<8x1x128xbf16>, vector<8x15x128xbf16> -> vector<8x16x128xbf16>
    %179 = vector.extract_strided_slice %175 {offsets = [0, 1, 0], sizes = [8, 15, 128], strides = [1, 1, 1]} : vector<8x16x128xbf16> to vector<8x15x128xbf16>
    %180 = tpu.concatenate %179, %176 in 1 : vector<8x15x128xbf16>, vector<8x1x128xbf16> -> vector<8x16x128xbf16>
    %181 = tpu.concatenate %178, %175, %180 in 2 : vector<8x16x128xbf16>, vector<8x16x128xbf16>, vector<8x16x128xbf16> -> vector<8x16x384xbf16>
    %c2_i32_104 = arith.constant 2 : i32
    %182 = arith.addi %163, %c2_i32_104 : i32
    %183 = arith.index_cast %182 : i32 to index
    %c0_105 = arith.constant 0 : index
    %c0_106 = arith.constant 0 : index
    %184 = vector.load %arg12[%183, %c0_105, %c0_106] : memref<18x16x128xbf16, #tpu.memory_space<vmem>>, vector<8x16x128xbf16>
    %cst_107 = arith.constant 0.000000e+00 : bf16
    %185 = vector.broadcast %cst_107 : bf16 to vector<8x1x128xbf16>
    %186 = vector.extract_strided_slice %184 {offsets = [0, 0, 0], sizes = [8, 15, 128], strides = [1, 1, 1]} : vector<8x16x128xbf16> to vector<8x15x128xbf16>
    %187 = tpu.concatenate %185, %186 in 1 : vector<8x1x128xbf16>, vector<8x15x128xbf16> -> vector<8x16x128xbf16>
    %188 = vector.extract_strided_slice %184 {offsets = [0, 1, 0], sizes = [8, 15, 128], strides = [1, 1, 1]} : vector<8x16x128xbf16> to vector<8x15x128xbf16>
    %189 = tpu.concatenate %188, %185 in 1 : vector<8x15x128xbf16>, vector<8x1x128xbf16> -> vector<8x16x128xbf16>
    %190 = tpu.concatenate %187, %184, %189 in 2 : vector<8x16x128xbf16>, vector<8x16x128xbf16>, vector<8x16x128xbf16> -> vector<8x16x384xbf16>
    %191 = tpu.concatenate %172, %181, %190 in 2 : vector<8x16x384xbf16>, vector<8x16x384xbf16>, vector<8x16x384xbf16> -> vector<8x16x1152xbf16>
    %192 = vector.shape_cast %191 : vector<8x16x1152xbf16> to vector<128x1152xbf16>
    %cst_108 = arith.constant dense<0.000000e+00> : vector<128x128xf32>
    %193 = tpu.matmul %192, %160, %cst_108 {dimension_numbers = #tpu.dot_dimension_numbers<[1], [0], [0], [1], [0, 0, 1, 1], [], []>} : vector<128x1152xbf16>, vector<1152x128xbf16>, vector<128x128xf32> -> vector<128x128xf32>
    %194 = vector.broadcast %161 : vector<1x128xf32> to vector<128x128xf32>
    %195 = arith.addf %193, %194 : vector<128x128xf32>
    %cst_109 = arith.constant 0.000000e+00 : f32
    %196 = vector.broadcast %cst_109 : f32 to vector<128x128xf32>
    %197 = arith.cmpf ogt, %195, %196 : vector<128x128xf32>
    %cst_110 = arith.constant 2.000000e-01 : f32
    %198 = vector.broadcast %cst_110 : f32 to vector<128x128xf32>
    %199 = arith.mulf %198, %195 : vector<128x128xf32>
    %200 = arith.select %197, %195, %199 : vector<128x128xi1>, vector<128x128xf32>
    %201 = vector.shape_cast %200 : vector<128x128xf32> to vector<8x16x128xf32>
    %202 = arith.truncf %201 : vector<8x16x128xf32> to vector<8x16x128xbf16>
    %c1_i32_111 = arith.constant 1 : i32
    %203 = arith.addi %163, %c1_i32_111 : i32
    %204 = arith.index_cast %203 : i32 to index
    %c0_112 = arith.constant 0 : index
    %c0_113 = arith.constant 0 : index
    %205 = vector.load %arg11[%204, %c0_112, %c0_113] : memref<18x16x256xbf16, #tpu.memory_space<vmem>>, vector<8x16x128xbf16>
    tpu.vector_store %arg11[%204, %c0_112, %c0_113], %202 {strides = array<i32>} : memref<18x16x256xbf16, #tpu.memory_space<vmem>>, vector<8x16x128xbf16>,
    %c1_i32_114 = arith.constant 1 : i32
    %c8_i32_115 = arith.constant 8 : i32
    %206 = arith.muli %c1_i32_114, %c8_i32_115 : i32
    %207 = tpu.assume_multiple %206, 8 : i32
    %c0_i32_116 = arith.constant 0 : i32
    %208 = arith.addi %207, %c0_i32_116 : i32
    %209 = arith.index_cast %208 : i32 to index
    %c0_117 = arith.constant 0 : index
    %c0_118 = arith.constant 0 : index
    %210 = vector.load %arg12[%209, %c0_117, %c0_118] : memref<18x16x128xbf16, #tpu.memory_space<vmem>>, vector<8x16x128xbf16>
    %cst_119 = arith.constant 0.000000e+00 : bf16
    %211 = vector.broadcast %cst_119 : bf16 to vector<8x1x128xbf16>
    %212 = vector.extract_strided_slice %210 {offsets = [0, 0, 0], sizes = [8, 15, 128], strides = [1, 1, 1]} : vector<8x16x128xbf16> to vector<8x15x128xbf16>
    %213 = tpu.concatenate %211, %212 in 1 : vector<8x1x128xbf16>, vector<8x15x128xbf16> -> vector<8x16x128xbf16>
    %214 = vector.extract_strided_slice %210 {offsets = [0, 1, 0], sizes = [8, 15, 128], strides = [1, 1, 1]} : vector<8x16x128xbf16> to vector<8x15x128xbf16>
    %215 = tpu.concatenate %214, %211 in 1 : vector<8x15x128xbf16>, vector<8x1x128xbf16> -> vector<8x16x128xbf16>
    %216 = tpu.concatenate %213, %210, %215 in 2 : vector<8x16x128xbf16>, vector<8x16x128xbf16>, vector<8x16x128xbf16> -> vector<8x16x384xbf16>
    %c1_i32_120 = arith.constant 1 : i32
    %217 = arith.addi %207, %c1_i32_120 : i32
    %218 = arith.index_cast %217 : i32 to index
    %c0_121 = arith.constant 0 : index
    %c0_122 = arith.constant 0 : index
    %219 = vector.load %arg12[%218, %c0_121, %c0_122] : memref<18x16x128xbf16, #tpu.memory_space<vmem>>, vector<8x16x128xbf16>
    %cst_123 = arith.constant 0.000000e+00 : bf16
    %220 = vector.broadcast %cst_123 : bf16 to vector<8x1x128xbf16>
    %221 = vector.extract_strided_slice %219 {offsets = [0, 0, 0], sizes = [8, 15, 128], strides = [1, 1, 1]} : vector<8x16x128xbf16> to vector<8x15x128xbf16>
    %222 = tpu.concatenate %220, %221 in 1 : vector<8x1x128xbf16>, vector<8x15x128xbf16> -> vector<8x16x128xbf16>
    %223 = vector.extract_strided_slice %219 {offsets = [0, 1, 0], sizes = [8, 15, 128], strides = [1, 1, 1]} : vector<8x16x128xbf16> to vector<8x15x128xbf16>
    %224 = tpu.concatenate %223, %220 in 1 : vector<8x15x128xbf16>, vector<8x1x128xbf16> -> vector<8x16x128xbf16>
    %225 = tpu.concatenate %222, %219, %224 in 2 : vector<8x16x128xbf16>, vector<8x16x128xbf16>, vector<8x16x128xbf16> -> vector<8x16x384xbf16>
    %c2_i32_124 = arith.constant 2 : i32
    %226 = arith.addi %207, %c2_i32_124 : i32
    %227 = arith.index_cast %226 : i32 to index
    %c0_125 = arith.constant 0 : index
    %c0_126 = arith.constant 0 : index
    %228 = vector.load %arg12[%227, %c0_125, %c0_126] : memref<18x16x128xbf16, #tpu.memory_space<vmem>>, vector<8x16x128xbf16>
    %cst_127 = arith.constant 0.000000e+00 : bf16
    %229 = vector.broadcast %cst_127 : bf16 to vector<8x1x128xbf16>
    %230 = vector.extract_strided_slice %228 {offsets = [0, 0, 0], sizes = [8, 15, 128], strides = [1, 1, 1]} : vector<8x16x128xbf16> to vector<8x15x128xbf16>
    %231 = tpu.concatenate %229, %230 in 1 : vector<8x1x128xbf16>, vector<8x15x128xbf16> -> vector<8x16x128xbf16>
    %232 = vector.extract_strided_slice %228 {offsets = [0, 1, 0], sizes = [8, 15, 128], strides = [1, 1, 1]} : vector<8x16x128xbf16> to vector<8x15x128xbf16>
    %233 = tpu.concatenate %232, %229 in 1 : vector<8x15x128xbf16>, vector<8x1x128xbf16> -> vector<8x16x128xbf16>
    %234 = tpu.concatenate %231, %228, %233 in 2 : vector<8x16x128xbf16>, vector<8x16x128xbf16>, vector<8x16x128xbf16> -> vector<8x16x384xbf16>
    %235 = tpu.concatenate %216, %225, %234 in 2 : vector<8x16x384xbf16>, vector<8x16x384xbf16>, vector<8x16x384xbf16> -> vector<8x16x1152xbf16>
    %236 = vector.shape_cast %235 : vector<8x16x1152xbf16> to vector<128x1152xbf16>
    %cst_128 = arith.constant dense<0.000000e+00> : vector<128x128xf32>
    %237 = tpu.matmul %236, %160, %cst_128 {dimension_numbers = #tpu.dot_dimension_numbers<[1], [0], [0], [1], [0, 0, 1, 1], [], []>} : vector<128x1152xbf16>, vector<1152x128xbf16>, vector<128x128xf32> -> vector<128x128xf32>
    %238 = vector.broadcast %161 : vector<1x128xf32> to vector<128x128xf32>
    %239 = arith.addf %237, %238 : vector<128x128xf32>
    %cst_129 = arith.constant 0.000000e+00 : f32
    %240 = vector.broadcast %cst_129 : f32 to vector<128x128xf32>
    %241 = arith.cmpf ogt, %239, %240 : vector<128x128xf32>
    %cst_130 = arith.constant 2.000000e-01 : f32
    %242 = vector.broadcast %cst_130 : f32 to vector<128x128xf32>
    %243 = arith.mulf %242, %239 : vector<128x128xf32>
    %244 = arith.select %241, %239, %243 : vector<128x128xi1>, vector<128x128xf32>
    %245 = vector.shape_cast %244 : vector<128x128xf32> to vector<8x16x128xf32>
    %246 = arith.truncf %245 : vector<8x16x128xf32> to vector<8x16x128xbf16>
    %c1_i32_131 = arith.constant 1 : i32
    %247 = arith.addi %207, %c1_i32_131 : i32
    %248 = arith.index_cast %247 : i32 to index
    %c0_132 = arith.constant 0 : index
    %c0_133 = arith.constant 0 : index
    %249 = vector.load %arg11[%248, %c0_132, %c0_133] : memref<18x16x256xbf16, #tpu.memory_space<vmem>>, vector<8x16x128xbf16>
    tpu.vector_store %arg11[%248, %c0_132, %c0_133], %246 {strides = array<i32>} : memref<18x16x256xbf16, #tpu.memory_space<vmem>>, vector<8x16x128xbf16>,
    %c2_i32_134 = arith.constant 2 : i32
    %c0_135 = arith.constant 0 : index
    %c0_136 = arith.constant 0 : index
    %250 = vector.load %arg8[%c0_135, %c0_136] : memref<9x128xf32, #tpu.memory_space<vmem>>, vector<9x128xf32>
    %251 = vector.extract_strided_slice %250 {offsets = [0, 0], sizes = [1, 128], strides = [1, 1]} : vector<9x128xf32> to vector<1x128xf32>
    %252 = vector.extract_strided_slice %250 {offsets = [1, 0], sizes = [1, 128], strides = [1, 1]} : vector<9x128xf32> to vector<1x128xf32>
    %253 = vector.extract_strided_slice %250 {offsets = [2, 0], sizes = [1, 128], strides = [1, 1]} : vector<9x128xf32> to vector<1x128xf32>
    %254 = vector.extract_strided_slice %250 {offsets = [3, 0], sizes = [1, 128], strides = [1, 1]} : vector<9x128xf32> to vector<1x128xf32>
    %255 = vector.extract_strided_slice %250 {offsets = [4, 0], sizes = [1, 128], strides = [1, 1]} : vector<9x128xf32> to vector<1x128xf32>
    %256 = vector.extract_strided_slice %250 {offsets = [5, 0], sizes = [1, 128], strides = [1, 1]} : vector<9x128xf32> to vector<1x128xf32>
    %257 = vector.extract_strided_slice %250 {offsets = [6, 0], sizes = [1, 128], strides = [1, 1]} : vector<9x128xf32> to vector<1x128xf32>
    %258 = vector.extract_strided_slice %250 {offsets = [7, 0], sizes = [1, 128], strides = [1, 1]} : vector<9x128xf32> to vector<1x128xf32>
    %259 = vector.extract_strided_slice %250 {offsets = [8, 0], sizes = [1, 128], strides = [1, 1]} : vector<9x128xf32> to vector<1x128xf32>
    %c0_137 = arith.constant 0 : index
    %c0_138 = arith.constant 0 : index
    %260 = vector.load %arg9[%c0_137, %c0_138] : memref<1x1xf32, #tpu.memory_space<vmem>>, vector<1x1xf32>
    %c0_i32_139 = arith.constant 0 : i32
    %c16_i32_140 = arith.constant 16 : i32
    %261 = arith.muli %c0_i32_139, %c16_i32_140 : i32
    %262 = tpu.assume_multiple %261, 8 : i32
    %cst_141 = arith.constant 0.000000e+00 : f32
    %263 = vector.broadcast %cst_141 : f32 to vector<16x16x128xf32>
    %c0_i32_142 = arith.constant 0 : i32
    %264 = arith.addi %262, %c0_i32_142 : i32
    %265 = arith.index_cast %264 : i32 to index
    %c0_143 = arith.constant 0 : index
    %c0_144 = arith.constant 0 : index
    %266 = vector.load %arg11[%265, %c0_143, %c0_144] : memref<18x16x256xbf16, #tpu.memory_space<vmem>>, vector<16x16x128xbf16>
    %cst_145 = arith.constant 0.000000e+00 : bf16
    %267 = vector.broadcast %cst_145 : bf16 to vector<16x1x128xbf16>
    %268 = vector.extract_strided_slice %266 {offsets = [0, 0, 0], sizes = [16, 15, 128], strides = [1, 1, 1]} : vector<16x16x128xbf16> to vector<16x15x128xbf16>
    %269 = tpu.concatenate %267, %268 in 1 : vector<16x1x128xbf16>, vector<16x15x128xbf16> -> vector<16x16x128xbf16>
    %270 = vector.extract_strided_slice %266 {offsets = [0, 1, 0], sizes = [16, 15, 128], strides = [1, 1, 1]} : vector<16x16x128xbf16> to vector<16x15x128xbf16>
    %271 = tpu.concatenate %270, %267 in 1 : vector<16x15x128xbf16>, vector<16x1x128xbf16> -> vector<16x16x128xbf16>
    %272 = arith.extf %269 : vector<16x16x128xbf16> to vector<16x16x128xf32>
    %273 = vector.shape_cast %251 : vector<1x128xf32> to vector<1x1x128xf32>
    %274 = vector.broadcast %273 : vector<1x1x128xf32> to vector<16x16x128xf32>
    %275 = arith.mulf %272, %274 : vector<16x16x128xf32>
    %276 = arith.addf %263, %275 : vector<16x16x128xf32>
    %277 = arith.extf %266 : vector<16x16x128xbf16> to vector<16x16x128xf32>
    %278 = vector.shape_cast %252 : vector<1x128xf32> to vector<1x1x128xf32>
    %279 = vector.broadcast %278 : vector<1x1x128xf32> to vector<16x16x128xf32>
    %280 = arith.mulf %277, %279 : vector<16x16x128xf32>
    %281 = arith.addf %276, %280 : vector<16x16x128xf32>
    %282 = arith.extf %271 : vector<16x16x128xbf16> to vector<16x16x128xf32>
    %283 = vector.shape_cast %253 : vector<1x128xf32> to vector<1x1x128xf32>
    %284 = vector.broadcast %283 : vector<1x1x128xf32> to vector<16x16x128xf32>
    %285 = arith.mulf %282, %284 : vector<16x16x128xf32>
    %286 = arith.addf %281, %285 : vector<16x16x128xf32>
    %c1_i32_146 = arith.constant 1 : i32
    %287 = arith.addi %262, %c1_i32_146 : i32
    %288 = arith.index_cast %287 : i32 to index
    %c0_147 = arith.constant 0 : index
    %c0_148 = arith.constant 0 : index
    %289 = vector.load %arg11[%288, %c0_147, %c0_148] : memref<18x16x256xbf16, #tpu.memory_space<vmem>>, vector<16x16x128xbf16>
    %cst_149 = arith.constant 0.000000e+00 : bf16
    %290 = vector.broadcast %cst_149 : bf16 to vector<16x1x128xbf16>
    %291 = vector.extract_strided_slice %289 {offsets = [0, 0, 0], sizes = [16, 15, 128], strides = [1, 1, 1]} : vector<16x16x128xbf16> to vector<16x15x128xbf16>
    %292 = tpu.concatenate %290, %291 in 1 : vector<16x1x128xbf16>, vector<16x15x128xbf16> -> vector<16x16x128xbf16>
    %293 = vector.extract_strided_slice %289 {offsets = [0, 1, 0], sizes = [16, 15, 128], strides = [1, 1, 1]} : vector<16x16x128xbf16> to vector<16x15x128xbf16>
    %294 = tpu.concatenate %293, %290 in 1 : vector<16x15x128xbf16>, vector<16x1x128xbf16> -> vector<16x16x128xbf16>
    %295 = arith.extf %292 : vector<16x16x128xbf16> to vector<16x16x128xf32>
    %296 = vector.shape_cast %254 : vector<1x128xf32> to vector<1x1x128xf32>
    %297 = vector.broadcast %296 : vector<1x1x128xf32> to vector<16x16x128xf32>
    %298 = arith.mulf %295, %297 : vector<16x16x128xf32>
    %299 = arith.addf %286, %298 : vector<16x16x128xf32>
    %300 = arith.extf %289 : vector<16x16x128xbf16> to vector<16x16x128xf32>
    %301 = vector.shape_cast %255 : vector<1x128xf32> to vector<1x1x128xf32>
    %302 = vector.broadcast %301 : vector<1x1x128xf32> to vector<16x16x128xf32>
    %303 = arith.mulf %300, %302 : vector<16x16x128xf32>
    %304 = arith.addf %299, %303 : vector<16x16x128xf32>
    %305 = arith.extf %294 : vector<16x16x128xbf16> to vector<16x16x128xf32>
    %306 = vector.shape_cast %256 : vector<1x128xf32> to vector<1x1x128xf32>
    %307 = vector.broadcast %306 : vector<1x1x128xf32> to vector<16x16x128xf32>
    %308 = arith.mulf %305, %307 : vector<16x16x128xf32>
    %309 = arith.addf %304, %308 : vector<16x16x128xf32>
    %c2_i32_150 = arith.constant 2 : i32
    %310 = arith.addi %262, %c2_i32_150 : i32
    %311 = arith.index_cast %310 : i32 to index
    %c0_151 = arith.constant 0 : index
    %c0_152 = arith.constant 0 : index
    %312 = vector.load %arg11[%311, %c0_151, %c0_152] : memref<18x16x256xbf16, #tpu.memory_space<vmem>>, vector<16x16x128xbf16>
    %cst_153 = arith.constant 0.000000e+00 : bf16
    %313 = vector.broadcast %cst_153 : bf16 to vector<16x1x128xbf16>
    %314 = vector.extract_strided_slice %312 {offsets = [0, 0, 0], sizes = [16, 15, 128], strides = [1, 1, 1]} : vector<16x16x128xbf16> to vector<16x15x128xbf16>
    %315 = tpu.concatenate %313, %314 in 1 : vector<16x1x128xbf16>, vector<16x15x128xbf16> -> vector<16x16x128xbf16>
    %316 = vector.extract_strided_slice %312 {offsets = [0, 1, 0], sizes = [16, 15, 128], strides = [1, 1, 1]} : vector<16x16x128xbf16> to vector<16x15x128xbf16>
    %317 = tpu.concatenate %316, %313 in 1 : vector<16x15x128xbf16>, vector<16x1x128xbf16> -> vector<16x16x128xbf16>
    %318 = arith.extf %315 : vector<16x16x128xbf16> to vector<16x16x128xf32>
    %319 = vector.shape_cast %257 : vector<1x128xf32> to vector<1x1x128xf32>
    %320 = vector.broadcast %319 : vector<1x1x128xf32> to vector<16x16x128xf32>
    %321 = arith.mulf %318, %320 : vector<16x16x128xf32>
    %322 = arith.addf %309, %321 : vector<16x16x128xf32>
    %323 = arith.extf %312 : vector<16x16x128xbf16> to vector<16x16x128xf32>
    %324 = vector.shape_cast %258 : vector<1x128xf32> to vector<1x1x128xf32>
    %325 = vector.broadcast %324 : vector<1x1x128xf32> to vector<16x16x128xf32>
    %326 = arith.mulf %323, %325 : vector<16x16x128xf32>
    %327 = arith.addf %322, %326 : vector<16x16x128xf32>
    %328 = arith.extf %317 : vector<16x16x128xbf16> to vector<16x16x128xf32>
    %329 = vector.shape_cast %259 : vector<1x128xf32> to vector<1x1x128xf32>
    %330 = vector.broadcast %329 : vector<1x1x128xf32> to vector<16x16x128xf32>
    %331 = arith.mulf %328, %330 : vector<16x16x128xf32>
    %332 = arith.addf %327, %331 : vector<16x16x128xf32>
    %cst_154 = arith.constant dense<0.000000e+00> : vector<16x16xf32>
    %333 = vector.multi_reduction <add>, %332, %cst_154 [2] : vector<16x16x128xf32> to vector<16x16xf32>
    %334 = vector.broadcast %260 : vector<1x1xf32> to vector<16x16xf32>
    %335 = arith.addf %333, %334 : vector<16x16xf32>
    %c0_155 = arith.constant 0 : index
    %336 = arith.index_cast %262 : i32 to index
    %c0_156 = arith.constant 0 : index
    %337 = vector.load %arg10[%c0_155, %336, %c0_156] : memref<1x16x16xf32, #tpu.memory_space<vmem>>, vector<1x16x16xf32>
    %338 = vector.shape_cast %337 : vector<1x16x16xf32> to vector<16x16xf32>
    %339 = vector.shape_cast %335 : vector<16x16xf32> to vector<1x16x16xf32>
    tpu.vector_store %arg10[%c0_155, %336, %c0_156], %339 {strides = array<i32>} : memref<1x16x16xf32, #tpu.memory_space<vmem>>, vector<1x16x16xf32>,
    %c1_i32_157 = arith.constant 1 : i32
    return
  }
  func.func @transform_0(%arg0: i32) -> (i32, i32, i32, i32) {
    %c0_i32 = arith.constant 0 : i32
    %c0_i32_0 = arith.constant 0 : i32
    %c0_i32_1 = arith.constant 0 : i32
    %c0_i32_2 = arith.constant 0 : i32
    return %arg0, %c0_i32, %c0_i32_0, %c0_i32_1 : i32, i32, i32, i32
  }
  func.func @transform_1(%arg0: i32) -> (i32, i32) {
    %c0_i32 = arith.constant 0 : i32
    %c0_i32_0 = arith.constant 0 : i32
    %c0_i32_1 = arith.constant 0 : i32
    return %c0_i32, %c0_i32_0 : i32, i32
  }
  func.func @transform_2(%arg0: i32) -> (i32, i32) {
    %c0_i32 = arith.constant 0 : i32
    %c0_i32_0 = arith.constant 0 : i32
    %c0_i32_1 = arith.constant 0 : i32
    return %c0_i32, %c0_i32_0 : i32, i32
  }
  func.func @transform_3(%arg0: i32) -> (i32, i32, i32) {
    %c0_i32 = arith.constant 0 : i32
    %c0_i32_0 = arith.constant 0 : i32
    %c0_i32_1 = arith.constant 0 : i32
    %c0_i32_2 = arith.constant 0 : i32
    return %c0_i32, %c0_i32_0, %c0_i32_1 : i32, i32, i32
  }
  func.func @transform_4(%arg0: i32) -> (i32, i32) {
    %c0_i32 = arith.constant 0 : i32
    %c0_i32_0 = arith.constant 0 : i32
    %c0_i32_1 = arith.constant 0 : i32
    return %c0_i32, %c0_i32_0 : i32, i32
  }
  func.func @transform_5(%arg0: i32) -> (i32, i32) {
    %c0_i32 = arith.constant 0 : i32
    %c0_i32_0 = arith.constant 0 : i32
    %c0_i32_1 = arith.constant 0 : i32
    return %c0_i32, %c0_i32_0 : i32, i32
  }
  func.func @transform_6(%arg0: i32) -> (i32, i32) {
    %c0_i32 = arith.constant 0 : i32
    %c0_i32_0 = arith.constant 0 : i32
    %c0_i32_1 = arith.constant 0 : i32
    return %c0_i32, %c0_i32_0 : i32, i32
  }
  func.func @transform_7(%arg0: i32) -> (i32, i32) {
    %c0_i32 = arith.constant 0 : i32
    %c0_i32_0 = arith.constant 0 : i32
    %c0_i32_1 = arith.constant 0 : i32
    return %c0_i32, %c0_i32_0 : i32, i32
  }
  func.func @transform_8(%arg0: i32) -> (i32, i32) {
    %c0_i32 = arith.constant 0 : i32
    %c0_i32_0 = arith.constant 0 : i32
    %c0_i32_1 = arith.constant 0 : i32
    return %c0_i32, %c0_i32_0 : i32, i32
  }
  func.func @transform_9(%arg0: i32) -> (i32, i32, i32) {
    %c0_i32 = arith.constant 0 : i32
    %c0_i32_0 = arith.constant 0 : i32
    %c0_i32_1 = arith.constant 0 : i32
    return %arg0, %c0_i32, %c0_i32_0 : i32, i32, i32
  }
}

</mosaic_0001>

<bundles_post_ra>
// kernel: fc_discriminator_img.1
= control target key start
LH: loop header
LB: loop body
LE: loop exit
PB: predicated region body
PF: predicated region fallthrough
CT: control target
= control target key end

     0   :  { %s18970_s0 = inlined_call_operand.vmem [shape: bf16[2,18,16,4], index: 0, kind: input, shape index: {}]   ;;  %s18971_s1 = inlined_call_operand.vmem [shape: bf16[36,256], index: 1, kind: input, shape index: {}]   ;;  %s18972_s2 = inlined_call_operand.vmem [shape: f32[1,256], index: 2, kind: input, shape index: {}]   ;;  %s18973_s3 = inlined_call_operand.vmem [shape: bf16[3,768,128], index: 3, kind: input, shape index: {}]   ;;  %s18974_s4 = inlined_call_operand.vmem [shape: f32[1,128], index: 4, kind: input, shape index: {}]   ;;  %s18975_s5 = inlined_call_operand.vmem [shape: bf16[1152,128], index: 5, kind: input, shape index: {}]   ;;  %s18976_s6 = inlined_call_operand.vmem [shape: f32[1,128], index: 6, kind: input, shape index: {}]   ;;  %s18977_s7 = inlined_call_operand.vmem [shape: f32[9,128], index: 7, kind: input, shape index: {}]   ;;  %s18978_s8 = inlined_call_operand.<no memory space> [shape: f32[1,1], index: 8, kind: input, shape index: {}]   ;;  %s18979_s9 = inlined_call_operand.hbm [shape: f32[2,16,16], index: 9, kind: output, shape index: {}]  }
   0x1   :  { %v14_v0 = vstv %s18978_s8 }
   0x2   :  { %15 = vst [vmem:[#allocation4] sm:$0x1] %v14_v0 }
   0x3   :  { %16 = vsyncpa [#allocation6], 0 }
   0x4   :  { %18 = vsyncpa [#allocation6 + $0x1], 0  ;;  %s13722_s11 = smov 0   ;;  %s13724_s12 = smov 0  }
   0x5   :  { %s13726_s13 = smov 0   ;;  %s13728_s14 = smov 0  }
   0x6 LB: > { %s13743_s8 = sadd.s32 4294967295, %s13660_s14   ;;  %s11028_s15 = sadd.s32 4294967294, %s13660_s14   ;;  %s13660_s14 = sphi %s13728_s14, %s19652_s14   ;;  %s13656_s13 = sphi %s13726_s13, %s19651_s13   ;;  %s13652_s12 = sphi %s13724_s12, %s19650_s12   ;;  %s13648_s11 = sphi %s13722_s11, %s19649_s11  }
   0x7   : > { %s13747_s16 = sadd.s32 1, %s13660_s14   ;;  %s225_s17 = sadd.s32 1, %s13656_s13 }
   0x8   : > { %s222_s18 = ssub.s32 %s13660_s14, %s13747_s16  ;;  %p235_p0 = scmp.ne.s32.totalorder %s13656_s13, %s13652_s12 }
   0x9   : > { %p223_p1 = scmp.eq.s32.totalorder %s222_s18, 0  ;;  %p236_p2 = scmp.eq.s32.totalorder %s13743_s8, 1 }
   0xa   : > { %p241_p3 = scmp.ne.s32.totalorder %s13652_s12, %s13648_s11  ;;  %p242_p4 = scmp.eq.s32.totalorder %s11028_s15, 1 }
   0xb   : > { %s13758_s19 = scalar_select %p223_p1, %s13656_s13, %s225_s17  }
   0xc   : > { %p13760_p5 = por %p236_p2, %p235_p0  ;;  %p13764_p6 = por %p242_p4, %p241_p3 }
   0xd   : > { %p11031_p7 = scmp.ge.s32.totalorder %s13660_s14, 1  ;;  %p292_p8 = scmp.lt.s32.totalorder %s13660_s14, 3 }
   0xf   : > { %p293_p9 = pnand %p11031_p7, %p292_p8 }
  0x11   : > { %296 = sbr.rel (%p293_p9) target bundleno = 2166 (0x876), region = 56 }
  0x18   : > { %p328_p10 = scmp.lt.s32.totalorder %s13743_s8, 1  ;;  %vm507_vm0 = vsmask.f32 7424  ;;  %vm506_vm1 = vcmask 1047552   ;;  %s13662_s27 = smov 4   ;;  %v19176_v14 = vmov 0 }
  0x19   : > { %vm13787_vm2 = vmand %vm506_vm1, %vm507_vm0  ;;  %s13663_s28 = smov 8   ;;  %vm472_vm3 = vsmask.f32 256  ;;  %vm471_vm4 = vcmask 1040384   ;;  %vm557_vm6 = vcmask 31744   ;;  %vm582_vm7 = vcmask 64512  }
  0x1a   : > { %s329_s22 = scalar_select %p328_p10, %s13743_s8, 1  ;;  %v19177_v14 = vsel %vm13787_vm2, 4294967295, %v19176_v14  ;;  %vm13976_vm5 = vmand %vm471_vm4, %vm472_vm3  ;;  %vm1222_vm8 = vcmask 1041408   ;;  %vm1135_vm9 = vcmask 97280   ;;  %vm1152_vm10 = vcmask 195584  }
  0x1b   : > { %19178 = vst [vmem:[#allocation8_spill] sm:$0xff] %v19177_v14  ;;  %s13665_s29 = smov 24   ;;  %s13666_s30 = smov 12   ;;  %vm1205_vm11 = vcmask 293888  }
  0x1c   : > { %s13220_s23 = smul.u32 144, %s329_s22  ;;  %s11603_s24 = sshll.u32 %s13743_s8, 8 }
  0x1d   : > { %s18914_s15 = scalar_lea.hbm %s18979_s9, %s11603_s24  ;;  %s13667_s18 = smov [#allocation5]  }
  0x1e   : > { %s13775_s26 = scalar_lea.vmem %s18970_s0, %s13220_s23  ;;  %s325_s23 = sand.u32 1, %s13652_s12  }
  0x1f   : > { %v13268_v1 = vld [vmem:[%s13775_s26 + $0x8] sm:$0xff]   ;;  %v13269_v2 = vld [vmem:[%s13775_s26 + $0x10] sm:$0xff]   ;;  %v13271_v7 = vld [vmem:[%s13775_s26 + $0x18] sm:$0xff]   ;;  %s18928_s17 = scalar_lea.sflag [#allocation6], %s325_s23 }
  0x20   : > { %763 = vrot.lane.b32.xlu0 %v13268_v1, %s13662_s27  ;;  %v13270_v3 = vld [vmem:[%s13775_s26 + $0x10] sm:$0xff]   ;;  %v660_v4 = vshrl.u32 %v13268_v1, 16  ;;  %1007 = vrot.lane.b32.xlu1 %v13269_v2, %s13662_s27  ;;  %v904_v5 = vshrl.u32 %v13269_v2, 16  ;;  %v907_v6 = vshll.u32 %v13269_v2, 16  ;;  %v13272_v10 = vld [vmem:[%s13775_s26 + $0x18] sm:$0xff]   ;;  %v663_v12 = vshll.u32 %v13268_v1, 16 }
  0x21   : > { %v667_v8 = vshrl.u32 %v13270_v3, 16  ;;  %v670_v9 = vshll.u32 %v13270_v3, 16  ;;  %v914_v16 = vshll.u32 %v13271_v7, 16  ;;  %v911_v18 = vshrl.u32 %v13271_v7, 16  ;;  %v13273_v21 = vld [vmem:[%s13775_s26 + $0x20] sm:$0xff]   ;;  %v13275_v40 = vld [vmem:[%s13775_s26 + $0x28] sm:$0xff]  }
  0x22   : > { %v975_v11 = vrot.slane %v907_v6, 1  ;;  %v662_v13 = vrot.slane %v660_v4, 7  ;;  %v731_v19 = vrot.slane %v663_v12, 1  ;;  %v677_v20 = vshll.u32 %v13272_v10, 16  ;;  %v13274_v30 = vld [vmem:[%s13775_s26 + $0x20] sm:$0xff]   ;;  %v13276_v46 = vld [vmem:[%s13775_s26 + $0x28] sm:$0xff]  }
  0x23   : > { %v733_v15 = vrot.slane %v670_v9, 1  ;;  %v977_v23 = vrot.slane %v914_v16, 1  ;;  %v906_v26 = vrot.slane %v904_v5, 7  ;;  %v674_v28 = vshrl.u32 %v13272_v10, 16  ;;  %v13277_v60 = vld [vmem:[%s13775_s26 + $0x30] sm:$0xff]  }
  0x24   : > { %765 = vrot.lane.b32.xlu0 %v13270_v3, %s13662_s27  ;;  %v976_v17 = vor.u32 %v975_v11, %v904_v5  ;;  %v13792_v24 = vor.u32 %v663_v12, %v662_v13  ;;  %v732_v27 = vor.u32 %v731_v19, %v660_v4  ;;  %v735_v29 = vrot.slane %v677_v20, 1  ;;  %v13278_v5 = vld [vmem:[%s13775_s26 + $0x30] sm:$0xff]  }
  0x25   : > { %v734_v22 = vor.u32 %v733_v15, %v667_v8  ;;  %v669_v32 = vrot.slane %v667_v8, 7  ;;  %v978_v33 = vor.u32 %v977_v23, %v911_v18  ;;  %v921_v34 = vshll.u32 %v13273_v21, 16 }
  0x26   : > { %v999_v25 = vsel %vm13787_vm2, %v976_v17, 0  ;;  %v913_v35 = vrot.slane %v911_v18, 7  ;;  %v755_v36 = vsel %vm13787_vm2, %v732_v27, 0  ;;  %v736_v37 = vor.u32 %v735_v29, %v674_v28  ;;  %v13280_v27 = vld [vmem:[%s13775_s26 + $0x38] sm:$0xff]  }
  0x27   : > { %1031 = vrot.lane.b32.xlu1 %v999_v25, %s13663_s28  ;;  %v756_v31 = vsel %vm13787_vm2, %v734_v22, 0  ;;  %v918_v38 = vshrl.u32 %v13273_v21, 16  ;;  %v684_v39 = vshll.u32 %v13274_v30, 16  ;;  %v1000_v41 = vsel %vm13787_vm2, %v978_v33, 0 }
  0x28   : > { %1009 = vrot.lane.b32.xlu0 %v13271_v7, %s13662_s27  ;;  %v979_v42 = vrot.slane %v921_v34, 1  ;;  %v13808_v43 = vor.u32 %v907_v6, %v906_v26  ;;  %v13810_v44 = vor.u32 %v670_v9, %v669_v32  ;;  %v676_v45 = vrot.slane %v674_v28, 7 }
  0x29   : > { %v681_v47 = vshrl.u32 %v13274_v30, 16  ;;  %v13815_v48 = vor.u32 %v914_v16, %v913_v35  ;;  %v757_v49 = vsel %vm13787_vm2, %v736_v37, 0  ;;  %v737_v51 = vrot.slane %v684_v39, 1  ;;  %v13279_v16 = vld [vmem:[%s13775_s26 + $0x38] sm:$0xff]  }
  0x2a   : > { %v980_v50 = vor.u32 %v979_v42, %v918_v38  ;;  %v928_v52 = vshll.u32 %v13275_v40, 16  ;;  %v13819_v53 = vor.u32 %v677_v20, %v676_v45  ;;  %v920_v54 = vrot.slane %v918_v38, 7 }
  0x2b   : > { %789 = vrot.lane.b32.xlu1 %v756_v31, %s13663_s28  ;;  %v691_v55 = vshll.u32 %v13276_v46, 16  ;;  %v738_v57 = vor.u32 %v737_v51, %v681_v47  ;;  %v925_v58 = vshrl.u32 %v13275_v40, 16  ;;  %v683_v61 = vrot.slane %v681_v47, 7 }
  0x2c   : > { %767 = vrot.lane.b32.xlu0 %v13272_v10, %s13662_s27  ;;  %v1001_v56 = vsel %vm13787_vm2, %v980_v50, 0  ;;  %v981_v59 = vrot.slane %v928_v52, 1  ;;  %v688_v62 = vshrl.u32 %v13276_v46, 16  ;;  %v13828_v0 = vor.u32 %v921_v34, %v920_v54  ;;  %v13281_v34 = vld [vmem:[%s13775_s26 + $0x40] sm:$0xff]   ;;  %v13284_v50 = vld [vmem:[%s13775_s26 + $0x48] sm:$0xff]  }
  0x2d   : > { %v739_v63 = vrot.slane %v691_v55, 1  ;;  %v758_v1 = vsel %vm13787_vm2, %v738_v57, 0  ;;  %v927_v2 = vrot.slane %v925_v58, 7  ;;  %v935_v4 = vshll.u32 %v13277_v60, 16  ;;  %v13283_v54 = vld [vmem:[%s13775_s26] sm:$0xff]  }
  0x2e   : > { %v982_v3 = vor.u32 %v981_v59, %v925_v58  ;;  %v690_v6 = vrot.slane %v688_v62, 7  ;;  %v932_v7 = vshrl.u32 %v13277_v60, 16  ;;  %v13833_v8 = vor.u32 %v684_v39, %v683_v61 }
  0x2f   : > { %1033 = vrot.lane.b32.xlu1 %v1000_v41, %s13663_s28  ;;  %v740_v9 = vor.u32 %v739_v63, %v688_v62  ;;  %v695_v11 = vshrl.u32 %v13278_v5, 16  ;;  %v983_v13 = vrot.slane %v935_v4, 1  ;;  %v698_v15 = vshll.u32 %v13278_v5, 16  ;;  %v13282_v41 = vld [vmem:[%s13775_s26 + $0x40] sm:$0xff]   ;;  %v13285_v63 = vld [vmem:[%s13775_s26 + $0x48] sm:$0xff]  }
  0x30   : > { %787 = vrot.lane.b32.xlu0 %v755_v36, %s13663_s28  ;;  %v934_v10 = vrot.slane %v932_v7, 7  ;;  %v1002_v12 = vsel %vm13787_vm2, %v982_v3, 0  ;;  %v13840_v17 = vor.u32 %v928_v52, %v927_v2  ;;  %v13842_v18 = vor.u32 %v691_v55, %v690_v6 }
  0x31   : > { %v697_v19 = vrot.slane %v695_v11, 7  ;;  %v939_v20 = vshrl.u32 %v13279_v16, 16  ;;  %v759_v22 = vsel %vm13787_vm2, %v740_v9, 0  ;;  %v984_v23 = vor.u32 %v983_v13, %v932_v7 }
  0x32   : > { %v741_v25 = vrot.slane %v698_v15, 1  ;;  %v942_v26 = vshll.u32 %v13279_v16, 16  ;;  %v705_v33 = vshll.u32 %v13280_v27, 16  ;;  %v702_v36 = vshrl.u32 %v13280_v27, 16 }
  0x33   : > { %791 = vrot.lane.b32.xlu1 %v757_v49, %s13663_s28  ;;  %v941_v28 = vrot.slane %v939_v20, 7  ;;  %v13851_v29 = vor.u32 %v698_v15, %v697_v19  ;;  %v946_v42 = vshrl.u32 %v13281_v34, 16  ;;  %v712_v49 = vshll.u32 %v13282_v41, 16  ;;  %v13287_v15 = vld [vmem:[%s13775_s26 + $0x50] sm:$0xff]  }
  0x34   : > { %1011 = vrot.lane.b32.xlu0 %v13273_v21, %s13662_s27  ;;  %v13846_v21 = vor.u32 %v935_v4, %v934_v10  ;;  %v742_v31 = vor.u32 %v741_v25, %v695_v11  ;;  %v985_v32 = vrot.slane %v942_v26, 1  ;;  %v743_v39 = vrot.slane %v705_v33, 1  ;;  %v13286_v11 = vld [vmem:[%s13775_s26 + $0x8] sm:$0xff]  }
  0x35   : > { %v13858_v35 = vor.u32 %v942_v26, %v941_v28  ;;  %v704_v51 = vrot.slane %v702_v36, 7  ;;  %v709_v52 = vshrl.u32 %v13282_v41, 16  ;;  %v745_v57 = vrot.slane %v712_v49, 1 }
  0x36   : > { %v760_v37 = vsel %vm13787_vm2, %v742_v31, 0  ;;  %v986_v38 = vor.u32 %v985_v32, %v939_v20  ;;  %v956_v58 = vshll.u32 %v13284_v50, 16  ;;  %v408_v61 = vshrl.u32 %v13283_v54, 16 }
  0x37   : > { %1035 = vrot.lane.b32.xlu1 %v1001_v56, %s13663_s28  ;;  %v13875_v59 = vor.u32 %v705_v33, %v704_v51  ;;  %v411_v62 = vshll.u32 %v13283_v54, 16  ;;  %v746_v2 = vor.u32 %v745_v57, %v709_v52  ;;  %v953_v3 = vshrl.u32 %v13284_v50, 16  ;;  %v13288_v33 = vld [vmem:[%s13775_s26 + $0x50] sm:$0xff]  }
  0x38   : > { %769 = vrot.lane.b32.xlu0 %v13274_v30, %s13662_s27  ;;  %v1003_v30 = vsel %vm13787_vm2, %v984_v23, 0  ;;  %v1004_v45 = vsel %vm13787_vm2, %v986_v38, 0  ;;  %v989_v4 = vrot.slane %v956_v58, 1  ;;  %v711_v6 = vrot.slane %v709_v52, 7 }
  0x39   : > { %v482_v7 = vrot.slane %v411_v62, 1  ;;  %v1779_v9 = vshll.u32 %v13285_v63, 16  ;;  %v955_v10 = vrot.slane %v953_v3, 7  ;;  %v415_v19 = vshrl.u32 %v13286_v11, 16 }
  0x3a   : > { %v990_v13 = vor.u32 %v989_v4, %v953_v3  ;;  %v13894_v26 = vor.u32 %v712_v49, %v711_v6  ;;  %v418_v32 = vshll.u32 %v13286_v11, 16 }
  0x3b   : > { %793 = vrot.lane.b32.xlu1 %v758_v1, %s13663_s28  ;;  %v1847_v23 = vrot.slane %v1779_v9, 1  ;;  %v417_v25 = vrot.slane %v415_v19, 7  ;;  %v13898_v31 = vor.u32 %v956_v58, %v955_v10 }
  0x3c   : > { %1013 = vrot.lane.b32.xlu0 %v13275_v40, %s13662_s27  ;;  %v949_v40 = vshll.u32 %v13281_v34, 16  ;;  %v1006_v28 = vsel %vm13787_vm2, %v990_v13, 0 }
  0x3e   : > { %v987_v47 = vrot.slane %v949_v40, 1 }
  0x3f   : > { %1037 = vrot.lane.b32.xlu1 %v1002_v12, %s13663_s28  ;;  %v762_v12 = vsel %vm13787_vm2, %v746_v2, 0 }
  0x40   : > { %771 = vrot.lane.b32.xlu0 %v13276_v46, %s13662_s27  ;;  %v744_v46 = vor.u32 %v743_v39, %v702_v36  ;;  %v988_v56 = vor.u32 %v987_v47, %v946_v42  ;;  %v2020_v39 = vshrl.u32 %v13287_v15, 16 }
  0x42   : > { %v761_v55 = vsel %vm13787_vm2, %v744_v46, 0  ;;  %v1005_v1 = vsel %vm13787_vm2, %v988_v56, 0  ;;  %v13290_v46 = vld [vmem:[%s13775_s26 + $0x58] sm:$0xff]   ;;  %v2022_v49 = vrot.slane %v2020_v39, 7 }
  0x43   : > { %795 = vrot.lane.b32.xlu1 %v759_v22, %s13663_s28  ;;  %v1776_v22 = vshrl.u32 %v13285_v63, 16 }
  0x44   : > { %1015 = vrot.lane.b32.xlu0 %v13277_v60, %s13662_s27  ;;  %v948_v60 = vrot.slane %v946_v42, 7  ;;  %v13289_v42 = vld [vmem:[%s13775_s26 + $0x10] sm:$0xff]  }
  0x45   : > { %v1848_v36 = vor.u32 %v1847_v23, %v1776_v22  ;;  %v422_v52 = vshrl.u32 %v13289_v42, 16 }
  0x47   : > { %1039 = vrot.lane.b32.xlu1 %v1003_v30, %s13663_s28  ;;  %v2023_v30 = vshll.u32 %v13287_v15, 16  ;;  %v1871_v47 = vsel %vm13787_vm2, %v1848_v36, 0  ;;  %v424_v57 = vrot.slane %v422_v52, 7  ;;  %v13294_v36 = vld [vmem:[%s13775_s26 + $0x60] sm:$0xff]  }
  0x48   : > { %773 = vrot.lane.b32.xlu0 %v13278_v5, %s13662_s27  ;;  %v410_v5 = vrot.slane %v408_v61, 7 }
  0x49   : > { %v13917_v58 = vor.u32 %v2023_v30, %v2022_v49  ;;  %v13295_v49 = vld [vmem:[%s13775_s26 + $0x20] sm:$0xff]  }
  0x4a   : > { %v13890_v20 = vor.u32 %v411_v62, %v410_v5  ;;  %v425_v62 = vshll.u32 %v13289_v42, 16  ;;  %v2027_v5 = vshrl.u32 %v13290_v46, 16 }
  0x4b   : > { %797 = vrot.lane.b32.xlu1 %v760_v37, %s13663_s28  ;;  %v13903_v37 = vor.u32 %v418_v32, %v417_v25 }
  0x4c   : > { %1017 = vrot.lane.b32.xlu0 %v13279_v16, %s13662_s27  ;;  %v13888_v16 = vor.u32 %v949_v40, %v948_v60  ;;  %v2091_v40 = vrot.slane %v2023_v30, 1  ;;  %v13926_v3 = vor.u32 %v425_v62, %v424_v57  ;;  %v436_v57 = vshrl.u32 %v13295_v49, 16 }
  0x4e   : > { %v2092_v51 = vor.u32 %v2091_v40, %v2020_v39 }
  0x4f   : > { %1041 = vrot.lane.b32.xlu1 %v1004_v45, %s13663_s28  ;;  %v1786_v45 = vshll.u32 %v13288_v33, 16 }
  0x50   : > { %775 = vrot.lane.b32.xlu0 %v13280_v27, %s13662_s27  ;;  %v483_v27 = vor.u32 %v482_v7, %v408_v61  ;;  %v2115_v60 = vsel %vm13787_vm2, %v2092_v51, 0  ;;  %v2030_v61 = vshll.u32 %v13290_v46, 16  ;;  %v486_v7 = vrot.slane %v425_v62, 1 }
  0x51   : > { %v1849_v56 = vrot.slane %v1786_v45, 1  ;;  %v1800_v51 = vshll.u32 %v13294_v36, 16  ;;  %v438_v62 = vrot.slane %v436_v57, 7 }
  0x52   : > { %v509_v38 = vsel %vm13787_vm2, %v483_v27, 0  ;;  %v2093_v6 = vrot.slane %v2030_v61, 1  ;;  %v487_v25 = vor.u32 %v486_v7, %v422_v52  ;;  %v13296_v52 = vld [vmem:[%s13775_s26 + $0x68] sm:$0xff]  }
  0x53   : > { %799 = vrot.lane.b32.xlu1 %v761_v55, %s13663_s28 }
  0x54   : > { %1019 = vrot.lane.b32.xlu0 %v13281_v34, %s13662_s27  ;;  %v1778_v34 = vrot.slane %v1776_v22, 7 }
  0x57   : > { %1043 = vrot.lane.b32.xlu1 %v1005_v1, %s13663_s28 }
  0x58   : > { %777 = vrot.lane.b32.xlu0 %v13282_v41, %s13662_s27  ;;  %v484_v41 = vrot.slane %v418_v32, 1 }
  0x5a   : > { %v485_v55 = vor.u32 %v484_v41, %v415_v19  ;;  %v13293_v19 = vld [vmem:[%s13775_s26 + $0x60] sm:$0xff]  }
  0x5b   : > { %801 = vrot.lane.b32.xlu1 %v762_v12, %s13663_s28 }
  0x5c   : > { %1021 = vrot.lane.b32.xlu0 %v13284_v50, %s13662_s27  ;;  %v13913_v50 = vor.u32 %v1779_v9, %v1778_v34  ;;  %v510_v1 = vsel %vm13787_vm2, %v485_v55, 0  ;;  %v13292_v9 = vld [vmem:[%s13775_s26 + $0x18] sm:$0xff]  }
  0x5d   : > { %v429_v22 = vshrl.u32 %v13292_v9, 16  ;;  %v432_v34 = vshll.u32 %v13292_v9, 16 }
  0x5f   : > { %517 = vrot.lane.b32.xlu1 %v13283_v54, %s13662_s27  ;;  %v1783_v54 = vshrl.u32 %v13288_v33, 16 }
  0x60   : > { %1045 = vrot.lane.b32.xlu0 %v1006_v28, %s13663_s28  ;;  %v431_v28 = vrot.slane %v429_v22, 7 }
  0x61   : > { %v1785_v2 = vrot.slane %v1783_v54, 7  ;;  %v1850_v4 = vor.u32 %v1849_v56, %v1783_v54 }
  0x62   : > { %v13947_v41 = vor.u32 %v432_v34, %v431_v28 }
  0x63   : > { %541 = vrot.lane.b32.xlu1 %v509_v38, %s13663_s28  ;;  %v13931_v12 = vor.u32 %v1786_v45, %v1785_v2  ;;  %v1872_v13 = vsel %vm13787_vm2, %v1850_v4, 0  ;;  %v511_v38 = vsel %vm13787_vm2, %v487_v25, 0  ;;  %v2034_v45 = vshrl.u32 %v13293_v19, 16 }
  0x64   : > { %1879 = vrot.lane.b32.xlu0 %v13285_v63, %s13662_s27  ;;  %v13291_v63 = vld [vmem:[%s13775_s26 + $0x58] sm:$0xff]   ;;  %v1853_v4 = vrot.slane %v1800_v51, 1 }
  0x65   : > { %v1793_v10 = vshll.u32 %v13291_v63, 16  ;;  %v1790_v23 = vshrl.u32 %v13291_v63, 16  ;;  %v2036_v54 = vrot.slane %v2034_v45, 7 }
  0x67   : > { %1903 = vrot.lane.b32.xlu1 %v1871_v47, %s13663_s28  ;;  %v1851_v27 = vrot.slane %v1793_v10, 1  ;;  %v1792_v39 = vrot.slane %v1790_v23, 7  ;;  %v488_v47 = vrot.slane %v432_v34, 1 }
  0x68   : > { %2123 = vrot.lane.b32.xlu0 %v13287_v15, %s13662_s27  ;;  %v2094_v15 = vor.u32 %v2093_v6, %v2027_v5 }
  0x69   : > { %v1852_v40 = vor.u32 %v1851_v27, %v1790_v23  ;;  %v13955_v55 = vor.u32 %v1793_v10, %v1792_v39  ;;  %v2041_v10 = vshrl.u32 %v13296_v52, 16  ;;  %v19179_v27 = vmov 0 }
  0x6a   : > { %v2116_v32 = vsel %vm13787_vm2, %v2094_v15, 0  ;;  %v19180_v27 = vsel %vm13976_vm5, 4294967295, %v19179_v27 }
  0x6b   : > { %519 = vrot.lane.b32.xlu1 %v13286_v11, %s13662_s27  ;;  %v2029_v11 = vrot.slane %v2027_v5, 7  ;;  %19181 = vst [vmem:[#allocation9_spill] sm:$0xff] %v19180_v27 }
  0x6c   : > { %2147 = vrot.lane.b32.xlu0 %v2115_v60, %s13663_s28  ;;  %v489_v60 = vor.u32 %v488_v47, %v429_v22  ;;  %v2043_v22 = vrot.slane %v2041_v10, 7 }
  0x6d   : > { %v13938_v30 = vor.u32 %v2030_v61, %v2029_v11  ;;  %v1797_v61 = vshrl.u32 %v13294_v36, 16 }
  0x6e   : > { %v512_v6 = vsel %vm13787_vm2, %v489_v60, 0  ;;  %v19003_v60 = vmov 0  }
  0x6f   : > { %543 = vrot.lane.b32.xlu1 %v510_v1, %s13663_s28  ;;  %v2044_v1 = vshll.u32 %v13296_v52, 16  ;;  %v1799_v7 = vrot.slane %v1797_v61, 7  ;;  %v1854_v15 = vor.u32 %v1853_v4, %v1797_v61  ;;  %1261 = vmatprep.mubr.bf16.mxu0 %v19003_v60 }
  0x70   : > { %1881 = vrot.lane.b32.xlu0 %v13288_v33, %s13662_s27  ;;  %v2037_v33 = vshll.u32 %v13293_v19, 16  ;;  %2331 = vmatprep.mubr.bf16.mxu1 %v19003_v60 }
  0x71   : > { %v2097_v11 = vrot.slane %v2044_v1, 1  ;;  %v13971_v25 = vor.u32 %v1800_v51, %v1799_v7  ;;  %v13986_v34 = vor.u32 %v2044_v1, %v2043_v22  ;;  %13266 = vset.pattern.permute.xlu1 %v19003_v60  ;;  %13267 = vset.pattern.permute.xlu0 %v19003_v60 }
  0x72   : > { %v13959_v2 = vor.u32 %v2037_v33, %v2036_v54 }
  0x73   : > { %1905 = vrot.lane.b32.xlu1 %v1872_v13, %s13663_s28  ;;  %v2098_v23 = vor.u32 %v2097_v11, %v2041_v10  ;;  %v969_v11 = vsel %vm13976_vm5, 0, %v13828_v0 }
  0x74   : > { %2125 = vrot.lane.b32.xlu0 %v13290_v46, %s13662_s27  ;;  %v2095_v46 = vrot.slane %v2037_v33, 1  ;;  %v13312_v33 = vld [vmem:[%s18971_s1 + $0x4] ss:$8 sps:$4 sm:$0xff]  }
  0x75   : > { %1229 = vmatprep.subr.bf16.mxu0 %v13312_v33  ;;  %2299 = vmatprep.subr.bf16.mxu1 %v13312_v33 }
  0x76   : > { %v2096_v56 = vor.u32 %v2095_v46, %v2034_v45  ;;  %v13317_v45 = vld [vmem:[%s18971_s1 + $0x10] ss:$8 sps:$4 sm:$0xff]  }
  0x77   : > { %521 = vrot.lane.b32.xlu1 %v13289_v42, %s13662_s27  ;;  %v1873_v42 = vsel %vm13787_vm2, %v1852_v40, 0  ;;  %v13315_v40 = vld [vmem:[%s18971_s1 + $0x14] ss:$8 sps:$4 sm:$0xff]  }
  0x78   : > { %2149 = vrot.lane.b32.xlu0 %v2116_v32, %s13663_s28  ;;  %v2117_v5 = vsel %vm13787_vm2, %v2096_v56, 0  ;;  %v2118_v32 = vsel %vm13787_vm2, %v2098_v23, 0 }
  0x7b   : > { %545 = vrot.lane.b32.xlu1 %v511_v38, %s13663_s28  ;;  %v723_v38 = vsel %vm13976_vm5, 0, %v13792_v24  ;;  %v346_v24 = vld [vmem:[%s18971_s1 + $0x20] sm:$0x33] }
  0x7c   : > { %1883 = vrot.lane.b32.xlu0 %v13291_v63, %s13662_s27  ;;  %v439_v63 = vshll.u32 %v13295_v49, 16  ;;  %v11095_v51 = vcombine.high %v346_v24, %v346_v24 }
  0x7e   : > { %v13967_v13 = vor.u32 %v439_v63, %v438_v62 }
  0x7f   : > { %1907 = vrot.lane.b32.xlu1 %v1873_v42, %s13663_s28  ;;  %v724_v42 = vsel %vm13976_vm5, 0, %v13810_v44 }
  0x80   : > { %2127 = vrot.lane.b32.xlu0 %v13293_v19, %s13662_s27  ;;  %v490_v19 = vrot.slane %v439_v63, 1 }
  0x82   : > { %v491_v28 = vor.u32 %v490_v19, %v436_v57  ;;  %v968_v57 = vsel %vm13976_vm5, 0, %v13815_v48 }
  0x83   : > { %523 = vrot.lane.b32.xlu1 %v13292_v9, %s13662_s27  ;;  %v1874_v9 = vsel %vm13787_vm2, %v1854_v15, 0  ;;  %v726_v15 = vsel %vm13976_vm5, 0, %v13833_v8 }
  0x84   : > { %2151 = vrot.lane.b32.xlu0 %v2117_v5, %s13663_s28  ;;  %v513_v39 = vsel %vm13787_vm2, %v491_v28, 0 }
  0x87   : > { %547 = vrot.lane.b32.xlu1 %v512_v6, %s13663_s28 }
  0x88   : > { %1885 = vrot.lane.b32.xlu0 %v13294_v36, %s13662_s27  ;;  %v13314_v36 = vld [vmem:[%s18971_s1] ss:$8 sps:$4 sm:$0xff]  }
  0x89   : > { %1230 = vmatpush1.bf16.msra.mxu0 %v13314_v36  ;;  %2300 = vmatpush1.bf16.msra.mxu1 %v13314_v36  ;;  %v14045_v36 = vld [vmem:[%s13775_s26 + $0x68] sm:$0xff]  }
  0x8a   : > { %1231 = vmatprep.subr.bf16.mxu0 %v13315_v40  ;;  %2301 = vmatprep.subr.bf16.mxu1 %v13315_v40  ;;  %v970_v40 = vsel %vm13976_vm5, 0, %v13840_v17 }
  0x8b   : > { %1909 = vrot.lane.b32.xlu1 %v1874_v9, %s13663_s28 }
  0x8c   : > { %2129 = vrot.lane.b32.xlu0 %v13296_v52, %s13662_s27  ;;  %v11094_v52 = vcombine.low %v346_v24, %v346_v24  ;;  %v14062_v24 = vld [vmem:[%s13775_s26 + $0x70] sm:$0xff]  }
  0x8d   : > { %1232 = vmatpush1.bf16.msra.mxu0 %v13317_v45  ;;  %2302 = vmatpush1.bf16.msra.mxu1 %v13317_v45  ;;  %v727_v45 = vsel %vm13976_vm5, 0, %v13842_v18  ;;  %v1804_v18 = vshrl.u32 %v14045_v36, 16 }
  0x8e   : > { %11096 = vmatprep.subr.msk.bf16.mxu0 %vm1222_vm8, %v11095_v51  ;;  %v1224_v56 = vsel %vm1222_vm8, %v11094_v52, 0  ;;  %11177 = vmatprep.subr.msk.bf16.mxu1 %vm1222_vm8, %v11095_v51  ;;  %v1807_v51 = vshll.u32 %v14045_v36, 16  ;;  %v14066_v52 = vld [vmem:[%s13775_s26 + $0x28] sm:$0xff]  }
  0x8f   : > { %525 = vrot.lane.b32.xlu1 %v13295_v49, %s13662_s27  ;;  %v967_v49 = vsel %vm13976_vm5, 0, %v13808_v43  ;;  %v725_v43 = vsel %vm13976_vm5, 0, %v13819_v53 }
  0x90   : > { %2153 = vrot.lane.b32.xlu0 %v2118_v32, %s13663_s28 }
  0x91   : > { %1234 = vmatpush1.bf16.msra.mxu0 %v1224_v56  ;;  %2304 = vmatpush1.bf16.msra.mxu1 %v1224_v56 }
  0x92   : > { %v764_v46 = vpop.permute.xlu0 %763  ;;  %v1008_v47 = vpop.permute.xlu1 %1007 }
  0x93   : > { %549 = vrot.lane.b32.xlu1 %v513_v39, %s13663_s28  ;;  %v1049_v44 = vsel %vm557_vm6, %v967_v49, %v1008_v47  ;;  %v805_v4 = vsel %vm557_vm6, %v723_v38, %v764_v46  ;;  %v971_v46 = vsel %vm13976_vm5, 0, %v13846_v21 }
  0x96   : > { %v766_v54 = vpop.permute.xlu0 %765 }
  0x97   : > { %v808_v19 = vsel %vm557_vm6, %v724_v42, %v766_v54  ;;  %v2051_v54 = vshll.u32 %v14062_v24, 16 }
  0x99   : > { %v1032_v61 = vpop.permute.xlu1 %1031 }
  0x9a   : > { %v1010_v62 = vpop.permute.xlu0 %1009  ;;  %v1072_v1 = vsel %vm582_vm7, %v1049_v44, %v1032_v61 }
  0x9b   : > { %1119 = vrot.lane.b32.xlu1 %v1072_v1, %s13665_s29  ;;  %v1052_v5 = vsel %vm557_vm6, %v968_v57, %v1010_v62  ;;  %v1855_v57 = vrot.slane %v1807_v51, 1 }
  0x9d   : > { %v790_v48 = vpop.permute.xlu1 %789 }
  0x9e   : > { %v768_v53 = vpop.permute.xlu0 %767  ;;  %v830_v9 = vsel %vm582_vm7, %v808_v19, %v790_v48 }
  0x9f   : > { %v811_v32 = vsel %vm557_vm6, %v725_v43, %v768_v53  ;;  %v18998_v43 = vshll.u32 %v14066_v52, 16 }
  0xa1   : > { %v1034_v63 = vpop.permute.xlu1 %1033  ;;  %v492_v19 = vrot.slane %v18998_v43, 1  ;;  %v14323_v43 = vld [vmem:[%s13775_s26 + $0x58] sm:$0xff]  }
  0xa2   : > { %v788_v6 = vpop.permute.xlu0 %787  ;;  %v1074_v7 = vsel %vm582_vm7, %v1052_v5, %v1034_v63  ;;  %v2048_v5 = vshrl.u32 %v14062_v24, 16  ;;  %v2099_v63 = vrot.slane %v2051_v54, 1 }
  0xa3   : > { %v828_v10 = vsel %vm582_vm7, %v805_v4, %v788_v6  ;;  %1121 = vrot.lane.b32.xlu1 %v1074_v7, %s13665_s29  ;;  %v1856_v4 = vor.u32 %v1855_v57, %v1804_v18 }
  0xa4   : > { %1095 = vrot.lane.b32.xlu0 %v828_v10, %s13666_s30  ;;  %v14088_v10 = vld [vmem:[%s13775_s26 + $0x70] sm:$0xff]  }
  0xa5   : > { %v792_v22 = vpop.permute.xlu1 %791 }
  0xa6   : > { %v1012_v23 = vpop.permute.xlu0 %1011  ;;  %v832_v38 = vsel %vm582_vm7, %v811_v32, %v792_v22  ;;  %v1875_v22 = vsel %vm13787_vm2, %v1856_v4, 0  ;;  %v972_v32 = vsel %vm13976_vm5, 0, %v13858_v35  ;;  %v729_v35 = vsel %vm13976_vm5, 0, %v13875_v59  ;;  %v14147_v4 = vld [vmem:[%s13775_s26 + $0x78] sm:$0xff]  }
  0xa7   : > { %v1055_v28 = vsel %vm557_vm6, %v969_v11, %v1012_v23  ;;  %v2100_v23 = vor.u32 %v2099_v63, %v2048_v5 }
  0xa8   : > { %1097 = vrot.lane.b32.xlu0 %v830_v9, %s13666_s30  ;;  %v728_v9 = vsel %vm13976_vm5, 0, %v13851_v29  ;;  %v18989_v29 = vshll.u32 %v14088_v10, 16 }
  0xa9   : > { %v1036_v33 = vpop.permute.xlu1 %1035 }
  0xaa   : > { %v770_v0 = vpop.permute.xlu0 %769  ;;  %v1076_v8 = vsel %vm582_vm7, %v1055_v28, %v1036_v33  ;;  %v1857_v59 = vrot.slane %v18989_v29, 1 }
  0xab   : > { %1123 = vrot.lane.b32.xlu1 %v1076_v8, %s13665_s29  ;;  %v814_v39 = vsel %vm557_vm6, %v726_v15, %v770_v0  ;;  %v443_v15 = vshrl.u32 %v14066_v52, 16  ;;  %v14108_v0 = vld [vmem:[%s13775_s26 + $0x78] sm:$0xff]  }
  0xac   : > { %1099 = vrot.lane.b32.xlu0 %v832_v38, %s13666_s30  ;;  %v18997_v38 = vshrl.u32 %v14088_v10, 16 }
  0xad   : > { %v794_v47 = vpop.permute.xlu1 %793  ;;  %v493_v8 = vor.u32 %v492_v19, %v443_v15 }
  0xae   : > { %v1014_v49 = vpop.permute.xlu0 %1013  ;;  %v834_v42 = vsel %vm582_vm7, %v814_v39, %v794_v47  ;;  %v2119_v39 = vsel %vm13787_vm2, %v2100_v23, 0  ;;  %v18996_v47 = vshrl.u32 %v14108_v0, 16 }
  0xaf   : > { %v1058_v17 = vsel %vm557_vm6, %v970_v40, %v1014_v49  ;;  %v18987_v49 = vshll.u32 %v14108_v0, 16 }
  0xb0   : > { %1101 = vrot.lane.b32.xlu0 %v834_v42, %s13666_s30  ;;  %v14126_v42 = vld [vmem:[%s13775_s26 + $0x30] sm:$0xff]  }
  0xb1   : > { %v1038_v56 = vpop.permute.xlu1 %1037 }
  0xb2   : > { %v772_v21 = vpop.permute.xlu0 %771  ;;  %v1078_v44 = vsel %vm582_vm7, %v1058_v17, %v1038_v56  ;;  %v514_v17 = vsel %vm13787_vm2, %v493_v8, 0  ;;  %v14168_v8 = vld [vmem:[%s13775_s26 + $0x38] sm:$0xff]  }
  0xb3   : > { %1125 = vrot.lane.b32.xlu1 %v1078_v44, %s13665_s29  ;;  %v817_v61 = vsel %vm557_vm6, %v727_v45, %v772_v21 }
  0xb5   : > { %v796_v62 = vpop.permute.xlu1 %795 }
  0xb6   : > { %v1016_v1 = vpop.permute.xlu0 %1015  ;;  %v836_v48 = vsel %vm582_vm7, %v817_v61, %v796_v62  ;;  %v1858_v61 = vor.u32 %v1857_v59, %v18997_v38  ;;  %v2101_v62 = vrot.slane %v18987_v49, 1 }
  0xb7   : > { %1103 = vrot.lane.b32.xlu0 %v836_v48, %s13666_s30  ;;  %v1061_v53 = vsel %vm557_vm6, %v971_v46, %v1016_v1  ;;  %v18986_v1 = vshll.u32 %v14126_v42, 16 }
  0xb8   : > { %v1876_v19 = vsel %vm13787_vm2, %v1858_v61, 0 }
  0xb9   : > { %v1040_v6 = vpop.permute.xlu1 %1039  ;;  %v494_v23 = vrot.slane %v18986_v1, 1 }
  0xba   : > { %v774_v7 = vpop.permute.xlu0 %773  ;;  %v1080_v11 = vsel %vm582_vm7, %v1061_v53, %v1040_v6  ;;  %v18988_v53 = vshrl.u32 %v14126_v42, 16  ;;  %v973_v6 = vsel %vm13976_vm5, 0, %v13888_v16  ;;  %v18982_v16 = vshll.u32 %v14147_v4, 16 }
  0xbb   : > { %1887 = vrot.lane.b32.xlu0 %v14045_v36, %s13662_s27  ;;  %1127 = vrot.lane.b32.xlu1 %v1080_v11, %s13665_s29  ;;  %v820_v40 = vsel %vm557_vm6, %v728_v9, %v774_v7  ;;  %v14153_v11 = vld [vmem:[%s13775_s26 + $0x80] sm:$0xff]   ;;  %v18983_v9 = vshrl.u32 %v14147_v4, 16  ;;  %v478_v36 = vsel %vm13976_vm5, 0, %v13967_v13 }
  0xbd   : > { %v798_v28 = vpop.permute.xlu1 %797 }
  0xbe   : > { %v1018_v33 = vpop.permute.xlu0 %1017  ;;  %v838_v56 = vsel %vm582_vm7, %v820_v40, %v798_v28  ;;  %v495_v40 = vor.u32 %v494_v23, %v18988_v53  ;;  %v18984_v23 = vshrl.u32 %v14168_v8, 16 }
  0xbf   : > { %2131 = vrot.lane.b32.xlu0 %v14062_v24, %s13662_s27  ;;  %1911 = vrot.lane.b32.xlu1 %v1875_v22, %s13663_s28  ;;  %v1064_v21 = vsel %vm557_vm6, %v972_v32, %v1018_v33  ;;  %v2102_v22 = vor.u32 %v2101_v62, %v18996_v47  ;;  %v18981_v33 = vshll.u32 %v14153_v11, 16  ;;  %v19182_v24 = vshll.u32 %v14066_v52, 16 }
  0xc0   : > { %v515_v62 = vsel %vm13787_vm2, %v495_v40, 0 }
  0xc1   : > { %v1042_v45 = vpop.permute.xlu1 %1041  ;;  %v2103_v61 = vrot.slane %v18981_v33, 1 }
  0xc2   : > { %v776_v46 = vpop.permute.xlu0 %775  ;;  %v1082_v48 = vsel %vm582_vm7, %v1064_v21, %v1042_v45  ;;  %v18985_v45 = vshrl.u32 %v14153_v11, 16 }
  0xc3   : > { %2155 = vrot.lane.b32.xlu0 %v2119_v39, %s13663_s28  ;;  %527 = vrot.lane.b32.xlu1 %v14066_v52, %s13662_s27  ;;  %v2120_v39 = vsel %vm13787_vm2, %v2102_v22, 0 }
  0xc5   : > { %v800_v57 = vpop.permute.xlu1 %799 }
  0xc6   : > { %v1020_v44 = vpop.permute.xlu0 %1019 }
  0xc7   : > { %1105 = vrot.lane.b32.xlu0 %v838_v56, %s13666_s30  ;;  %551 = vrot.lane.b32.xlu1 %v514_v17, %s13663_s28  ;;  %v823_v17 = vsel %vm557_vm6, %v729_v35, %v776_v46  ;;  %v1859_v56 = vrot.slane %v18982_v16, 1  ;;  %v18980_v35 = vshll.u32 %v14168_v8, 16  ;;  %v14235_v16 = vld [vmem:[%s13775_s26 + $0x88] sm:$0xff]  }
  0xc8   : > { %v840_v46 = vsel %vm582_vm7, %v823_v17, %v800_v57  ;;  %v14210_v17 = vld [vmem:[%s13775_s26 + $0x80] sm:$0xff]  }
  0xc9   : > { %v1044_v63 = vpop.permute.xlu1 %1043  ;;  %v1860_v57 = vor.u32 %v1859_v56, %v18983_v9  ;;  %v14239_v9 = vld [vmem:[%s13775_s26 + $0x40] sm:$0xff]  }
  0xca   : > { %v778_v7 = vpop.permute.xlu0 %777 }
  0xcb   : > { %1889 = vrot.lane.b32.xlu0 %v14088_v10, %s13662_s27  ;;  %1129 = vrot.lane.b32.xlu1 %v1082_v48, %s13665_s29  ;;  %v1067_v48 = vsel %vm557_vm6, %v973_v6, %v1020_v44 }
  0xcc   : > { %v1084_v40 = vsel %vm582_vm7, %v1067_v48, %v1044_v63  ;;  %v2104_v63 = vor.u32 %v2103_v61, %v18985_v45  ;;  %v974_v48 = vsel %vm13976_vm5, 0, %v13898_v31 }
  0xcd   : > { %v802_v28 = vpop.permute.xlu1 %801 }
  0xce   : > { %v1022_v32 = vpop.permute.xlu0 %1021  ;;  %v2121_v31 = vsel %vm13787_vm2, %v2104_v63, 0  ;;  %v18992_v63 = vshll.u32 %v14239_v9, 16 }
  0xcf   : > { %2133 = vrot.lane.b32.xlu0 %v14108_v0, %s13662_s27  ;;  %1913 = vrot.lane.b32.xlu1 %v1876_v19, %s13663_s28  ;;  %v1070_v29 = vsel %vm557_vm6, %v974_v48, %v1022_v32  ;;  %v14278_v48 = vld [vmem:[%s13775_s26 + $0x48] sm:$0xff]  }
  0xd1   : > { %v14179_v59 = vpop.permute.xlu1 %517 }
  0xd2   : > { %v1046_v21 = vpop.permute.xlu0 %1045 }
  0xd3   : > { %2157 = vrot.lane.b32.xlu0 %v2120_v39, %s13663_s28  ;;  %529 = vrot.lane.b32.xlu1 %v14126_v42, %s13662_s27  ;;  %v496_v39 = vrot.slane %v18980_v35, 1  ;;  %v1877_v35 = vsel %vm13787_vm2, %v1860_v57, 0  ;;  %v18993_v57 = vshrl.u32 %v14210_v17, 16  ;;  %v1086_v32 = vsel %vm582_vm7, %v1070_v29, %v1046_v21 }
  0xd5   : > { %v14193_v19 = vpop.permute.xlu1 %541  ;;  %v497_v56 = vor.u32 %v496_v39, %v18984_v23 }
  0xd6   : > { %v14195_v22 = vpop.permute.xlu0 %1879 }
  0xd7   : > { %1107 = vrot.lane.b32.xlu0 %v840_v46, %s13666_s30  ;;  %553 = vrot.lane.b32.xlu1 %v515_v62, %s13663_s28  ;;  %v474_v62 = vsel %vm13976_vm5, 0, %v13890_v20  ;;  %v730_v46 = vsel %vm13976_vm5, 0, %v13894_v26  ;;  %v516_v61 = vsel %vm13787_vm2, %v497_v56, 0 }
  0xd8   : > { %v826_v1 = vsel %vm557_vm6, %v730_v46, %v778_v7  ;;  %v18994_v46 = vshrl.u32 %v14235_v16, 16 }
  0xd9   : > { %v14205_v44 = vpop.permute.xlu1 %1903  ;;  %v842_v53 = vsel %vm582_vm7, %v826_v1, %v802_v28  ;;  %v18995_v1 = vshrl.u32 %v14239_v9, 16 }
  0xda   : > { %v14207_v6 = vpop.permute.xlu0 %2123 }
  0xdb   : > { %1891 = vrot.lane.b32.xlu0 %v14147_v4, %s13662_s27  ;;  %1131 = vrot.lane.b32.xlu1 %v1084_v40, %s13665_s29  ;;  %v18990_v40 = vshll.u32 %v14210_v17, 16 }
  0xdd   : > { %v14230_v33 = vpop.permute.xlu1 %519  ;;  %v1861_v23 = vrot.slane %v18990_v40, 1  ;;  %v475_v40 = vsel %vm13976_vm5, 0, %v13903_v37 }
  0xde   : > { %v14232_v26 = vpop.permute.xlu0 %2147 }
  0xdf   : > { %2135 = vrot.lane.b32.xlu0 %v14153_v11, %s13662_s27  ;;  %1915 = vrot.lane.b32.xlu1 %v1877_v35, %s13663_s28  ;;  %v18991_v35 = vshll.u32 %v14235_v16, 16  ;;  %v1862_v7 = vor.u32 %v1861_v23, %v18993_v57  ;;  %v1603_v23 = vrot.slane %v18992_v63, 1  ;;  %v2083_v63 = vsel %vm13976_vm5, 0, %v13917_v58  ;;  %v14298_v57 = vld [vmem:[%s13775_s26 + $0x50] sm:$0xff]  }
  0xe1   : > { %v14248_v39 = vpop.permute.xlu1 %543 }
  0xe2   : > { %v1882_v45 = vpop.permute.xlu0 %1881 }
  0xe3   : > { %2159 = vrot.lane.b32.xlu0 %v2121_v31, %s13663_s28  ;;  %531 = vrot.lane.b32.xlu1 %v14168_v8, %s13662_s27  ;;  %v2105_v31 = vrot.slane %v18991_v35, 1  ;;  %v1878_v35 = vsel %vm13787_vm2, %v1862_v7, 0 }
  0xe5   : > { %v1906_v56 = vpop.permute.xlu1 %1905  ;;  %v2106_v29 = vor.u32 %v2105_v31, %v18994_v46 }
  0xe6   : > { %v2126_v49 = vpop.permute.xlu0 %2125 }
  0xe7   : > { %1109 = vrot.lane.b32.xlu0 %v842_v53, %s13666_s30  ;;  %555 = vrot.lane.b32.xlu1 %v516_v61, %s13663_s28  ;;  %v1839_v61 = vsel %vm13976_vm5, 0, %v13913_v50  ;;  %v1604_v50 = vor.u32 %v1603_v23, %v18995_v1  ;;  %v2122_v7 = vsel %vm13787_vm2, %v2106_v29, 0  ;;  %v1539_v23 = vshrl.u32 %v14278_v48, 16 }
  0xe8   : > { %v1921_v1 = vsel %vm557_vm6, %v1839_v61, %v14195_v22  ;;  %v1549_v29 = vshll.u32 %v14298_v57, 16  ;;  %v2165_v22 = vsel %vm557_vm6, %v2083_v63, %v14207_v6  ;;  %v1546_v61 = vshrl.u32 %v14298_v57, 16 }
  0xe9   : > { %v14272_v28 = vpop.permute.xlu1 %521  ;;  %v1627_v58 = vsel %vm13787_vm2, %v1604_v50, 0  ;;  %v1840_v50 = vsel %vm13976_vm5, 0, %v13931_v12  ;;  %v1944_v38 = vsel %vm582_vm7, %v1921_v1, %v14205_v44  ;;  %v2188_v44 = vsel %vm582_vm7, %v2165_v22, %v14232_v26 }
  0xea   : > { %v2150_v53 = vpop.permute.xlu0 %2149  ;;  %v1924_v1 = vsel %vm557_vm6, %v1840_v50, %v1882_v45  ;;  %v2084_v6 = vsel %vm13976_vm5, 0, %v13938_v30  ;;  %v1556_v63 = vshll.u32 %v14323_v43, 16  ;;  %v1553_v22 = vshrl.u32 %v14323_v43, 16 }
  0xeb   : > { %1893 = vrot.lane.b32.xlu0 %v14210_v17, %s13662_s27  ;;  %1133 = vrot.lane.b32.xlu1 %v1086_v32, %s13665_s29  ;;  %v18999_v32 = vshll.u32 %v14278_v48, 16  ;;  %v2168_v50 = vsel %vm557_vm6, %v2084_v6, %v2126_v49  ;;  %v1842_v6 = vsel %vm13976_vm5, 0, %v13971_v25 }
  0xec   : > { %v2190_v49 = vsel %vm582_vm7, %v2168_v50, %v2150_v53 }
  0xed   : > { %v14290_v21 = vpop.permute.xlu1 %545 }
  0xee   : > { %v1884_v31 = vpop.permute.xlu0 %1883 }
  0xef   : > { %2137 = vrot.lane.b32.xlu0 %v14235_v16, %s13662_s27  ;;  %1917 = vrot.lane.b32.xlu1 %v1878_v35, %s13663_s28  ;;  %v1605_v35 = vrot.slane %v18999_v32, 1 }
  0xf1   : > { %v1908_v46 = vpop.permute.xlu1 %1907  ;;  %v1606_v12 = vor.u32 %v1605_v35, %v1539_v23  ;;  %v1946_v35 = vsel %vm582_vm7, %v1924_v1, %v1906_v56  ;;  %v14368_v56 = vld [vmem:[%s13775_s26 + $0x60] sm:$0xff]  }
  0xf2   : > { %v2128_v47 = vpop.permute.xlu0 %2127 }
  0xf3   : > { %2161 = vrot.lane.b32.xlu0 %v2122_v7, %s13663_s28  ;;  %1635 = vrot.lane.b32.xlu1 %v14239_v9, %s13662_s27  ;;  %v1607_v7 = vrot.slane %v1549_v29, 1  ;;  %v1628_v45 = vsel %vm13787_vm2, %v1606_v12, 0  ;;  %v2085_v12 = vsel %vm13976_vm5, 0, %v13959_v2  ;;  %v2086_v2 = vsel %vm13976_vm5, 0, %v13986_v34 }
  0xf5   : > { %v14332_v32 = vpop.permute.xlu1 %523  ;;  %v1608_v26 = vor.u32 %v1607_v7, %v1546_v61 }
  0xf7   : > { %1659 = vrot.lane.b32.xlu1 %v1627_v58, %s13663_s28  ;;  %2211 = vrot.lane.b32.xlu0 %v1944_v38, %s13666_s30  ;;  %v2152_v38 = vpop.permute.xlu0 %2151  ;;  %v1841_v58 = vsel %vm13976_vm5, 0, %v13955_v55  ;;  %v1609_v55 = vrot.slane %v1556_v63, 1  ;;  %v1629_v7 = vsel %vm13787_vm2, %v1608_v26, 0 }
  0xf8   : > { %v1927_v1 = vsel %vm557_vm6, %v1841_v58, %v1884_v31  ;;  %v2171_v31 = vsel %vm557_vm6, %v2085_v12, %v2128_v47  ;;  %v1560_v47 = vshrl.u32 %v14368_v56, 16 }
  0xf9   : > { %v14353_v30 = vpop.permute.xlu1 %547  ;;  %v1948_v53 = vsel %vm582_vm7, %v1927_v1, %v1908_v46  ;;  %v2192_v50 = vsel %vm582_vm7, %v2171_v31, %v2152_v38 }
  0xfb   : > { %2235 = vrot.lane.b32.xlu1 %v2188_v44, %s13665_s29  ;;  %1637 = vrot.lane.b32.xlu0 %v14278_v48, %s13662_s27  ;;  %v1886_v44 = vpop.permute.xlu0 %1885 }
  0xfc   : > { %v1930_v34 = vsel %vm557_vm6, %v1842_v6, %v1886_v44  ;;  %v560_v6 = vsel %vm557_vm6, %v474_v62, %v14179_v59  ;;  %v563_v59 = vsel %vm557_vm6, %v475_v40, %v14230_v33 }
  0xfd   : > { %v1910_v26 = vpop.permute.xlu1 %1909 }
  0xfe   : > { %v1950_v12 = vsel %vm582_vm7, %v1930_v34, %v1910_v26 }
  0xff   : > { %1661 = vrot.lane.b32.xlu1 %v1628_v45, %s13663_s28  ;;  %2213 = vrot.lane.b32.xlu0 %v1946_v35, %s13666_s30  ;;  %v1610_v45 = vor.u32 %v1609_v55, %v1553_v22  ;;  %v2130_v58 = vpop.permute.xlu0 %2129  ;;  %v1563_v35 = vshll.u32 %v14368_v56, 16 }
 0x101   : > { %v1630_v25 = vsel %vm13787_vm2, %v1610_v45, 0  ;;  %v14392_v55 = vpop.permute.xlu1 %525  ;;  %v1611_v46 = vrot.slane %v1563_v35, 1  ;;  %v584_v45 = vsel %vm582_vm7, %v560_v6, %v14193_v19  ;;  %v586_v19 = vsel %vm582_vm7, %v563_v59, %v14248_v39 }
 0x102   : > { %v572_v13 = vsel %vm557_vm6, %v478_v36, %v14392_v55 }
 0x103   : > { %2237 = vrot.lane.b32.xlu1 %v2190_v49, %s13665_s29  ;;  %1639 = vrot.lane.b32.xlu0 %v14298_v57, %s13662_s27  ;;  %v2154_v49 = vpop.permute.xlu0 %2153  ;;  %v1612_v38 = vor.u32 %v1611_v46, %v1560_v47  ;;  %v13348_v57 = vld [vmem:[%s18973_s3 + $0x1e8] sm:$0xff]  }
 0x105   : > { %v14406_v44 = vpop.permute.xlu1 %549 }
 0x106   : > { %v592_v52 = vsel %vm582_vm7, %v572_v13, %v14406_v44 }
 0x107   : > { %1663 = vrot.lane.b32.xlu1 %v1629_v7, %s13663_s28  ;;  %2215 = vrot.lane.b32.xlu0 %v1948_v53, %s13666_s30  ;;  %v2174_v7 = vsel %vm557_vm6, %v2086_v2, %v2130_v58  ;;  %v1631_v2 = vsel %vm13787_vm2, %v1612_v38, 0 }
 0x108   : > { %v2194_v1 = vsel %vm582_vm7, %v2174_v7, %v2154_v49  ;;  %v477_v7 = vsel %vm13976_vm5, 0, %v13947_v41  ;;  %v14455_v49 = vld [vmem:[%s13775_s26 + $0x68] sm:$0xff]  }
 0x109   : > { %v1570_v41 = vshll.u32 %v14455_v49, 16 }
 0x10b   : > { %2239 = vrot.lane.b32.xlu1 %v2192_v50, %s13665_s29  ;;  %1641 = vrot.lane.b32.xlu0 %v14323_v43, %s13662_s27  ;;  %v13354_v43 = vld [vmem:[%s18973_s3 + $0x1f8] sm:$0xff]  }
 0x10d   : > { %v1120_v53 = vpop.permute.xlu1 %1119 }
 0x10f   : > { %1665 = vrot.lane.b32.xlu1 %v1630_v25, %s13663_s28  ;;  %2217 = vrot.lane.b32.xlu0 %v1950_v12, %s13666_s30  ;;  %v476_v25 = vsel %vm13976_vm5, 0, %v13926_v3  ;;  %v1806_v3 = vrot.slane %v1804_v18, 7  ;;  %v569_v18 = vsel %vm557_vm6, %v477_v7, %v14332_v32  ;;  %v14512_v7 = vld [vmem:[%s13775_s26 + $0x70] sm:$0xff]  }
 0x110   : > { %v566_v33 = vsel %vm557_vm6, %v476_v25, %v14272_v28 }
 0x111   : > { %v588_v40 = vsel %vm582_vm7, %v566_v33, %v14290_v21  ;;  %v2050_v21 = vrot.slane %v2048_v5, 7  ;;  %v1809_v6 = vor.u32 %v1807_v51, %v1806_v3  ;;  %v19183_v33 = vshrl.u32 %v14088_v10, 16 }
 0x113   : > { %2241 = vrot.lane.b32.xlu1 %v2194_v1, %s13665_s29  ;;  %1643 = vrot.lane.b32.xlu0 %v14368_v56, %s13662_s27  ;;  %v1843_v5 = vsel %vm13976_vm5, 0, %v1809_v6  ;;  %v2053_v32 = vor.u32 %v2051_v54, %v2050_v21 }
 0x115   : > { %v1122_v34 = vpop.permute.xlu1 %1121 }
 0x116   : > { %v1096_v26 = vpop.permute.xlu0 %1095 }
 0x117   : > { %v1137_v31 = vsel %vm1135_vm9, %v584_v45, %v1096_v26  ;;  %1667 = vrot.lane.b32.xlu1 %v1631_v2, %s13663_s28  ;;  %v445_v2 = vrot.slane %v443_v15, 7  ;;  %v590_v45 = vsel %vm582_vm7, %v569_v18, %v14353_v30  ;;  %v1567_v15 = vshrl.u32 %v14455_v49, 16 }
 0x118   : > { %v1154_v20 = vsel %vm1152_vm10, %v1137_v31, %v1120_v53  ;;  %v1613_v30 = vrot.slane %v1570_v41, 1  ;;  %v19185_v18 = vshll.u32 %v14088_v10, 16 }
 0x119   : > { %11097 = vmatmul.mubr.msk.bf16.vlgmr.msra.gmra.mrb[0].mxu0 %vm1205_vm11, %v1154_v20  ;;  %v448_v54 = vor.u32 %v19182_v24, %v445_v2 }
 0x11a   : > { %v1098_v62 = vpop.permute.xlu0 %1097  ;;  %1271 = vmatprep.mubr.bf16.mxu0 %v19003_v60  ;;  %v1614_v25 = vor.u32 %v1613_v30, %v1567_v15 }
 0x11b   : > { %v1139_v58 = vsel %vm1135_vm9, %v586_v19, %v1098_v62  ;;  %v2087_v19 = vsel %vm13976_vm5, 0, %v2053_v32  ;;  %v479_v55 = vsel %vm13976_vm5, 0, %v448_v54 }
 0x11c   : > { %v1156_v37 = vsel %vm1152_vm10, %v1139_v58, %v1122_v34  ;;  %v1632_v3 = vsel %vm13787_vm2, %v1614_v25, 0 }
 0x11d   : > { %v1124_v46 = vpop.permute.xlu1 %1123 }
 0x11e   : > { %v1100_v50 = vpop.permute.xlu0 %1099 }
 0x11f   : > { %v1141_v39 = vsel %vm1135_vm9, %v588_v40, %v1100_v50  ;;  %v1813_v40 = vrot.slane %v19183_v33, 7 }
 0x120   : > { %v1158_v28 = vsel %vm1152_vm10, %v1141_v39, %v1124_v46 }
 0x121   : > { %11098 = vmatmul.mubr.msk.bf16.gmra.mrb[4].mxu0 %vm1205_vm11, %v1156_v37  ;;  %v1816_v6 = vor.u32 %v19185_v18, %v1813_v40  ;;  %v19192_v18 = vshrl.u32 %v14168_v8, 16 }
 0x122   : > { %1281 = vmatprep.mubr.bf16.mxu0 %v19003_v60  ;;  %v1102_v12 = vpop.permute.xlu0 %1101 }
 0x123   : > { %v1143_v31 = vsel %vm1135_vm9, %v590_v45, %v1102_v12  ;;  %v19186_v45 = vshrl.u32 %v14126_v42, 16  ;;  %v1844_v32 = vsel %vm13976_vm5, 0, %v1816_v6  ;;  %v459_v6 = vrot.slane %v19192_v18, 7 }
 0x125   : > { %v1126_v38 = vpop.permute.xlu1 %1125 }
 0x126   : > { %v1160_v51 = vsel %vm1152_vm10, %v1143_v31, %v1126_v38 }
 0x129   : > { %11099 = vmatmul.mubr.msk.bf16.gmra.mrb[8].mxu0 %vm1205_vm11, %v1158_v28  ;;  %v1104_v1 = vpop.permute.xlu0 %1103 }
 0x12a   : > { %1291 = vmatprep.mubr.bf16.mxu0 %v19003_v60  ;;  %v1145_v39 = vsel %vm1135_vm9, %v592_v52, %v1104_v1  ;;  %v19184_v1 = vshrl.u32 %v14108_v0, 16 }
 0x12c   : > { %v2057_v21 = vrot.slane %v19184_v1, 7  ;;  %v19191_v1 = vshll.u32 %v14147_v4, 16 }
 0x12d   : > { %v1888_v26 = vpop.permute.xlu0 %1887  ;;  %v1128_v53 = vpop.permute.xlu1 %1127 }
 0x12e   : > { %v1933_v20 = vsel %vm557_vm6, %v1843_v5, %v1888_v26  ;;  %v1162_v12 = vsel %vm1152_vm10, %v1145_v39, %v1128_v53  ;;  %v452_v26 = vrot.slane %v19186_v45, 7  ;;  %v1577_v53 = vshll.u32 %v14512_v7, 16 }
 0x130   : > { %v1615_v24 = vrot.slane %v1577_v53, 1 }
 0x131   : > { %11100 = vmatmul.mubr.msk.bf16.gmra.mrb[12].mxu0 %vm1205_vm11, %v1160_v51  ;;  %v2132_v59 = vpop.permute.xlu0 %2131  ;;  %v1912_v62 = vpop.permute.xlu1 %1911  ;;  %v19187_v51 = vshll.u32 %v14108_v0, 16 }
 0x132   : > { %1301 = vmatprep.mubr.bf16.mxu0 %v19003_v60  ;;  %v1952_v58 = vsel %vm582_vm7, %v1933_v20, %v1912_v62  ;;  %v2177_v34 = vsel %vm557_vm6, %v2087_v19, %v2132_v59  ;;  %v19188_v20 = vshll.u32 %v14126_v42, 16  ;;  %v1574_v62 = vshrl.u32 %v14512_v7, 16 }
 0x133   : > { %2219 = vrot.lane.b32.xlu0 %v1952_v58, %s13666_s30  ;;  %v2060_v10 = vor.u32 %v19187_v51, %v2057_v21  ;;  %v19194_v51 = vshll.u32 %v14168_v8, 16 }
 0x134   : > { %v455_v59 = vor.u32 %v19188_v20, %v452_v26  ;;  %v1616_v25 = vor.u32 %v1615_v24, %v1574_v62 }
 0x135   : > { %v2156_v50 = vpop.permute.xlu0 %2155  ;;  %v528_v37 = vpop.permute.xlu1 %527  ;;  %v2088_v0 = vsel %vm13976_vm5, 0, %v2060_v10  ;;  %v462_v10 = vor.u32 %v19194_v51, %v459_v6  ;;  %v13332_v6 = vld [vmem:[%s18973_s3 + $0x1c8] sm:$0xff]   ;;  %v13336_v51 = vld [vmem:[%s18973_s3 + $0x1d0] sm:$0xff]  }
 0x136   : > { %v2196_v46 = vsel %vm582_vm7, %v2177_v34, %v2156_v50  ;;  %v575_v44 = vsel %vm557_vm6, %v479_v55, %v528_v37  ;;  %v480_v42 = vsel %vm13976_vm5, 0, %v455_v59  ;;  %v19189_v55 = vshrl.u32 %v14147_v4, 16 }
 0x137   : > { %2243 = vrot.lane.b32.xlu1 %v2196_v46, %s13665_s29  ;;  %1645 = vrot.lane.b32.xlu0 %v14455_v49, %s13662_s27  ;;  %v1633_v39 = vsel %vm13787_vm2, %v1616_v25, 0  ;;  %v14557_v46 = vld [vmem:[%s13775_s26 + $0x78] sm:$0xff]   ;;  %v481_v8 = vsel %vm13976_vm5, 0, %v462_v10  ;;  %v19195_v25 = vshrl.u32 %v14210_v17, 16  ;;  %v19200_v10 = vshll.u32 %v14239_v9, 16 }
 0x138   : > { %v1820_v37 = vrot.slane %v19189_v55, 7 }
 0x139   : > { %11101 = vmatmul.mubr.msk.bf16.gmra.mrb[16].mxu0 %vm1205_vm11, %v1162_v12  ;;  %v1106_v28 = vpop.permute.xlu0 %1105  ;;  %v552_v38 = vpop.permute.xlu1 %551 }
 0x13a   : > { %1311 = vmatprep.mubr.bf16.mxu0 %v19003_v60  ;;  %v594_v2 = vsel %vm582_vm7, %v575_v44, %v552_v38  ;;  %v1823_v21 = vor.u32 %v19191_v1, %v1820_v37  ;;  %v13329_v1 = vld [vmem:[%s18973_s3 + $0x180] sm:$0xff]  }
 0x13b   : > { %1669 = vrot.lane.b32.xlu1 %v1632_v3, %s13663_s28  ;;  %v1147_v36 = vsel %vm1135_vm9, %v594_v2, %v1106_v28  ;;  %v19190_v3 = vshrl.u32 %v14153_v11, 16  ;;  %v1584_v2 = vshll.u32 %v14557_v46, 16 }
 0x13d   : > { %v1890_v31 = vpop.permute.xlu0 %1889  ;;  %v1130_v5 = vpop.permute.xlu1 %1129  ;;  %v2064_v28 = vrot.slane %v19190_v3, 7  ;;  %v1617_v20 = vrot.slane %v1584_v2, 1  ;;  %v19197_v3 = vshll.u32 %v14210_v17, 16 }
 0x13e   : > { %v1164_v30 = vsel %vm1152_vm10, %v1147_v36, %v1130_v5  ;;  %v1936_v54 = vsel %vm557_vm6, %v1844_v32, %v1890_v31  ;;  %v1845_v5 = vsel %vm13976_vm5, 0, %v1823_v21  ;;  %v19193_v36 = vshll.u32 %v14153_v11, 16 }
 0x13f   : > { %v19198_v21 = vshrl.u32 %v14239_v9, 16  ;;  %v13340_v9 = vld [vmem:[%s18973_s3 + $0x1d8] sm:$0xff]  }
 0x140   : > { %v2067_v4 = vor.u32 %v19193_v36, %v2064_v28 }
 0x141   : > { %11102 = vmatmul.mubr.msk.bf16.gmra.mrb[20].mxu0 %vm1205_vm11, %v1164_v30  ;;  %v2134_v13 = vpop.permute.xlu0 %2133  ;;  %v1914_v19 = vpop.permute.xlu1 %1913  ;;  %v1581_v30 = vshrl.u32 %v14557_v46, 16  ;;  %v1534_v18 = vrot.slane %v19198_v21, 7 }
 0x142   : > { %1321 = vmatprep.mubr.bf16.mxu0 %v19003_v60  ;;  %v1954_v58 = vsel %vm582_vm7, %v1936_v54, %v1914_v19  ;;  %v2180_v52 = vsel %vm557_vm6, %v2088_v0, %v2134_v13  ;;  %v2089_v11 = vsel %vm13976_vm5, 0, %v2067_v4  ;;  %v13333_v4 = vld [vmem:[%s18973_s3 + $0x188] sm:$0xff]  }
 0x143   : > { %2221 = vrot.lane.b32.xlu0 %v1954_v58, %s13666_s30  ;;  %v1618_v19 = vor.u32 %v1617_v20, %v1581_v30  ;;  %v1537_v20 = vor.u32 %v19200_v10, %v1534_v18 }
 0x145   : > { %v2158_v34 = vpop.permute.xlu0 %2157  ;;  %v530_v50 = vpop.permute.xlu1 %529  ;;  %v1634_v37 = vsel %vm13787_vm2, %v1618_v19, 0  ;;  %v1541_v19 = vrot.slane %v1539_v23, 7  ;;  %v13341_v23 = vld [vmem:[%s18973_s3 + $0x198] sm:$0xff]  }
 0x146   : > { %v2198_v33 = vsel %vm582_vm7, %v2180_v52, %v2158_v34  ;;  %v578_v40 = vsel %vm557_vm6, %v480_v42, %v530_v50  ;;  %v1827_v52 = vrot.slane %v19195_v25, 7  ;;  %v13324_v50 = vld [vmem:[%s18973_s3 + $0x240] sm:$0xff]  }
 0x147   : > { %2245 = vrot.lane.b32.xlu1 %v2198_v33, %s13665_s29  ;;  %1647 = vrot.lane.b32.xlu0 %v14512_v7, %s13662_s27 }
 0x148   : > { %11716 = vmatprep.subr.bf16.mxu1 %v13324_v50  ;;  %v1830_v28 = vor.u32 %v19197_v3, %v1827_v52 }
 0x149   : > { %v1108_v12 = vpop.permute.xlu0 %1107  ;;  %v554_v44 = vpop.permute.xlu1 %553 }
 0x14a   : > { %v596_v38 = vsel %vm582_vm7, %v578_v40, %v554_v44 }
 0x14b   : > { %1671 = vrot.lane.b32.xlu1 %v1633_v39, %s13663_s28  ;;  %v1149_v26 = vsel %vm1135_vm9, %v596_v38, %v1108_v12  ;;  %v19196_v39 = vshrl.u32 %v14235_v16, 16  ;;  %v13328_v38 = vld [vmem:[%s18973_s3 + $0x1c0] sm:$0xff]  }
 0x14c   : > { %11604 = vmatprep.subr.bf16.mxu0 %v13328_v38  ;;  %v13344_v38 = vld [vmem:[%s18973_s3 + $0x1e0] sm:$0xff]  }
 0x14d   : > { %v1892_v45 = vpop.permute.xlu0 %1891  ;;  %v1132_v31 = vpop.permute.xlu1 %1131  ;;  %v2071_v12 = vrot.slane %v19196_v39, 7  ;;  %11605 = vmatpush3.bf16.msra.mxu0 %v13329_v1  ;;  %v1548_v39 = vrot.slane %v1546_v61, 7  ;;  %v13345_v61 = vld [vmem:[%s18973_s3 + $0x1a0] sm:$0xff]  }
 0x14e   : > { %v1166_v32 = vsel %vm1152_vm10, %v1149_v26, %v1132_v31  ;;  %v1939_v59 = vsel %vm557_vm6, %v1845_v5, %v1892_v45  ;;  %v1846_v31 = vsel %vm13976_vm5, 0, %v1830_v28  ;;  %11606 = vmatprep.subr.bf16.mxu0 %v13332_v6  ;;  %v13326_v28 = vld [vmem:[%s18973_s3 + $0x248] sm:$0xff]  }
 0x14f   : > { %11103 = vmatmul.mubr.msk.bf16.gmra.mrb[24].mxu0 %vm1205_vm11, %v1166_v32  ;;  %v19199_v32 = vshll.u32 %v14235_v16, 16  ;;  %v1551_v18 = vor.u32 %v1549_v29, %v1548_v39  ;;  %v13327_v6 = vld [vmem:[%s18973_s3 + $0x208] sm:$0xff]  }
 0x150   : > { %1331 = vmatprep.mubr.bf16.mxu0 %v19003_v60 }
 0x151   : > { %v2136_v24 = vpop.permute.xlu0 %2135  ;;  %v1916_v54 = vpop.permute.xlu1 %1915  ;;  %v2074_v36 = vor.u32 %v19199_v32, %v2071_v12  ;;  %11607 = vmatpush3.bf16.msra.mxu0 %v13333_v4  ;;  %v13325_v12 = vld [vmem:[%s18973_s3 + $0x200] sm:$0xff]   ;;  %v1555_v32 = vrot.slane %v1553_v22, 7 }
 0x152   : > { %v1956_v13 = vsel %vm582_vm7, %v1939_v59, %v1916_v54  ;;  %v2183_v0 = vsel %vm557_vm6, %v2089_v11, %v2136_v24  ;;  %11608 = vmatprep.subr.bf16.mxu0 %v13336_v51 }
 0x153   : > { %2223 = vrot.lane.b32.xlu0 %v1956_v13, %s13666_s30  ;;  %v2090_v54 = vsel %vm13976_vm5, 0, %v2074_v36  ;;  %v13337_v13 = vld [vmem:[%s18973_s3 + $0x190] sm:$0xff]  }
 0x154   : > { %v13331_v36 = vld [vmem:[%s18973_s3 + $0x210] sm:$0xff]  }
 0x155   : > { %v2160_v58 = vpop.permute.xlu0 %2159  ;;  %v532_v42 = vpop.permute.xlu1 %531  ;;  %11609 = vmatpush3.bf16.msra.mxu0 %v13337_v13 }
 0x156   : > { %v2200_v34 = vsel %vm582_vm7, %v2183_v0, %v2160_v58  ;;  %v581_v55 = vsel %vm557_vm6, %v481_v8, %v532_v42  ;;  %v1595_v8 = vsel %vm13976_vm5, 0, %v1537_v20  ;;  %11610 = vmatprep.subr.bf16.mxu0 %v13340_v9  ;;  %v13334_v20 = vld [vmem:[%s18973_s3 + $0x258] sm:$0xff]  }
 0x157   : > { %2247 = vrot.lane.b32.xlu1 %v2200_v34, %s13665_s29  ;;  %1649 = vrot.lane.b32.xlu0 %v14557_v46, %s13662_s27  ;;  %v19201_v34 = vshll.u32 %v14278_v48, 16  ;;  %v19000_v46 = vlaneseq }
 0x159   : > { %v1110_v33 = vpop.permute.xlu0 %1109  ;;  %v556_v40 = vpop.permute.xlu1 %555  ;;  %v1544_v50 = vor.u32 %v19201_v34, %v1541_v19  ;;  %11611 = vmatpush3.bf16.msra.mxu0 %v13341_v23  ;;  %v13355_v19 = vld [vmem:[%s18973_s3 + $0x1b8] sm:$0xff]   ;;  %v13342_v34 = vld [vmem:[%s18973_s3 + $0x268] sm:$0xff]   ;;  %v13346_v23 = vld [vmem:[%s18973_s3 + $0x270] sm:$0xff]  }
 0x15a   : > { %v598_v44 = vsel %vm582_vm7, %v581_v55, %v556_v40  ;;  %11612 = vmatprep.subr.bf16.mxu0 %v13344_v38  ;;  %v13351_v38 = vld [vmem:[%s18973_s3 + $0x238] sm:$0xff]  }
 0x15b   : > { %1673 = vrot.lane.b32.xlu1 %v1634_v37, %s13663_s28  ;;  %v1151_v17 = vsel %vm1135_vm9, %v598_v44, %v1110_v33  ;;  %v1596_v40 = vsel %vm13976_vm5, 0, %v1544_v50 }
 0x15d   : > { %v1894_v45 = vpop.permute.xlu0 %1893  ;;  %v1134_v26 = vpop.permute.xlu1 %1133  ;;  %11613 = vmatpush3.bf16.msra.mxu0 %v13345_v61 }
 0x15e   : > { %v1168_v5 = vsel %vm1152_vm10, %v1151_v17, %v1134_v26  ;;  %v1942_v59 = vsel %vm557_vm6, %v1846_v31, %v1894_v45  ;;  %v13330_v26 = vld [vmem:[%s18973_s3 + $0x250] sm:$0xff]   ;;  %v13349_v31 = vld [vmem:[%s18973_s3 + $0x1a8] sm:$0xff]   ;;  %11614 = vmatprep.subr.bf16.mxu0 %v13348_v57  ;;  %v1569_v57 = vrot.slane %v1567_v15, 7 }
 0x15f   : > { %11104 = vmatmul.mubr.msk.bf16.gmra.mrb[28].mxu0 %vm1205_vm11, %v1168_v5  ;;  %v1597_v5 = vsel %vm13976_vm5, 0, %v1551_v18 }
 0x160   : > { %v1572_v56 = vor.u32 %v1570_v41, %v1569_v57 }
 0x161   : > { %v2138_v24 = vpop.permute.xlu0 %2137  ;;  %v1918_v16 = vpop.permute.xlu1 %1917  ;;  %11615 = vmatpush3.bf16.msra.mxu0 %v13349_v31 }
 0x162   : > { %v1958_v11 = vsel %vm582_vm7, %v1942_v59, %v1918_v16  ;;  %v2186_v0 = vsel %vm557_vm6, %v2090_v54, %v2138_v24  ;;  %v13352_v59 = vld [vmem:[%s18973_s3 + $0x1f0] sm:$0xff]   ;;  %v1558_v54 = vor.u32 %v1556_v63, %v1555_v32 }
 0x163   : > { %2225 = vrot.lane.b32.xlu0 %v1958_v11, %s13666_s30  ;;  %v13353_v24 = vld [vmem:[%s18973_s3 + $0x1b0] sm:$0xff]   ;;  %11616 = vmatprep.subr.bf16.mxu0 %v13352_v59  ;;  %v13335_v11 = vld [vmem:[%s18973_s3 + $0x218] sm:$0xff]   ;;  %s13602_s30 = sshll.u32 %s13667_s18, 4  ;;  %s13603_s30 = int_to_ptr.vmem [resolvable:$false] %s13602_s30 }
 0x164   : > { %s13604_s22 = scalar_lea.vmem %s13603_s30, 512 }
 0x165   : > { %v2162_v58 = vpop.permute.xlu0 %2161  ;;  %v1636_v42 = vpop.permute.xlu1 %1635  ;;  %11617 = vmatpush3.bf16.msra.mxu0 %v13353_v24 }
 0x166   : > { %v2202_v25 = vsel %vm582_vm7, %v2186_v0, %v2162_v58  ;;  %v1677_v52 = vsel %vm557_vm6, %v1595_v8, %v1636_v42  ;;  %v13338_v8 = vld [vmem:[%s18973_s3 + $0x260] sm:$0xff]   ;;  %11618 = vmatprep.subr.bf16.mxu0 %v13354_v43  ;;  %v1598_v0 = vsel %vm13976_vm5, 0, %v1558_v54 }
 0x167   : > { %2249 = vrot.lane.b32.xlu1 %v2202_v25, %s13665_s29  ;;  %v13339_v58 = vld [vmem:[%s18973_s3 + $0x220] sm:$0xff]   ;;  %s18864_s29 = sshll.u32 %s325_s23, 4 }
 0x168   : > { %s327_s25 = scalar_lea.vmem [#allocation5], %s18864_s29 }
 0x169   : > { %v2212_v55 = vpop.permute.xlu0 %2211  ;;  %v1660_v37 = vpop.permute.xlu1 %1659  ;;  %11619 = vmatpush3.bf16.msra.mxu0 %v13355_v19  ;;  %s10954_s26 = sshll.u32 %s327_s25, 4  ;;  %s18920_s26 = int_to_ptr.vmem [resolvable:$true] %s10954_s26 }
 0x16a   : > { %v1700_v33 = vsel %vm582_vm7, %v1677_v52, %v1660_v37  ;;  %v13343_v37 = vld [vmem:[%s18973_s3 + $0x228] sm:$0xff]   ;;  %s13598_s27 = scalar_lea.vmem %s18920_s26, 256  ;;  %p13605_p0 = scmp.lt.s32.totalorder %s18920_s26, %s13603_s30 }
 0x16b   : > { %v2252_v44 = vsel %vm1135_vm9, %v1700_v33, %v2212_v55  ;;  %p13599_p11 = scmp.ne.s32.totalorder %s18920_s26, %s13598_s27  ;;  %p13606_p1 = scmp.lt.s32.totalorder %s13604_s22, %s13598_s27 }
 0x16d   : > { %v1638_v48 = vpop.permute.xlu0 %1637  ;;  %v2236_v3 = vpop.permute.xlu1 %2235  ;;  %p13600_p12 = pnand %p13599_p11, %p13760_p5  ;;  %p13607_p2 = por %p13606_p1, %p13605_p0 }
 0x16e   : > { %v2268_v1 = vsel %vm1152_vm10, %v2252_v44, %v2236_v3  ;;  %v1680_v21 = vsel %vm557_vm6, %v1596_v40, %v1638_v48  ;;  %v13350_v3 = vld [vmem:[%s18973_s3 + $0x278] sm:$0xff]  }
 0x16f   : > { %11178 = vmatmul.mubr.msk.bf16.vlgmr.msra.gmra.mrb[0].mxu1 %vm1205_vm11, %v2268_v1  ;;  %v1562_v1 = vrot.slane %v1560_v47, 7  ;;  %p13601_p13 = pneg %p13600_p12 }
 0x170   : > { %2341 = vmatprep.mubr.bf16.mxu1 %v19003_v60  ;;  %11717 = vmatpush3.bf16.msra.mxu1 %v13325_v12  ;;  %v13347_v12 = vld [vmem:[%s18973_s3 + $0x230] sm:$0xff]  }
 0x171   : > { %v2214_v45 = vpop.permute.xlu0 %2213  ;;  %v1662_v17 = vpop.permute.xlu1 %1661  ;;  %11718 = vmatprep.subr.bf16.mxu1 %v13326_v28  ;;  %v1565_v61 = vor.u32 %v1563_v35, %v1562_v1  ;;  %v1600_v35 = vsel %vm13976_vm5, 0, %v1572_v56  ;;  %p13608_p3 = pnand %p13607_p2, %p13601_p13 }
 0x172   : > { %v1702_v29 = vsel %vm582_vm7, %v1680_v21, %v1662_v17 }
 0x173   : > { %v2254_v51 = vsel %vm1135_vm9, %v1702_v29, %v2214_v45  ;;  %v1599_v21 = vsel %vm13976_vm5, 0, %v1565_v61 }
 0x174   : > { %11719 = vmatpush3.bf16.msra.mxu1 %v13327_v6 }
 0x175   : > { %v1640_v4 = vpop.permute.xlu0 %1639  ;;  %v2238_v10 = vpop.permute.xlu1 %2237  ;;  %11720 = vmatprep.subr.bf16.mxu1 %v13330_v26 }
 0x176   : > { %v2270_v22 = vsel %vm1152_vm10, %v2254_v51, %v2238_v10  ;;  %v1683_v16 = vsel %vm557_vm6, %v1597_v5, %v1640_v4  ;;  %v1576_v51 = vrot.slane %v1574_v62, 7 }
 0x177   : > { %11179 = vmatmul.mubr.msk.bf16.gmra.mrb[4].mxu1 %vm1205_vm11, %v2270_v22 }
 0x178   : > { %2351 = vmatprep.mubr.bf16.mxu1 %v19003_v60  ;;  %11721 = vmatpush3.bf16.msra.mxu1 %v13331_v36  ;;  %v1579_v41 = vor.u32 %v1577_v53, %v1576_v51  ;;  %v13356_v53 = vld [vmem:[%s18973_s3 + $0x2c0] sm:$0xff]  }
 0x179   : > { %v2216_v13 = vpop.permute.xlu0 %2215  ;;  %v1664_v9 = vpop.permute.xlu1 %1663  ;;  %11722 = vmatprep.subr.bf16.mxu1 %v13334_v20  ;;  %11828 = vmatprep.subr.bf16.mxu0 %v13356_v53 }
 0x17a   : > { %v1704_v63 = vsel %vm582_vm7, %v1683_v16, %v1664_v9  ;;  %v1601_v59 = vsel %vm13976_vm5, 0, %v1579_v41 }
 0x17b   : > { %v2256_v42 = vsel %vm1135_vm9, %v1704_v63, %v2216_v13 }
 0x17c   : > { %11723 = vmatpush3.bf16.msra.mxu1 %v13335_v11  ;;  %v1583_v11 = vrot.slane %v1581_v30, 7 }
 0x17d   : > { %v2240_v25 = vpop.permute.xlu1 %2239  ;;  %v1642_v52 = vpop.permute.xlu0 %1641  ;;  %11724 = vmatprep.subr.bf16.mxu1 %v13338_v8 }
 0x17e   : > { %v2272_v50 = vsel %vm1152_vm10, %v2256_v42, %v2240_v25  ;;  %v1686_v55 = vsel %vm557_vm6, %v1598_v0, %v1642_v52  ;;  %v1586_v8 = vor.u32 %v1584_v2, %v1583_v11  ;;  %v14816_v2 = vshrl.u32 %v19000_v46, 7 }
 0x17f   : > { %11180 = vmatmul.mubr.msk.bf16.gmra.mrb[8].mxu1 %vm1205_vm11, %v2272_v50  ;;  %v347_v50 = vld [vmem:[%s18972_s2] sm:$0x3] }
 0x180   : > { %2361 = vmatprep.mubr.bf16.mxu1 %v19003_v60  ;;  %11725 = vmatpush3.bf16.msra.mxu1 %v13339_v58  ;;  %v1602_v30 = vsel %vm13976_vm5, 0, %v1586_v8  ;;  %19202 = vst [vmem:[#allocation10_spill] sm:$0xff] %v14816_v2 }
 0x181   : > { %v1666_v33 = vpop.permute.xlu1 %1665  ;;  %11726 = vmatprep.subr.bf16.mxu1 %v13342_v34  ;;  %v2218_v39 = vpop.permute.xlu0 %2217  ;;  %v19002_v34 = vsub.s32 0, %v14816_v2 }
 0x182   : > { %v1706_v40 = vsel %vm582_vm7, %v1686_v55, %v1666_v33  ;;  %v19001_v55 = vsub.s32 1, %v14816_v2  ;;  %v13384_v2 = vld [vmem:[%s18973_s3 + $0x70] sm:$0xff]  }
 0x183   : > { %v2258_v48 = vsel %vm1135_vm9, %v1706_v40, %v2218_v39 }
 0x184   : > { %11727 = vmatpush3.bf16.msra.mxu1 %v13343_v37  ;;  %v14825_v37 = vrot.slane %v347_v50, %v19002_v34  ;;  %v14829_v33 = vrot.slane %v347_v50, %v19001_v55 }
 0x185   : > { %v2242_v44 = vpop.permute.xlu1 %2241  ;;  %11728 = vmatprep.subr.bf16.mxu1 %v13346_v23  ;;  %v1644_v18 = vpop.permute.xlu0 %1643 }
 0x186   : > { %v2274_v28 = vsel %vm1152_vm10, %v2258_v48, %v2242_v44  ;;  %v1689_v6 = vsel %vm557_vm6, %v1599_v21, %v1644_v18 }
 0x187   : > { %11181 = vmatmul.mubr.msk.bf16.gmra.mrb[12].mxu1 %vm1205_vm11, %v2274_v28 }
 0x188   : > { %2371 = vmatprep.mubr.bf16.mxu1 %v19003_v60  ;;  %11729 = vmatpush3.bf16.msra.mxu1 %v13347_v12 }
 0x189   : > { %11730 = vmatprep.subr.bf16.mxu1 %v13350_v3  ;;  %v1668_v45 = vpop.permute.xlu1 %1667 }
 0x18a   : > { %v1708_v17 = vsel %vm582_vm7, %v1689_v6, %v1668_v45 }
 0x18c   : > { %11731 = vmatpush3.bf16.msra.mxu1 %v13351_v38 }
 0x1a5   : > { %v2220_v26 = vpop.permute.xlu0 %2219 }
 0x1a6   : > { %v2260_v29 = vsel %vm1135_vm9, %v1708_v17, %v2220_v26 }
 0x1a9   : > { %v2244_v31 = vpop.permute.xlu1 %2243  ;;  %v1646_v5 = vpop.permute.xlu0 %1645 }
 0x1aa   : > { %v2276_v47 = vsel %vm1152_vm10, %v2260_v29, %v2244_v31  ;;  %v1692_v32 = vsel %vm557_vm6, %v1600_v35, %v1646_v5 }
 0x1ab   : > { %11182 = vmatmul.mubr.msk.bf16.gmra.mrb[16].mxu1 %vm1205_vm11, %v2276_v47 }
 0x1ac   : > { %2381 = vmatprep.mubr.bf16.mxu1 %v19003_v60 }
 0x1ad   : > { %v1670_v36 = vpop.permute.xlu1 %1669 }
 0x1ae   : > { %v1710_v15 = vsel %vm582_vm7, %v1692_v32, %v1670_v36 }
 0x1b5   : > { %v2222_v4 = vpop.permute.xlu0 %2221 }
 0x1b6   : > { %v2262_v10 = vsel %vm1135_vm9, %v1710_v15, %v2222_v4 }
 0x1b9   : > { %v2246_v20 = vpop.permute.xlu1 %2245  ;;  %v1648_v22 = vpop.permute.xlu0 %1647 }
 0x1ba   : > { %v2278_v49 = vsel %vm1152_vm10, %v2262_v10, %v2246_v20  ;;  %v1695_v24 = vsel %vm557_vm6, %v1601_v59, %v1648_v22 }
 0x1bb   : > { %11183 = vmatmul.mubr.msk.bf16.gmra.mrb[20].mxu1 %vm1205_vm11, %v2278_v49 }
 0x1bc   : > { %2391 = vmatprep.mubr.bf16.mxu1 %v19003_v60 }
 0x1bd   : > { %v1672_v16 = vpop.permute.xlu1 %1671 }
 0x1be   : > { %v1712_v62 = vsel %vm582_vm7, %v1695_v24, %v1672_v16 }
 0x1c5   : > { %v2224_v54 = vpop.permute.xlu0 %2223 }
 0x1c6   : > { %v2264_v13 = vsel %vm1135_vm9, %v1712_v62, %v2224_v54 }
 0x1c9   : > { %v2248_v9 = vpop.permute.xlu1 %2247  ;;  %v1650_v43 = vpop.permute.xlu0 %1649 }
 0x1ca   : > { %v2280_v7 = vsel %vm1152_vm10, %v2264_v13, %v2248_v9  ;;  %v1698_v63 = vsel %vm557_vm6, %v1602_v30, %v1650_v43  ;;  %v13357_v30 = vld [vmem:[%s18973_s3 + $0x280] sm:$0xff]  }
 0x1cb   : > { %11184 = vmatmul.mubr.msk.bf16.gmra.mrb[24].mxu1 %vm1205_vm11, %v2280_v7 }
 0x1cc   : > { %2401 = vmatprep.mubr.bf16.mxu1 %v19003_v60 }
 0x1cd   : > { %v1674_v19 = vpop.permute.xlu1 %1673 }
 0x1ce   : > { %v1714_v0 = vsel %vm582_vm7, %v1698_v63, %v1674_v19 }
 0x1d5   : > { %v2226_v58 = vpop.permute.xlu0 %2225 }
 0x1d6   : > { %v2266_v42 = vsel %vm1135_vm9, %v1714_v0, %v2226_v58  ;;  %v13358_v58 = vld [vmem:[%s18973_s3 + $0x2c8] sm:$0xff]  }
 0x1d9   : > { %v2250_v25 = vpop.permute.xlu1 %2249 }
 0x1da   : > { %v2282_v52 = vsel %vm1152_vm10, %v2266_v42, %v2250_v25 }
 0x1db   : > { %11185 = vmatmul.mubr.msk.bf16.gmra.mrb[28].mxu1 %vm1205_vm11, %v2282_v52 }
 0x1ec   : > { %v1263_v23 = vpop.f32.mrb[0].mxu0 }
 0x1ed   : > { %v1264_v40 = vadd.f32 %v1263_v23, %v14825_v37  ;;  %v1265_v39 = vpop.f32.mrb[1].mxu0 }
 0x1ee   : > { %v1266_v12 = vadd.f32 %v1265_v39, %v14829_v33  ;;  %v1267_v48 = vpop.f32.mrb[2].mxu0 }
 0x1ef   : > { %v1374_v44 = vmul.f32 0.2, %v1264_v40  ;;  %v1268_v3 = vadd.f32 %v1267_v48, %v14825_v37  ;;  %v1269_v28 = vpop.f32.mrb[3].mxu0  ;;  %vm1342_vm12 = vcmp.gt.f32.partialorder %v1264_v40, 0.0 }
 0x1f0   : > { %v1375_v38 = vmul.f32 0.2, %v1266_v12  ;;  %v1270_v1 = vadd.f32 %v1269_v28, %v14829_v33  ;;  %vm1343_vm13 = vcmp.gt.f32.partialorder %v1266_v12, 0.0 }
 0x1f1   : > { %vm1344_vm14 = vcmp.gt.f32.partialorder %v1268_v3, 0.0  ;;  %v1376_v61 = vmul.f32 0.2, %v1268_v3  ;;  %v1406_v18 = vsel %vm1342_vm12, %v1264_v40, %v1374_v44 }
 0x1f2   : > { %vm1345_vm15 = vcmp.gt.f32.partialorder %v1270_v1, 0.0  ;;  %v1377_v21 = vmul.f32 0.2, %v1270_v1  ;;  %v1407_v45 = vsel %vm1343_vm13, %v1266_v12, %v1375_v38  ;;  %v13359_v38 = vld [vmem:[%s18973_s3 + $0x288] sm:$0xff]  }
 0x1f3   : > { %v1408_v6 = vsel %vm1344_vm14, %v1268_v3, %v1376_v61 }
 0x1f4   : > { %v14835_v17 = vpack.c.bf16 %v1408_v6, %v1406_v18  ;;  %v1409_v26 = vsel %vm1345_vm15, %v1270_v1, %v1377_v21  ;;  %v1273_v57 = vpop.f32.mrb[4].mxu0  ;;  %v13360_v18 = vld [vmem:[%s18973_s3 + $0x2d0] sm:$0xff]  }
 0x1f5   : > { %v1274_v29 = vadd.f32 %v1273_v57, %v14825_v37  ;;  %v1275_v31 = vpop.f32.mrb[5].mxu0  ;;  %v14838_v47 = vpack.c.bf16 %v1409_v26, %v1407_v45 }
 0x1f6   : > { %19203 = vst [vmem:[#allocation11_spill] sm:$0xff] %v14835_v17  ;;  %v1276_v56 = vadd.f32 %v1275_v31, %v14829_v33  ;;  %v1277_v35 = vpop.f32.mrb[6].mxu0  ;;  %v2882_v5 = vshrl.u32 %v14835_v17, 16  ;;  %v2885_v24 = vshll.u32 %v14835_v17, 16 }
 0x1f7   : > { %19204 = vst [vmem:[#allocation12_spill] sm:$0xff] %v14838_v47  ;;  %v1378_v32 = vmul.f32 0.2, %v1274_v29  ;;  %v1278_v36 = vadd.f32 %v1277_v35, %v14825_v37  ;;  %v1279_v15 = vpop.f32.mrb[7].mxu0  ;;  %4212 = vmatprep.mubr.bf16.mxu1 %v14838_v47  ;;  %v2889_v4 = vshrl.u32 %v14838_v47, 16  ;;  %vm1346_vm0 = vcmp.gt.f32.partialorder %v1274_v29, 0.0 }
 0x1f8   : > { %v1379_v51 = vmul.f32 0.2, %v1276_v56  ;;  %v1280_v10 = vadd.f32 %v1279_v15, %v14829_v33  ;;  %4213 = vmatmul.mubr.bf16.vlgmr.msra.gmra.mrb[32].mxu1 %v14835_v17  ;;  %v2892_v20 = vshll.u32 %v14838_v47, 16  ;;  %vm1347_vm1 = vcmp.gt.f32.partialorder %v1276_v56, 0.0 }
 0x1f9   : > { %vm1348_vm3 = vcmp.gt.f32.partialorder %v1278_v36, 0.0  ;;  %v1380_v49 = vmul.f32 0.2, %v1278_v36  ;;  %v2891_v41 = vrot.slane %v2889_v4, 7  ;;  %v2884_v22 = vrot.slane %v2882_v5, 7 }
 0x1fa   : > { %vm1349_vm4 = vcmp.gt.f32.partialorder %v1280_v10, 0.0  ;;  %v1381_v59 = vmul.f32 0.2, %v1280_v10  ;;  %v1410_v16 = vsel %vm1346_vm0, %v1274_v29, %v1378_v32  ;;  %v3161_v11 = vrot.slane %v2892_v20, 1 }
 0x1fb   : > { %v1412_v62 = vsel %vm1348_vm3, %v1278_v36, %v1380_v49  ;;  %v2894_v54 = vor.u32 %v2892_v20, %v2891_v41  ;;  %v1411_v13 = vsel %vm1347_vm1, %v1276_v56, %v1379_v51  ;;  %v2887_v8 = vor.u32 %v2885_v24, %v2884_v22  ;;  %v13361_v51 = vld [vmem:[%s18973_s3 + $0x290] sm:$0xff]   ;;  %v13362_v41 = vld [vmem:[%s18973_s3 + $0x2d8] sm:$0xff]  }
 0x1fc   : > { %v14851_v9 = vpack.c.bf16 %v1412_v62, %v1410_v16  ;;  %v1413_v7 = vsel %vm1349_vm4, %v1280_v10, %v1381_v59  ;;  %v1283_v53 = vpop.f32.mrb[8].mxu0  ;;  %v14866_v42 = vor.u32 %v3161_v11, %v2889_v4  ;;  %v3159_v44 = vrot.slane %v2885_v24, 1 }
 0x1fd   : > { %v14856_v43 = vpack.c.bf16 %v1413_v7, %v1411_v13  ;;  %v1284_v63 = vadd.f32 %v1283_v53, %v14825_v37  ;;  %v1285_v19 = vpop.f32.mrb[9].mxu0  ;;  %v14861_v0 = vsel %vm13976_vm5, 0, %v2894_v54  ;;  %v14872_v50 = vsel %vm13976_vm5, 0, %v2887_v8 }
 0x1fe   : > { %19205 = vst [vmem:[#allocation13_spill] sm:$0xff] %v14851_v9  ;;  %v1286_v25 = vadd.f32 %v1285_v19, %v14829_v33  ;;  %v1287_v52 = vpop.f32.mrb[10].mxu0  ;;  %4051 = vmatprep.mubr.bf16.mxu0 %v14861_v0  ;;  %v2896_v23 = vshrl.u32 %v14851_v9, 16  ;;  %v2899_v26 = vshll.u32 %v14851_v9, 16  ;;  %v14896_v56 = vor.u32 %v3159_v44, %v2882_v5 }
 0x1ff   : > { %19206 = vst [vmem:[#allocation14_spill] sm:$0xff] %v14856_v43  ;;  %v1382_v40 = vmul.f32 0.2, %v1284_v63  ;;  %v1288_v39 = vadd.f32 %v1287_v52, %v14825_v37  ;;  %v1289_v12 = vpop.f32.mrb[11].mxu0  ;;  %4052 = vmatmul.mubr.bf16.vlgmr.msra.gmra.mrb[32].mxu0 %v14872_v50  ;;  %4220 = vmatprep.mubr.bf16.mxu1 %v14856_v43  ;;  %v2903_v48 = vshrl.u32 %v14856_v43, 16  ;;  %vm1350_vm6 = vcmp.gt.f32.partialorder %v1284_v63, 0.0 }
 0x200   : > { %vm1351_vm7 = vcmp.gt.f32.partialorder %v1286_v25, 0.0  ;;  %v1383_v3 = vmul.f32 0.2, %v1286_v25  ;;  %v1290_v28 = vadd.f32 %v1289_v12, %v14829_v33  ;;  %4221 = vmatmul.mubr.bf16.gmra.mrb[36].mxu1 %v14851_v9  ;;  %11829 = vmatpush3.bf16.msra.mxu0 %v13357_v30  ;;  %v2906_v21 = vshll.u32 %v14856_v43, 16  ;;  %v13363_v30 = vld [vmem:[%s18973_s3 + $0x298] sm:$0xff]  }
 0x201   : > { %vm1352_vm8 = vcmp.gt.f32.partialorder %v1288_v39, 0.0  ;;  %v1384_v1 = vmul.f32 0.2, %v1288_v39  ;;  %v2905_v61 = vrot.slane %v2903_v48, 7  ;;  %11830 = vmatprep.subr.bf16.mxu0 %v13358_v58  ;;  %v2898_v45 = vrot.slane %v2896_v23, 7 }
 0x202   : > { %vm1353_vm9 = vcmp.gt.f32.partialorder %v1290_v28, 0.0  ;;  %v1385_v6 = vmul.f32 0.2, %v1290_v28  ;;  %v1414_v57 = vsel %vm1350_vm6, %v1284_v63, %v1382_v40  ;;  %v1415_v35 = vsel %vm1351_vm7, %v1286_v25, %v1383_v3  ;;  %v13364_v25 = vld [vmem:[%s18973_s3 + $0x2e0] sm:$0xff]  }
 0x203   : > { %v1416_v29 = vsel %vm1352_vm8, %v1288_v39, %v1384_v1  ;;  %v2908_v31 = vor.u32 %v2906_v21, %v2905_v61  ;;  %v2901_v4 = vor.u32 %v2899_v26, %v2898_v45  ;;  %v3165_v7 = vrot.slane %v2906_v21, 1 }
 0x204   : > { %v14899_v32 = vpack.c.bf16 %v1416_v29, %v1414_v57  ;;  %v1417_v36 = vsel %vm1353_vm9, %v1290_v28, %v1385_v6  ;;  %v1293_v15 = vpop.f32.mrb[12].mxu0  ;;  %11831 = vmatpush3.bf16.msra.mxu0 %v13359_v38  ;;  %v13365_v6 = vld [vmem:[%s18973_s3 + $0x2a0] sm:$0xff]  }
 0x205   : > { %v14904_v10 = vpack.c.bf16 %v1417_v36, %v1415_v35  ;;  %v1294_v20 = vadd.f32 %v1293_v15, %v14825_v37  ;;  %v1295_v49 = vpop.f32.mrb[13].mxu0  ;;  %v14909_v5 = vsel %vm13976_vm5, 0, %v2908_v31  ;;  %11832 = vmatprep.subr.bf16.mxu0 %v13360_v18  ;;  %v14918_v24 = vsel %vm13976_vm5, 0, %v2901_v4 }
 0x206   : > { %19207 = vst [vmem:[#allocation15_spill] sm:$0xff] %v14899_v32  ;;  %v1296_v59 = vadd.f32 %v1295_v49, %v14829_v33  ;;  %v1297_v22 = vpop.f32.mrb[14].mxu0  ;;  %4059 = vmatprep.mubr.bf16.mxu0 %v14909_v5  ;;  %19209 = vst [vmem:[#allocation17_spill] sm:$0xff] %v14918_v24  ;;  %v2910_v16 = vshrl.u32 %v14899_v32, 16  ;;  %v2913_v39 = vshll.u32 %v14899_v32, 16  ;;  %v14942_v28 = vor.u32 %v3165_v7, %v2903_v48 }
 0x207   : > { %19208 = vst [vmem:[#allocation16_spill] sm:$0xff] %v14904_v10  ;;  %v1386_v62 = vmul.f32 0.2, %v1294_v20  ;;  %v1298_v54 = vadd.f32 %v1297_v22, %v14825_v37  ;;  %v1299_v11 = vpop.f32.mrb[15].mxu0  ;;  %4060 = vmatmul.mubr.bf16.gmra.mrb[36].mxu0 %v14918_v24  ;;  %4228 = vmatprep.mubr.bf16.mxu1 %v14904_v10  ;;  %v2917_v13 = vshrl.u32 %v14904_v10, 16  ;;  %vm1354_vm10 = vcmp.gt.f32.partialorder %v1294_v20, 0.0 }
 0x208   : > { %vm1355_vm11 = vcmp.gt.f32.partialorder %v1296_v59, 0.0  ;;  %v1387_v53 = vmul.f32 0.2, %v1296_v59  ;;  %v1300_v8 = vadd.f32 %v1299_v11, %v14829_v33  ;;  %4229 = vmatmul.mubr.bf16.gmra.mrb[40].mxu1 %v14899_v32  ;;  %11833 = vmatpush3.bf16.msra.mxu0 %v13361_v51  ;;  %v2920_v58 = vshll.u32 %v14904_v10, 16 }
 0x209   : > { %vm1356_vm12 = vcmp.gt.f32.partialorder %v1298_v54, 0.0  ;;  %v1388_v63 = vmul.f32 0.2, %v1298_v54  ;;  %v2919_v19 = vrot.slane %v2917_v13, 7  ;;  %11834 = vmatprep.subr.bf16.mxu0 %v13362_v41  ;;  %v2912_v40 = vrot.slane %v2910_v16, 7 }
 0x20a   : > { %vm1357_vm13 = vcmp.gt.f32.partialorder %v1300_v8, 0.0  ;;  %v1389_v52 = vmul.f32 0.2, %v1300_v8  ;;  %v1418_v12 = vsel %vm1354_vm10, %v1294_v20, %v1386_v62  ;;  %v1419_v38 = vsel %vm1355_vm11, %v1296_v59, %v1387_v53 }
 0x20b   : > { %v1420_v44 = vsel %vm1356_vm12, %v1298_v54, %v1388_v63  ;;  %v2922_v3 = vor.u32 %v2920_v58, %v2919_v19  ;;  %v2915_v18 = vor.u32 %v2913_v39, %v2912_v40  ;;  %v3163_v31 = vrot.slane %v2899_v26, 1 }
 0x20c   : > { %v14945_v1 = vpack.c.bf16 %v1420_v44, %v1418_v12  ;;  %v1421_v61 = vsel %vm1357_vm13, %v1300_v8, %v1389_v52  ;;  %v1303_v21 = vpop.f32.mrb[16].mxu0  ;;  %11835 = vmatpush3.bf16.msra.mxu0 %v13363_v30  ;;  %v3169_v51 = vrot.slane %v2920_v58, 1 }
 0x20d   : > { %v14950_v45 = vpack.c.bf16 %v1421_v61, %v1419_v38  ;;  %v1304_v57 = vadd.f32 %v1303_v21, %v14825_v37  ;;  %v1305_v29 = vpop.f32.mrb[17].mxu0  ;;  %v14955_v48 = vsel %vm13976_vm5, 0, %v2922_v3  ;;  %11836 = vmatprep.subr.bf16.mxu0 %v13364_v25  ;;  %v14961_v15 = vsel %vm13976_vm5, 0, %v2915_v18  ;;  %v19338_v14 = vld [vmem:[#allocation15_spill] sm:$0xff] }
 0x20e   : > { %19210 = vst [vmem:[#allocation18_spill] sm:$0xff] %v14945_v1  ;;  %19212 = vst [vmem:[#allocation20_spill] sm:$0xff] %v14955_v48  ;;  %v1306_v35 = vadd.f32 %v1305_v29, %v14829_v33  ;;  %v1307_v36 = vpop.f32.mrb[18].mxu0  ;;  %4067 = vmatprep.mubr.bf16.mxu0 %v14955_v48  ;;  %v2924_v4 = vshrl.u32 %v14945_v1, 16  ;;  %v2927_v62 = vshll.u32 %v14945_v1, 16  ;;  %v14979_v58 = vor.u32 %v3163_v31, %v2896_v23 }
 0x20f   : > { %19211 = vst [vmem:[#allocation19_spill] sm:$0xff] %v14950_v45  ;;  %19213 = vst [vmem:[#allocation21_spill] sm:$0xff] %v14961_v15  ;;  %vm1358_vm14 = vcmp.gt.f32.partialorder %v1304_v57, 0.0  ;;  %v1390_v20 = vmul.f32 0.2, %v1304_v57  ;;  %v1308_v49 = vadd.f32 %v1307_v36, %v14825_v37  ;;  %v1309_v41 = vpop.f32.mrb[19].mxu0  ;;  %4068 = vmatmul.mubr.bf16.gmra.mrb[40].mxu0 %v14961_v15  ;;  %4236 = vmatprep.mubr.bf16.mxu1 %v14950_v45 }
 0x210   : > { %v2931_v26 = vshrl.u32 %v14950_v45, 16  ;;  %vm1359_vm15 = vcmp.gt.f32.partialorder %v1306_v35, 0.0  ;;  %v1391_v59 = vmul.f32 0.2, %v1306_v35  ;;  %v1310_v22 = vadd.f32 %v1309_v41, %v14829_v33  ;;  %4237 = vmatmul.mubr.bf16.gmra.mrb[44].mxu1 %v14945_v1  ;;  %11837 = vmatpush3.bf16.msra.mxu0 %v13365_v6 }
 0x211   : > { %vm1360_vm0 = vcmp.gt.f32.partialorder %v1308_v49, 0.0  ;;  %v1392_v54 = vmul.f32 0.2, %v1308_v49  ;;  %v2934_v7 = vshll.u32 %v14950_v45, 16  ;;  %v1422_v53 = vsel %vm1358_vm14, %v1304_v57, %v1390_v20 }
 0x212   : > { %v2933_v11 = vrot.slane %v2931_v26, 7  ;;  %vm1361_vm1 = vcmp.gt.f32.partialorder %v1310_v22, 0.0  ;;  %v1393_v8 = vmul.f32 0.2, %v1310_v22  ;;  %v2926_v30 = vrot.slane %v2924_v4, 7 }
 0x213   : > { %v1424_v63 = vsel %vm1360_vm0, %v1308_v49, %v1392_v54  ;;  %v14983_v25 = vor.u32 %v3169_v51, %v2917_v13  ;;  %v1423_v52 = vsel %vm1359_vm15, %v1306_v35, %v1391_v59  ;;  %v3167_v29 = vrot.slane %v2913_v39, 1  ;;  %v13366_v39 = vld [vmem:[%s18973_s3 + $0x2e8] sm:$0xff]  }
 0x214   : > { %v2936_v19 = vor.u32 %v2934_v7, %v2933_v11  ;;  %v14986_v40 = vpack.c.bf16 %v1424_v63, %v1422_v53  ;;  %v1425_v12 = vsel %vm1361_vm1, %v1310_v22, %v1393_v8  ;;  %v1313_v44 = vpop.f32.mrb[20].mxu0  ;;  %v2929_v3 = vor.u32 %v2927_v62, %v2926_v30  ;;  %11838 = vmatprep.subr.bf16.mxu0 %v13366_v39  ;;  %v13367_v30 = vld [vmem:[%s18973_s3 + $0x2a8] sm:$0xff]  }
 0x215   : > { %v14990_v38 = vpack.c.bf16 %v1425_v12, %v1423_v52  ;;  %v1314_v61 = vadd.f32 %v1313_v44, %v14825_v37  ;;  %v1315_v21 = vpop.f32.mrb[21].mxu0  ;;  %v15022_v12 = vor.u32 %v3167_v29, %v2910_v16  ;;  %11839 = vmatpush3.bf16.msra.mxu0 %v13367_v30 }
 0x216   : > { %19214 = vst [vmem:[#allocation22_spill] sm:$0xff] %v14986_v40  ;;  %v14995_v23 = vsel %vm13976_vm5, 0, %v2936_v19  ;;  %v1316_v13 = vadd.f32 %v1315_v21, %v14829_v33  ;;  %v1317_v18 = vpop.f32.mrb[22].mxu0  ;;  %v15001_v6 = vsel %vm13976_vm5, 0, %v2929_v3  ;;  %v2938_v57 = vshrl.u32 %v14986_v40, 16 }
 0x217   : > { %19215 = vst [vmem:[#allocation23_spill] sm:$0xff] %v14990_v38  ;;  %19216 = vst [vmem:[#allocation24_spill] sm:$0xff] %v14995_v23  ;;  %4075 = vmatprep.mubr.bf16.mxu0 %v14995_v23  ;;  %vm1362_vm3 = vcmp.gt.f32.partialorder %v1314_v61, 0.0  ;;  %v1394_v31 = vmul.f32 0.2, %v1314_v61  ;;  %v1318_v35 = vadd.f32 %v1317_v18, %v14825_v37  ;;  %v1319_v36 = vpop.f32.mrb[23].mxu0  ;;  %4244 = vmatprep.mubr.bf16.mxu1 %v14990_v38 }
 0x218   : > { %19217 = vst [vmem:[#allocation25_spill] sm:$0xff] %v15001_v6  ;;  %4076 = vmatmul.mubr.bf16.gmra.mrb[44].mxu0 %v15001_v6  ;;  %v2945_v51 = vshrl.u32 %v14990_v38, 16  ;;  %vm1363_vm4 = vcmp.gt.f32.partialorder %v1316_v13, 0.0  ;;  %v1395_v20 = vmul.f32 0.2, %v1316_v13  ;;  %v1320_v49 = vadd.f32 %v1319_v36, %v14829_v33  ;;  %4245 = vmatmul.mubr.bf16.gmra.mrb[48].mxu1 %v14986_v40 }
 0x219   : > { %v2941_v41 = vshll.u32 %v14986_v40, 16  ;;  %vm1364_vm6 = vcmp.gt.f32.partialorder %v1318_v35, 0.0  ;;  %v1396_v59 = vmul.f32 0.2, %v1318_v35  ;;  %v2948_v54 = vshll.u32 %v14990_v38, 16 }
 0x21a   : > { %v2947_v22 = vrot.slane %v2945_v51, 7  ;;  %v1426_v11 = vsel %vm1362_vm3, %v1314_v61, %v1394_v31  ;;  %vm1365_vm7 = vcmp.gt.f32.partialorder %v1320_v49, 0.0  ;;  %v1397_v53 = vmul.f32 0.2, %v1320_v49 }
 0x21b   : > { %v2940_v8 = vrot.slane %v2938_v57, 7  ;;  %v1427_v63 = vsel %vm1363_vm4, %v1316_v13, %v1395_v20  ;;  %v1428_v19 = vsel %vm1364_vm6, %v1318_v35, %v1396_v59  ;;  %v3173_v21 = vrot.slane %v2934_v7, 1 }
 0x21c   : > { %v2950_v52 = vor.u32 %v2948_v54, %v2947_v22  ;;  %v15024_v44 = vpack.c.bf16 %v1428_v19, %v1426_v11  ;;  %v1429_v3 = vsel %vm1365_vm7, %v1320_v49, %v1397_v53  ;;  %v3171_v13 = vrot.slane %v2927_v62, 1 }
 0x21d   : > { %v2943_v61 = vor.u32 %v2941_v41, %v2940_v8  ;;  %v15026_v18 = vpack.c.bf16 %v1429_v3, %v1427_v63  ;;  %v15043_v7 = vor.u32 %v3173_v21, %v2931_v26  ;;  %v3177_v49 = vrot.slane %v2948_v54, 1 }
 0x21e   : > { %19218 = vst [vmem:[#allocation26_spill] sm:$0xff] %v15024_v44  ;;  %v15030_v31 = vsel %vm13976_vm5, 0, %v2950_v52  ;;  %v2952_v29 = vshrl.u32 %v15024_v44, 16  ;;  %v2955_v35 = vshll.u32 %v15024_v44, 16  ;;  %v15051_v20 = vor.u32 %v3171_v13, %v2924_v4  ;;  %v13368_v4 = vld [vmem:[%s18973_s3 + $0x40] sm:$0xff]  }
 0x21f   : > { %19219 = vst [vmem:[#allocation27_spill] sm:$0xff] %v15026_v18  ;;  %19220 = vst [vmem:[#allocation28_spill] sm:$0xff] %v15030_v31  ;;  %4083 = vmatprep.mubr.bf16.mxu0 %v15030_v31  ;;  %v15037_v16 = vsel %vm13976_vm5, 0, %v2943_v61  ;;  %4252 = vmatprep.mubr.bf16.mxu1 %v15026_v18  ;;  %v2959_v62 = vshrl.u32 %v15026_v18, 16  ;;  %v2962_v36 = vshll.u32 %v15026_v18, 16  ;;  %v3175_v59 = vrot.slane %v2941_v41, 1 }
 0x220   : > { %19221 = vst [vmem:[#allocation29_spill] sm:$0xff] %v15037_v16  ;;  %4084 = vmatmul.mubr.bf16.gmra.mrb[48].mxu0 %v15037_v16  ;;  %4253 = vmatmul.mubr.bf16.gmra.mrb[52].mxu1 %v15024_v44  ;;  %v2954_v39 = vrot.slane %v2952_v29, 7  ;;  %v3179_v22 = vrot.slane %v2955_v35, 1  ;;  %v15054_v11 = vor.u32 %v3177_v49, %v2945_v51  ;;  %v13369_v51 = vld [vmem:[%s18973_s3] sm:$0xff]  }
 0x221   : > { %v2961_v26 = vrot.slane %v2959_v62, 7  ;;  %v3181_v53 = vrot.slane %v2962_v36, 1  ;;  %v15056_v30 = vor.u32 %v3175_v59, %v2938_v57  ;;  %11940 = vmatprep.subr.bf16.mxu1 %v13368_v4 }
 0x222   : > { %v2957_v8 = vor.u32 %v2955_v35, %v2954_v39  ;;  %v15058_v63 = vor.u32 %v3179_v22, %v2952_v29  ;;  %v1323_v19 = vpop.f32.mrb[24].mxu0  ;;  %11941 = vmatpush3.bf16.msra.mxu1 %v13369_v51  ;;  %v13370_v39 = vld [vmem:[%s18973_s3 + $0x48] sm:$0xff]  }
 0x223   : > { %v2964_v52 = vor.u32 %v2962_v36, %v2961_v26  ;;  %v15063_v54 = vor.u32 %v3181_v53, %v2959_v62  ;;  %v1324_v41 = vadd.f32 %v1323_v19, %v14825_v37  ;;  %v1325_v3 = vpop.f32.mrb[25].mxu0  ;;  %v13371_v22 = vld [vmem:[%s18973_s3 + $0x8] sm:$0xff]   ;;  %v13372_v26 = vld [vmem:[%s18973_s3 + $0x2f0] sm:$0xff]   ;;  %11942 = vmatprep.subr.bf16.mxu1 %v13370_v39  ;;  %v13376_v39 = vld [vmem:[%s18973_s3 + $0x58] sm:$0xff]  }
 0x224   : > { %v1326_v57 = vadd.f32 %v1325_v3, %v14829_v33  ;;  %v1327_v61 = vpop.f32.mrb[26].mxu0  ;;  %v15078_v62 = vsel %vm13976_vm5, 0, %v2957_v8  ;;  %11840 = vmatprep.subr.bf16.mxu0 %v13372_v26  ;;  %v13377_v26 = vld [vmem:[%s18973_s3 + $0x18] sm:$0xff]  }
 0x225   : > { %v15072_v21 = vsel %vm13976_vm5, 0, %v2964_v52  ;;  %v1398_v13 = vmul.f32 0.2, %v1324_v41  ;;  %v1328_v29 = vadd.f32 %v1327_v61, %v14825_v37  ;;  %v1329_v35 = vpop.f32.mrb[27].mxu0  ;;  %19223 = vst [vmem:[#allocation31_spill] sm:$0xff] %v15078_v62  ;;  %vm1366_vm8 = vcmp.gt.f32.partialorder %v1324_v41, 0.0 }
 0x226   : > { %19222 = vst [vmem:[#allocation30_spill] sm:$0xff] %v15072_v21  ;;  %4091 = vmatprep.mubr.bf16.mxu0 %v15072_v21  ;;  %v1399_v36 = vmul.f32 0.2, %v1326_v57  ;;  %v1330_v49 = vadd.f32 %v1329_v35, %v14829_v33  ;;  %vm1367_vm9 = vcmp.gt.f32.partialorder %v1326_v57, 0.0  ;;  %11943 = vmatpush3.bf16.msra.mxu1 %v13371_v22  ;;  %v13373_v52 = vld [vmem:[%s18973_s3 + $0x2b0] sm:$0xff]  }
 0x227   : > { %vm1368_vm10 = vcmp.gt.f32.partialorder %v1328_v29, 0.0  ;;  %v1400_v59 = vmul.f32 0.2, %v1328_v29  ;;  %v1430_v8 = vsel %vm1366_vm8, %v1324_v41, %v1398_v13  ;;  %v13374_v61 = vld [vmem:[%s18973_s3 + $0x50] sm:$0xff]   ;;  %11841 = vmatpush3.bf16.msra.mxu0 %v13373_v52 }
 0x228   : > { %4092 = vmatmul.mubr.bf16.gmra.mrb[52].mxu0 %v15078_v62  ;;  %vm1369_vm11 = vcmp.gt.f32.partialorder %v1330_v49, 0.0  ;;  %v1401_v53 = vmul.f32 0.2, %v1330_v49  ;;  %v1431_v4 = vsel %vm1367_vm9, %v1326_v57, %v1399_v36  ;;  %v13375_v35 = vld [vmem:[%s18973_s3 + $0x10] sm:$0xff]   ;;  %11944 = vmatprep.subr.bf16.mxu1 %v13374_v61  ;;  %v13378_v61 = vld [vmem:[%s18973_s3 + $0x60] sm:$0xff]  }
 0x229   : > { %v1432_v19 = vsel %vm1368_vm10, %v1328_v29, %v1400_v59 }
 0x22a   : > { %v15094_v3 = vpack.c.bf16 %v1432_v19, %v1430_v8  ;;  %v1433_v51 = vsel %vm1369_vm11, %v1330_v49, %v1401_v53  ;;  %11945 = vmatpush3.bf16.msra.mxu1 %v13375_v35 }
 0x22b   : > { %v15102_v41 = vpack.c.bf16 %v1433_v51, %v1431_v4  ;;  %11946 = vmatprep.subr.bf16.mxu1 %v13376_v39 }
 0x22c   : > { %19224 = vst [vmem:[#allocation32_spill] sm:$0xff] %v15094_v3  ;;  %v2966_v13 = vshrl.u32 %v15094_v3, 16  ;;  %v2969_v29 = vshll.u32 %v15094_v3, 16 }
 0x22d   : > { %19225 = vst [vmem:[#allocation33_spill] sm:$0xff] %v15102_v41  ;;  %4260 = vmatprep.mubr.bf16.mxu1 %v15102_v41  ;;  %v2973_v57 = vshrl.u32 %v15102_v41, 16  ;;  %v2976_v36 = vshll.u32 %v15102_v41, 16 }
 0x22e   : > { %4261 = vmatmul.mubr.bf16.gmra.mrb[56].mxu1 %v15094_v3  ;;  %v2968_v49 = vrot.slane %v2966_v13, 7  ;;  %v3183_v59 = vrot.slane %v2969_v29, 1 }
 0x22f   : > { %v2975_v22 = vrot.slane %v2973_v57, 7  ;;  %v3185_v53 = vrot.slane %v2976_v36, 1  ;;  %11947 = vmatpush3.bf16.msra.mxu1 %v13377_v26 }
 0x230   : > { %v2971_v8 = vor.u32 %v2969_v29, %v2968_v49  ;;  %v15116_v19 = vor.u32 %v3183_v59, %v2966_v13  ;;  %v13379_v13 = vld [vmem:[%s18973_s3 + $0x20] sm:$0xff]   ;;  %11948 = vmatprep.subr.bf16.mxu1 %v13378_v61 }
 0x231   : > { %v2978_v52 = vor.u32 %v2976_v36, %v2975_v22  ;;  %v15118_v4 = vor.u32 %v3185_v53, %v2973_v57  ;;  %v13381_v53 = vld [vmem:[%s18973_s3 + $0x28] sm:$0xff]  }
 0x232   : > { %v1333_v51 = vpop.f32.mrb[28].mxu0  ;;  %v15135_v36 = vsel %vm13976_vm5, 0, %v2971_v8  ;;  %v13382_v8 = vld [vmem:[%s18973_s3 + $0x2f8] sm:$0xff]  }
 0x233   : > { %v1334_v35 = vadd.f32 %v1333_v51, %v14825_v37  ;;  %v1335_v46 = vpop.f32.mrb[29].mxu0  ;;  %v15126_v55 = vsel %vm13976_vm5, 0, %v2978_v52  ;;  %19227 = vst [vmem:[#allocation35_spill] sm:$0xff] %v15135_v36  ;;  %11949 = vmatpush3.bf16.msra.mxu1 %v13379_v13  ;;  %11842 = vmatprep.subr.bf16.mxu0 %v13382_v8 }
 0x234   : > { %19226 = vst [vmem:[#allocation34_spill] sm:$0xff] %v15126_v55  ;;  %v1336_v29 = vadd.f32 %v1335_v46, %v14829_v33  ;;  %v1337_v57 = vpop.f32.mrb[30].mxu0  ;;  %4099 = vmatprep.mubr.bf16.mxu0 %v15126_v55  ;;  %v13380_v46 = vld [vmem:[%s18973_s3 + $0x68] sm:$0xff]  }
 0x235   : > { %v1402_v49 = vmul.f32 0.2, %v1334_v35  ;;  %v1338_v39 = vadd.f32 %v1337_v57, %v14825_v37  ;;  %v1339_v59 = vpop.f32.mrb[31].mxu0  ;;  %4100 = vmatmul.mubr.bf16.gmra.mrb[56].mxu0 %v15135_v36  ;;  %vm1370_vm12 = vcmp.gt.f32.partialorder %v1334_v35, 0.0  ;;  %11950 = vmatprep.subr.bf16.mxu1 %v13380_v46  ;;  %v13383_v57 = vld [vmem:[%s18973_s3 + $0x2b8] sm:$0xff]   ;;  %v13385_v46 = vld [vmem:[%s18973_s3 + $0x30] sm:$0xff]  }
 0x236   : > { %v1403_v22 = vmul.f32 0.2, %v1336_v29  ;;  %v1340_v26 = vadd.f32 %v1339_v59, %v14829_v33  ;;  %vm1371_vm13 = vcmp.gt.f32.partialorder %v1336_v29, 0.0  ;;  %11843 = vmatpush3.bf16.msra.mxu0 %v13383_v57 }
 0x237   : > { %vm1372_vm14 = vcmp.gt.f32.partialorder %v1338_v39, 0.0  ;;  %v1404_v52 = vmul.f32 0.2, %v1338_v39  ;;  %v1434_v61 = vsel %vm1370_vm12, %v1334_v35, %v1402_v49  ;;  %11951 = vmatpush3.bf16.msra.mxu1 %v13381_v53  ;;  %v13386_v35 = vld [vmem:[%s18973_s3 + $0x78] sm:$0xff]  }
 0x238   : > { %vm1373_vm15 = vcmp.gt.f32.partialorder %v1340_v26, 0.0  ;;  %v1405_v51 = vmul.f32 0.2, %v1340_v26  ;;  %v1435_v59 = vsel %vm1371_vm13, %v1336_v29, %v1403_v22  ;;  %11952 = vmatprep.subr.bf16.mxu1 %v13384_v2  ;;  %v13387_v53 = vld [vmem:[%s18973_s3 + $0x38] sm:$0xff]  }
 0x239   : > { %v1436_v13 = vsel %vm1372_vm14, %v1338_v39, %v1404_v52 }
 0x23a   : > { %v15152_v34 = vpack.c.bf16 %v1436_v13, %v1434_v61  ;;  %v1437_v60 = vsel %vm1373_vm15, %v1340_v26, %v1405_v51 }
 0x23b   : > { %v15163_v49 = vpack.c.bf16 %v1437_v60, %v1435_v59  ;;  %11953 = vmatpush3.bf16.msra.mxu1 %v13385_v46 }
 0x23c   : > { %19228 = vst [vmem:[#allocation36_spill] sm:$0xff] %v15152_v34  ;;  %v2980_v29 = vshrl.u32 %v15152_v34, 16  ;;  %v2983_v39 = vshll.u32 %v15152_v34, 16  ;;  %11954 = vmatprep.subr.bf16.mxu1 %v13386_v35  ;;  %v13388_v35 = vld [vmem:[%s18973_s3 + $0xc0] sm:$0xff]  }
 0x23d   : > { %19229 = vst [vmem:[#allocation37_spill] sm:$0xff] %v15163_v49  ;;  %4268 = vmatprep.mubr.bf16.mxu1 %v15163_v49  ;;  %v2987_v22 = vshrl.u32 %v15163_v49, 16  ;;  %v2990_v26 = vshll.u32 %v15163_v49, 16  ;;  %12052 = vmatprep.subr.bf16.mxu0 %v13388_v35 }
 0x23e   : > { %4269 = vmatmul.mubr.bf16.gmra.mrb[60].mxu1 %v15152_v34  ;;  %v2982_v60 = vrot.slane %v2980_v29, 7  ;;  %v3187_v8 = vrot.slane %v2983_v39, 1 }
 0x23f   : > { %v2989_v52 = vrot.slane %v2987_v22, 7  ;;  %v3189_v51 = vrot.slane %v2990_v26, 1  ;;  %11955 = vmatpush3.bf16.msra.mxu1 %v13387_v53 }
 0x240   : > { %v2985_v61 = vor.u32 %v2983_v39, %v2982_v60  ;;  %v15174_v2 = vor.u32 %v3187_v8, %v2980_v29 }
 0x241   : > { %v2992_v13 = vor.u32 %v2990_v26, %v2989_v52  ;;  %v15176_v57 = vor.u32 %v3189_v51, %v2987_v22 }
 0x242   : > { %19230 = vst [vmem:[#allocation38_spill] sm:$0xff] %v15174_v2  ;;  %v2333_v59 = vpop.f32.mrb[0].mxu1  ;;  %v15190_v22 = vsel %vm13976_vm5, 0, %v2985_v61 }
 0x243   : > { %v2334_v46 = vadd.f32 %v2333_v59, %v14825_v37  ;;  %v2335_v49 = vpop.f32.mrb[1].mxu1  ;;  %v15181_v3 = vsel %vm13976_vm5, 0, %v2992_v13  ;;  %19232 = vst [vmem:[#allocation40_spill] sm:$0xff] %v15190_v22 }
 0x244   : > { %19231 = vst [vmem:[#allocation39_spill] sm:$0xff] %v15181_v3  ;;  %v2336_v39 = vadd.f32 %v2335_v49, %v14829_v33  ;;  %v2337_v29 = vpop.f32.mrb[2].mxu1  ;;  %4107 = vmatprep.mubr.bf16.mxu0 %v15181_v3 }
 0x245   : > { %v2444_v26 = vmul.f32 0.2, %v2334_v46  ;;  %v2338_v53 = vadd.f32 %v2337_v29, %v14825_v37  ;;  %v2339_v60 = vpop.f32.mrb[3].mxu1  ;;  %4108 = vmatmul.mubr.bf16.gmra.mrb[60].mxu0 %v15190_v22  ;;  %vm2412_vm0 = vcmp.gt.f32.partialorder %v2334_v46, 0.0 }
 0x246   : > { %v2445_v8 = vmul.f32 0.2, %v2336_v39  ;;  %v2340_v52 = vadd.f32 %v2339_v60, %v14829_v33  ;;  %vm2413_vm1 = vcmp.gt.f32.partialorder %v2336_v39, 0.0 }
 0x247   : > { %vm2414_vm3 = vcmp.gt.f32.partialorder %v2338_v53, 0.0  ;;  %v2446_v49 = vmul.f32 0.2, %v2338_v53  ;;  %v2476_v13 = vsel %vm2412_vm0, %v2334_v46, %v2444_v26 }
 0x248   : > { %vm2415_vm4 = vcmp.gt.f32.partialorder %v2340_v52, 0.0  ;;  %v2447_v51 = vmul.f32 0.2, %v2340_v52  ;;  %v2477_v61 = vsel %vm2413_vm1, %v2336_v39, %v2445_v8 }
 0x249   : > { %v2478_v59 = vsel %vm2414_vm3, %v2338_v53, %v2446_v49 }
 0x24a   : > { %v15195_v34 = vpack.c.bf16 %v2478_v59, %v2476_v13  ;;  %v2479_v41 = vsel %vm2415_vm4, %v2340_v52, %v2447_v51  ;;  %v2343_v29 = vpop.f32.mrb[4].mxu1 }
 0x24b   : > { %v15197_v44 = vpack.c.bf16 %v2479_v41, %v2477_v61  ;;  %v2344_v35 = vadd.f32 %v2343_v29, %v14825_v37  ;;  %v2345_v18 = vpop.f32.mrb[5].mxu1 }
 0x24c   : > { %19233 = vst [vmem:[#allocation41_spill] sm:$0xff] %v15195_v34  ;;  %v2346_v40 = vadd.f32 %v2345_v18, %v14829_v33  ;;  %v2347_v60 = vpop.f32.mrb[6].mxu1  ;;  %v2994_v38 = vshrl.u32 %v15195_v34, 16  ;;  %v2997_v51 = vshll.u32 %v15195_v34, 16 }
 0x24d   : > { %19234 = vst [vmem:[#allocation42_spill] sm:$0xff] %v15197_v44  ;;  %v2448_v1 = vmul.f32 0.2, %v2344_v35  ;;  %v2348_v45 = vadd.f32 %v2347_v60, %v14825_v37  ;;  %v2349_v46 = vpop.f32.mrb[7].mxu1  ;;  %4276 = vmatprep.mubr.bf16.mxu1 %v15197_v44  ;;  %v3001_v39 = vshrl.u32 %v15197_v44, 16  ;;  %vm2416_vm6 = vcmp.gt.f32.partialorder %v2344_v35, 0.0 }
 0x24e   : > { %v2449_v26 = vmul.f32 0.2, %v2346_v40  ;;  %v2350_v41 = vadd.f32 %v2349_v46, %v14829_v33  ;;  %4277 = vmatmul.mubr.bf16.gmra.mrb[64].mxu1 %v15195_v34  ;;  %v3004_v53 = vshll.u32 %v15197_v44, 16  ;;  %vm2417_vm7 = vcmp.gt.f32.partialorder %v2346_v40, 0.0 }
 0x24f   : > { %vm2418_vm8 = vcmp.gt.f32.partialorder %v2348_v45, 0.0  ;;  %v2450_v18 = vmul.f32 0.2, %v2348_v45  ;;  %v3003_v8 = vrot.slane %v3001_v39, 7  ;;  %v2996_v49 = vrot.slane %v2994_v38, 7 }
 0x250   : > { %vm2419_vm9 = vcmp.gt.f32.partialorder %v2350_v41, 0.0  ;;  %v2451_v52 = vmul.f32 0.2, %v2350_v41  ;;  %v2480_v13 = vsel %vm2416_vm6, %v2344_v35, %v2448_v1  ;;  %v3193_v29 = vrot.slane %v3004_v53, 1 }
 0x251   : > { %v2482_v59 = vsel %vm2418_vm8, %v2348_v45, %v2450_v18  ;;  %v3006_v61 = vor.u32 %v3004_v53, %v3003_v8  ;;  %v2481_v60 = vsel %vm2417_vm7, %v2346_v40, %v2449_v26  ;;  %v2999_v9 = vor.u32 %v2997_v51, %v2996_v49 }
 0x252   : > { %v15209_v32 = vpack.c.bf16 %v2482_v59, %v2480_v13  ;;  %v2483_v46 = vsel %vm2419_vm9, %v2350_v41, %v2451_v52  ;;  %v2353_v10 = vpop.f32.mrb[8].mxu1  ;;  %v15218_v34 = vor.u32 %v3193_v29, %v3001_v39 }
 0x253   : > { %v15211_v44 = vpack.c.bf16 %v2483_v46, %v2481_v60  ;;  %v2354_v43 = vadd.f32 %v2353_v10, %v14825_v37  ;;  %v2355_v17 = vpop.f32.mrb[9].mxu1  ;;  %v15216_v47 = vsel %vm13976_vm5, 0, %v3006_v61  ;;  %v15224_v40 = vsel %vm13976_vm5, 0, %v2999_v9 }
 0x254   : > { %19235 = vst [vmem:[#allocation43_spill] sm:$0xff] %v15209_v32  ;;  %19237 = vst [vmem:[#allocation45_spill] sm:$0xff] %v15216_v47  ;;  %v2356_v1 = vadd.f32 %v2355_v17, %v14829_v33  ;;  %v2357_v45 = vpop.f32.mrb[10].mxu1  ;;  %4115 = vmatprep.mubr.bf16.mxu0 %v15216_v47  ;;  %v19049_v35 = vshrl.u32 %v15209_v32, 16  ;;  %v3191_v17 = vrot.slane %v2997_v51, 1  ;;  %v3011_v59 = vshll.u32 %v15209_v32, 16 }
 0x255   : > { %19236 = vst [vmem:[#allocation44_spill] sm:$0xff] %v15211_v44  ;;  %19238 = vst [vmem:[#allocation46_spill] sm:$0xff] %v15218_v34  ;;  %v2452_v26 = vmul.f32 0.2, %v2354_v43  ;;  %v2358_v10 = vadd.f32 %v2357_v45, %v14825_v37  ;;  %v2359_v41 = vpop.f32.mrb[11].mxu1  ;;  %4116 = vmatmul.mubr.bf16.gmra.mrb[64].mxu0 %v15224_v40  ;;  %4284 = vmatprep.mubr.bf16.mxu1 %v15211_v44  ;;  %v3015_v39 = vshrl.u32 %v15211_v44, 16 }
 0x256   : > { %19239 = vst [vmem:[#allocation47_spill] sm:$0xff] %v15224_v40  ;;  %vm2420_vm10 = vcmp.gt.f32.partialorder %v2354_v43, 0.0  ;;  %vm2421_vm11 = vcmp.gt.f32.partialorder %v2356_v1, 0.0  ;;  %v2453_v53 = vmul.f32 0.2, %v2356_v1  ;;  %v2360_v18 = vadd.f32 %v2359_v41, %v14829_v33  ;;  %4285 = vmatmul.mubr.bf16.gmra.mrb[68].mxu1 %v15209_v32 }
 0x257   : > { %vm2422_vm12 = vcmp.gt.f32.partialorder %v2358_v10, 0.0  ;;  %v2454_v9 = vmul.f32 0.2, %v2358_v10  ;;  %v3017_v8 = vrot.slane %v3015_v39, 7  ;;  %v3018_v52 = vshll.u32 %v15211_v44, 16 }
 0x258   : > { %vm2423_vm13 = vcmp.gt.f32.partialorder %v2360_v18, 0.0  ;;  %v2455_v49 = vmul.f32 0.2, %v2360_v18  ;;  %v3010_v13 = vrot.slane %v19049_v35, 7  ;;  %v2484_v51 = vsel %vm2420_vm10, %v2354_v43, %v2452_v26 }
 0x259   : > { %v2486_v61 = vsel %vm2422_vm12, %v2358_v10, %v2454_v9  ;;  %v3020_v29 = vor.u32 %v3018_v52, %v3017_v8  ;;  %v15237_v60 = vor.u32 %v3191_v17, %v2994_v38  ;;  %v2485_v46 = vsel %vm2421_vm11, %v2356_v1, %v2453_v53 }
 0x25a   : > { %v15240_v45 = vpack.c.bf16 %v2486_v61, %v2484_v51  ;;  %v2487_v41 = vsel %vm2423_vm13, %v2360_v18, %v2455_v49  ;;  %v2363_v40 = vpop.f32.mrb[12].mxu1  ;;  %v3013_v47 = vor.u32 %v3011_v59, %v3010_v13  ;;  %v3197_v43 = vrot.slane %v3018_v52, 1 }
 0x25b   : > { %19240 = vst [vmem:[#allocation48_spill] sm:$0xff] %v15237_v60  ;;  %v15242_v44 = vpack.c.bf16 %v2487_v41, %v2485_v46  ;;  %v2364_v22 = vadd.f32 %v2363_v40, %v14825_v37  ;;  %v2365_v34 = vpop.f32.mrb[13].mxu1  ;;  %v15247_v35 = vsel %vm13976_vm5, 0, %v3020_v29 }
 0x25c   : > { %19241 = vst [vmem:[#allocation49_spill] sm:$0xff] %v15240_v45  ;;  %19243 = vst [vmem:[#allocation51_spill] sm:$0xff] %v15247_v35  ;;  %v2366_v38 = vadd.f32 %v2365_v34, %v14829_v33  ;;  %v2367_v26 = vpop.f32.mrb[14].mxu1  ;;  %4123 = vmatprep.mubr.bf16.mxu0 %v15247_v35  ;;  %v15253_v1 = vsel %vm13976_vm5, 0, %v3013_v47  ;;  %v3022_v10 = vshrl.u32 %v15240_v45, 16  ;;  %v3025_v17 = vshll.u32 %v15240_v45, 16 }
 0x25d   : > { %19242 = vst [vmem:[#allocation50_spill] sm:$0xff] %v15242_v44  ;;  %19244 = vst [vmem:[#allocation52_spill] sm:$0xff] %v15253_v1  ;;  %vm2424_vm14 = vcmp.gt.f32.partialorder %v2364_v22, 0.0  ;;  %v2456_v40 = vmul.f32 0.2, %v2364_v22  ;;  %v2368_v53 = vadd.f32 %v2367_v26, %v14825_v37  ;;  %v2369_v18 = vpop.f32.mrb[15].mxu1  ;;  %4124 = vmatmul.mubr.bf16.gmra.mrb[68].mxu0 %v15253_v1  ;;  %4292 = vmatprep.mubr.bf16.mxu1 %v15242_v44 }
 0x25e   : > { %v3029_v34 = vshrl.u32 %v15242_v44, 16  ;;  %vm2425_vm15 = vcmp.gt.f32.partialorder %v2366_v38, 0.0  ;;  %v2457_v9 = vmul.f32 0.2, %v2366_v38  ;;  %v2370_v47 = vadd.f32 %v2369_v18, %v14829_v33  ;;  %4293 = vmatmul.mubr.bf16.gmra.mrb[72].mxu1 %v15240_v45 }
 0x25f   : > { %v3032_v8 = vshll.u32 %v15242_v44, 16  ;;  %v2488_v52 = vsel %vm2424_vm14, %v2364_v22, %v2456_v40  ;;  %vm2426_vm0 = vcmp.gt.f32.partialorder %v2368_v53, 0.0  ;;  %v2458_v49 = vmul.f32 0.2, %v2368_v53 }
 0x260   : > { %v3031_v13 = vrot.slane %v3029_v34, 7  ;;  %v2489_v51 = vsel %vm2425_vm15, %v2366_v38, %v2457_v9  ;;  %vm2427_vm1 = vcmp.gt.f32.partialorder %v2370_v47, 0.0  ;;  %v2459_v61 = vmul.f32 0.2, %v2370_v47 }
 0x261   : > { %v3024_v29 = vrot.slane %v3022_v10, 7  ;;  %v2490_v46 = vsel %vm2426_vm0, %v2368_v53, %v2458_v49  ;;  %v15264_v26 = vor.u32 %v3197_v43, %v3015_v39  ;;  %v3195_v1 = vrot.slane %v3011_v59, 1 }
 0x262   : > { %v3034_v41 = vor.u32 %v3032_v8, %v3031_v13  ;;  %v15266_v35 = vpack.c.bf16 %v2490_v46, %v2488_v52  ;;  %v2491_v18 = vsel %vm2427_vm1, %v2370_v47, %v2459_v61  ;;  %v3201_v45 = vrot.slane %v3032_v8, 1 }
 0x263   : > { %v3027_v60 = vor.u32 %v3025_v17, %v3024_v29  ;;  %v15268_v2 = vpack.c.bf16 %v2491_v18, %v2489_v51  ;;  %v19248_v38 = vshrl.u32 %v15209_v32, 16  ;;  %v3199_v47 = vrot.slane %v3025_v17, 1 }
 0x264   : > { %19245 = vst [vmem:[#allocation53_spill] sm:$0xff] %v15266_v35  ;;  %v15272_v22 = vsel %vm13976_vm5, 0, %v3034_v41  ;;  %v3036_v59 = vshrl.u32 %v15266_v35, 16  ;;  %v3039_v43 = vshll.u32 %v15266_v35, 16  ;;  %v15285_v53 = vor.u32 %v3201_v45, %v3029_v34 }
 0x265   : > { %19246 = vst [vmem:[#allocation54_spill] sm:$0xff] %v15268_v2  ;;  %19247 = vst [vmem:[#allocation55_spill] sm:$0xff] %v15272_v22  ;;  %v15276_v40 = vor.u32 %v3195_v1, %v19248_v38  ;;  %4131 = vmatprep.mubr.bf16.mxu0 %v15272_v22  ;;  %v15281_v39 = vsel %vm13976_vm5, 0, %v3027_v60  ;;  %4300 = vmatprep.mubr.bf16.mxu1 %v15268_v2  ;;  %v3043_v9 = vshrl.u32 %v15268_v2, 16  ;;  %v3046_v1 = vshll.u32 %v15268_v2, 16 }
 0x266   : > { %19249 = vst [vmem:[#allocation56_spill] sm:$0xff] %v15281_v39  ;;  %4132 = vmatmul.mubr.bf16.gmra.mrb[72].mxu0 %v15281_v39  ;;  %4301 = vmatmul.mubr.bf16.gmra.mrb[76].mxu1 %v15266_v35  ;;  %v3038_v8 = vrot.slane %v3036_v59, 7  ;;  %v3203_v60 = vrot.slane %v3039_v43, 1  ;;  %v15292_v49 = vor.u32 %v3199_v47, %v3022_v10 }
 0x267   : > { %v3045_v52 = vrot.slane %v3043_v9, 7  ;;  %v3205_v13 = vrot.slane %v3046_v1, 1 }
 0x268   : > { %v3041_v51 = vor.u32 %v3039_v43, %v3038_v8  ;;  %v15294_v45 = vor.u32 %v3203_v60, %v3036_v59 }
 0x269   : > { %v3048_v34 = vor.u32 %v3046_v1, %v3045_v52  ;;  %v15296_v61 = vor.u32 %v3205_v13, %v3043_v9 }
 0x26a   : > { %v15305_v17 = vsel %vm13976_vm5, 0, %v3041_v51 }
 0x26b   : > { %v15300_v29 = vsel %vm13976_vm5, 0, %v3048_v34  ;;  %19251 = vst [vmem:[#allocation58_spill] sm:$0xff] %v15305_v17 }
 0x26c   : > { %19250 = vst [vmem:[#allocation57_spill] sm:$0xff] %v15300_v29  ;;  %4139 = vmatprep.mubr.bf16.mxu0 %v15300_v29 }
 0x26e   : > { %4140 = vmatmul.mubr.bf16.gmra.mrb[76].mxu0 %v15305_v17 }
 0x27e   : > { %v2373_v10 = vpop.f32.mrb[16].mxu1 }
 0x27f   : > { %v2374_v46 = vadd.f32 %v2373_v10, %v14825_v37  ;;  %v2375_v41 = vpop.f32.mrb[17].mxu1 }
 0x280   : > { %v2376_v18 = vadd.f32 %v2375_v41, %v14829_v33  ;;  %v2377_v38 = vpop.f32.mrb[18].mxu1 }
 0x281   : > { %v2460_v59 = vmul.f32 0.2, %v2374_v46  ;;  %v2378_v43 = vadd.f32 %v2377_v38, %v14825_v37  ;;  %v2379_v9 = vpop.f32.mrb[19].mxu1  ;;  %vm2428_vm3 = vcmp.gt.f32.partialorder %v2374_v46, 0.0 }
 0x282   : > { %v2461_v1 = vmul.f32 0.2, %v2376_v18  ;;  %v2380_v47 = vadd.f32 %v2379_v9, %v14829_v33  ;;  %vm2429_vm4 = vcmp.gt.f32.partialorder %v2376_v18, 0.0 }
 0x283   : > { %vm2430_vm6 = vcmp.gt.f32.partialorder %v2378_v43, 0.0  ;;  %v2462_v8 = vmul.f32 0.2, %v2378_v43  ;;  %v2492_v52 = vsel %vm2428_vm3, %v2374_v46, %v2460_v59 }
 0x284   : > { %vm2431_vm7 = vcmp.gt.f32.partialorder %v2380_v47, 0.0  ;;  %v2463_v60 = vmul.f32 0.2, %v2380_v47  ;;  %v2493_v51 = vsel %vm2429_vm4, %v2376_v18, %v2461_v1 }
 0x285   : > { %v2494_v13 = vsel %vm2430_vm6, %v2378_v43, %v2462_v8 }
 0x286   : > { %v15312_v34 = vpack.c.bf16 %v2494_v13, %v2492_v52  ;;  %v2495_v10 = vsel %vm2431_vm7, %v2380_v47, %v2463_v60 }
 0x287   : > { %v15314_v41 = vpack.c.bf16 %v2495_v10, %v2493_v51 }
 0x288   : > { %19252 = vst [vmem:[#allocation59_spill] sm:$0xff] %v15312_v34  ;;  %v3050_v38 = vshrl.u32 %v15312_v34, 16  ;;  %v3053_v35 = vshll.u32 %v15312_v34, 16 }
 0x289   : > { %19253 = vst [vmem:[#allocation60_spill] sm:$0xff] %v15314_v41  ;;  %4308 = vmatprep.mubr.bf16.mxu1 %v15314_v41  ;;  %v3057_v9 = vshrl.u32 %v15314_v41, 16  ;;  %v3060_v2 = vshll.u32 %v15314_v41, 16 }
 0x28a   : > { %4309 = vmatmul.mubr.bf16.gmra.mrb[80].mxu1 %v15312_v34  ;;  %v3052_v46 = vrot.slane %v3050_v38, 7  ;;  %v3207_v59 = vrot.slane %v3053_v35, 1 }
 0x28b   : > { %v3059_v18 = vrot.slane %v3057_v9, 7  ;;  %v3209_v43 = vrot.slane %v3060_v2, 1 }
 0x28c   : > { %v3055_v1 = vor.u32 %v3053_v35, %v3052_v46  ;;  %v15322_v47 = vor.u32 %v3207_v59, %v3050_v38 }
 0x28d   : > { %v3062_v8 = vor.u32 %v3060_v2, %v3059_v18  ;;  %v15324_v60 = vor.u32 %v3209_v43, %v3057_v9 }
 0x28e   : > { %19254 = vst [vmem:[#allocation61_spill] sm:$0xff] %v15322_v47  ;;  %v2383_v52 = vpop.f32.mrb[20].mxu1  ;;  %v15335_v35 = vsel %vm13976_vm5, 0, %v3055_v1 }
 0x28f   : > { %v2384_v13 = vadd.f32 %v2383_v52, %v14825_v37  ;;  %v2385_v51 = vpop.f32.mrb[21].mxu1  ;;  %v15329_v10 = vsel %vm13976_vm5, 0, %v3062_v8  ;;  %19256 = vst [vmem:[#allocation63_spill] sm:$0xff] %v15335_v35 }
 0x290   : > { %19255 = vst [vmem:[#allocation62_spill] sm:$0xff] %v15329_v10  ;;  %v2386_v34 = vadd.f32 %v2385_v51, %v14829_v33  ;;  %v2387_v41 = vpop.f32.mrb[22].mxu1  ;;  %4147 = vmatprep.mubr.bf16.mxu0 %v15329_v10 }
 0x291   : > { %v2464_v2 = vmul.f32 0.2, %v2384_v13  ;;  %v2388_v38 = vadd.f32 %v2387_v41, %v14825_v37  ;;  %v2389_v9 = vpop.f32.mrb[23].mxu1  ;;  %4148 = vmatmul.mubr.bf16.gmra.mrb[80].mxu0 %v15335_v35  ;;  %vm2432_vm8 = vcmp.gt.f32.partialorder %v2384_v13, 0.0 }
 0x292   : > { %v2465_v46 = vmul.f32 0.2, %v2386_v34  ;;  %v2390_v59 = vadd.f32 %v2389_v9, %v14829_v33  ;;  %vm2433_vm9 = vcmp.gt.f32.partialorder %v2386_v34, 0.0 }
 0x293   : > { %vm2434_vm10 = vcmp.gt.f32.partialorder %v2388_v38, 0.0  ;;  %v2466_v18 = vmul.f32 0.2, %v2388_v38  ;;  %v2496_v8 = vsel %vm2432_vm8, %v2384_v13, %v2464_v2 }
 0x294   : > { %vm2435_vm11 = vcmp.gt.f32.partialorder %v2390_v59, 0.0  ;;  %v2467_v43 = vmul.f32 0.2, %v2390_v59  ;;  %v2497_v51 = vsel %vm2433_vm9, %v2386_v34, %v2465_v46 }
 0x295   : > { %v2498_v52 = vsel %vm2434_vm10, %v2388_v38, %v2466_v18 }
 0x296   : > { %v15340_v1 = vpack.c.bf16 %v2498_v52, %v2496_v8  ;;  %v2499_v44 = vsel %vm2435_vm11, %v2390_v59, %v2467_v43 }
 0x297   : > { %v15342_v32 = vpack.c.bf16 %v2499_v44, %v2497_v51 }
 0x298   : > { %19257 = vst [vmem:[#allocation64_spill] sm:$0xff] %v15340_v1  ;;  %v3064_v41 = vshrl.u32 %v15340_v1, 16  ;;  %v3067_v35 = vshll.u32 %v15340_v1, 16 }
 0x299   : > { %19258 = vst [vmem:[#allocation65_spill] sm:$0xff] %v15342_v32  ;;  %4316 = vmatprep.mubr.bf16.mxu1 %v15342_v32  ;;  %v3071_v9 = vshrl.u32 %v15342_v32, 16  ;;  %v3074_v47 = vshll.u32 %v15342_v32, 16 }
 0x29a   : > { %4317 = vmatmul.mubr.bf16.gmra.mrb[84].mxu1 %v15340_v1  ;;  %v3066_v13 = vrot.slane %v3064_v41, 7  ;;  %v3211_v2 = vrot.slane %v3067_v35, 1 }
 0x29b   : > { %v3073_v34 = vrot.slane %v3071_v9, 7  ;;  %v3213_v38 = vrot.slane %v3074_v47, 1 }
 0x29c   : > { %v3069_v46 = vor.u32 %v3067_v35, %v3066_v13  ;;  %v15350_v59 = vor.u32 %v3211_v2, %v3064_v41 }
 0x29d   : > { %v3076_v44 = vor.u32 %v3074_v47, %v3073_v34  ;;  %v15352_v18 = vor.u32 %v3213_v38, %v3071_v9  ;;  %v13400_v38 = vld [vmem:[%s18973_s3 + $0x140] sm:$0xff]  }
 0x29e   : > { %19259 = vst [vmem:[#allocation66_spill] sm:$0xff] %v15350_v59  ;;  %v2393_v43 = vpop.f32.mrb[24].mxu1  ;;  %v15363_v35 = vsel %vm13976_vm5, 0, %v3069_v46  ;;  %12164 = vmatprep.subr.bf16.mxu1 %v13400_v38 }
 0x29f   : > { %19260 = vst [vmem:[#allocation67_spill] sm:$0xff] %v15352_v18  ;;  %v2394_v8 = vadd.f32 %v2393_v43, %v14825_v37  ;;  %v2395_v52 = vpop.f32.mrb[25].mxu1  ;;  %v15357_v51 = vsel %vm13976_vm5, 0, %v3076_v44  ;;  %19262 = vst [vmem:[#allocation69_spill] sm:$0xff] %v15363_v35 }
 0x2a0   : > { %19261 = vst [vmem:[#allocation68_spill] sm:$0xff] %v15357_v51  ;;  %v2396_v1 = vadd.f32 %v2395_v52, %v14829_v33  ;;  %v2397_v32 = vpop.f32.mrb[26].mxu1  ;;  %4155 = vmatprep.mubr.bf16.mxu0 %v15357_v51 }
 0x2a1   : > { %v2468_v47 = vmul.f32 0.2, %v2394_v8  ;;  %v2398_v41 = vadd.f32 %v2397_v32, %v14825_v37  ;;  %v2399_v9 = vpop.f32.mrb[27].mxu1  ;;  %4156 = vmatmul.mubr.bf16.gmra.mrb[84].mxu0 %v15363_v35  ;;  %vm2436_vm12 = vcmp.gt.f32.partialorder %v2394_v8, 0.0 }
 0x2a2   : > { %v2469_v13 = vmul.f32 0.2, %v2396_v1  ;;  %v2400_v2 = vadd.f32 %v2399_v9, %v14829_v33  ;;  %vm2437_vm13 = vcmp.gt.f32.partialorder %v2396_v1, 0.0 }
 0x2a3   : > { %vm2438_vm14 = vcmp.gt.f32.partialorder %v2398_v41, 0.0  ;;  %v2470_v34 = vmul.f32 0.2, %v2398_v41  ;;  %v2500_v44 = vsel %vm2436_vm12, %v2394_v8, %v2468_v47 }
 0x2a4   : > { %vm2439_vm15 = vcmp.gt.f32.partialorder %v2400_v2, 0.0  ;;  %v2471_v46 = vmul.f32 0.2, %v2400_v2  ;;  %v2501_v32 = vsel %vm2437_vm13, %v2396_v1, %v2469_v13 }
 0x2a5   : > { %v2502_v43 = vsel %vm2438_vm14, %v2398_v41, %v2470_v34 }
 0x2a6   : > { %v15371_v52 = vpack.c.bf16 %v2502_v43, %v2500_v44  ;;  %v2503_v35 = vsel %vm2439_vm15, %v2400_v2, %v2471_v46 }
 0x2a7   : > { %v15373_v59 = vpack.c.bf16 %v2503_v35, %v2501_v32 }
 0x2a8   : > { %19263 = vst [vmem:[#allocation70_spill] sm:$0xff] %v15371_v52  ;;  %v3078_v9 = vshrl.u32 %v15371_v52, 16  ;;  %v3081_v51 = vshll.u32 %v15371_v52, 16 }
 0x2a9   : > { %19264 = vst [vmem:[#allocation71_spill] sm:$0xff] %v15373_v59  ;;  %4324 = vmatprep.mubr.bf16.mxu1 %v15373_v59  ;;  %v3085_v18 = vshrl.u32 %v15373_v59, 16  ;;  %v3088_v10 = vshll.u32 %v15373_v59, 16 }
 0x2aa   : > { %4325 = vmatmul.mubr.bf16.gmra.mrb[88].mxu1 %v15371_v52  ;;  %v3080_v8 = vrot.slane %v3078_v9, 7  ;;  %v3215_v47 = vrot.slane %v3081_v51, 1 }
 0x2ab   : > { %v3087_v1 = vrot.slane %v3085_v18, 7  ;;  %v3217_v41 = vrot.slane %v3088_v10, 1 }
 0x2ac   : > { %v3083_v13 = vor.u32 %v3081_v51, %v3080_v8  ;;  %v15381_v2 = vor.u32 %v3215_v47, %v3078_v9 }
 0x2ad   : > { %v3090_v35 = vor.u32 %v3088_v10, %v3087_v1  ;;  %v15383_v34 = vor.u32 %v3217_v41, %v3085_v18 }
 0x2ae   : > { %19265 = vst [vmem:[#allocation72_spill] sm:$0xff] %v15381_v2  ;;  %v2403_v38 = vpop.f32.mrb[28].mxu1  ;;  %v15394_v51 = vsel %vm13976_vm5, 0, %v3083_v13 }
 0x2af   : > { %v2404_v46 = vadd.f32 %v2403_v38, %v14825_v37  ;;  %v2405_v44 = vpop.f32.mrb[29].mxu1  ;;  %v15388_v43 = vsel %vm13976_vm5, 0, %v3090_v35  ;;  %19267 = vst [vmem:[#allocation74_spill] sm:$0xff] %v15394_v51  ;;  %v19268_v35 = vmov 0  }
 0x2b0   : > { %19266 = vst [vmem:[#allocation73_spill] sm:$0xff] %v15388_v43  ;;  %v2406_v32 = vadd.f32 %v2405_v44, %v14829_v33  ;;  %v2407_v52 = vpop.f32.mrb[30].mxu1  ;;  %4163 = vmatprep.mubr.bf16.mxu0 %v15388_v43  ;;  %v2870_v38 = vrot.slane %v19268_v35, 7 }
 0x2b1   : > { %v2472_v10 = vmul.f32 0.2, %v2404_v46  ;;  %v2408_v18 = vadd.f32 %v2407_v52, %v14825_v37  ;;  %v2409_v9 = vpop.f32.mrb[31].mxu1  ;;  %4164 = vmatmul.mubr.bf16.gmra.mrb[88].mxu0 %v15394_v51  ;;  %vm2440_vm0 = vcmp.gt.f32.partialorder %v2404_v46, 0.0 }
 0x2b2   : > { %v2473_v8 = vmul.f32 0.2, %v2406_v32  ;;  %v2410_v47 = vadd.f32 %v2409_v9, %v14829_v33  ;;  %vm2441_vm1 = vcmp.gt.f32.partialorder %v2406_v32, 0.0  ;;  %v15408_v33 = vsel %vm13976_vm5, 0, %v2870_v38  ;;  %v13401_v38 = vld [vmem:[%s18973_s3 + $0x100] sm:$0xff]  }
 0x2b3   : > { %vm2442_vm3 = vcmp.gt.f32.partialorder %v2408_v18, 0.0  ;;  %v2474_v1 = vmul.f32 0.2, %v2408_v18  ;;  %v2504_v44 = vsel %vm2440_vm0, %v2404_v46, %v2472_v10  ;;  %19271 = vst [vmem:[#allocation77_spill] sm:$0xff] %v15408_v33 }
 0x2b4   : > { %vm2443_vm4 = vcmp.gt.f32.partialorder %v2410_v47, 0.0  ;;  %v2475_v41 = vmul.f32 0.2, %v2410_v47  ;;  %v2505_v59 = vsel %vm2441_vm1, %v2406_v32, %v2473_v8 }
 0x2b5   : > { %v2506_v13 = vsel %vm2442_vm3, %v2408_v18, %v2474_v1 }
 0x2b6   : > { %v2507_v2 = vsel %vm2443_vm4, %v2410_v47, %v2475_v41  ;;  %v15400_v43 = vpack.c.bf16 %v2506_v13, %v2504_v44  ;;  %v15438_v13 = vsel %vm13787_vm2, %v14866_v42, 0  ;;  %v13389_v42 = vld [vmem:[%s18973_s3 + $0x80] sm:$0xff]  }
 0x2b7   : > { %v15402_v37 = vpack.c.bf16 %v2507_v2, %v2505_v59 }
 0x2b8   : > { %19269 = vst [vmem:[#allocation75_spill] sm:$0xff] %v15400_v43  ;;  %v3526_v52 = vshrl.u32 %v15400_v43, 16  ;;  %v3529_v51 = vshll.u32 %v15400_v43, 16 }
 0x2b9   : > { %19270 = vst [vmem:[#allocation76_spill] sm:$0xff] %v15402_v37  ;;  %4332 = vmatprep.mubr.bf16.mxu1 %v15402_v37  ;;  %v3533_v9 = vshrl.u32 %v15402_v37, 16  ;;  %v3536_v46 = vshll.u32 %v15402_v37, 16 }
 0x2ba   : > { %4333 = vmatmul.mubr.bf16.gmra.mrb[92].mxu1 %v15400_v43  ;;  %v3528_v32 = vrot.slane %v3526_v52, 7  ;;  %v3663_v10 = vrot.slane %v3529_v51, 1 }
 0x2bb   : > { %v3535_v59 = vrot.slane %v3533_v9, 7  ;;  %4822 = vmatprep.mubr.bf16.mxu1 %v15408_v33  ;;  %v3665_v2 = vrot.slane %v3536_v46, 1 }
 0x2bc   : > { %v3531_v18 = vor.u32 %v3529_v51, %v3528_v32  ;;  %v15415_v8 = vor.u32 %v3663_v10, %v3526_v52  ;;  %v13402_v51 = vld [vmem:[%s18973_s3 + $0x148] sm:$0xff]   ;;  %v13407_v32 = vld [vmem:[%s18973_s3 + $0x110] sm:$0xff]   ;;  %v15467_v10 = vsel %vm13787_vm2, %v14942_v28, 0 }
 0x2bd   : > { %v3538_v47 = vor.u32 %v3536_v46, %v3535_v59  ;;  %v15417_v1 = vor.u32 %v3665_v2, %v3533_v9  ;;  %v13403_v52 = vld [vmem:[%s18973_s3 + $0x108] sm:$0xff]   ;;  %v13406_v9 = vld [vmem:[%s18973_s3 + $0x150] sm:$0xff]   ;;  %19274 = vst [vmem:[#allocation80_spill] sm:$0xff] %v15467_v10  ;;  %v13408_v59 = vld [vmem:[%s18973_s3 + $0x158] sm:$0xff]  }
 0x2be   : > { %v15429_v44 = vsel %vm13976_vm5, 0, %v3531_v18  ;;  %v13390_v46 = vld [vmem:[%s18973_s3 + $0xc8] sm:$0xff]   ;;  %v13392_v28 = vld [vmem:[%s18973_s3 + $0xd0] sm:$0xff]  }
 0x2bf   : > { %v15421_v41 = vsel %vm13976_vm5, 0, %v3538_v47  ;;  %19273 = vst [vmem:[#allocation79_spill] sm:$0xff] %v15429_v44  ;;  %v13391_v2 = vld [vmem:[%s18973_s3 + $0x88] sm:$0xff]  }
 0x2c0   : > { %19272 = vst [vmem:[#allocation78_spill] sm:$0xff] %v15421_v41  ;;  %4171 = vmatprep.mubr.bf16.mxu0 %v15421_v41 }
 0x2c1   : > { %4172 = vmatmul.mubr.bf16.gmra.mrb[92].mxu0 %v15429_v44 }
 0x2c2   : > { %4373 = vmatprep.mubr.bf16.mxu0 %v15438_v13  ;;  %4823 = vmatmul.mubr.bf16.vlgmr.msra.gmra.mrb[96].mxu1 %v15408_v33 }
 0x2c3   : > { %4830 = vmatprep.mubr.bf16.mxu1 %v14861_v0  ;;  %12165 = vmatpush3.bf16.msra.mxu1 %v13401_v38  ;;  %v15458_v0 = vsel %vm13787_vm2, %v14896_v56, 0 }
 0x2c4   : > { %12166 = vmatprep.subr.bf16.mxu1 %v13402_v51  ;;  %v13409_v51 = vld [vmem:[%s18973_s3 + $0x118] sm:$0xff]  }
 0x2c7   : > { %12167 = vmatpush3.bf16.msra.mxu1 %v13403_v52 }
 0x2c8   : > { %12168 = vmatprep.subr.bf16.mxu1 %v13406_v9 }
 0x2c9   : > { %4374 = vmatmul.mubr.bf16.vlgmr.msra.gmra.mrb[96].mxu0 %v15458_v0 }
 0x2ca   : > { %12053 = vmatpush3.bf16.msra.mxu0 %v13389_v42  ;;  %4381 = vmatprep.mubr.bf16.mxu0 %v15467_v10  ;;  %v13393_v42 = vld [vmem:[%s18973_s3 + $0x90] sm:$0xff]  }
 0x2cb   : > { %v11732_v56 = vpop.f32.mrb[32].mxu1  ;;  %4831 = vmatmul.mubr.bf16.gmra.mrb[100].mxu1 %v14872_v50  ;;  %12054 = vmatprep.subr.bf16.mxu0 %v13390_v46  ;;  %v13410_v50 = vld [vmem:[%s18973_s3 + $0x160] sm:$0xff]   ;;  %v13394_v46 = vld [vmem:[%s18973_s3 + $0xd8] sm:$0xff]  }
 0x2cc   : > { %v11733_v18 = vpop.f32.mrb[33].mxu1  ;;  %4838 = vmatprep.mubr.bf16.mxu1 %v14909_v5  ;;  %12169 = vmatpush3.bf16.msra.mxu1 %v13407_v32  ;;  %v15496_v32 = vsel %vm13787_vm2, %v14979_v58, 0 }
 0x2cd   : > { %v11734_v47 = vadd.f32 %v11733_v18, %v11732_v56  ;;  %v11735_v38 = vpop.f32.mrb[34].mxu1  ;;  %12170 = vmatprep.subr.bf16.mxu1 %v13408_v59  ;;  %19275 = vst [vmem:[#allocation81_spill] sm:$0xff] %v15496_v32  ;;  %v13411_v59 = vld [vmem:[%s18973_s3 + $0x120] sm:$0xff]   ;;  %v13412_v18 = vld [vmem:[%s18973_s3 + $0x168] sm:$0xff]  }
 0x2ce   : > { %v11736_v52 = vpop.f32.mrb[35].mxu1  ;;  %12055 = vmatpush3.bf16.msra.mxu0 %v13391_v2  ;;  %v15505_v2 = vsel %vm13787_vm2, %v14983_v25, 0 }
 0x2cf   : > { %v11737_v9 = vadd.f32 %v11736_v52, %v11735_v38  ;;  %12056 = vmatprep.subr.bf16.mxu0 %v13392_v28  ;;  %19276 = vst [vmem:[#allocation82_spill] sm:$0xff] %v15505_v2  ;;  %v13395_v38 = vld [vmem:[%s18973_s3 + $0x98] sm:$0xff]  }
 0x2d0   : > { %12171 = vmatpush3.bf16.msra.mxu1 %v13409_v51 }
 0x2d1   : > { %4382 = vmatmul.mubr.bf16.gmra.mrb[100].mxu0 %v15496_v32  ;;  %12172 = vmatprep.subr.bf16.mxu1 %v13410_v50  ;;  %v13396_v50 = vld [vmem:[%s18973_s3 + $0xe0] sm:$0xff]  }
 0x2d2   : > { %v11620_v56 = vpop.f32.mrb[32].mxu0  ;;  %4389 = vmatprep.mubr.bf16.mxu0 %v15505_v2  ;;  %12057 = vmatpush3.bf16.msra.mxu0 %v13393_v42  ;;  %v13413_v42 = vld [vmem:[%s18973_s3 + $0x128] sm:$0xff]  }
 0x2d3   : > { %v11621_v58 = vpop.f32.mrb[33].mxu0  ;;  %v11738_v28 = vpop.f32.mrb[36].mxu1  ;;  %4839 = vmatmul.mubr.bf16.gmra.mrb[104].mxu1 %v14918_v24  ;;  %12058 = vmatprep.subr.bf16.mxu0 %v13394_v46  ;;  %v13416_v46 = vld [vmem:[%s18973_s3 + $0x170] sm:$0xff]  }
 0x2d4   : > { %v11622_v51 = vadd.f32 %v11621_v58, %v11620_v56  ;;  %v11623_v52 = vpop.f32.mrb[34].mxu0  ;;  %v11739_v25 = vpop.f32.mrb[37].mxu1  ;;  %4846 = vmatprep.mubr.bf16.mxu1 %v14955_v48  ;;  %12173 = vmatpush3.bf16.msra.mxu1 %v13411_v59 }
 0x2d5   : > { %v11740_v27 = vadd.f32 %v11739_v25, %v11738_v28  ;;  %v11624_v33 = vpop.f32.mrb[35].mxu0  ;;  %v11741_v44 = vpop.f32.mrb[38].mxu1  ;;  %12174 = vmatprep.subr.bf16.mxu1 %v13412_v18  ;;  %v13397_v28 = vld [vmem:[%s18973_s3 + $0xa0] sm:$0xff]  }
 0x2d6   : > { %v15522_v43 = vadd.f32 %v11734_v47, %v11622_v51  ;;  %v11625_v56 = vadd.f32 %v11624_v33, %v11623_v52  ;;  %v11742_v58 = vpop.f32.mrb[39].mxu1  ;;  %12059 = vmatpush3.bf16.msra.mxu0 %v13395_v38  ;;  %v13398_v47 = vld [vmem:[%s18973_s3 + $0xe8] sm:$0xff]   ;;  %v15538_v33 = vsel %vm13787_vm2, %v15022_v12, 0  ;;  %v13418_v38 = vld [vmem:[%s18973_s3 + $0x178] sm:$0xff]  }
 0x2d7   : > { %v11743_v41 = vadd.f32 %v11742_v58, %v11741_v44  ;;  %12060 = vmatprep.subr.bf16.mxu0 %v13396_v50  ;;  %19277 = vst [vmem:[#allocation83_spill] sm:$0xff] %v15538_v33  ;;  %v13417_v44 = vld [vmem:[%s18973_s3 + $0x130] sm:$0xff]   ;;  %v13399_v52 = vld [vmem:[%s18973_s3 + $0xa8] sm:$0xff]  }
 0x2d8   : > { %v15530_v59 = vadd.f32 %v11737_v9, %v11625_v56  ;;  %12175 = vmatpush3.bf16.msra.mxu1 %v13413_v42  ;;  %v15547_v9 = vsel %vm13787_vm2, %v15043_v7, 0  ;;  %v13404_v42 = vld [vmem:[%s18973_s3 + $0xf0] sm:$0xff]  }
 0x2d9   : > { %4390 = vmatmul.mubr.bf16.gmra.mrb[104].mxu0 %v15538_v33  ;;  %19278 = vst [vmem:[#allocation84_spill] sm:$0xff] %v15547_v9  ;;  %12176 = vmatprep.subr.bf16.mxu1 %v13416_v46 }
 0x2da   : > { %v11626_v18 = vpop.f32.mrb[36].mxu0  ;;  %4397 = vmatprep.mubr.bf16.mxu0 %v15547_v9  ;;  %12061 = vmatpush3.bf16.msra.mxu0 %v13397_v28  ;;  %v13419_v28 = vld [vmem:[%s18973_s3 + $0x138] sm:$0xff]  }
 0x2db   : > { %v11627_v12 = vpop.f32.mrb[37].mxu0  ;;  %v11744_v51 = vpop.f32.mrb[40].mxu1  ;;  %4847 = vmatmul.mubr.bf16.gmra.mrb[108].mxu1 %v14961_v15  ;;  %12062 = vmatprep.subr.bf16.mxu0 %v13398_v47  ;;  %v13405_v15 = vld [vmem:[%s18973_s3 + $0xb0] sm:$0xff]  }
 0x2dc   : > { %v11628_v25 = vadd.f32 %v11627_v12, %v11626_v18  ;;  %v11629_v50 = vpop.f32.mrb[38].mxu0  ;;  %v11745_v7 = vpop.f32.mrb[41].mxu1  ;;  %4854 = vmatprep.mubr.bf16.mxu1 %v14995_v23  ;;  %12177 = vmatpush3.bf16.msra.mxu1 %v13417_v44  ;;  %v13414_v44 = vld [vmem:[%s18973_s3 + $0xf8] sm:$0xff]  }
 0x2dd   : > { %v11746_v56 = vadd.f32 %v11745_v7, %v11744_v51  ;;  %v11630_v58 = vpop.f32.mrb[39].mxu0  ;;  %v11747_v46 = vpop.f32.mrb[42].mxu1  ;;  %12178 = vmatprep.subr.bf16.mxu1 %v13418_v38  ;;  %v15583_v51 = vsel %vm13787_vm2, %v15054_v11, 0  ;;  %v13420_v11 = vld [vmem:[%s18973_s3 + $0x340] sm:$0xff]  }
 0x2de   : > { %v15564_v37 = vadd.f32 %v11740_v27, %v11628_v25  ;;  %v11631_v18 = vadd.f32 %v11630_v58, %v11629_v50  ;;  %v11748_v12 = vpop.f32.mrb[43].mxu1  ;;  %12063 = vmatpush3.bf16.msra.mxu0 %v13399_v52  ;;  %v15577_v27 = vsel %vm13787_vm2, %v15051_v20, 0  ;;  %19280 = vst [vmem:[#allocation86_spill] sm:$0xff] %v15583_v51  ;;  %v13415_v25 = vld [vmem:[%s18973_s3 + $0xb8] sm:$0xff]  }
 0x2df   : > { %v11749_v47 = vadd.f32 %v11748_v12, %v11747_v46  ;;  %12064 = vmatprep.subr.bf16.mxu0 %v13404_v42  ;;  %19279 = vst [vmem:[#allocation85_spill] sm:$0xff] %v15577_v27 }
 0x2e0   : > { %v15569_v23 = vadd.f32 %v11743_v41, %v11631_v18  ;;  %12179 = vmatpush3.bf16.msra.mxu1 %v13419_v28 }
 0x2e1   : > { %4398 = vmatmul.mubr.bf16.gmra.mrb[108].mxu0 %v15577_v27 }
 0x2e2   : > { %v11632_v38 = vpop.f32.mrb[40].mxu0  ;;  %4405 = vmatprep.mubr.bf16.mxu0 %v15583_v51  ;;  %12065 = vmatpush3.bf16.msra.mxu0 %v13405_v15 }
 0x2e3   : > { %v11633_v41 = vpop.f32.mrb[41].mxu0  ;;  %v11750_v52 = vpop.f32.mrb[44].mxu1  ;;  %4855 = vmatmul.mubr.bf16.gmra.mrb[112].mxu1 %v15001_v6  ;;  %12066 = vmatprep.subr.bf16.mxu0 %v13414_v44  ;;  %v15601_v44 = vsel %vm13787_vm2, %v15056_v30, 0 }
 0x2e4   : > { %v11634_v20 = vadd.f32 %v11633_v41, %v11632_v38  ;;  %v11635_v50 = vpop.f32.mrb[42].mxu0  ;;  %v11751_v7 = vpop.f32.mrb[45].mxu1  ;;  %4862 = vmatprep.mubr.bf16.mxu1 %v15030_v31  ;;  %19281 = vst [vmem:[#allocation87_spill] sm:$0xff] %v15601_v44 }
 0x2e5   : > { %v11752_v42 = vadd.f32 %v11751_v7, %v11750_v52  ;;  %v11636_v58 = vpop.f32.mrb[43].mxu0  ;;  %v11753_v46 = vpop.f32.mrb[46].mxu1 }
 0x2e6   : > { %v15594_v15 = vadd.f32 %v11746_v56, %v11634_v20  ;;  %v11637_v28 = vadd.f32 %v11636_v58, %v11635_v50  ;;  %v11754_v18 = vpop.f32.mrb[47].mxu1  ;;  %12067 = vmatpush3.bf16.msra.mxu0 %v13415_v25  ;;  %v15607_v56 = vsel %vm13787_vm2, %v15063_v54, 0 }
 0x2e7   : > { %v11755_v12 = vadd.f32 %v11754_v18, %v11753_v46  ;;  %12276 = vmatprep.subr.bf16.mxu0 %v13420_v11  ;;  %19282 = vst [vmem:[#allocation88_spill] sm:$0xff] %v15607_v56  ;;  %v15619_v18 = vsel %vm13787_vm2, %v15058_v63, 0 }
 0x2e8   : > { %v15596_v6 = vadd.f32 %v11749_v47, %v11637_v28  ;;  %19283 = vst [vmem:[#allocation89_spill] sm:$0xff] %v15619_v18 }
 0x2e9   : > { %4406 = vmatmul.mubr.bf16.gmra.mrb[112].mxu0 %v15601_v44 }
 0x2ea   : > { %4413 = vmatprep.mubr.bf16.mxu0 %v15607_v56 }
 0x2eb   : > { %v11638_v38 = vpop.f32.mrb[44].mxu0  ;;  %v11756_v52 = vpop.f32.mrb[48].mxu1  ;;  %4863 = vmatmul.mubr.bf16.gmra.mrb[116].mxu1 %v15037_v16  ;;  %v15637_v16 = vsel %vm13787_vm2, %v15116_v19, 0 }
 0x2ec   : > { %v11639_v41 = vpop.f32.mrb[45].mxu0  ;;  %v11757_v20 = vpop.f32.mrb[49].mxu1  ;;  %4870 = vmatprep.mubr.bf16.mxu1 %v15072_v21  ;;  %19285 = vst [vmem:[#allocation91_spill] sm:$0xff] %v15637_v16 }
 0x2ed   : > { %v11640_v47 = vadd.f32 %v11639_v41, %v11638_v38  ;;  %v11641_v25 = vpop.f32.mrb[46].mxu0  ;;  %v11758_v30 = vadd.f32 %v11757_v20, %v11756_v52  ;;  %v11759_v7 = vpop.f32.mrb[50].mxu1  ;;  %v15625_v41 = vsel %vm13787_vm2, %v15118_v4, 0 }
 0x2ee   : > { %v11642_v50 = vpop.f32.mrb[47].mxu0  ;;  %v11760_v46 = vpop.f32.mrb[51].mxu1  ;;  %19284 = vst [vmem:[#allocation90_spill] sm:$0xff] %v15625_v41 }
 0x2ef   : > { %v15612_v11 = vadd.f32 %v11752_v42, %v11640_v47  ;;  %v11643_v58 = vadd.f32 %v11642_v50, %v11641_v25  ;;  %v11761_v54 = vadd.f32 %v11760_v46, %v11759_v7 }
 0x2f1   : > { %v15614_v28 = vadd.f32 %v11755_v12, %v11643_v58  ;;  %4414 = vmatmul.mubr.bf16.gmra.mrb[116].mxu0 %v15619_v18 }
 0x2f2   : > { %4421 = vmatprep.mubr.bf16.mxu0 %v15625_v41 }
 0x2f3   : > { %v11644_v38 = vpop.f32.mrb[48].mxu0  ;;  %v11762_v52 = vpop.f32.mrb[52].mxu1  ;;  %4871 = vmatmul.mubr.bf16.gmra.mrb[120].mxu1 %v15078_v62  ;;  %v15687_v62 = vsel %vm13787_vm2, %v15276_v40, 0 }
 0x2f4   : > { %v11645_v42 = vpop.f32.mrb[49].mxu0  ;;  %v11763_v25 = vpop.f32.mrb[53].mxu1  ;;  %4878 = vmatprep.mubr.bf16.mxu1 %v15126_v55  ;;  %19302 = vst [vmem:[#allocation98_spill] sm:$0xff] %v15687_v62 }
 0x2f5   : > { %v11646_v12 = vadd.f32 %v11645_v42, %v11644_v38  ;;  %v11647_v47 = vpop.f32.mrb[50].mxu0  ;;  %v11764_v63 = vadd.f32 %v11763_v25, %v11762_v52  ;;  %v11765_v50 = vpop.f32.mrb[54].mxu1  ;;  %v15643_v42 = vsel %vm13787_vm2, %v15176_v57, 0 }
 0x2f6   : > { %v11648_v20 = vpop.f32.mrb[51].mxu0  ;;  %v11766_v46 = vpop.f32.mrb[55].mxu1  ;;  %19286 = vst [vmem:[#allocation92_spill] sm:$0xff] %v15643_v42 }
 0x2f7   : > { %v15630_v7 = vadd.f32 %v11758_v30, %v11646_v12  ;;  %v11649_v58 = vadd.f32 %v11648_v20, %v11647_v47  ;;  %v11767_v4 = vadd.f32 %v11766_v46, %v11765_v50  ;;  %v19289_v20 = vld [vmem:[#allocation38_spill] sm:$0xff] }
 0x2f8   : > { %v15655_v57 = vsel %vm13787_vm2, %v19289_v20, 0  ;;  %v19295_v20 = vld [vmem:[#allocation48_spill] sm:$0xff] }
 0x2f9   : > { %v15632_v21 = vadd.f32 %v11761_v54, %v11649_v58  ;;  %4422 = vmatmul.mubr.bf16.gmra.mrb[120].mxu0 %v15637_v16  ;;  %19290 = vst [vmem:[#allocation38_spill] sm:$0xff] %v15655_v57  ;;  %v19291_v58 = vld [vmem:[#allocation46_spill] sm:$0xff] }
 0x2fa   : > { %4429 = vmatprep.mubr.bf16.mxu0 %v15643_v42  ;;  %v15661_v46 = vsel %vm13787_vm2, %v19291_v58, 0 }
 0x2fb   : > { %v11650_v38 = vpop.f32.mrb[52].mxu0  ;;  %4879 = vmatmul.mubr.bf16.gmra.mrb[124].mxu1 %v15135_v36  ;;  %19292 = vst [vmem:[#allocation46_spill] sm:$0xff] %v15661_v46 }
 0x2fc   : > { %v11651_v30 = vpop.f32.mrb[53].mxu0  ;;  %4886 = vmatprep.mubr.bf16.mxu1 %v15181_v3  ;;  %v15669_v3 = vsel %vm13787_vm2, %v19295_v20, 0  ;;  %v19300_v20 = vld [vmem:[#allocation51_spill] sm:$0xff] }
 0x2fd   : > { %v11652_v54 = vadd.f32 %v11651_v30, %v11650_v38  ;;  %v11653_v52 = vpop.f32.mrb[54].mxu0  ;;  %v19293_v30 = vld [vmem:[#allocation40_spill] sm:$0xff]  ;;  %19296 = vst [vmem:[#allocation48_spill] sm:$0xff] %v15669_v3 }
 0x2fe   : > { %v11654_v12 = vpop.f32.mrb[55].mxu0 }
 0x2ff   : > { %v15648_v19 = vadd.f32 %v11764_v63, %v11652_v54  ;;  %v11655_v47 = vadd.f32 %v11654_v12, %v11653_v52  ;;  %v19294_v54 = vld [vmem:[#allocation45_spill] sm:$0xff] }
 0x301   : > { %19287 = vst [vmem:[#allocation93_spill] sm:$0xff] %v15648_v19  ;;  %v15650_v25 = vadd.f32 %v11767_v4, %v11655_v47  ;;  %v11768_v50 = vpop.f32.mrb[56].mxu1  ;;  %4430 = vmatmul.mubr.bf16.gmra.mrb[124].mxu0 %v15655_v57 }
 0x302   : > { %v11769_v38 = vpop.f32.mrb[57].mxu1  ;;  %4437 = vmatprep.mubr.bf16.mxu0 %v15661_v46 }
 0x303   : > { %19288 = vst [vmem:[#allocation94_spill] sm:$0xff] %v15650_v25  ;;  %v11770_v63 = vadd.f32 %v11769_v38, %v11768_v50  ;;  %4887 = vmatmul.mubr.bf16.gmra.mrb[128].mxu1 %v19293_v30  ;;  %v11771_v4 = vpop.f32.mrb[58].mxu1  ;;  %v15675_v50 = vsel %vm13787_vm2, %v15264_v26, 0 }
 0x304   : > { %4894 = vmatprep.mubr.bf16.mxu1 %v19294_v54  ;;  %v11772_v52 = vpop.f32.mrb[59].mxu1  ;;  %19297 = vst [vmem:[#allocation95_spill] sm:$0xff] %v15675_v50  ;;  %v19298_v54 = vld [vmem:[#allocation47_spill] sm:$0xff] }
 0x305   : > { %v11773_v12 = vadd.f32 %v11772_v52, %v11771_v4 }
 0x308   : > { %v11656_v47 = vpop.f32.mrb[56].mxu0 }
 0x309   : > { %v11657_v36 = vpop.f32.mrb[57].mxu0  ;;  %4438 = vmatmul.mubr.bf16.gmra.mrb[128].mxu0 %v15669_v3 }
 0x30a   : > { %v11658_v58 = vadd.f32 %v11657_v36, %v11656_v47  ;;  %v11659_v38 = vpop.f32.mrb[58].mxu0  ;;  %4445 = vmatprep.mubr.bf16.mxu0 %v15675_v50  ;;  %v15693_v36 = vsel %vm13787_vm2, %v15285_v53, 0  ;;  %v15707_v53 = vsel %vm13787_vm2, %v15296_v61, 0 }
 0x30b   : > { %4895 = vmatmul.mubr.bf16.gmra.mrb[132].mxu1 %v19298_v54  ;;  %v11660_v4 = vpop.f32.mrb[59].mxu0  ;;  %19303 = vst [vmem:[#allocation99_spill] sm:$0xff] %v15693_v36  ;;  %19306 = vst [vmem:[#allocation101_spill] sm:$0xff] %v15707_v53 }
 0x30c   : > { %v15679_v52 = vadd.f32 %v11770_v63, %v11658_v58  ;;  %v11661_v30 = vadd.f32 %v11660_v4, %v11659_v38  ;;  %4902 = vmatprep.mubr.bf16.mxu1 %v19300_v20  ;;  %v19304_v58 = vld [vmem:[#allocation52_spill] sm:$0xff]  ;;  %v15701_v4 = vsel %vm13787_vm2, %v15292_v49, 0 }
 0x30d   : > { %19305 = vst [vmem:[#allocation100_spill] sm:$0xff] %v15701_v4 }
 0x30e   : > { %19299 = vst [vmem:[#allocation96_spill] sm:$0xff] %v15679_v52  ;;  %v15682_v55 = vadd.f32 %v11773_v12, %v11661_v30 }
 0x310   : > { %19301 = vst [vmem:[#allocation97_spill] sm:$0xff] %v15682_v55  ;;  %v19318_v55 = vld [vmem:[#allocation68_spill] sm:$0xff] }
 0x311   : > { %v11774_v26 = vpop.f32.mrb[60].mxu1  ;;  %4446 = vmatmul.mubr.bf16.gmra.mrb[132].mxu0 %v15687_v62 }
 0x312   : > { %v11775_v63 = vpop.f32.mrb[61].mxu1  ;;  %4453 = vmatprep.mubr.bf16.mxu0 %v15693_v36 }
 0x313   : > { %v11776_v47 = vadd.f32 %v11775_v63, %v11774_v26  ;;  %4903 = vmatmul.mubr.bf16.gmra.mrb[136].mxu1 %v19304_v58  ;;  %v11777_v30 = vpop.f32.mrb[62].mxu1  ;;  %v15719_v58 = vsel %vm13787_vm2, %v15294_v45, 0  ;;  %v13432_v45 = vld [vmem:[%s18973_s3 + $0x3c0] sm:$0xff]  }
 0x314   : > { %4910 = vmatprep.mubr.bf16.mxu1 %v15272_v22  ;;  %v11778_v12 = vpop.f32.mrb[63].mxu1  ;;  %19309 = vst [vmem:[#allocation104_spill] sm:$0xff] %v15719_v58  ;;  %12388 = vmatprep.subr.bf16.mxu1 %v13432_v45  ;;  %v19316_v45 = vld [vmem:[#allocation63_spill] sm:$0xff] }
 0x315   : > { %v11779_v40 = vadd.f32 %v11778_v12, %v11777_v30 }
 0x318   : > { %v11662_v38 = vpop.f32.mrb[60].mxu0 }
 0x319   : > { %v11663_v20 = vpop.f32.mrb[61].mxu0  ;;  %4454 = vmatmul.mubr.bf16.gmra.mrb[136].mxu0 %v15701_v4 }
 0x31a   : > { %v11664_v26 = vadd.f32 %v11663_v20, %v11662_v38  ;;  %v11665_v63 = vpop.f32.mrb[62].mxu0  ;;  %4461 = vmatprep.mubr.bf16.mxu0 %v15707_v53  ;;  %v15725_v20 = vsel %vm13787_vm2, %v15324_v60, 0 }
 0x31b   : > { %4911 = vmatmul.mubr.bf16.gmra.mrb[140].mxu1 %v15281_v39  ;;  %v11666_v30 = vpop.f32.mrb[63].mxu0  ;;  %19310 = vst [vmem:[#allocation105_spill] sm:$0xff] %v15725_v20 }
 0x31c   : > { %v15711_v12 = vadd.f32 %v11776_v47, %v11664_v26  ;;  %v11667_v22 = vadd.f32 %v11666_v30, %v11665_v63  ;;  %4918 = vmatprep.mubr.bf16.mxu1 %v15300_v29  ;;  %v19312_v29 = vld [vmem:[#allocation61_spill] sm:$0xff] }
 0x31d   : > { %v15736_v60 = vsel %vm13787_vm2, %v19312_v29, 0 }
 0x31e   : > { %19307 = vst [vmem:[#allocation102_spill] sm:$0xff] %v15711_v12  ;;  %v15714_v49 = vadd.f32 %v11779_v40, %v11667_v22  ;;  %v19311_v40 = vld [vmem:[#allocation62_spill] sm:$0xff]  ;;  %19313 = vst [vmem:[#allocation61_spill] sm:$0xff] %v15736_v60 }
 0x320   : > { %19308 = vst [vmem:[#allocation103_spill] sm:$0xff] %v15714_v49 }
 0x321   : > { %v11780_v61 = vpop.f32.mrb[64].mxu1  ;;  %4462 = vmatmul.mubr.bf16.gmra.mrb[140].mxu0 %v15719_v58 }
 0x322   : > { %v11781_v47 = vpop.f32.mrb[65].mxu1  ;;  %4469 = vmatprep.mubr.bf16.mxu0 %v15725_v20 }
 0x323   : > { %v11782_v38 = vadd.f32 %v11781_v47, %v11780_v61  ;;  %4919 = vmatmul.mubr.bf16.gmra.mrb[144].mxu1 %v15305_v17  ;;  %v11783_v22 = vpop.f32.mrb[66].mxu1  ;;  %v19314_v47 = vld [vmem:[#allocation67_spill] sm:$0xff] }
 0x324   : > { %4926 = vmatprep.mubr.bf16.mxu1 %v19311_v40  ;;  %v11784_v26 = vpop.f32.mrb[67].mxu1  ;;  %v15742_v17 = vsel %vm13787_vm2, %v19314_v47, 0 }
 0x325   : > { %v11785_v63 = vadd.f32 %v11784_v26, %v11783_v22  ;;  %19315 = vst [vmem:[#allocation67_spill] sm:$0xff] %v15742_v17 }
 0x328   : > { %v11668_v30 = vpop.f32.mrb[64].mxu0 }
 0x329   : > { %v11669_v39 = vpop.f32.mrb[65].mxu0  ;;  %v11786_v61 = vpop.f32.mrb[68].mxu1  ;;  %4470 = vmatmul.mubr.bf16.gmra.mrb[144].mxu0 %v15736_v60 }
 0x32a   : > { %v11670_v54 = vadd.f32 %v11669_v39, %v11668_v30  ;;  %v11671_v40 = vpop.f32.mrb[66].mxu0  ;;  %v11787_v31 = vpop.f32.mrb[69].mxu1  ;;  %4477 = vmatprep.mubr.bf16.mxu0 %v15742_v17  ;;  %v19320_v39 = vld [vmem:[#allocation66_spill] sm:$0xff] }
 0x32b   : > { %v11788_v22 = vadd.f32 %v11787_v31, %v11786_v61  ;;  %4927 = vmatmul.mubr.bf16.gmra.mrb[148].mxu1 %v19316_v45  ;;  %v11672_v26 = vpop.f32.mrb[67].mxu0  ;;  %v11789_v29 = vpop.f32.mrb[70].mxu1  ;;  %v15754_v30 = vsel %vm13787_vm2, %v19320_v39, 0  ;;  %v19325_v45 = vld [vmem:[#allocation73_spill] sm:$0xff] }
 0x32c   : > { %v15746_v49 = vadd.f32 %v11782_v38, %v11670_v54  ;;  %v11673_v12 = vadd.f32 %v11672_v26, %v11671_v40  ;;  %4934 = vmatprep.mubr.bf16.mxu1 %v19318_v55  ;;  %v11790_v52 = vpop.f32.mrb[71].mxu1  ;;  %19321 = vst [vmem:[#allocation66_spill] sm:$0xff] %v15754_v30  ;;  %v15760_v54 = vsel %vm13787_vm2, %v15383_v34, 0  ;;  %v3155_v34 = vrot.slane %v19268_v35, 1 }
 0x32d   : > { %v11791_v48 = vadd.f32 %v11790_v52, %v11789_v29  ;;  %19322 = vst [vmem:[#allocation108_spill] sm:$0xff] %v15760_v54 }
 0x32e   : > { %19317 = vst [vmem:[#allocation106_spill] sm:$0xff] %v15746_v49  ;;  %v15749_v25 = vadd.f32 %v11785_v63, %v11673_v12  ;;  %v19323_v63 = vld [vmem:[#allocation69_spill] sm:$0xff] }
 0x330   : > { %19319 = vst [vmem:[#allocation107_spill] sm:$0xff] %v15749_v25  ;;  %v11674_v47 = vpop.f32.mrb[68].mxu0 }
 0x331   : > { %v11675_v31 = vpop.f32.mrb[69].mxu0  ;;  %v11792_v61 = vpop.f32.mrb[72].mxu1  ;;  %4478 = vmatmul.mubr.bf16.gmra.mrb[148].mxu0 %v15754_v30 }
 0x332   : > { %v11676_v38 = vadd.f32 %v11675_v31, %v11674_v47  ;;  %v11677_v40 = vpop.f32.mrb[70].mxu0  ;;  %v11793_v52 = vpop.f32.mrb[73].mxu1  ;;  %4485 = vmatprep.mubr.bf16.mxu0 %v15760_v54  ;;  %v19327_v31 = vld [vmem:[#allocation72_spill] sm:$0xff] }
 0x333   : > { %v11794_v12 = vadd.f32 %v11793_v52, %v11792_v61  ;;  %4935 = vmatmul.mubr.bf16.gmra.mrb[152].mxu1 %v19323_v63  ;;  %v11678_v26 = vpop.f32.mrb[71].mxu0  ;;  %v11795_v29 = vpop.f32.mrb[74].mxu1  ;;  %v15773_v61 = vsel %vm13787_vm2, %v19327_v31, 0 }
 0x334   : > { %v15764_v39 = vadd.f32 %v11788_v22, %v11676_v38  ;;  %v11679_v55 = vadd.f32 %v11678_v26, %v11677_v40  ;;  %4942 = vmatprep.mubr.bf16.mxu1 %v19325_v45  ;;  %v11796_v25 = vpop.f32.mrb[75].mxu1  ;;  %19328 = vst [vmem:[#allocation72_spill] sm:$0xff] %v15773_v61  ;;  %v15779_v22 = vsel %vm13787_vm2, %v15417_v1, 0  ;;  %v19331_v26 = vld [vmem:[#allocation74_spill] sm:$0xff] }
 0x335   : > { %v11797_v49 = vadd.f32 %v11796_v25, %v11795_v29  ;;  %19329 = vst [vmem:[#allocation111_spill] sm:$0xff] %v15779_v22  ;;  %v15783_v25 = vsel %vm13787_vm2, %v3155_v34, 0 }
 0x336   : > { %19324 = vst [vmem:[#allocation109_spill] sm:$0xff] %v15764_v39  ;;  %v15768_v24 = vadd.f32 %v11791_v48, %v11679_v55  ;;  %19330 = vst [vmem:[#allocation112_spill] sm:$0xff] %v15783_v25 }
 0x338   : > { %19326 = vst [vmem:[#allocation110_spill] sm:$0xff] %v15768_v24 }
 0x339   : > { %v11680_v47 = vpop.f32.mrb[72].mxu0  ;;  %v11798_v63 = vpop.f32.mrb[76].mxu1  ;;  %4486 = vmatmul.mubr.bf16.gmra.mrb[152].mxu0 %v15773_v61 }
 0x33a   : > { %v11681_v52 = vpop.f32.mrb[73].mxu0  ;;  %v11799_v38 = vpop.f32.mrb[77].mxu1  ;;  %4493 = vmatprep.mubr.bf16.mxu0 %v15779_v22 }
 0x33b   : > { %v11682_v55 = vadd.f32 %v11681_v52, %v11680_v47  ;;  %v11683_v48 = vpop.f32.mrb[74].mxu0  ;;  %v11800_v40 = vadd.f32 %v11799_v38, %v11798_v63  ;;  %4943 = vmatmul.mubr.bf16.gmra.mrb[156].mxu1 %v19331_v26  ;;  %v11801_v31 = vpop.f32.mrb[78].mxu1  ;;  %v15795_v47 = vsel %vm13787_vm2, %v15415_v8, 0  ;;  %v13433_v63 = vld [vmem:[%s18973_s3 + $0x380] sm:$0xff]   ;;  %v13438_v38 = vld [vmem:[%s18973_s3 + $0x3d0] sm:$0xff]  }
 0x33c   : > { %v11684_v29 = vpop.f32.mrb[75].mxu0  ;;  %v11802_v39 = vpop.f32.mrb[79].mxu1  ;;  %5144 = vmatprep.mubr.bf16.mxu1 %v15783_v25  ;;  %19332 = vst [vmem:[#allocation113_spill] sm:$0xff] %v15795_v47  ;;  %v19355_v26 = vld [vmem:[#allocation43_spill] sm:$0xff] }
 0x33d   : > { %v15787_v45 = vadd.f32 %v11794_v12, %v11682_v55  ;;  %v11685_v24 = vadd.f32 %v11684_v29, %v11683_v48  ;;  %v11803_v1 = vadd.f32 %v11802_v39, %v11801_v31  ;;  %v13434_v12 = vld [vmem:[%s18973_s3 + $0x3c8] sm:$0xff]   ;;  %v13439_v31 = vld [vmem:[%s18973_s3 + $0x390] sm:$0xff]  }
 0x33e   : > { %v13435_v48 = vld [vmem:[%s18973_s3 + $0x388] sm:$0xff]  }
 0x33f   : > { %v15790_v19 = vadd.f32 %v11797_v49, %v11685_v24 }
 0x341   : > { %v11686_v34 = vpop.f32.mrb[76].mxu0  ;;  %4494 = vmatmul.mubr.bf16.gmra.mrb[156].mxu0 %v15795_v47  ;;  %v19340_v47 = vld [vmem:[#allocation18_spill] sm:$0xff] }
 0x342   : > { %v11687_v52 = vpop.f32.mrb[77].mxu0  ;;  %4983 = vmatprep.mubr.bf16.mxu0 %v19268_v35 }
 0x343   : > { %v11688_v39 = vadd.f32 %v11687_v52, %v11686_v34  ;;  %v11689_v24 = vpop.f32.mrb[78].mxu0  ;;  %5145 = vmatmul.mubr.bf16.vlgmr.msra.gmra.mrb[160].mxu1 %v15783_v25  ;;  %v19333_v34 = vld [vmem:[#allocation12_spill] sm:$0xff]  ;;  %v13424_v52 = vld [vmem:[%s18973_s3 + $0x350] sm:$0xff]   ;;  %v19339_v25 = vld [vmem:[#allocation19_spill] sm:$0xff] }
 0x344   : > { %v11690_v49 = vpop.f32.mrb[79].mxu0  ;;  %5152 = vmatprep.mubr.bf16.mxu1 %v15438_v13  ;;  %12389 = vmatpush3.bf16.msra.mxu1 %v13433_v63  ;;  %v13422_v13 = vld [vmem:[%s18973_s3 + $0x348] sm:$0xff]  }
 0x345   : > { %v15806_v8 = vadd.f32 %v11800_v40, %v11688_v39  ;;  %v11691_v55 = vadd.f32 %v11690_v49, %v11689_v24  ;;  %12390 = vmatprep.subr.bf16.mxu1 %v13434_v12  ;;  %v13421_v40 = vld [vmem:[%s18973_s3 + $0x300] sm:$0xff]   ;;  %v13423_v63 = vld [vmem:[%s18973_s3 + $0x308] sm:$0xff]   ;;  %v13441_v12 = vld [vmem:[%s18973_s3 + $0x398] sm:$0xff]  }
 0x346   : > { %v13442_v39 = vld [vmem:[%s18973_s3 + $0x3e0] sm:$0xff]   ;;  %v13426_v24 = vld [vmem:[%s18973_s3 + $0x358] sm:$0xff]  }
 0x347   : > { %v15815_v29 = vadd.f32 %v11803_v1, %v11691_v55  ;;  %v13440_v1 = vld [vmem:[%s18973_s3 + $0x3d8] sm:$0xff]   ;;  %v13443_v49 = vld [vmem:[%s18973_s3 + $0x3a0] sm:$0xff]  }
 0x348   : > { %12391 = vmatpush3.bf16.msra.mxu1 %v13435_v48  ;;  %v19334_v55 = vld [vmem:[#allocation11_spill] sm:$0xff]  ;;  %v13444_v48 = vld [vmem:[%s18973_s3 + $0x3e8] sm:$0xff]  }
 0x349   : > { %4984 = vmatmul.mubr.bf16.vlgmr.msra.gmra.mrb[160].mxu0 %v19268_v35  ;;  %12392 = vmatprep.subr.bf16.mxu1 %v13438_v38  ;;  %v19335_v38 = vld [vmem:[#allocation14_spill] sm:$0xff] }
 0x34a   : > { %12277 = vmatpush3.bf16.msra.mxu0 %v13421_v40  ;;  %4991 = vmatprep.mubr.bf16.mxu0 %v19333_v34  ;;  %v13427_v40 = vld [vmem:[%s18973_s3 + $0x318] sm:$0xff]   ;;  %v13429_v34 = vld [vmem:[%s18973_s3 + $0x320] sm:$0xff]  }
 0x34b   : > { %5153 = vmatmul.mubr.bf16.gmra.mrb[164].mxu1 %v15458_v0  ;;  %12278 = vmatprep.subr.bf16.mxu0 %v13422_v13  ;;  %v13425_v0 = vld [vmem:[%s18973_s3 + $0x310] sm:$0xff]   ;;  %v13428_v13 = vld [vmem:[%s18973_s3 + $0x360] sm:$0xff]  }
 0x34c   : > { %5160 = vmatprep.mubr.bf16.mxu1 %v15467_v10  ;;  %12393 = vmatpush3.bf16.msra.mxu1 %v13439_v31  ;;  %v13445_v31 = vld [vmem:[%s18973_s3 + $0x3a8] sm:$0xff]  }
 0x34d   : > { %12394 = vmatprep.subr.bf16.mxu1 %v13440_v1  ;;  %v13448_v1 = vld [vmem:[%s18973_s3 + $0x3f0] sm:$0xff]  }
 0x34e   : > { %12279 = vmatpush3.bf16.msra.mxu0 %v13423_v63  ;;  %v13430_v63 = vld [vmem:[%s18973_s3 + $0x368] sm:$0xff]  }
 0x34f   : > { %12280 = vmatprep.subr.bf16.mxu0 %v13424_v52  ;;  %v13449_v52 = vld [vmem:[%s18973_s3 + $0x3b0] sm:$0xff]  }
 0x350   : > { %12395 = vmatpush3.bf16.msra.mxu1 %v13441_v12  ;;  %v19336_v12 = vld [vmem:[#allocation13_spill] sm:$0xff] }
 0x351   : > { %4992 = vmatmul.mubr.bf16.gmra.mrb[164].mxu0 %v19334_v55  ;;  %12396 = vmatprep.subr.bf16.mxu1 %v13442_v39  ;;  %v13450_v39 = vld [vmem:[%s18973_s3 + $0x3f8] sm:$0xff]   ;;  %v19352_v10 = vld [vmem:[#allocation41_spill] sm:$0xff] }
 0x352   : > { %4999 = vmatprep.mubr.bf16.mxu0 %v19335_v38  ;;  %12281 = vmatpush3.bf16.msra.mxu0 %v13425_v0  ;;  %v19337_v0 = vld [vmem:[#allocation16_spill] sm:$0xff]  ;;  %v13451_v55 = vld [vmem:[%s18973_s3 + $0x3b8] sm:$0xff]  }
 0x353   : > { %5161 = vmatmul.mubr.bf16.gmra.mrb[168].mxu1 %v15496_v32  ;;  %12282 = vmatprep.subr.bf16.mxu0 %v13426_v24  ;;  %v13431_v24 = vld [vmem:[%s18973_s3 + $0x328] sm:$0xff]  }
 0x354   : > { %5168 = vmatprep.mubr.bf16.mxu1 %v15505_v2  ;;  %12397 = vmatpush3.bf16.msra.mxu1 %v13443_v49  ;;  %v13436_v49 = vld [vmem:[%s18973_s3 + $0x370] sm:$0xff]   ;;  %v19346_v2 = vld [vmem:[#allocation32_spill] sm:$0xff] }
 0x355   : > { %12398 = vmatprep.subr.bf16.mxu1 %v13444_v48 }
 0x356   : > { %12283 = vmatpush3.bf16.msra.mxu0 %v13427_v40 }
 0x357   : > { %12284 = vmatprep.subr.bf16.mxu0 %v13428_v13  ;;  %v13437_v13 = vld [vmem:[%s18973_s3 + $0x330] sm:$0xff]  }
 0x358   : > { %12399 = vmatpush3.bf16.msra.mxu1 %v13445_v31 }
 0x359   : > { %5000 = vmatmul.mubr.bf16.gmra.mrb[168].mxu0 %v19336_v12  ;;  %12400 = vmatprep.subr.bf16.mxu1 %v13448_v1 }
 0x35a   : > { %5007 = vmatprep.mubr.bf16.mxu0 %v19337_v0  ;;  %12285 = vmatpush3.bf16.msra.mxu0 %v13429_v34  ;;  %v13446_v34 = vld [vmem:[%s18973_s3 + $0x378] sm:$0xff]  }
 0x35b   : > { %5169 = vmatmul.mubr.bf16.gmra.mrb[172].mxu1 %v15538_v33  ;;  %12286 = vmatprep.subr.bf16.mxu0 %v13430_v63 }
 0x35c   : > { %5176 = vmatprep.mubr.bf16.mxu1 %v15547_v9  ;;  %12401 = vmatpush3.bf16.msra.mxu1 %v13449_v52 }
 0x35d   : > { %v11804_v48 = vpop.f32.mrb[80].mxu1  ;;  %12402 = vmatprep.subr.bf16.mxu1 %v13450_v39  ;;  %v13447_v39 = vld [vmem:[%s18973_s3 + $0x338] sm:$0xff]  }
 0x35e   : > { %v11805_v40 = vpop.f32.mrb[81].mxu1  ;;  %12287 = vmatpush3.bf16.msra.mxu0 %v13431_v24  ;;  %v13452_v24 = vld [vmem:[%s18973_s3 + $0x440] sm:$0xff]  }
 0x35f   : > { %v11806_v31 = vadd.f32 %v11805_v40, %v11804_v48  ;;  %v11807_v1 = vpop.f32.mrb[82].mxu1  ;;  %12288 = vmatprep.subr.bf16.mxu0 %v13436_v49 }
 0x360   : > { %v11808_v63 = vpop.f32.mrb[83].mxu1  ;;  %12403 = vmatpush3.bf16.msra.mxu1 %v13451_v55 }
 0x361   : > { %v11809_v52 = vadd.f32 %v11808_v63, %v11807_v1  ;;  %5008 = vmatmul.mubr.bf16.gmra.mrb[172].mxu0 %v19338_v14 }
 0x362   : > { %5015 = vmatprep.mubr.bf16.mxu0 %v19339_v25  ;;  %12289 = vmatpush3.bf16.msra.mxu0 %v13437_v13 }
 0x363   : > { %5177 = vmatmul.mubr.bf16.gmra.mrb[176].mxu1 %v15577_v27  ;;  %12290 = vmatprep.subr.bf16.mxu0 %v13446_v34  ;;  %v19341_v34 = vld [vmem:[#allocation23_spill] sm:$0xff] }
 0x364   : > { %5184 = vmatprep.mubr.bf16.mxu1 %v15583_v51  ;;  %v11692_v49 = vpop.f32.mrb[80].mxu0 }
 0x365   : > { %v11693_v55 = vpop.f32.mrb[81].mxu0 }
 0x366   : > { %v11694_v48 = vadd.f32 %v11693_v55, %v11692_v49  ;;  %v11695_v40 = vpop.f32.mrb[82].mxu0  ;;  %12291 = vmatpush3.bf16.msra.mxu0 %v13447_v39 }
 0x367   : > { %v11696_v1 = vpop.f32.mrb[83].mxu0  ;;  %12500 = vmatprep.subr.bf16.mxu0 %v13452_v24  ;;  %v19342_v24 = vld [vmem:[#allocation22_spill] sm:$0xff] }
 0x368   : > { %v15914_v13 = vadd.f32 %v11806_v31, %v11694_v48  ;;  %v11697_v63 = vadd.f32 %v11696_v1, %v11695_v40  ;;  %v19343_v31 = vld [vmem:[#allocation27_spill] sm:$0xff] }
 0x369   : > { %5016 = vmatmul.mubr.bf16.gmra.mrb[176].mxu0 %v19340_v47 }
 0x36a   : > { %v15917_v22 = vadd.f32 %v11809_v52, %v11697_v63  ;;  %5023 = vmatprep.mubr.bf16.mxu0 %v19341_v34 }
 0x36b   : > { %5185 = vmatmul.mubr.bf16.gmra.mrb[180].mxu1 %v15601_v44 }
 0x36c   : > { %5192 = vmatprep.mubr.bf16.mxu1 %v15607_v56 }
 0x36d   : > { %v11810_v51 = vpop.f32.mrb[84].mxu1 }
 0x36e   : > { %v11811_v27 = vpop.f32.mrb[85].mxu1 }
 0x36f   : > { %v11812_v49 = vadd.f32 %v11811_v27, %v11810_v51  ;;  %v11813_v55 = vpop.f32.mrb[86].mxu1  ;;  %v19344_v27 = vld [vmem:[#allocation26_spill] sm:$0xff] }
 0x370   : > { %v11814_v39 = vpop.f32.mrb[87].mxu1 }
 0x371   : > { %v11815_v9 = vadd.f32 %v11814_v39, %v11813_v55  ;;  %5024 = vmatmul.mubr.bf16.gmra.mrb[180].mxu0 %v19342_v24  ;;  %v19345_v55 = vld [vmem:[#allocation33_spill] sm:$0xff] }
 0x372   : > { %5031 = vmatprep.mubr.bf16.mxu0 %v19343_v31 }
 0x373   : > { %5193 = vmatmul.mubr.bf16.gmra.mrb[184].mxu1 %v15619_v18 }
 0x374   : > { %5200 = vmatprep.mubr.bf16.mxu1 %v15625_v41  ;;  %v11698_v52 = vpop.f32.mrb[84].mxu0 }
 0x375   : > { %v11699_v48 = vpop.f32.mrb[85].mxu0 }
 0x376   : > { %v11700_v40 = vadd.f32 %v11699_v48, %v11698_v52  ;;  %v11701_v1 = vpop.f32.mrb[86].mxu0 }
 0x377   : > { %v11702_v63 = vpop.f32.mrb[87].mxu0 }
 0x378   : > { %v15926_v56 = vadd.f32 %v11812_v49, %v11700_v40  ;;  %v11703_v44 = vadd.f32 %v11702_v63, %v11701_v1  ;;  %v19347_v49 = vld [vmem:[#allocation37_spill] sm:$0xff] }
 0x379   : > { %5032 = vmatmul.mubr.bf16.gmra.mrb[184].mxu0 %v19344_v27 }
 0x37a   : > { %v15929_v51 = vadd.f32 %v11815_v9, %v11703_v44  ;;  %5039 = vmatprep.mubr.bf16.mxu0 %v19345_v55 }
 0x37b   : > { %5201 = vmatmul.mubr.bf16.gmra.mrb[188].mxu1 %v15637_v16 }
 0x37c   : > { %5208 = vmatprep.mubr.bf16.mxu1 %v15643_v42 }
 0x37d   : > { %v11816_v39 = vpop.f32.mrb[88].mxu1 }
 0x37e   : > { %v11817_v41 = vpop.f32.mrb[89].mxu1 }
 0x37f   : > { %v11818_v18 = vadd.f32 %v11817_v41, %v11816_v39  ;;  %v11819_v33 = vpop.f32.mrb[90].mxu1  ;;  %v19349_v41 = vld [vmem:[#allocation36_spill] sm:$0xff] }
 0x380   : > { %v11820_v52 = vpop.f32.mrb[91].mxu1 }
 0x381   : > { %v11821_v48 = vadd.f32 %v11820_v52, %v11819_v33  ;;  %5040 = vmatmul.mubr.bf16.gmra.mrb[188].mxu0 %v19346_v2  ;;  %v19351_v33 = vld [vmem:[#allocation42_spill] sm:$0xff] }
 0x382   : > { %5047 = vmatprep.mubr.bf16.mxu0 %v19347_v49 }
 0x383   : > { %5209 = vmatmul.mubr.bf16.gmra.mrb[192].mxu1 %v15655_v57 }
 0x384   : > { %5216 = vmatprep.mubr.bf16.mxu1 %v15661_v46  ;;  %v11704_v9 = vpop.f32.mrb[88].mxu0 }
 0x385   : > { %v11705_v44 = vpop.f32.mrb[89].mxu0 }
 0x386   : > { %v11706_v40 = vadd.f32 %v11705_v44, %v11704_v9  ;;  %v11707_v1 = vpop.f32.mrb[90].mxu0 }
 0x387   : > { %v11708_v63 = vpop.f32.mrb[91].mxu0 }
 0x388   : > { %v15938_v42 = vadd.f32 %v11818_v18, %v11706_v40  ;;  %v11709_v16 = vadd.f32 %v11708_v63, %v11707_v1  ;;  %v19353_v18 = vld [vmem:[#allocation44_spill] sm:$0xff] }
 0x389   : > { %5048 = vmatmul.mubr.bf16.gmra.mrb[192].mxu0 %v19349_v41 }
 0x38a   : > { %19348 = vst [vmem:[#allocation12_spill] sm:$0xff] %v15938_v42  ;;  %v15941_v39 = vadd.f32 %v11821_v48, %v11709_v16  ;;  %5055 = vmatprep.mubr.bf16.mxu0 %v19351_v33 }
 0x38b   : > { %5217 = vmatmul.mubr.bf16.gmra.mrb[196].mxu1 %v15669_v3 }
 0x38c   : > { %19350 = vst [vmem:[#allocation11_spill] sm:$0xff] %v15941_v39  ;;  %5224 = vmatprep.mubr.bf16.mxu1 %v15675_v50 }
 0x38d   : > { %v11822_v52 = vpop.f32.mrb[92].mxu1 }
 0x38e   : > { %v11823_v46 = vpop.f32.mrb[93].mxu1 }
 0x38f   : > { %v11824_v57 = vadd.f32 %v11823_v46, %v11822_v52  ;;  %v11825_v32 = vpop.f32.mrb[94].mxu1 }
 0x390   : > { %v11826_v9 = vpop.f32.mrb[95].mxu1 }
 0x391   : > { %v11827_v44 = vadd.f32 %v11826_v9, %v11825_v32  ;;  %5056 = vmatmul.mubr.bf16.gmra.mrb[196].mxu0 %v19352_v10 }
 0x392   : > { %5063 = vmatprep.mubr.bf16.mxu0 %v19353_v18 }
 0x393   : > { %5225 = vmatmul.mubr.bf16.gmra.mrb[200].mxu1 %v15687_v62  ;;  %v19357_v62 = vld [vmem:[#allocation50_spill] sm:$0xff] }
 0x394   : > { %5232 = vmatprep.mubr.bf16.mxu1 %v15693_v36  ;;  %v11710_v16 = vpop.f32.mrb[92].mxu0 }
 0x395   : > { %v11711_v48 = vpop.f32.mrb[93].mxu0  ;;  %v11956_v40 = vpop.f32.mrb[96].mxu1 }
 0x396   : > { %v11712_v1 = vadd.f32 %v11711_v48, %v11710_v16  ;;  %v11713_v63 = vpop.f32.mrb[94].mxu0  ;;  %v11957_v50 = vpop.f32.mrb[97].mxu1 }
 0x397   : > { %v11714_v3 = vpop.f32.mrb[95].mxu0  ;;  %v11958_v35 = vadd.f32 %v11957_v50, %v11956_v40  ;;  %v11959_v46 = vpop.f32.mrb[98].mxu1 }
 0x398   : > { %v15950_v52 = vadd.f32 %v11824_v57, %v11712_v1  ;;  %v11715_v32 = vadd.f32 %v11714_v3, %v11713_v63  ;;  %v11960_v9 = vpop.f32.mrb[99].mxu1 }
 0x399   : > { %5064 = vmatmul.mubr.bf16.gmra.mrb[200].mxu0 %v19355_v26  ;;  %v11961_v39 = vadd.f32 %v11960_v9, %v11959_v46 }
 0x39a   : > { %19354 = vst [vmem:[#allocation14_spill] sm:$0xff] %v15950_v52  ;;  %v15953_v42 = vadd.f32 %v11827_v44, %v11715_v32  ;;  %5071 = vmatprep.mubr.bf16.mxu0 %v19357_v62  ;;  %v19358_v32 = vld [vmem:[#allocation49_spill] sm:$0xff] }
 0x39b   : > { %5233 = vmatmul.mubr.bf16.gmra.mrb[204].mxu1 %v15701_v4 }
 0x39c   : > { %19356 = vst [vmem:[#allocation13_spill] sm:$0xff] %v15953_v42  ;;  %5240 = vmatprep.mubr.bf16.mxu1 %v15707_v53  ;;  %v11844_v16 = vpop.f32.mrb[96].mxu0  ;;  %v19359_v42 = vld [vmem:[#allocation54_spill] sm:$0xff] }
 0x39d   : > { %v11845_v48 = vpop.f32.mrb[97].mxu0 }
 0x39e   : > { %v11846_v36 = vadd.f32 %v11845_v48, %v11844_v16  ;;  %v11962_v50 = vpop.f32.mrb[100].mxu1  ;;  %v11847_v40 = vpop.f32.mrb[98].mxu0 }
 0x39f   : > { %v11963_v57 = vpop.f32.mrb[101].mxu1  ;;  %v11848_v1 = vpop.f32.mrb[99].mxu0 }
 0x3a0   : > { %v4376_v3 = vadd.f32 %v11846_v36, %v15522_v43  ;;  %v11964_v63 = vadd.f32 %v11963_v57, %v11962_v50  ;;  %v11849_v52 = vadd.f32 %v11848_v1, %v11847_v40  ;;  %v11965_v46 = vpop.f32.mrb[102].mxu1 }
 0x3a1   : > { %v11966_v44 = vpop.f32.mrb[103].mxu1  ;;  %5072 = vmatmul.mubr.bf16.gmra.mrb[204].mxu0 %v19358_v32 }
 0x3a2   : > { %v4379_v9 = vadd.f32 %v11849_v52, %v15530_v59  ;;  %v11967_v4 = vadd.f32 %v11966_v44, %v11965_v46  ;;  %5079 = vmatprep.mubr.bf16.mxu0 %v19359_v42  ;;  %v15962_v53 = vadd.f32 %v11958_v35, %v4376_v3  ;;  %v19361_v3 = vld [vmem:[#allocation53_spill] sm:$0xff] }
 0x3a3   : > { %5241 = vmatmul.mubr.bf16.gmra.mrb[208].mxu1 %v15719_v58 }
 0x3a4   : > { %19360 = vst [vmem:[#allocation16_spill] sm:$0xff] %v15962_v53  ;;  %5248 = vmatprep.mubr.bf16.mxu1 %v15725_v20  ;;  %v11850_v16 = vpop.f32.mrb[100].mxu0  ;;  %v15966_v48 = vadd.f32 %v11961_v39, %v4379_v9  ;;  %v19362_v53 = vld [vmem:[#allocation60_spill] sm:$0xff] }
 0x3a5   : > { %v11851_v43 = vpop.f32.mrb[101].mxu0 }
 0x3a6   : > { %v11852_v36 = vadd.f32 %v11851_v43, %v11850_v16  ;;  %v11968_v50 = vpop.f32.mrb[104].mxu1  ;;  %v11853_v40 = vpop.f32.mrb[102].mxu0 }
 0x3a7   : > { %v11969_v57 = vpop.f32.mrb[105].mxu1  ;;  %v11854_v1 = vpop.f32.mrb[103].mxu0 }
 0x3a8   : > { %v4384_v59 = vadd.f32 %v11852_v36, %v15564_v37  ;;  %v11970_v52 = vadd.f32 %v11969_v57, %v11968_v50  ;;  %v11855_v46 = vadd.f32 %v11854_v1, %v11853_v40  ;;  %v11971_v44 = vpop.f32.mrb[106].mxu1 }
 0x3a9   : > { %v11972_v35 = vpop.f32.mrb[107].mxu1  ;;  %5080 = vmatmul.mubr.bf16.gmra.mrb[208].mxu0 %v19361_v3 }
 0x3aa   : > { %v4387_v58 = vadd.f32 %v11855_v46, %v15569_v23  ;;  %v11973_v20 = vadd.f32 %v11972_v35, %v11971_v44  ;;  %5087 = vmatprep.mubr.bf16.mxu0 %v19362_v53  ;;  %v15972_v39 = vadd.f32 %v11964_v63, %v4384_v59  ;;  %v19363_v59 = vld [vmem:[#allocation59_spill] sm:$0xff] }
 0x3ab   : > { %5249 = vmatmul.mubr.bf16.gmra.mrb[212].mxu1 %v15736_v60  ;;  %v19364_v60 = vld [vmem:[#allocation65_spill] sm:$0xff] }
 0x3ac   : > { %5256 = vmatprep.mubr.bf16.mxu1 %v15742_v17  ;;  %v11856_v9 = vpop.f32.mrb[104].mxu0  ;;  %v15976_v16 = vadd.f32 %v11967_v4, %v4387_v58 }
 0x3ad   : > { %v11857_v37 = vpop.f32.mrb[105].mxu0 }
 0x3ae   : > { %v11858_v43 = vadd.f32 %v11857_v37, %v11856_v9  ;;  %v11974_v36 = vpop.f32.mrb[108].mxu1  ;;  %v11859_v50 = vpop.f32.mrb[106].mxu0 }
 0x3af   : > { %v11975_v40 = vpop.f32.mrb[109].mxu1  ;;  %v11860_v57 = vpop.f32.mrb[107].mxu0 }
 0x3b0   : > { %v4392_v23 = vadd.f32 %v11858_v43, %v15594_v15  ;;  %v11976_v1 = vadd.f32 %v11975_v40, %v11974_v36  ;;  %v11861_v46 = vadd.f32 %v11860_v57, %v11859_v50  ;;  %v11977_v44 = vpop.f32.mrb[110].mxu1 }
 0x3b1   : > { %v11978_v63 = vpop.f32.mrb[111].mxu1  ;;  %5088 = vmatmul.mubr.bf16.gmra.mrb[212].mxu0 %v19363_v59 }
 0x3b2   : > { %v4395_v35 = vadd.f32 %v11861_v46, %v15596_v6  ;;  %v11979_v17 = vadd.f32 %v11978_v63, %v11977_v44  ;;  %5095 = vmatprep.mubr.bf16.mxu0 %v19364_v60  ;;  %v15982_v58 = vadd.f32 %v11970_v52, %v4392_v23  ;;  %v19365_v23 = vld [vmem:[#allocation64_spill] sm:$0xff] }
 0x3b3   : > { %5257 = vmatmul.mubr.bf16.gmra.mrb[216].mxu1 %v15754_v30  ;;  %v19366_v30 = vld [vmem:[#allocation71_spill] sm:$0xff] }
 0x3b4   : > { %5264 = vmatprep.mubr.bf16.mxu1 %v15760_v54  ;;  %v11862_v4 = vpop.f32.mrb[108].mxu0  ;;  %v15986_v9 = vadd.f32 %v11973_v20, %v4395_v35 }
 0x3b5   : > { %v11863_v15 = vpop.f32.mrb[109].mxu0 }
 0x3b6   : > { %v11864_v37 = vadd.f32 %v11863_v15, %v11862_v4  ;;  %v11980_v43 = vpop.f32.mrb[112].mxu1  ;;  %v11865_v36 = vpop.f32.mrb[110].mxu0 }
 0x3b7   : > { %v11981_v50 = vpop.f32.mrb[113].mxu1  ;;  %v11866_v40 = vpop.f32.mrb[111].mxu0 }
 0x3b8   : > { %v4400_v6 = vadd.f32 %v11864_v37, %v15612_v11  ;;  %v11982_v57 = vadd.f32 %v11981_v50, %v11980_v43  ;;  %v11867_v46 = vadd.f32 %v11866_v40, %v11865_v36  ;;  %v11983_v44 = vpop.f32.mrb[114].mxu1 }
 0x3b9   : > { %v11984_v52 = vpop.f32.mrb[115].mxu1  ;;  %5096 = vmatmul.mubr.bf16.gmra.mrb[216].mxu0 %v19365_v23 }
 0x3ba   : > { %v4403_v63 = vadd.f32 %v11867_v46, %v15614_v28  ;;  %v11985_v54 = vadd.f32 %v11984_v52, %v11983_v44  ;;  %5103 = vmatprep.mubr.bf16.mxu0 %v19366_v30  ;;  %v15992_v20 = vadd.f32 %v11976_v1, %v4400_v6  ;;  %v19367_v6 = vld [vmem:[#allocation70_spill] sm:$0xff] }
 0x3bb   : > { %5265 = vmatmul.mubr.bf16.gmra.mrb[220].mxu1 %v15773_v61 }
 0x3bc   : > { %6204 = vmatprep.mubr.bf16.mxu1 %v19335_v38  ;;  %v11868_v35 = vpop.f32.mrb[112].mxu0  ;;  %v15996_v4 = vadd.f32 %v11979_v17, %v4403_v63 }
 0x3bd   : > { %v11869_v11 = vpop.f32.mrb[113].mxu0 }
 0x3be   : > { %v11870_v15 = vadd.f32 %v11869_v11, %v11868_v35  ;;  %v11986_v37 = vpop.f32.mrb[116].mxu1  ;;  %v11871_v43 = vpop.f32.mrb[114].mxu0 }
 0x3bf   : > { %v11987_v36 = vpop.f32.mrb[117].mxu1  ;;  %v11872_v50 = vpop.f32.mrb[115].mxu0 }
 0x3c0   : > { %v4408_v28 = vadd.f32 %v11870_v15, %v15630_v7  ;;  %v11988_v40 = vadd.f32 %v11987_v36, %v11986_v37  ;;  %v11873_v46 = vadd.f32 %v11872_v50, %v11871_v43  ;;  %v11989_v44 = vpop.f32.mrb[118].mxu1 }
 0x3c1   : > { %v11990_v1 = vpop.f32.mrb[119].mxu1  ;;  %5104 = vmatmul.mubr.bf16.gmra.mrb[220].mxu0 %v19367_v6 }
 0x3c2   : > { %v4411_v52 = vadd.f32 %v11873_v46, %v15632_v21  ;;  %v11991_v38 = vadd.f32 %v11990_v1, %v11989_v44  ;;  %6043 = vmatprep.mubr.bf16.mxu0 %v14909_v5  ;;  %v16002_v17 = vadd.f32 %v11982_v57, %v4408_v28  ;;  %v13453_v21 = vld [vmem:[%s18973_s3 + $0x400] sm:$0xff]   ;;  %v13454_v5 = vld [vmem:[%s18973_s3 + $0x448] sm:$0xff]   ;;  %v19370_v44 = vld [vmem:[#allocation94_spill] sm:$0xff] }
 0x3c3   : > { %6205 = vmatmul.mubr.bf16.vlgmr.msra.gmra.mrb[224].mxu1 %v19336_v12  ;;  %v19368_v12 = vld [vmem:[#allocation93_spill] sm:$0xff] }
 0x3c4   : > { %6212 = vmatprep.mubr.bf16.mxu1 %v19337_v0  ;;  %v11874_v63 = vpop.f32.mrb[116].mxu0  ;;  %v16006_v35 = vadd.f32 %v11985_v54, %v4411_v52  ;;  %v19369_v46 = vld [vmem:[#allocation17_spill] sm:$0xff] }
 0x3c5   : > { %v11875_v7 = vpop.f32.mrb[117].mxu0 }
 0x3c6   : > { %v11876_v11 = vadd.f32 %v11875_v7, %v11874_v63  ;;  %v11992_v15 = vpop.f32.mrb[120].mxu1  ;;  %v11877_v37 = vpop.f32.mrb[118].mxu0  ;;  %v19371_v63 = vld [vmem:[#allocation20_spill] sm:$0xff] }
 0x3c7   : > { %v11993_v43 = vpop.f32.mrb[121].mxu1  ;;  %v11878_v36 = vpop.f32.mrb[119].mxu0  ;;  %v13455_v7 = vld [vmem:[%s18973_s3 + $0x408] sm:$0xff]  }
 0x3c8   : > { %v4416_v57 = vadd.f32 %v11876_v11, %v19368_v12  ;;  %v11994_v0 = vadd.f32 %v11993_v43, %v11992_v15  ;;  %v11879_v50 = vadd.f32 %v11878_v36, %v11877_v37  ;;  %v11995_v54 = vpop.f32.mrb[122].mxu1  ;;  %v13456_v11 = vld [vmem:[%s18973_s3 + $0x450] sm:$0xff]  }
 0x3c9   : > { %v11996_v28 = vpop.f32.mrb[123].mxu1  ;;  %6044 = vmatmul.mubr.bf16.vlgmr.msra.gmra.mrb[224].mxu0 %v19369_v46 }
 0x3ca   : > { %v4419_v1 = vadd.f32 %v11879_v50, %v19370_v44  ;;  %v11997_v52 = vadd.f32 %v11996_v28, %v11995_v54  ;;  %12501 = vmatpush3.bf16.msra.mxu0 %v13453_v21  ;;  %6051 = vmatprep.mubr.bf16.mxu0 %v19371_v63  ;;  %v16021_v61 = vadd.f32 %v11988_v40, %v4416_v57  ;;  %v13457_v40 = vld [vmem:[%s18973_s3 + $0x410] sm:$0xff]   ;;  %v13458_v57 = vld [vmem:[%s18973_s3 + $0x458] sm:$0xff]  }
 0x3cb   : > { %6213 = vmatmul.mubr.bf16.gmra.mrb[228].mxu1 %v19338_v14  ;;  %12502 = vmatprep.subr.bf16.mxu0 %v13454_v5  ;;  %v19373_v44 = vld [vmem:[#allocation21_spill] sm:$0xff] }
 0x3cc   : > { %6220 = vmatprep.mubr.bf16.mxu1 %v19339_v25  ;;  %v11880_v15 = vpop.f32.mrb[120].mxu0  ;;  %v16028_v37 = vadd.f32 %v11991_v38, %v4419_v1  ;;  %v19372_v25 = vld [vmem:[#allocation96_spill] sm:$0xff]  ;;  %v19374_v1 = vld [vmem:[#allocation97_spill] sm:$0xff] }
 0x3cd   : > { %v11881_v21 = vpop.f32.mrb[121].mxu0 }
 0x3ce   : > { %v11882_v43 = vadd.f32 %v11881_v21, %v11880_v15  ;;  %v11998_v36 = vpop.f32.mrb[124].mxu1  ;;  %v11883_v12 = vpop.f32.mrb[122].mxu0  ;;  %12503 = vmatpush3.bf16.msra.mxu0 %v13455_v7  ;;  %v19375_v15 = vld [vmem:[#allocation24_spill] sm:$0xff] }
 0x3cf   : > { %v11999_v14 = vpop.f32.mrb[125].mxu1  ;;  %v11884_v5 = vpop.f32.mrb[123].mxu0  ;;  %12504 = vmatprep.subr.bf16.mxu0 %v13456_v11  ;;  %v13459_v11 = vld [vmem:[%s18973_s3 + $0x418] sm:$0xff]  }
 0x3d0   : > { %v4424_v50 = vadd.f32 %v11882_v43, %v19372_v25  ;;  %v12000_v38 = vadd.f32 %v11999_v14, %v11998_v36  ;;  %v11885_v54 = vadd.f32 %v11884_v5, %v11883_v12  ;;  %v12001_v28 = vpop.f32.mrb[126].mxu1  ;;  %v13460_v43 = vld [vmem:[%s18973_s3 + $0x460] sm:$0xff]  }
 0x3d1   : > { %v12002_v46 = vpop.f32.mrb[127].mxu1  ;;  %6052 = vmatmul.mubr.bf16.gmra.mrb[228].mxu0 %v19373_v44 }
 0x3d2   : > { %v4427_v63 = vadd.f32 %v11885_v54, %v19374_v1  ;;  %v12003_v7 = vadd.f32 %v12002_v46, %v12001_v28  ;;  %6059 = vmatprep.mubr.bf16.mxu0 %v19375_v15  ;;  %12505 = vmatpush3.bf16.msra.mxu0 %v13457_v40  ;;  %v16043_v21 = vadd.f32 %v11994_v0, %v4424_v50  ;;  %v13461_v0 = vld [vmem:[%s18973_s3 + $0x420] sm:$0xff]   ;;  %v13462_v50 = vld [vmem:[%s18973_s3 + $0x468] sm:$0xff]  }
 0x3d3   : > { %6221 = vmatmul.mubr.bf16.gmra.mrb[232].mxu1 %v19340_v47  ;;  %12506 = vmatprep.subr.bf16.mxu0 %v13458_v57  ;;  %v19377_v1 = vld [vmem:[#allocation25_spill] sm:$0xff] }
 0x3d4   : > { %6228 = vmatprep.mubr.bf16.mxu1 %v19341_v34  ;;  %v11886_v36 = vpop.f32.mrb[124].mxu0  ;;  %v16050_v12 = vadd.f32 %v11997_v52, %v4427_v63  ;;  %v19376_v34 = vld [vmem:[#allocation102_spill] sm:$0xff]  ;;  %v19378_v63 = vld [vmem:[#allocation103_spill] sm:$0xff] }
 0x3d5   : > { %v11887_v14 = vpop.f32.mrb[125].mxu0 }
 0x3d6   : > { %v11888_v40 = vadd.f32 %v11887_v14, %v11886_v36  ;;  %v12004_v5 = vpop.f32.mrb[128].mxu1  ;;  %v11889_v25 = vpop.f32.mrb[126].mxu0  ;;  %12507 = vmatpush3.bf16.msra.mxu0 %v13459_v11  ;;  %v19379_v36 = vld [vmem:[#allocation28_spill] sm:$0xff] }
 0x3d7   : > { %v12005_v47 = vpop.f32.mrb[129].mxu1  ;;  %v11890_v57 = vpop.f32.mrb[127].mxu0  ;;  %12508 = vmatprep.subr.bf16.mxu0 %v13460_v43  ;;  %v13463_v43 = vld [vmem:[%s18973_s3 + $0x428] sm:$0xff]  }
 0x3d8   : > { %v4432_v54 = vadd.f32 %v11888_v40, %v19376_v34  ;;  %v12006_v52 = vadd.f32 %v12005_v47, %v12004_v5  ;;  %v11891_v28 = vadd.f32 %v11890_v57, %v11889_v25  ;;  %v12007_v46 = vpop.f32.mrb[130].mxu1  ;;  %v13464_v40 = vld [vmem:[%s18973_s3 + $0x470] sm:$0xff]  }
 0x3d9   : > { %v12008_v44 = vpop.f32.mrb[131].mxu1  ;;  %6060 = vmatmul.mubr.bf16.gmra.mrb[232].mxu0 %v19377_v1 }
 0x3da   : > { %v4435_v15 = vadd.f32 %v11891_v28, %v19378_v63  ;;  %v12009_v11 = vadd.f32 %v12008_v44, %v12007_v46  ;;  %6067 = vmatprep.mubr.bf16.mxu0 %v19379_v36  ;;  %12509 = vmatpush3.bf16.msra.mxu0 %v13461_v0  ;;  %v16065_v14 = vadd.f32 %v12000_v38, %v4432_v54  ;;  %v13465_v38 = vld [vmem:[%s18973_s3 + $0x430] sm:$0xff]   ;;  %v13466_v54 = vld [vmem:[%s18973_s3 + $0x478] sm:$0xff]  }
 0x3db   : > { %6229 = vmatmul.mubr.bf16.gmra.mrb[236].mxu1 %v19342_v24  ;;  %12510 = vmatprep.subr.bf16.mxu0 %v13462_v50  ;;  %v19381_v63 = vld [vmem:[#allocation29_spill] sm:$0xff] }
 0x3dc   : > { %6236 = vmatprep.mubr.bf16.mxu1 %v19343_v31  ;;  %v11892_v5 = vpop.f32.mrb[128].mxu0  ;;  %v16072_v25 = vadd.f32 %v12003_v7, %v4435_v15  ;;  %v19380_v31 = vld [vmem:[#allocation106_spill] sm:$0xff]  ;;  %v19382_v15 = vld [vmem:[#allocation107_spill] sm:$0xff] }
 0x3dd   : > { %v11893_v47 = vpop.f32.mrb[129].mxu0 }
 0x3de   : > { %v11894_v0 = vadd.f32 %v11893_v47, %v11892_v5  ;;  %v12010_v57 = vpop.f32.mrb[132].mxu1  ;;  %v11895_v34 = vpop.f32.mrb[130].mxu0  ;;  %12511 = vmatpush3.bf16.msra.mxu0 %v13463_v43  ;;  %v19383_v5 = vld [vmem:[#allocation30_spill] sm:$0xff] }
 0x3df   : > { %v12011_v24 = vpop.f32.mrb[133].mxu1  ;;  %v11896_v50 = vpop.f32.mrb[131].mxu0  ;;  %12512 = vmatprep.subr.bf16.mxu0 %v13464_v40  ;;  %v13467_v40 = vld [vmem:[%s18973_s3 + $0x438] sm:$0xff]  }
 0x3e0   : > { %v4440_v28 = vadd.f32 %v11894_v0, %v19380_v31  ;;  %v12012_v7 = vadd.f32 %v12011_v24, %v12010_v57  ;;  %v11897_v46 = vadd.f32 %v11896_v50, %v11895_v34  ;;  %v12013_v44 = vpop.f32.mrb[134].mxu1 }
 0x3e1   : > { %v12014_v1 = vpop.f32.mrb[135].mxu1  ;;  %6068 = vmatmul.mubr.bf16.gmra.mrb[236].mxu0 %v19381_v63 }
 0x3e2   : > { %v4443_v36 = vadd.f32 %v11897_v46, %v19382_v15  ;;  %v12015_v43 = vadd.f32 %v12014_v1, %v12013_v44  ;;  %6075 = vmatprep.mubr.bf16.mxu0 %v19383_v5  ;;  %12513 = vmatpush3.bf16.msra.mxu0 %v13465_v38  ;;  %v16087_v47 = vadd.f32 %v12006_v52, %v4440_v28  ;;  %v19384_v44 = vld [vmem:[#allocation109_spill] sm:$0xff] }
 0x3e3   : > { %6237 = vmatmul.mubr.bf16.gmra.mrb[240].mxu1 %v19344_v27  ;;  %12514 = vmatprep.subr.bf16.mxu0 %v13466_v54  ;;  %v19385_v27 = vld [vmem:[#allocation31_spill] sm:$0xff]  ;;  %v19386_v54 = vld [vmem:[#allocation110_spill] sm:$0xff] }
 0x3e4   : > { %6244 = vmatprep.mubr.bf16.mxu1 %v19345_v55  ;;  %v11898_v0 = vpop.f32.mrb[132].mxu0  ;;  %v16091_v57 = vadd.f32 %v12009_v11, %v4443_v36  ;;  %v19387_v11 = vld [vmem:[#allocation34_spill] sm:$0xff] }
 0x3e5   : > { %v11899_v34 = vpop.f32.mrb[133].mxu0 }
 0x3e6   : > { %v11900_v24 = vadd.f32 %v11899_v34, %v11898_v0  ;;  %v12016_v50 = vpop.f32.mrb[136].mxu1  ;;  %v11901_v31 = vpop.f32.mrb[134].mxu0  ;;  %12515 = vmatpush3.bf16.msra.mxu0 %v13467_v40 }
 0x3e7   : > { %v12017_v38 = vpop.f32.mrb[137].mxu1  ;;  %v11902_v46 = vpop.f32.mrb[135].mxu0 }
 0x3e8   : > { %v4448_v1 = vadd.f32 %v11900_v24, %v19384_v44  ;;  %v12018_v63 = vadd.f32 %v12017_v38, %v12016_v50  ;;  %v11903_v52 = vadd.f32 %v11902_v46, %v11901_v31  ;;  %v12019_v28 = vpop.f32.mrb[138].mxu1 }
 0x3e9   : > { %v12020_v15 = vpop.f32.mrb[139].mxu1  ;;  %6076 = vmatmul.mubr.bf16.gmra.mrb[240].mxu0 %v19385_v27  ;;  %v19389_v27 = vld [vmem:[#allocation39_spill] sm:$0xff] }
 0x3ea   : > { %v4451_v55 = vadd.f32 %v11903_v52, %v19386_v54  ;;  %v12021_v5 = vadd.f32 %v12020_v15, %v12019_v28  ;;  %6083 = vmatprep.mubr.bf16.mxu0 %v19387_v11  ;;  %v16097_v36 = vadd.f32 %v12012_v7, %v4448_v1  ;;  %v19388_v1 = vld [vmem:[#allocation35_spill] sm:$0xff] }
 0x3eb   : > { %6245 = vmatmul.mubr.bf16.gmra.mrb[244].mxu1 %v19346_v2 }
 0x3ec   : > { %6252 = vmatprep.mubr.bf16.mxu1 %v19347_v49  ;;  %v11904_v40 = vpop.f32.mrb[136].mxu0  ;;  %v16101_v0 = vadd.f32 %v12015_v43, %v4451_v55 }
 0x3ed   : > { %v11905_v34 = vpop.f32.mrb[137].mxu0 }
 0x3ee   : > { %v11906_v24 = vadd.f32 %v11905_v34, %v11904_v40  ;;  %v12022_v50 = vpop.f32.mrb[140].mxu1  ;;  %v11907_v31 = vpop.f32.mrb[138].mxu0 }
 0x3ef   : > { %v12023_v38 = vpop.f32.mrb[141].mxu1  ;;  %v11908_v46 = vpop.f32.mrb[139].mxu0 }
 0x3f0   : > { %v4456_v44 = vadd.f32 %v11906_v24, %v15787_v45  ;;  %v12024_v52 = vadd.f32 %v12023_v38, %v12022_v50  ;;  %v11909_v28 = vadd.f32 %v11908_v46, %v11907_v31  ;;  %v12025_v15 = vpop.f32.mrb[142].mxu1 }
 0x3f1   : > { %v12026_v7 = vpop.f32.mrb[143].mxu1  ;;  %6084 = vmatmul.mubr.bf16.gmra.mrb[244].mxu0 %v19388_v1 }
 0x3f2   : > { %v4459_v2 = vadd.f32 %v11909_v28, %v15790_v19  ;;  %v12027_v49 = vadd.f32 %v12026_v7, %v12025_v15  ;;  %6091 = vmatprep.mubr.bf16.mxu0 %v19389_v27  ;;  %v16107_v43 = vadd.f32 %v12018_v63, %v4456_v44  ;;  %v19390_v44 = vld [vmem:[#allocation40_spill] sm:$0xff]  ;;  %v19391_v28 = vld [vmem:[#allocation45_spill] sm:$0xff] }
 0x3f3   : > { %6253 = vmatmul.mubr.bf16.gmra.mrb[248].mxu1 %v19349_v41 }
 0x3f4   : > { %6260 = vmatprep.mubr.bf16.mxu1 %v19351_v33  ;;  %v11910_v54 = vpop.f32.mrb[140].mxu0  ;;  %v16111_v55 = vadd.f32 %v12021_v5, %v4459_v2 }
 0x3f5   : > { %v11911_v45 = vpop.f32.mrb[141].mxu0 }
 0x3f6   : > { %v11912_v11 = vadd.f32 %v11911_v45, %v11910_v54  ;;  %v12028_v40 = vpop.f32.mrb[144].mxu1  ;;  %v11913_v34 = vpop.f32.mrb[142].mxu0 }
 0x3f7   : > { %v12029_v24 = vpop.f32.mrb[145].mxu1  ;;  %v11914_v50 = vpop.f32.mrb[143].mxu0 }
 0x3f8   : > { %v4464_v19 = vadd.f32 %v11912_v11, %v15806_v8  ;;  %v12030_v31 = vadd.f32 %v12029_v24, %v12028_v40  ;;  %v11915_v38 = vadd.f32 %v11914_v50, %v11913_v34  ;;  %v12031_v46 = vpop.f32.mrb[146].mxu1  ;;  %v19392_v24 = vld [vmem:[#allocation47_spill] sm:$0xff] }
 0x3f9   : > { %v12032_v63 = vpop.f32.mrb[147].mxu1  ;;  %6092 = vmatmul.mubr.bf16.gmra.mrb[248].mxu0 %v19390_v44  ;;  %v19393_v50 = vld [vmem:[#allocation51_spill] sm:$0xff] }
 0x3fa   : > { %v4467_v41 = vadd.f32 %v11915_v38, %v15815_v29  ;;  %v12033_v33 = vadd.f32 %v12032_v63, %v12031_v46  ;;  %6099 = vmatprep.mubr.bf16.mxu0 %v19391_v28  ;;  %v16117_v5 = vadd.f32 %v12024_v52, %v4464_v19 }
 0x3fb   : > { %6261 = vmatmul.mubr.bf16.gmra.mrb[252].mxu1 %v19352_v10 }
 0x3fc   : > { %6268 = vmatprep.mubr.bf16.mxu1 %v19353_v18  ;;  %v11916_v15 = vpop.f32.mrb[144].mxu0  ;;  %v16121_v7 = vadd.f32 %v12027_v49, %v4467_v41 }
 0x3fd   : > { %v11917_v8 = vpop.f32.mrb[145].mxu0 }
 0x3fe   : > { %v11918_v1 = vadd.f32 %v11917_v8, %v11916_v15  ;;  %v12034_v2 = vpop.f32.mrb[148].mxu1  ;;  %v11919_v27 = vpop.f32.mrb[146].mxu0 }
 0x3ff   : > { %v12035_v54 = vpop.f32.mrb[149].mxu1  ;;  %v11920_v45 = vpop.f32.mrb[147].mxu0 }
 0x400   : > { %v4472_v29 = vadd.f32 %v11918_v1, %v15914_v13  ;;  %v12036_v11 = vadd.f32 %v12035_v54, %v12034_v2  ;;  %v11921_v40 = vadd.f32 %v11920_v45, %v11919_v27  ;;  %v12037_v34 = vpop.f32.mrb[150].mxu1  ;;  %v19394_v2 = vld [vmem:[#allocation52_spill] sm:$0xff]  ;;  %v19395_v27 = vld [vmem:[#allocation55_spill] sm:$0xff] }
 0x401   : > { %v12038_v52 = vpop.f32.mrb[151].mxu1  ;;  %6100 = vmatmul.mubr.bf16.gmra.mrb[252].mxu0 %v19392_v24 }
 0x402   : > { %v4475_v10 = vadd.f32 %v11921_v40, %v15917_v22  ;;  %v12039_v18 = vadd.f32 %v12038_v52, %v12037_v34  ;;  %6107 = vmatprep.mubr.bf16.mxu0 %v19393_v50  ;;  %v16127_v49 = vadd.f32 %v12030_v31, %v4472_v29 }
 0x403   : > { %6269 = vmatmul.mubr.bf16.gmra.mrb[0].mxu1 %v19355_v26 }
 0x404   : > { %6276 = vmatprep.mubr.bf16.mxu1 %v19357_v62  ;;  %v11922_v19 = vpop.f32.mrb[148].mxu0  ;;  %v16131_v38 = vadd.f32 %v12033_v33, %v4475_v10  ;;  %v19396_v10 = vld [vmem:[#allocation12_spill] sm:$0xff] }
 0x405   : > { %v11923_v13 = vpop.f32.mrb[149].mxu0 }
 0x406   : > { %v11924_v46 = vadd.f32 %v11923_v13, %v11922_v19  ;;  %v12040_v63 = vpop.f32.mrb[152].mxu1  ;;  %v11925_v44 = vpop.f32.mrb[150].mxu0 }
 0x407   : > { %v12041_v41 = vpop.f32.mrb[153].mxu1  ;;  %v11926_v28 = vpop.f32.mrb[151].mxu0 }
 0x408   : > { %v4480_v22 = vadd.f32 %v11924_v46, %v15926_v56  ;;  %v12042_v15 = vadd.f32 %v12041_v41, %v12040_v63  ;;  %v11927_v8 = vadd.f32 %v11926_v28, %v11925_v44  ;;  %v12043_v1 = vpop.f32.mrb[154].mxu1  ;;  %v19397_v46 = vld [vmem:[#allocation56_spill] sm:$0xff]  ;;  %v19399_v44 = vld [vmem:[#allocation57_spill] sm:$0xff] }
 0x409   : > { %v12044_v31 = vpop.f32.mrb[155].mxu1  ;;  %6108 = vmatmul.mubr.bf16.gmra.mrb[0].mxu0 %v19394_v2 }
 0x40a   : > { %v4483_v26 = vadd.f32 %v11927_v8, %v15929_v51  ;;  %v12045_v62 = vadd.f32 %v12044_v31, %v12043_v1  ;;  %6115 = vmatprep.mubr.bf16.mxu0 %v19395_v27  ;;  %v16137_v33 = vadd.f32 %v12036_v11, %v4480_v22  ;;  %v19400_v27 = vld [vmem:[#allocation14_spill] sm:$0xff] }
 0x40b   : > { %6277 = vmatmul.mubr.bf16.gmra.mrb[4].mxu1 %v19358_v32  ;;  %v19398_v32 = vld [vmem:[#allocation11_spill] sm:$0xff] }
 0x40c   : > { %6284 = vmatprep.mubr.bf16.mxu1 %v19359_v42  ;;  %v11928_v54 = vpop.f32.mrb[152].mxu0  ;;  %v16141_v45 = vadd.f32 %v12039_v18, %v4483_v26 }
 0x40d   : > { %v11929_v56 = vpop.f32.mrb[153].mxu0 }
 0x40e   : > { %v11930_v29 = vadd.f32 %v11929_v56, %v11928_v54  ;;  %v12046_v40 = vpop.f32.mrb[156].mxu1  ;;  %v11931_v34 = vpop.f32.mrb[154].mxu0 }
 0x40f   : > { %v12047_v52 = vpop.f32.mrb[157].mxu1  ;;  %v11932_v24 = vpop.f32.mrb[155].mxu0 }
 0x410   : > { %v4488_v51 = vadd.f32 %v11930_v29, %v19396_v10  ;;  %v12048_v50 = vadd.f32 %v12047_v52, %v12046_v40  ;;  %v11933_v19 = vadd.f32 %v11932_v24, %v11931_v34  ;;  %v12049_v13 = vpop.f32.mrb[158].mxu1 }
 0x411   : > { %v12050_v11 = vpop.f32.mrb[159].mxu1  ;;  %6116 = vmatmul.mubr.bf16.gmra.mrb[4].mxu0 %v19397_v46 }
 0x412   : > { %v4491_v63 = vadd.f32 %v11933_v19, %v19398_v32  ;;  %v12051_v42 = vadd.f32 %v12050_v11, %v12049_v13  ;;  %6123 = vmatprep.mubr.bf16.mxu0 %v19399_v44  ;;  %v16147_v18 = vadd.f32 %v12042_v15, %v4488_v51  ;;  %v19401_v15 = vld [vmem:[#allocation58_spill] sm:$0xff]  ;;  %v19404_v44 = vld [vmem:[#allocation16_spill] sm:$0xff] }
 0x413   : > { %6285 = vmatmul.mubr.bf16.gmra.mrb[8].mxu1 %v19361_v3  ;;  %v19402_v3 = vld [vmem:[#allocation13_spill] sm:$0xff] }
 0x414   : > { %6292 = vmatprep.mubr.bf16.mxu1 %v19362_v53  ;;  %v11934_v41 = vpop.f32.mrb[156].mxu0  ;;  %v16151_v28 = vadd.f32 %v12045_v62, %v4491_v63  ;;  %v19403_v53 = vld [vmem:[#allocation62_spill] sm:$0xff] }
 0x415   : > { %v11935_v22 = vpop.f32.mrb[157].mxu0 }
 0x416   : > { %v11936_v8 = vadd.f32 %v11935_v22, %v11934_v41  ;;  %v11937_v1 = vpop.f32.mrb[158].mxu0  ;;  %v12180_v31 = vpop.f32.mrb[160].mxu1 }
 0x417   : > { %v11938_v2 = vpop.f32.mrb[159].mxu0  ;;  %v12181_v26 = vpop.f32.mrb[161].mxu1 }
 0x418   : > { %v4496_v54 = vadd.f32 %v11936_v8, %v19400_v27  ;;  %v11939_v56 = vadd.f32 %v11938_v2, %v11937_v1  ;;  %v12182_v29 = vadd.f32 %v12181_v26, %v12180_v31  ;;  %v12183_v40 = vpop.f32.mrb[162].mxu1  ;;  %v19405_v31 = vld [vmem:[#allocation63_spill] sm:$0xff]  ;;  %v19406_v2 = vld [vmem:[#allocation68_spill] sm:$0xff] }
 0x419   : > { %6124 = vmatmul.mubr.bf16.gmra.mrb[8].mxu0 %v19401_v15  ;;  %v12184_v34 = vpop.f32.mrb[163].mxu1 }
 0x41a   : > { %v4499_v52 = vadd.f32 %v11939_v56, %v19402_v3  ;;  %6131 = vmatprep.mubr.bf16.mxu0 %v19403_v53  ;;  %v12185_v62 = vadd.f32 %v12184_v34, %v12183_v40  ;;  %v16157_v24 = vadd.f32 %v12048_v50, %v4496_v54 }
 0x41b   : > { %6293 = vmatmul.mubr.bf16.gmra.mrb[12].mxu1 %v19363_v59 }
 0x41c   : > { %6300 = vmatprep.mubr.bf16.mxu1 %v19364_v60  ;;  %v12068_v10 = vpop.f32.mrb[160].mxu0  ;;  %v16161_v51 = vadd.f32 %v12051_v42, %v4499_v52 }
 0x41d   : > { %v12069_v19 = vpop.f32.mrb[161].mxu0 }
 0x41e   : > { %v12070_v13 = vadd.f32 %v12069_v19, %v12068_v10  ;;  %v12186_v11 = vpop.f32.mrb[164].mxu1  ;;  %v12071_v46 = vpop.f32.mrb[162].mxu0  ;;  %v19407_v19 = vld [vmem:[#allocation69_spill] sm:$0xff] }
 0x41f   : > { %v12187_v32 = vpop.f32.mrb[165].mxu1  ;;  %v12072_v63 = vpop.f32.mrb[163].mxu0 }
 0x420   : > { %v4986_v41 = vadd.f32 %v12070_v13, %v19404_v44  ;;  %v12188_v22 = vadd.f32 %v12187_v32, %v12186_v11  ;;  %v12073_v8 = vadd.f32 %v12072_v63, %v12071_v46  ;;  %v12189_v1 = vpop.f32.mrb[166].mxu1  ;;  %v19408_v13 = vld [vmem:[#allocation73_spill] sm:$0xff]  ;;  %v13469_v32 = vld [vmem:[%s18975_s5] sm:$0xff]  }
 0x421   : > { %v12190_v50 = vpop.f32.mrb[167].mxu1  ;;  %6132 = vmatmul.mubr.bf16.gmra.mrb[12].mxu0 %v19405_v31 }
 0x422   : > { %v4989_v59 = vadd.f32 %v12073_v8, %v15966_v48  ;;  %v12191_v60 = vadd.f32 %v12190_v50, %v12189_v1  ;;  %6139 = vmatprep.mubr.bf16.mxu0 %v19406_v2  ;;  %v16167_v42 = vadd.f32 %v12182_v29, %v4986_v41 }
 0x423   : > { %6301 = vmatmul.mubr.bf16.gmra.mrb[16].mxu1 %v19365_v23 }
 0x424   : > { %6308 = vmatprep.mubr.bf16.mxu1 %v19366_v30  ;;  %v12074_v26 = vpop.f32.mrb[164].mxu0  ;;  %v16171_v27 = vadd.f32 %v12185_v62, %v4989_v59  ;;  %v13468_v62 = vld [vmem:[%s18975_s5 + $0x40] sm:$0xff]  }
 0x425   : > { %v12075_v54 = vpop.f32.mrb[165].mxu0  ;;  %12612 = vmatprep.subr.bf16.mxu1 %v13468_v62 }
 0x426   : > { %v12076_v56 = vadd.f32 %v12075_v54, %v12074_v26  ;;  %v12192_v40 = vpop.f32.mrb[168].mxu1  ;;  %v12077_v15 = vpop.f32.mrb[166].mxu0  ;;  %12613 = vmatpush3.bf16.msra.mxu1 %v13469_v32  ;;  %v19410_v26 = vld [vmem:[#allocation74_spill] sm:$0xff] }
 0x427   : > { %v12193_v34 = vpop.f32.mrb[169].mxu1  ;;  %v12078_v3 = vpop.f32.mrb[167].mxu0 }
 0x428   : > { %v4994_v48 = vadd.f32 %v12076_v56, %v15972_v39  ;;  %v12194_v52 = vadd.f32 %v12193_v34, %v12192_v40  ;;  %v12079_v53 = vadd.f32 %v12078_v3, %v12077_v15  ;;  %v12195_v10 = vpop.f32.mrb[170].mxu1  ;;  %v19409_v39 = vld [vmem:[#allocation76_spill] sm:$0xff]  ;;  %v19412_v15 = vld [vmem:[#allocation75_spill] sm:$0xff]  ;;  %v19413_v3 = vmov 0  }
 0x429   : > { %v12196_v29 = vpop.f32.mrb[171].mxu1  ;;  %6140 = vmatmul.mubr.bf16.gmra.mrb[16].mxu0 %v19407_v19 }
 0x42a   : > { %v4997_v23 = vadd.f32 %v12079_v53, %v15976_v16  ;;  %v12197_v30 = vadd.f32 %v12196_v29, %v12195_v10  ;;  %6147 = vmatprep.mubr.bf16.mxu0 %v19408_v13  ;;  %v16180_v11 = vadd.f32 %v12188_v22, %v4994_v48 }
 0x42b   : > { %6309 = vmatmul.mubr.bf16.gmra.mrb[20].mxu1 %v19367_v6 }
 0x42c   : > { %6316 = vmatprep.mubr.bf16.mxu1 %v19409_v39  ;;  %v12080_v46 = vpop.f32.mrb[168].mxu0  ;;  %v16187_v16 = vadd.f32 %v12191_v60, %v4997_v23  ;;  %v19411_v60 = vld [vmem:[#allocation78_spill] sm:$0xff] }
 0x42d   : > { %v12081_v63 = vpop.f32.mrb[169].mxu0 }
 0x42e   : > { %v12082_v44 = vadd.f32 %v12081_v63, %v12080_v46  ;;  %v12198_v41 = vpop.f32.mrb[172].mxu1  ;;  %v12083_v8 = vpop.f32.mrb[170].mxu0  ;;  %v19414_v46 = vld [vmem:[#allocation79_spill] sm:$0xff] }
 0x42f   : > { %v12199_v1 = vpop.f32.mrb[173].mxu1  ;;  %v12084_v22 = vpop.f32.mrb[171].mxu0 }
 0x430   : > { %v5002_v50 = vadd.f32 %v12082_v44, %v15982_v58  ;;  %v12200_v6 = vadd.f32 %v12199_v1, %v12198_v41  ;;  %v12085_v31 = vadd.f32 %v12084_v22, %v12083_v8  ;;  %v12201_v59 = vpop.f32.mrb[174].mxu1  ;;  %v19415_v44 = vld [vmem:[#allocation77_spill] sm:$0xff] }
 0x431   : > { %v12202_v2 = vpop.f32.mrb[175].mxu1  ;;  %6148 = vmatmul.mubr.bf16.gmra.mrb[20].mxu0 %v19410_v26  ;;  %v13471_v8 = vld [vmem:[%s18975_s5 + $0x8] sm:$0xff]  }
 0x432   : > { %v5005_v54 = vadd.f32 %v12085_v31, %v15986_v9  ;;  %v12203_v56 = vadd.f32 %v12202_v2, %v12201_v59  ;;  %6155 = vmatprep.mubr.bf16.mxu0 %v19411_v60  ;;  %v16193_v40 = vadd.f32 %v12194_v52, %v5002_v50 }
 0x433   : > { %6317 = vmatmul.mubr.bf16.gmra.mrb[24].mxu1 %v19412_v15 }
 0x434   : > { %v12086_v34 = vpop.f32.mrb[172].mxu0  ;;  %6324 = vmatprep.mubr.bf16.mxu1 %v19413_v3  ;;  %v16197_v48 = vadd.f32 %v12197_v30, %v5005_v54  ;;  %v13470_v30 = vld [vmem:[%s18975_s5 + $0x48] sm:$0xff]  }
 0x435   : > { %v12087_v58 = vpop.f32.mrb[173].mxu0  ;;  %12614 = vmatprep.subr.bf16.mxu1 %v13470_v30 }
 0x436   : > { %v12088_v53 = vadd.f32 %v12087_v58, %v12086_v34  ;;  %v12204_v10 = vpop.f32.mrb[176].mxu1  ;;  %v12089_v29 = vpop.f32.mrb[174].mxu0  ;;  %12615 = vmatpush3.bf16.msra.mxu1 %v13471_v8 }
 0x437   : > { %v12205_v19 = vpop.f32.mrb[177].mxu1  ;;  %v12090_v23 = vpop.f32.mrb[175].mxu0 }
 0x438   : > { %v5010_v9 = vadd.f32 %v12088_v53, %v15992_v20  ;;  %v12206_v13 = vadd.f32 %v12205_v19, %v12204_v10  ;;  %v12091_v62 = vadd.f32 %v12090_v23, %v12089_v29  ;;  %v12207_v39 = vpop.f32.mrb[178].mxu1 }
 0x439   : > { %v12208_v52 = vpop.f32.mrb[179].mxu1  ;;  %6156 = vmatmul.mubr.bf16.gmra.mrb[24].mxu0 %v19414_v46 }
 0x43a   : > { %v5013_v32 = vadd.f32 %v12091_v62, %v15996_v4  ;;  %v12209_v63 = vadd.f32 %v12208_v52, %v12207_v39  ;;  %6163 = vmatprep.mubr.bf16.mxu0 %v19415_v44  ;;  %v16206_v41 = vadd.f32 %v12200_v6, %v5010_v9 }
 0x43b   : > { %6325 = vmatmul.mubr.bf16.gmra.mrb[28].mxu1 %v19413_v3 }
 0x43c   : > { %v12092_v20 = vpop.f32.mrb[176].mxu0  ;;  %7647 = vmatprep.mubr.bf16.mxu1 %v19413_v3  ;;  %v16213_v4 = vadd.f32 %v12203_v56, %v5013_v32  ;;  %v19416_v56 = vld [vmem:[#allocation80_spill] sm:$0xff] }
 0x43d   : > { %v12093_v1 = vpop.f32.mrb[177].mxu0 }
 0x43e   : > { %v12094_v22 = vadd.f32 %v12093_v1, %v12092_v20  ;;  %v12210_v50 = vpop.f32.mrb[180].mxu1  ;;  %v12095_v31 = vpop.f32.mrb[178].mxu0  ;;  %v19417_v20 = vld [vmem:[#allocation81_spill] sm:$0xff]  ;;  %v19418_v1 = vld [vmem:[#allocation82_spill] sm:$0xff] }
 0x43f   : > { %v12211_v59 = vpop.f32.mrb[181].mxu1  ;;  %v12096_v6 = vpop.f32.mrb[179].mxu0 }
 0x440   : > { %v5018_v2 = vadd.f32 %v12094_v22, %v16002_v17  ;;  %v12212_v26 = vadd.f32 %v12211_v59, %v12210_v50  ;;  %v12097_v54 = vadd.f32 %v12096_v6, %v12095_v31  ;;  %v12213_v60 = vpop.f32.mrb[182].mxu1 }
 0x441   : > { %v12214_v15 = vpop.f32.mrb[183].mxu1  ;;  %6164 = vmatmul.mubr.bf16.gmra.mrb[28].mxu0 %v19415_v44 }
 0x442   : > { %v5021_v34 = vadd.f32 %v12097_v54, %v16006_v35  ;;  %v12215_v58 = vadd.f32 %v12214_v15, %v12213_v60  ;;  %6365 = vmatprep.mubr.bf16.mxu0 %v19416_v56  ;;  %v16219_v53 = vadd.f32 %v12206_v13, %v5018_v2 }
 0x444   : > { %v12098_v10 = vpop.f32.mrb[180].mxu0  ;;  %v16221_v29 = vadd.f32 %v12209_v63, %v5021_v34  ;;  %v13472_v63 = vld [vmem:[%s18975_s5 + $0x50] sm:$0xff]  }
 0x445   : > { %v12099_v19 = vpop.f32.mrb[181].mxu0  ;;  %12616 = vmatprep.subr.bf16.mxu1 %v13472_v63 }
 0x446   : > { %v12100_v23 = vadd.f32 %v12099_v19, %v12098_v10  ;;  %v12216_v9 = vpop.f32.mrb[184].mxu1  ;;  %v12101_v17 = vpop.f32.mrb[182].mxu0  ;;  %v19419_v19 = vld [vmem:[#allocation83_spill] sm:$0xff] }
 0x447   : > { %v12217_v62 = vpop.f32.mrb[185].mxu1  ;;  %v12102_v39 = vpop.f32.mrb[183].mxu0 }
 0x448   : > { %v5026_v52 = vadd.f32 %v12100_v23, %v16021_v61  ;;  %v12218_v46 = vadd.f32 %v12217_v62, %v12216_v9  ;;  %v12103_v32 = vadd.f32 %v12102_v39, %v12101_v17  ;;  %v12219_v30 = vpop.f32.mrb[186].mxu1  ;;  %v13473_v61 = vld [vmem:[%s18975_s5 + $0x10] sm:$0xff]  }
 0x449   : > { %v12220_v35 = vpop.f32.mrb[187].mxu1  ;;  %6366 = vmatmul.mubr.bf16.vlgmr.msra.gmra.mrb[32].mxu0 %v19417_v20  ;;  %12617 = vmatpush3.bf16.msra.mxu1 %v13473_v61  ;;  %v19421_v61 = vld [vmem:[#allocation85_spill] sm:$0xff] }
 0x44a   : > { %v5029_v13 = vadd.f32 %v12103_v32, %v16028_v37  ;;  %v12221_v8 = vadd.f32 %v12220_v35, %v12219_v30  ;;  %6373 = vmatprep.mubr.bf16.mxu0 %v19418_v1  ;;  %v16230_v22 = vadd.f32 %v12212_v26, %v5026_v52 }
 0x44c   : > { %v12104_v50 = vpop.f32.mrb[184].mxu0  ;;  %v16235_v31 = vadd.f32 %v12215_v58, %v5029_v13  ;;  %v19420_v58 = vld [vmem:[#allocation84_spill] sm:$0xff] }
 0x44d   : > { %v12105_v59 = vpop.f32.mrb[185].mxu0 }
 0x44e   : > { %v12106_v6 = vadd.f32 %v12105_v59, %v12104_v50  ;;  %v12222_v37 = vpop.f32.mrb[188].mxu1  ;;  %v12107_v2 = vpop.f32.mrb[186].mxu0 }
 0x44f   : > { %v12223_v54 = vpop.f32.mrb[189].mxu1  ;;  %v12108_v60 = vpop.f32.mrb[187].mxu0 }
 0x450   : > { %v5034_v15 = vadd.f32 %v12106_v6, %v16043_v21  ;;  %v12224_v34 = vadd.f32 %v12223_v54, %v12222_v37  ;;  %v12109_v26 = vadd.f32 %v12108_v60, %v12107_v2  ;;  %v12225_v56 = vpop.f32.mrb[190].mxu1  ;;  %v19422_v6 = vld [vmem:[#allocation86_spill] sm:$0xff] }
 0x451   : > { %v12226_v10 = vpop.f32.mrb[191].mxu1  ;;  %6374 = vmatmul.mubr.bf16.gmra.mrb[36].mxu0 %v19419_v19 }
 0x452   : > { %v5037_v23 = vadd.f32 %v12109_v26, %v16050_v12  ;;  %v12227_v9 = vadd.f32 %v12226_v10, %v12225_v56  ;;  %6381 = vmatprep.mubr.bf16.mxu0 %v19420_v58  ;;  %v16241_v17 = vadd.f32 %v12218_v46, %v5034_v15 }
 0x454   : > { %v12110_v62 = vpop.f32.mrb[188].mxu0  ;;  %v16243_v39 = vadd.f32 %v12221_v8, %v5037_v23  ;;  %v13474_v8 = vld [vmem:[%s18975_s5 + $0x58] sm:$0xff]  }
 0x455   : > { %v12111_v52 = vpop.f32.mrb[189].mxu0  ;;  %12618 = vmatprep.subr.bf16.mxu1 %v13474_v8 }
 0x456   : > { %v12112_v32 = vadd.f32 %v12111_v52, %v12110_v62  ;;  %v12228_v30 = vpop.f32.mrb[192].mxu1  ;;  %v12113_v21 = vpop.f32.mrb[190].mxu0  ;;  %v19423_v52 = vld [vmem:[#allocation87_spill] sm:$0xff] }
 0x457   : > { %v12229_v35 = vpop.f32.mrb[193].mxu1  ;;  %v12114_v20 = vpop.f32.mrb[191].mxu0 }
 0x458   : > { %v5042_v13 = vadd.f32 %v12112_v32, %v16065_v14  ;;  %v12230_v1 = vadd.f32 %v12229_v35, %v12228_v30  ;;  %v12115_v63 = vadd.f32 %v12114_v20, %v12113_v21  ;;  %v12231_v50 = vpop.f32.mrb[194].mxu1  ;;  %v13475_v14 = vld [vmem:[%s18975_s5 + $0x18] sm:$0xff]  }
 0x459   : > { %v12232_v12 = vpop.f32.mrb[195].mxu1  ;;  %6382 = vmatmul.mubr.bf16.gmra.mrb[40].mxu0 %v19421_v61  ;;  %12619 = vmatpush3.bf16.msra.mxu1 %v13475_v14  ;;  %v19425_v14 = vld [vmem:[#allocation89_spill] sm:$0xff] }
 0x45a   : > { %v5045_v46 = vadd.f32 %v12115_v63, %v16072_v25  ;;  %v12233_v59 = vadd.f32 %v12232_v12, %v12231_v50  ;;  %6389 = vmatprep.mubr.bf16.mxu0 %v19422_v6  ;;  %v16252_v37 = vadd.f32 %v12224_v34, %v5042_v13 }
 0x45c   : > { %v12116_v2 = vpop.f32.mrb[192].mxu0  ;;  %v16257_v54 = vadd.f32 %v12227_v9, %v5045_v46  ;;  %v19424_v9 = vld [vmem:[#allocation88_spill] sm:$0xff] }
 0x45d   : > { %v12117_v60 = vpop.f32.mrb[193].mxu0 }
 0x45e   : > { %v12118_v15 = vadd.f32 %v12117_v60, %v12116_v2  ;;  %v12234_v25 = vpop.f32.mrb[196].mxu1  ;;  %v12119_v26 = vpop.f32.mrb[194].mxu0 }
 0x45f   : > { %v12235_v56 = vpop.f32.mrb[197].mxu1  ;;  %v12120_v10 = vpop.f32.mrb[195].mxu0 }
 0x460   : > { %v5050_v19 = vadd.f32 %v12118_v15, %v16087_v47  ;;  %v12236_v23 = vadd.f32 %v12235_v56, %v12234_v25  ;;  %v12121_v34 = vadd.f32 %v12120_v10, %v12119_v26  ;;  %v12237_v58 = vpop.f32.mrb[198].mxu1  ;;  %v19426_v15 = vld [vmem:[#allocation90_spill] sm:$0xff] }
 0x461   : > { %v12238_v62 = vpop.f32.mrb[199].mxu1  ;;  %6390 = vmatmul.mubr.bf16.gmra.mrb[44].mxu0 %v19423_v52 }
 0x462   : > { %v5053_v32 = vadd.f32 %v12121_v34, %v16091_v57  ;;  %v12239_v30 = vadd.f32 %v12238_v62, %v12237_v58  ;;  %6397 = vmatprep.mubr.bf16.mxu0 %v19424_v9  ;;  %v16263_v21 = vadd.f32 %v12230_v1, %v5050_v19 }
 0x464   : > { %v12122_v35 = vpop.f32.mrb[196].mxu0  ;;  %v16265_v20 = vadd.f32 %v12233_v59, %v5053_v32  ;;  %v13476_v59 = vld [vmem:[%s18975_s5 + $0x60] sm:$0xff]  }
 0x465   : > { %v12123_v13 = vpop.f32.mrb[197].mxu0  ;;  %12620 = vmatprep.subr.bf16.mxu1 %v13476_v59 }
 0x466   : > { %v12124_v63 = vadd.f32 %v12123_v13, %v12122_v35  ;;  %v12240_v50 = vpop.f32.mrb[200].mxu1  ;;  %v12125_v47 = vpop.f32.mrb[198].mxu0  ;;  %v19428_v13 = vld [vmem:[#allocation91_spill] sm:$0xff] }
 0x467   : > { %v12241_v12 = vpop.f32.mrb[201].mxu1  ;;  %v12126_v61 = vpop.f32.mrb[199].mxu0 }
 0x468   : > { %v5058_v46 = vadd.f32 %v12124_v63, %v16097_v36  ;;  %v12242_v6 = vadd.f32 %v12241_v12, %v12240_v50  ;;  %v12127_v8 = vadd.f32 %v12126_v61, %v12125_v47  ;;  %v12243_v2 = vpop.f32.mrb[202].mxu1  ;;  %v13477_v36 = vld [vmem:[%s18975_s5 + $0x20] sm:$0xff]  }
 0x469   : > { %v12244_v57 = vpop.f32.mrb[203].mxu1  ;;  %6398 = vmatmul.mubr.bf16.gmra.mrb[48].mxu0 %v19425_v14  ;;  %12621 = vmatpush3.bf16.msra.mxu1 %v13477_v36  ;;  %v19432_v36 = vld [vmem:[#allocation38_spill] sm:$0xff] }
 0x46a   : > { %v5061_v1 = vadd.f32 %v12127_v8, %v16101_v0  ;;  %v12245_v60 = vadd.f32 %v12244_v57, %v12243_v2  ;;  %6405 = vmatprep.mubr.bf16.mxu0 %v19426_v15  ;;  %v16274_v25 = vadd.f32 %v12236_v23, %v5058_v46 }
 0x46c   : > { %v12128_v26 = vpop.f32.mrb[200].mxu0  ;;  %v16279_v56 = vadd.f32 %v12239_v30, %v5061_v1  ;;  %v19429_v30 = vld [vmem:[#allocation92_spill] sm:$0xff] }
 0x46d   : > { %v12129_v10 = vpop.f32.mrb[201].mxu0 }
 0x46e   : > { %19427 = vst [vmem:[#allocation15_spill] sm:$0xff] %v16279_v56  ;;  %v12130_v19 = vadd.f32 %v12129_v10, %v12128_v26  ;;  %v12246_v0 = vpop.f32.mrb[204].mxu1  ;;  %v12131_v34 = vpop.f32.mrb[202].mxu0 }
 0x46f   : > { %v12247_v58 = vpop.f32.mrb[205].mxu1  ;;  %v12132_v62 = vpop.f32.mrb[203].mxu0 }
 0x470   : > { %v5066_v52 = vadd.f32 %v12130_v19, %v16107_v43  ;;  %v12248_v32 = vadd.f32 %v12247_v58, %v12246_v0  ;;  %v12133_v23 = vadd.f32 %v12132_v62, %v12131_v34  ;;  %v12249_v9 = vpop.f32.mrb[206].mxu1  ;;  %v19433_v19 = vld [vmem:[#allocation46_spill] sm:$0xff] }
 0x471   : > { %v12250_v35 = vpop.f32.mrb[207].mxu1  ;;  %6406 = vmatmul.mubr.bf16.gmra.mrb[52].mxu0 %v19428_v13 }
 0x472   : > { %v5069_v63 = vadd.f32 %v12133_v23, %v16111_v55  ;;  %v12251_v50 = vadd.f32 %v12250_v35, %v12249_v9  ;;  %6413 = vmatprep.mubr.bf16.mxu0 %v19429_v30  ;;  %v16285_v47 = vadd.f32 %v12242_v6, %v5066_v52 }
 0x474   : > { %19430 = vst [vmem:[#allocation19_spill] sm:$0xff] %v16285_v47  ;;  %v12134_v12 = vpop.f32.mrb[204].mxu0  ;;  %v16287_v61 = vadd.f32 %v12245_v60, %v5069_v63  ;;  %v13478_v60 = vld [vmem:[%s18975_s5 + $0x68] sm:$0xff]  }
 0x475   : > { %v12135_v46 = vpop.f32.mrb[205].mxu0  ;;  %12622 = vmatprep.subr.bf16.mxu1 %v13478_v60 }
 0x476   : > { %19431 = vst [vmem:[#allocation18_spill] sm:$0xff] %v16287_v61  ;;  %v12136_v8 = vadd.f32 %v12135_v46, %v12134_v12  ;;  %v12252_v2 = vpop.f32.mrb[208].mxu1  ;;  %v12137_v43 = vpop.f32.mrb[206].mxu0  ;;  %v19436_v46 = vld [vmem:[#allocation48_spill] sm:$0xff] }
 0x477   : > { %v12253_v57 = vpop.f32.mrb[209].mxu1  ;;  %v12138_v14 = vpop.f32.mrb[207].mxu0 }
 0x478   : > { %v5074_v1 = vadd.f32 %v12136_v8, %v16117_v5  ;;  %v12254_v15 = vadd.f32 %v12253_v57, %v12252_v2  ;;  %v12139_v59 = vadd.f32 %v12138_v14, %v12137_v43  ;;  %v12255_v26 = vpop.f32.mrb[210].mxu1  ;;  %v13479_v5 = vld [vmem:[%s18975_s5 + $0x28] sm:$0xff]   ;;  %v19438_v43 = vld [vmem:[#allocation95_spill] sm:$0xff] }
 0x479   : > { %v12256_v55 = vpop.f32.mrb[211].mxu1  ;;  %6414 = vmatmul.mubr.bf16.gmra.mrb[56].mxu0 %v19432_v36  ;;  %12623 = vmatpush3.bf16.msra.mxu1 %v13479_v5  ;;  %v19440_v5 = vld [vmem:[#allocation98_spill] sm:$0xff] }
 0x47a   : > { %v5077_v6 = vadd.f32 %v12139_v59, %v16121_v7  ;;  %v12257_v10 = vadd.f32 %v12256_v55, %v12255_v26  ;;  %6421 = vmatprep.mubr.bf16.mxu0 %v19433_v19  ;;  %v16296_v0 = vadd.f32 %v12248_v32, %v5074_v1 }
 0x47c   : > { %19434 = vst [vmem:[#allocation23_spill] sm:$0xff] %v16296_v0  ;;  %v12140_v34 = vpop.f32.mrb[208].mxu0  ;;  %v16301_v58 = vadd.f32 %v12251_v50, %v5077_v6  ;;  %v13522_v0 = vld [vmem:[%s18975_s5 + $0x1c0] sm:$0xff]  }
 0x47d   : > { %v12141_v62 = vpop.f32.mrb[209].mxu0 }
 0x47e   : > { %19435 = vst [vmem:[#allocation22_spill] sm:$0xff] %v16301_v58  ;;  %v12142_v52 = vadd.f32 %v12141_v62, %v12140_v34  ;;  %v12258_v7 = vpop.f32.mrb[212].mxu1  ;;  %v12143_v23 = vpop.f32.mrb[210].mxu0 }
 0x47f   : > { %v12259_v9 = vpop.f32.mrb[213].mxu1  ;;  %v12144_v35 = vpop.f32.mrb[211].mxu0 }
 0x480   : > { %v5082_v13 = vadd.f32 %v12142_v52, %v16127_v49  ;;  %v12260_v63 = vadd.f32 %v12259_v9, %v12258_v7  ;;  %v12145_v32 = vadd.f32 %v12144_v35, %v12143_v23  ;;  %v12261_v30 = vpop.f32.mrb[214].mxu1  ;;  %v19442_v52 = vld [vmem:[#allocation99_spill] sm:$0xff]  ;;  %v13480_v7 = vld [vmem:[%s18975_s5 + $0x70] sm:$0xff]  }
 0x481   : > { %v12262_v12 = vpop.f32.mrb[215].mxu1  ;;  %6422 = vmatmul.mubr.bf16.gmra.mrb[60].mxu0 %v19436_v46  ;;  %12624 = vmatprep.subr.bf16.mxu1 %v13480_v7  ;;  %v13481_v9 = vld [vmem:[%s18975_s5 + $0x30] sm:$0xff]  }
 0x482   : > { %v16305_v8 = vadd.f32 %v12254_v15, %v5082_v13  ;;  %v5085_v50 = vadd.f32 %v12145_v32, %v16131_v38  ;;  %v12263_v2 = vadd.f32 %v12262_v12, %v12261_v30  ;;  %6429 = vmatprep.mubr.bf16.mxu0 %v19438_v43  ;;  %12625 = vmatpush3.bf16.msra.mxu1 %v13481_v9  ;;  %v19448_v9 = vld [vmem:[#allocation104_spill] sm:$0xff] }
 0x484   : > { %19437 = vst [vmem:[#allocation27_spill] sm:$0xff] %v16305_v8  ;;  %v16309_v57 = vadd.f32 %v12257_v10, %v5085_v50  ;;  %v12146_v14 = vpop.f32.mrb[212].mxu0 }
 0x485   : > { %v12147_v1 = vpop.f32.mrb[213].mxu0 }
 0x486   : > { %19439 = vst [vmem:[#allocation26_spill] sm:$0xff] %v16309_v57  ;;  %v12148_v59 = vadd.f32 %v12147_v1, %v12146_v14  ;;  %v12264_v26 = vpop.f32.mrb[216].mxu1  ;;  %v12149_v49 = vpop.f32.mrb[214].mxu0  ;;  %v19444_v14 = vld [vmem:[#allocation100_spill] sm:$0xff] }
 0x487   : > { %v12265_v55 = vpop.f32.mrb[217].mxu1  ;;  %v12150_v36 = vpop.f32.mrb[215].mxu0 }
 0x488   : > { %v5090_v6 = vadd.f32 %v12148_v59, %v16137_v33  ;;  %v12266_v19 = vadd.f32 %v12265_v55, %v12264_v26  ;;  %v12151_v60 = vadd.f32 %v12150_v36, %v12149_v49  ;;  %v12267_v15 = vpop.f32.mrb[218].mxu1  ;;  %v19446_v49 = vld [vmem:[#allocation101_spill] sm:$0xff] }
 0x489   : > { %v12268_v34 = vpop.f32.mrb[219].mxu1  ;;  %6430 = vmatmul.mubr.bf16.gmra.mrb[64].mxu0 %v19440_v5 }
 0x48a   : > { %v16313_v38 = vadd.f32 %v12260_v63, %v5090_v6  ;;  %v5093_v10 = vadd.f32 %v12151_v60, %v16141_v45  ;;  %v12269_v62 = vadd.f32 %v12268_v34, %v12267_v15  ;;  %6437 = vmatprep.mubr.bf16.mxu0 %v19442_v52 }
 0x48c   : > { %19441 = vst [vmem:[#allocation33_spill] sm:$0xff] %v16313_v38  ;;  %v16320_v23 = vadd.f32 %v12263_v2, %v5093_v10  ;;  %v12152_v33 = vpop.f32.mrb[216].mxu0 }
 0x48d   : > { %v12153_v35 = vpop.f32.mrb[217].mxu0 }
 0x48e   : > { %19443 = vst [vmem:[#allocation32_spill] sm:$0xff] %v16320_v23  ;;  %v12154_v13 = vadd.f32 %v12153_v35, %v12152_v33  ;;  %v12270_v63 = vpop.f32.mrb[220].mxu1  ;;  %v12155_v32 = vpop.f32.mrb[218].mxu0 }
 0x48f   : > { %v12271_v45 = vpop.f32.mrb[221].mxu1  ;;  %v12156_v30 = vpop.f32.mrb[219].mxu0 }
 0x490   : > { %v5098_v12 = vadd.f32 %v12154_v13, %v16147_v18  ;;  %v12272_v46 = vadd.f32 %v12271_v45, %v12270_v63  ;;  %v12157_v50 = vadd.f32 %v12156_v30, %v12155_v32  ;;  %v12273_v43 = vpop.f32.mrb[222].mxu1  ;;  %v13484_v32 = vld [vmem:[%s18975_s5 + $0x148] sm:$0xff]   ;;  %v13486_v45 = vld [vmem:[%s18975_s5 + $0x78] sm:$0xff]  }
 0x491   : > { %v12274_v2 = vpop.f32.mrb[223].mxu1  ;;  %6438 = vmatmul.mubr.bf16.gmra.mrb[68].mxu0 %v19444_v14  ;;  %v13485_v30 = vld [vmem:[%s18975_s5 + $0x108] sm:$0xff]   ;;  %12626 = vmatprep.subr.bf16.mxu1 %v13486_v45 }
 0x492   : > { %v16327_v1 = vadd.f32 %v12266_v19, %v5098_v12  ;;  %v5101_v59 = vadd.f32 %v12157_v50, %v16151_v28  ;;  %v12275_v26 = vadd.f32 %v12274_v2, %v12273_v43  ;;  %6445 = vmatprep.mubr.bf16.mxu0 %v19446_v49  ;;  %v13482_v28 = vld [vmem:[%s18975_s5 + $0x140] sm:$0xff]  }
 0x493   : > { %12740 = vmatprep.subr.bf16.mxu0 %v13482_v28 }
 0x494   : > { %19445 = vst [vmem:[#allocation37_spill] sm:$0xff] %v16327_v1  ;;  %v16331_v55 = vadd.f32 %v12269_v62, %v5101_v59  ;;  %v12158_v36 = vpop.f32.mrb[220].mxu0  ;;  %v13483_v62 = vld [vmem:[%s18975_s5 + $0x100] sm:$0xff]  }
 0x495   : > { %v12159_v6 = vpop.f32.mrb[221].mxu0  ;;  %12741 = vmatpush3.bf16.msra.mxu0 %v13483_v62 }
 0x496   : > { %19447 = vst [vmem:[#allocation36_spill] sm:$0xff] %v16331_v55  ;;  %v12160_v60 = vadd.f32 %v12159_v6, %v12158_v36  ;;  %v12404_v15 = vpop.f32.mrb[224].mxu1  ;;  %v12161_v18 = vpop.f32.mrb[222].mxu0  ;;  %12742 = vmatprep.subr.bf16.mxu0 %v13484_v32 }
 0x497   : > { %v12405_v34 = vpop.f32.mrb[225].mxu1  ;;  %v12162_v5 = vpop.f32.mrb[223].mxu0 }
 0x498   : > { %v5106_v10 = vadd.f32 %v12160_v60, %v16157_v24  ;;  %v12406_v52 = vadd.f32 %v12405_v34, %v12404_v15  ;;  %v12163_v7 = vadd.f32 %v12162_v5, %v12161_v18  ;;  %v12407_v19 = vpop.f32.mrb[226].mxu1  ;;  %v19450_v24 = vld [vmem:[#allocation105_spill] sm:$0xff] }
 0x499   : > { %v12408_v33 = vpop.f32.mrb[227].mxu1  ;;  %6446 = vmatmul.mubr.bf16.gmra.mrb[72].mxu0 %v19448_v9  ;;  %v19452_v18 = vld [vmem:[#allocation61_spill] sm:$0xff] }
 0x49a   : > { %v16341_v35 = vadd.f32 %v12272_v46, %v5106_v10  ;;  %v5109_v13 = vadd.f32 %v12163_v7, %v16161_v51  ;;  %v12409_v63 = vadd.f32 %v12408_v33, %v12407_v19  ;;  %6453 = vmatprep.mubr.bf16.mxu0 %v19450_v24  ;;  %v13487_v46 = vld [vmem:[%s18975_s5 + $0x38] sm:$0xff]   ;;  %12743 = vmatpush3.bf16.msra.mxu0 %v13485_v30  ;;  %v13489_v9 = vld [vmem:[%s18975_s5 + $0x110] sm:$0xff]  }
 0x49b   : > { %12627 = vmatpush3.bf16.msra.mxu1 %v13487_v46  ;;  %v19453_v10 = vld [vmem:[#allocation67_spill] sm:$0xff] }
 0x49c   : > { %19449 = vst [vmem:[#allocation42_spill] sm:$0xff] %v16341_v35  ;;  %v16354_v12 = vadd.f32 %v12275_v26, %v5109_v13  ;;  %v12292_v51 = vpop.f32.mrb[224].mxu0 }
 0x49d   : > { %v12293_v50 = vpop.f32.mrb[225].mxu0 }
 0x49e   : > { %19451 = vst [vmem:[#allocation41_spill] sm:$0xff] %v16354_v12  ;;  %v12294_v43 = vadd.f32 %v12293_v50, %v12292_v51  ;;  %v12410_v2 = vpop.f32.mrb[228].mxu1  ;;  %v12295_v14 = vpop.f32.mrb[226].mxu0  ;;  %7648 = vmatmul.mubr.bf16.vlgmr.msra.gmra.mrb[32].mxu1 %v19415_v44  ;;  %v13490_v51 = vld [vmem:[%s18975_s5 + $0x158] sm:$0xff]   ;;  %v13508_v12 = vld [vmem:[%s18975_s5 + $0xe0] sm:$0xff]  }
 0x49f   : > { %v12411_v59 = vpop.f32.mrb[229].mxu1  ;;  %v12296_v49 = vpop.f32.mrb[227].mxu0  ;;  %v19454_v50 = vld [vmem:[#allocation66_spill] sm:$0xff] }
 0x4a0   : > { %v16359_v36 = vadd.f32 %v12406_v52, %v12294_v43  ;;  %v12412_v6 = vadd.f32 %v12411_v59, %v12410_v2  ;;  %v12297_v26 = vadd.f32 %v12296_v49, %v12295_v14  ;;  %v12413_v60 = vpop.f32.mrb[230].mxu1  ;;  %v13488_v52 = vld [vmem:[%s18975_s5 + $0x150] sm:$0xff]   ;;  %v19455_v14 = vld [vmem:[#allocation108_spill] sm:$0xff]  ;;  %v13491_v59 = vld [vmem:[%s18975_s5 + $0x118] sm:$0xff]  }
 0x4a1   : > { %v12414_v15 = vpop.f32.mrb[231].mxu1  ;;  %6454 = vmatmul.mubr.bf16.gmra.mrb[76].mxu0 %v19452_v18  ;;  %12744 = vmatprep.subr.bf16.mxu0 %v13488_v52 }
 0x4a2   : > { %v16363_v34 = vadd.f32 %v12409_v63, %v12297_v26  ;;  %v12415_v5 = vadd.f32 %v12414_v15, %v12413_v60  ;;  %6461 = vmatprep.mubr.bf16.mxu0 %v19453_v10  ;;  %12745 = vmatpush3.bf16.msra.mxu0 %v13489_v9  ;;  %v19456_v9 = vld [vmem:[#allocation72_spill] sm:$0xff] }
 0x4a3   : > { %12746 = vmatprep.subr.bf16.mxu0 %v13490_v51  ;;  %v13495_v51 = vld [vmem:[%s18975_s5 + $0x128] sm:$0xff]  }
 0x4a4   : > { %v12298_v7 = vpop.f32.mrb[228].mxu0 }
 0x4a5   : > { %v12299_v19 = vpop.f32.mrb[229].mxu0 }
 0x4a6   : > { %v12300_v28 = vadd.f32 %v12299_v19, %v12298_v7  ;;  %v12416_v62 = vpop.f32.mrb[232].mxu1  ;;  %v12301_v33 = vpop.f32.mrb[230].mxu0  ;;  %12747 = vmatpush3.bf16.msra.mxu0 %v13491_v59 }
 0x4a7   : > { %v12417_v13 = vpop.f32.mrb[233].mxu1  ;;  %v12302_v24 = vpop.f32.mrb[231].mxu0 }
 0x4a8   : > { %v16372_v63 = vadd.f32 %v12412_v6, %v12300_v28  ;;  %v12418_v32 = vadd.f32 %v12417_v13, %v12416_v62  ;;  %v12303_v45 = vadd.f32 %v12302_v24, %v12301_v33  ;;  %v12419_v30 = vpop.f32.mrb[234].mxu1  ;;  %v13492_v62 = vld [vmem:[%s18975_s5 + $0x160] sm:$0xff]  }
 0x4a9   : > { %v12420_v46 = vpop.f32.mrb[235].mxu1  ;;  %6462 = vmatmul.mubr.bf16.gmra.mrb[80].mxu0 %v19454_v50  ;;  %v13493_v33 = vld [vmem:[%s18975_s5 + $0x120] sm:$0xff]   ;;  %12748 = vmatprep.subr.bf16.mxu0 %v13492_v62 }
 0x4aa   : > { %v16378_v43 = vadd.f32 %v12415_v5, %v12303_v45  ;;  %v12421_v2 = vadd.f32 %v12420_v46, %v12419_v30  ;;  %6469 = vmatprep.mubr.bf16.mxu0 %v19455_v14  ;;  %v19457_v45 = vld [vmem:[#allocation111_spill] sm:$0xff]  ;;  %12749 = vmatpush3.bf16.msra.mxu0 %v13493_v33  ;;  %v19458_v33 = vld [vmem:[#allocation113_spill] sm:$0xff] }
 0x4ab   : > { %v16402_v30 = vld [vmem:[%s18975_s5 + $0xc0] sm:$0xff]  }
 0x4ac   : > { %v12304_v49 = vpop.f32.mrb[232].mxu0  ;;  %v13497_v46 = vld [vmem:[%s18975_s5 + $0x80] sm:$0xff]   ;;  %12676 = vmatprep.subr.bf16.mxu1 %v16402_v30 }
 0x4ad   : > { %v12305_v6 = vpop.f32.mrb[233].mxu0  ;;  %12677 = vmatpush3.bf16.msra.mxu1 %v13497_v46 }
 0x4ae   : > { %v12306_v26 = vadd.f32 %v12305_v6, %v12304_v49  ;;  %v12422_v60 = vpop.f32.mrb[236].mxu1  ;;  %v12307_v15 = vpop.f32.mrb[234].mxu0 }
 0x4af   : > { %v12423_v18 = vpop.f32.mrb[237].mxu1  ;;  %v12308_v10 = vpop.f32.mrb[235].mxu0 }
 0x4b0   : > { %v16384_v7 = vadd.f32 %v12418_v32, %v12306_v26  ;;  %v12424_v5 = vadd.f32 %v12423_v18, %v12422_v60  ;;  %v12309_v19 = vadd.f32 %v12308_v10, %v12307_v15  ;;  %v12425_v28 = vpop.f32.mrb[238].mxu1  ;;  %v13494_v32 = vld [vmem:[%s18975_s5 + $0x168] sm:$0xff]  }
 0x4b1   : > { %v12426_v52 = vpop.f32.mrb[239].mxu1  ;;  %6470 = vmatmul.mubr.bf16.gmra.mrb[84].mxu0 %v19456_v9  ;;  %12750 = vmatprep.subr.bf16.mxu0 %v13494_v32  ;;  %v13501_v32 = vld [vmem:[%s18975_s5 + $0x138] sm:$0xff]  }
 0x4b2   : > { %v16393_v13 = vadd.f32 %v12421_v2, %v12309_v19  ;;  %v12427_v24 = vadd.f32 %v12426_v52, %v12425_v28  ;;  %6477 = vmatprep.mubr.bf16.mxu0 %v19457_v45  ;;  %12751 = vmatpush3.bf16.msra.mxu0 %v13495_v51  ;;  %v13498_v19 = vld [vmem:[%s18975_s5 + $0x170] sm:$0xff]   ;;  %v19459_v45 = vld [vmem:[#allocation112_spill] sm:$0xff] }
 0x4b3   : > { %v13499_v28 = vld [vmem:[%s18975_s5 + $0x130] sm:$0xff]   ;;  %12752 = vmatprep.subr.bf16.mxu0 %v13498_v19  ;;  %v13502_v51 = vld [vmem:[%s18975_s5 + $0xc8] sm:$0xff]  }
 0x4b4   : > { %v12310_v50 = vpop.f32.mrb[236].mxu0  ;;  %12678 = vmatprep.subr.bf16.mxu1 %v13502_v51  ;;  %v13505_v51 = vld [vmem:[%s18975_s5 + $0x90] sm:$0xff]  }
 0x4b5   : > { %v12311_v2 = vpop.f32.mrb[237].mxu0 }
 0x4b6   : > { %v12312_v14 = vadd.f32 %v12311_v2, %v12310_v50  ;;  %v12428_v59 = vpop.f32.mrb[240].mxu1  ;;  %v12313_v49 = vpop.f32.mrb[238].mxu0  ;;  %12753 = vmatpush3.bf16.msra.mxu0 %v13499_v28 }
 0x4b7   : > { %v12429_v6 = vpop.f32.mrb[241].mxu1  ;;  %v12314_v26 = vpop.f32.mrb[239].mxu0 }
 0x4b8   : > { %v16411_v60 = vadd.f32 %v12424_v5, %v12312_v14  ;;  %v12430_v15 = vadd.f32 %v12429_v6, %v12428_v59  ;;  %v12315_v18 = vadd.f32 %v12314_v26, %v12313_v49  ;;  %v12431_v10 = vpop.f32.mrb[242].mxu1  ;;  %v13500_v5 = vld [vmem:[%s18975_s5 + $0x178] sm:$0xff]  }
 0x4b9   : > { %v12432_v62 = vpop.f32.mrb[243].mxu1  ;;  %6478 = vmatmul.mubr.bf16.gmra.mrb[88].mxu0 %v19458_v33  ;;  %12754 = vmatprep.subr.bf16.mxu0 %v13500_v5  ;;  %v13504_v5 = vld [vmem:[%s18975_s5 + $0xd0] sm:$0xff]  }
 0x4ba   : > { %v16420_v52 = vadd.f32 %v12427_v24, %v12315_v18  ;;  %v12433_v9 = vadd.f32 %v12432_v62, %v12431_v10  ;;  %6485 = vmatprep.mubr.bf16.mxu0 %v19459_v45  ;;  %v13503_v24 = vld [vmem:[%s18975_s5 + $0x88] sm:$0xff]   ;;  %12755 = vmatpush3.bf16.msra.mxu0 %v13501_v32 }
 0x4bb   : > { %12679 = vmatpush3.bf16.msra.mxu1 %v13503_v24 }
 0x4bc   : > { %v12316_v46 = vpop.f32.mrb[240].mxu0  ;;  %12680 = vmatprep.subr.bf16.mxu1 %v13504_v5  ;;  %v13506_v5 = vld [vmem:[%s18975_s5 + $0xd8] sm:$0xff]  }
 0x4bd   : > { %v12317_v50 = vpop.f32.mrb[241].mxu0 }
 0x4be   : > { %v12318_v2 = vadd.f32 %v12317_v50, %v12316_v46  ;;  %v12434_v14 = vpop.f32.mrb[244].mxu1  ;;  %v12319_v59 = vpop.f32.mrb[242].mxu0 }
 0x4bf   : > { %v12435_v49 = vpop.f32.mrb[245].mxu1  ;;  %v12320_v6 = vpop.f32.mrb[243].mxu0  ;;  %12681 = vmatpush3.bf16.msra.mxu1 %v13505_v51  ;;  %v13507_v51 = vld [vmem:[%s18975_s5 + $0x98] sm:$0xff]  }
 0x4c0   : > { %v16435_v26 = vadd.f32 %v12430_v15, %v12318_v2  ;;  %v12436_v18 = vadd.f32 %v12435_v49, %v12434_v14  ;;  %v12321_v10 = vadd.f32 %v12320_v6, %v12319_v59  ;;  %v12437_v19 = vpop.f32.mrb[246].mxu1  ;;  %12682 = vmatprep.subr.bf16.mxu1 %v13506_v5  ;;  %v13509_v5 = vld [vmem:[%s18975_s5 + $0xa0] sm:$0xff]  }
 0x4c1   : > { %v12438_v28 = vpop.f32.mrb[247].mxu1  ;;  %6486 = vmatmul.mubr.bf16.gmra.mrb[92].mxu0 %v19459_v45 }
 0x4c2   : > { %v16438_v62 = vadd.f32 %v12433_v9, %v12321_v10  ;;  %v12439_v33 = vadd.f32 %v12438_v28, %v12437_v19 }
 0x4c3   : > { %12683 = vmatpush3.bf16.msra.mxu1 %v13507_v51 }
 0x4c4   : > { %v12322_v32 = vpop.f32.mrb[244].mxu0  ;;  %12684 = vmatprep.subr.bf16.mxu1 %v13508_v12  ;;  %v13510_v12 = vld [vmem:[%s18975_s5 + $0xe8] sm:$0xff]  }
 0x4c5   : > { %v12323_v15 = vpop.f32.mrb[245].mxu0 }
 0x4c6   : > { %v12324_v46 = vadd.f32 %v12323_v15, %v12322_v32  ;;  %v12440_v24 = vpop.f32.mrb[248].mxu1  ;;  %v12325_v50 = vpop.f32.mrb[246].mxu0 }
 0x4c7   : > { %v12441_v2 = vpop.f32.mrb[249].mxu1  ;;  %v12326_v14 = vpop.f32.mrb[247].mxu0  ;;  %12685 = vmatpush3.bf16.msra.mxu1 %v13509_v5  ;;  %v13511_v5 = vld [vmem:[%s18975_s5 + $0xa8] sm:$0xff]  }
 0x4c8   : > { %v16446_v9 = vadd.f32 %v12436_v18, %v12324_v46  ;;  %v12442_v59 = vadd.f32 %v12441_v2, %v12440_v24  ;;  %v12327_v49 = vadd.f32 %v12326_v14, %v12325_v50  ;;  %v12443_v6 = vpop.f32.mrb[250].mxu1  ;;  %12686 = vmatprep.subr.bf16.mxu1 %v13510_v12 }
 0x4c9   : > { %v12444_v10 = vpop.f32.mrb[251].mxu1 }
 0x4ca   : > { %v16448_v19 = vadd.f32 %v12439_v33, %v12327_v49  ;;  %v12445_v28 = vadd.f32 %v12444_v10, %v12443_v6 }
 0x4cb   : > { %12687 = vmatpush3.bf16.msra.mxu1 %v13511_v5  ;;  %v13514_v5 = vld [vmem:[%s18975_s5 + $0xf0] sm:$0xff]  }
 0x4cc   : > { %v12328_v32 = vpop.f32.mrb[248].mxu0  ;;  %12688 = vmatprep.subr.bf16.mxu1 %v13514_v5  ;;  %v13518_v5 = vld [vmem:[%s18975_s5 + $0xf8] sm:$0xff]  }
 0x4cd   : > { %v12329_v15 = vpop.f32.mrb[249].mxu0 }
 0x4ce   : > { %v12330_v18 = vadd.f32 %v12329_v15, %v12328_v32  ;;  %v12446_v46 = vpop.f32.mrb[252].mxu1  ;;  %v12331_v24 = vpop.f32.mrb[250].mxu0 }
 0x4cf   : > { %v12447_v50 = vpop.f32.mrb[253].mxu1  ;;  %v12332_v2 = vpop.f32.mrb[251].mxu0 }
 0x4d0   : > { %v16456_v33 = vadd.f32 %v12442_v59, %v12330_v18  ;;  %v12448_v14 = vadd.f32 %v12447_v50, %v12446_v46  ;;  %v12333_v49 = vadd.f32 %v12332_v2, %v12331_v24  ;;  %v12449_v6 = vpop.f32.mrb[254].mxu1 }
 0x4d1   : > { %v12450_v10 = vpop.f32.mrb[255].mxu1 }
 0x4d2   : > { %v16458_v44 = vadd.f32 %v12445_v28, %v12333_v49  ;;  %v12451_v3 = vadd.f32 %v12450_v10, %v12449_v6 }
 0x4d4   : > { %v12334_v51 = vpop.f32.mrb[252].mxu0 }
 0x4d5   : > { %v12335_v32 = vpop.f32.mrb[253].mxu0 }
 0x4d6   : > { %v12336_v59 = vadd.f32 %v12335_v32, %v12334_v51  ;;  %v12452_v15 = vpop.f32.mrb[0].mxu1  ;;  %v12337_v18 = vpop.f32.mrb[254].mxu0 }
 0x4d7   : > { %v12453_v46 = vpop.f32.mrb[1].mxu1  ;;  %v12338_v24 = vpop.f32.mrb[255].mxu0 }
 0x4d8   : > { %v16466_v28 = vadd.f32 %v12448_v14, %v12336_v59  ;;  %v12454_v50 = vadd.f32 %v12453_v46, %v12452_v15  ;;  %v12339_v2 = vadd.f32 %v12338_v24, %v12337_v18  ;;  %v12455_v49 = vpop.f32.mrb[2].mxu1 }
 0x4d9   : > { %v12456_v6 = vpop.f32.mrb[3].mxu1 }
 0x4da   : > { %v16468_v10 = vadd.f32 %v12451_v3, %v12339_v2  ;;  %v12457_v35 = vadd.f32 %v12456_v6, %v12455_v49  ;;  %v16481_v6 = vld [vmem:[%s18975_s5 + $0x200] sm:$0xff]  }
 0x4db   : > { %13156 = vmatprep.subr.bf16.mxu0 %v16481_v6 }
 0x4dc   : > { %v12340_v51 = vpop.f32.mrb[0].mxu0 }
 0x4dd   : > { %v12341_v32 = vpop.f32.mrb[1].mxu0 }
 0x4de   : > { %v12342_v14 = vadd.f32 %v12341_v32, %v12340_v51  ;;  %v12458_v59 = vpop.f32.mrb[4].mxu1  ;;  %v12343_v15 = vpop.f32.mrb[2].mxu0 }
 0x4df   : > { %v12459_v18 = vpop.f32.mrb[5].mxu1  ;;  %v12344_v46 = vpop.f32.mrb[3].mxu0 }
 0x4e0   : > { %v16476_v3 = vadd.f32 %v12454_v50, %v12342_v14  ;;  %v12460_v24 = vadd.f32 %v12459_v18, %v12458_v59  ;;  %v12345_v2 = vadd.f32 %v12344_v46, %v12343_v15  ;;  %v12461_v49 = vpop.f32.mrb[6].mxu1  ;;  %v13515_v50 = vld [vmem:[%s18975_s5 + $0xb0] sm:$0xff]  }
 0x4e1   : > { %v12462_v55 = vpop.f32.mrb[7].mxu1  ;;  %12689 = vmatpush3.bf16.msra.mxu1 %v13515_v50  ;;  %v13519_v50 = vld [vmem:[%s18975_s5 + $0xb8] sm:$0xff]  }
 0x4e2   : > { %v16483_v1 = vadd.f32 %v12457_v35, %v12345_v2  ;;  %v12463_v12 = vadd.f32 %v12462_v55, %v12461_v49  ;;  %12690 = vmatprep.subr.bf16.mxu1 %v13518_v5 }
 0x4e4   : > { %v12346_v51 = vpop.f32.mrb[4].mxu0 }
 0x4e5   : > { %v12347_v32 = vpop.f32.mrb[5].mxu0  ;;  %12691 = vmatpush3.bf16.msra.mxu1 %v13519_v50 }
 0x4e6   : > { %v12348_v14 = vadd.f32 %v12347_v32, %v12346_v51  ;;  %v12464_v59 = vpop.f32.mrb[8].mxu1  ;;  %v12349_v15 = vpop.f32.mrb[6].mxu0  ;;  %12804 = vmatprep.subr.bf16.mxu1 %v13522_v0 }
 0x4e7   : > { %v12465_v35 = vpop.f32.mrb[9].mxu1  ;;  %v12350_v18 = vpop.f32.mrb[7].mxu0 }
 0x4e8   : > { %v16492_v55 = vadd.f32 %v12460_v24, %v12348_v14  ;;  %v12466_v46 = vadd.f32 %v12465_v35, %v12464_v59  ;;  %v12351_v2 = vadd.f32 %v12350_v18, %v12349_v15  ;;  %v12467_v49 = vpop.f32.mrb[10].mxu1 }
 0x4e9   : > { %v12468_v23 = vpop.f32.mrb[11].mxu1 }
 0x4ea   : > { %v16494_v38 = vadd.f32 %v12463_v12, %v12351_v2  ;;  %v12469_v57 = vadd.f32 %v12468_v23, %v12467_v49 }
 0x4ec   : > { %19460 = vst [vmem:[#allocation44_spill] sm:$0xff] %v16494_v38  ;;  %v12352_v8 = vpop.f32.mrb[8].mxu0 }
 0x4ed   : > { %v12353_v51 = vpop.f32.mrb[9].mxu0 }
 0x4ee   : > { %v12354_v32 = vadd.f32 %v12353_v51, %v12352_v8  ;;  %v12470_v24 = vpop.f32.mrb[12].mxu1  ;;  %v12355_v14 = vpop.f32.mrb[10].mxu0 }
 0x4ef   : > { %v12471_v59 = vpop.f32.mrb[13].mxu1  ;;  %v12356_v15 = vpop.f32.mrb[11].mxu0 }
 0x4f0   : > { %v16502_v12 = vadd.f32 %v12466_v46, %v12354_v32  ;;  %v12472_v23 = vadd.f32 %v12471_v59, %v12470_v24  ;;  %v12357_v35 = vadd.f32 %v12356_v15, %v12355_v14  ;;  %v12473_v18 = vpop.f32.mrb[14].mxu1 }
 0x4f1   : > { %v12474_v2 = vpop.f32.mrb[15].mxu1 }
 0x4f2   : > { %19461 = vst [vmem:[#allocation43_spill] sm:$0xff] %v16502_v12  ;;  %v16504_v49 = vadd.f32 %v12469_v57, %v12357_v35  ;;  %v12475_v58 = vadd.f32 %v12474_v2, %v12473_v18 }
 0x4f4   : > { %19462 = vst [vmem:[#allocation50_spill] sm:$0xff] %v16504_v49  ;;  %v12358_v8 = vpop.f32.mrb[12].mxu0 }
 0x4f5   : > { %v12359_v51 = vpop.f32.mrb[13].mxu0 }
 0x4f6   : > { %v12360_v5 = vadd.f32 %v12359_v51, %v12358_v8  ;;  %v12476_v61 = vpop.f32.mrb[16].mxu1  ;;  %v12361_v47 = vpop.f32.mrb[14].mxu0 }
 0x4f7   : > { %v12477_v50 = vpop.f32.mrb[17].mxu1  ;;  %v12362_v46 = vpop.f32.mrb[15].mxu0 }
 0x4f8   : > { %v16509_v32 = vadd.f32 %v12472_v23, %v12360_v5  ;;  %v12478_v24 = vadd.f32 %v12477_v50, %v12476_v61  ;;  %v12363_v14 = vadd.f32 %v12362_v46, %v12361_v47  ;;  %v12479_v59 = vpop.f32.mrb[18].mxu1 }
 0x4f9   : > { %v12480_v57 = vpop.f32.mrb[19].mxu1 }
 0x4fa   : > { %19463 = vst [vmem:[#allocation49_spill] sm:$0xff] %v16509_v32  ;;  %v16511_v15 = vadd.f32 %v12475_v58, %v12363_v14  ;;  %v12481_v35 = vadd.f32 %v12480_v57, %v12479_v59 }
 0x4fc   : > { %19464 = vst [vmem:[#allocation54_spill] sm:$0xff] %v16511_v15  ;;  %v12364_v18 = vpop.f32.mrb[16].mxu0 }
 0x4fd   : > { %v12365_v2 = vpop.f32.mrb[17].mxu0 }
 0x4fe   : > { %v12366_v49 = vadd.f32 %v12365_v2, %v12364_v18  ;;  %v12482_v12 = vpop.f32.mrb[20].mxu1  ;;  %v12367_v45 = vpop.f32.mrb[18].mxu0 }
 0x4ff   : > { %v12483_v0 = vpop.f32.mrb[21].mxu1  ;;  %v12368_v8 = vpop.f32.mrb[19].mxu0 }
 0x500   : > { %v16513_v51 = vadd.f32 %v12478_v24, %v12366_v49  ;;  %v12484_v56 = vadd.f32 %v12483_v0, %v12482_v12  ;;  %v12369_v38 = vadd.f32 %v12368_v8, %v12367_v45  ;;  %v12485_v23 = vpop.f32.mrb[22].mxu1 }
 0x501   : > { %v12486_v5 = vpop.f32.mrb[23].mxu1 }
 0x502   : > { %19465 = vst [vmem:[#allocation53_spill] sm:$0xff] %v16513_v51  ;;  %v16515_v61 = vadd.f32 %v12481_v35, %v12369_v38  ;;  %v12487_v47 = vadd.f32 %v12486_v5, %v12485_v23 }
 0x504   : > { %19466 = vst [vmem:[#allocation60_spill] sm:$0xff] %v16515_v61  ;;  %v12370_v50 = vpop.f32.mrb[20].mxu0 }
 0x505   : > { %v12371_v58 = vpop.f32.mrb[21].mxu0 }
 0x506   : > { %v12372_v46 = vadd.f32 %v12371_v58, %v12370_v50  ;;  %v12488_v14 = vpop.f32.mrb[24].mxu1  ;;  %v12373_v59 = vpop.f32.mrb[22].mxu0 }
 0x507   : > { %v12489_v57 = vpop.f32.mrb[25].mxu1  ;;  %v12374_v18 = vpop.f32.mrb[23].mxu0 }
 0x508   : > { %v16517_v2 = vadd.f32 %v12484_v56, %v12372_v46  ;;  %v12490_v15 = vadd.f32 %v12489_v57, %v12488_v14  ;;  %v12375_v32 = vadd.f32 %v12374_v18, %v12373_v59  ;;  %v12491_v49 = vpop.f32.mrb[26].mxu1 }
 0x509   : > { %v12492_v24 = vpop.f32.mrb[27].mxu1 }
 0x50a   : > { %v16519_v12 = vadd.f32 %v12487_v47, %v12375_v32  ;;  %v12493_v45 = vadd.f32 %v12492_v24, %v12491_v49 }
 0x50c   : > { %19467 = vst [vmem:[#allocation59_spill] sm:$0xff] %v16519_v12  ;;  %v12376_v0 = vpop.f32.mrb[24].mxu0 }
 0x50d   : > { %v12377_v38 = vpop.f32.mrb[25].mxu0 }
 0x50e   : > { %v12378_v35 = vadd.f32 %v12377_v38, %v12376_v0  ;;  %v12379_v8 = vpop.f32.mrb[26].mxu0  ;;  %v12494_v23 = vpop.f32.mrb[28].mxu1 }
 0x50f   : > { %v12380_v5 = vpop.f32.mrb[27].mxu0  ;;  %v12495_v50 = vpop.f32.mrb[29].mxu1 }
 0x510   : > { %v16521_v58 = vadd.f32 %v12490_v15, %v12378_v35  ;;  %v12381_v61 = vadd.f32 %v12380_v5, %v12379_v8  ;;  %v12496_v51 = vadd.f32 %v12495_v50, %v12494_v23  ;;  %v12497_v56 = vpop.f32.mrb[30].mxu1 }
 0x511   : > { %v12498_v46 = vpop.f32.mrb[31].mxu1 }
 0x512   : > { %v16523_v14 = vadd.f32 %v12493_v45, %v12381_v61  ;;  %v12499_v59 = vadd.f32 %v12498_v46, %v12497_v56  ;;  %v16533_v45 = vld [vmem:[%s18974_s4] ss:$0 sm:$0xff] }
 0x514   : > { %v12382_v57 = vpop.f32.mrb[28].mxu0 }
 0x515   : > { %v12383_v32 = vpop.f32.mrb[29].mxu0 }
 0x516   : > { %v12384_v47 = vadd.f32 %v12383_v32, %v12382_v57  ;;  %v12385_v18 = vpop.f32.mrb[30].mxu0 }
 0x517   : > { %v12386_v49 = vpop.f32.mrb[31].mxu0 }
 0x518   : > { %v16525_v24 = vadd.f32 %v12496_v51, %v12384_v47  ;;  %v12387_v0 = vadd.f32 %v12386_v49, %v12385_v18 }
 0x51a   : > { %v16527_v38 = vadd.f32 %v12499_v59, %v12387_v0 }
 0x51c   : > { %v12516_v12 = vpop.f32.mrb[32].mxu0 }
 0x51d   : > { %v12517_v15 = vpop.f32.mrb[33].mxu0 }
 0x51e   : > { %v12518_v35 = vadd.f32 %v12517_v15, %v12516_v12  ;;  %v12519_v8 = vpop.f32.mrb[34].mxu0 }
 0x51f   : > { %v12520_v23 = vpop.f32.mrb[35].mxu0 }
 0x520   : > { %v6368_v5 = vadd.f32 %v12518_v35, %v16359_v36  ;;  %v12521_v61 = vadd.f32 %v12520_v23, %v12519_v8 }
 0x522   : > { %v6494_v50 = vadd.f32 %v6368_v5, %v16167_v42  ;;  %v6371_v51 = vadd.f32 %v12521_v61, %v16363_v34 }
 0x524   : > { %v6532_v56 = vadd.f32 %v16533_v45, %v6494_v50  ;;  %v6495_v46 = vadd.f32 %v6371_v51, %v16171_v27  ;;  %v12522_v59 = vpop.f32.mrb[36].mxu0 }
 0x525   : > { %v12523_v12 = vpop.f32.mrb[37].mxu0 }
 0x526   : > { %v6596_v57 = vmul.f32 0.2, %v6532_v56  ;;  %v6533_v32 = vadd.f32 %v16533_v45, %v6495_v46  ;;  %v12524_v36 = vadd.f32 %v12523_v12, %v12522_v59  ;;  %v12525_v47 = vpop.f32.mrb[38].mxu0  ;;  %vm6564_vm6 = vcmp.gt.f32.partialorder %v6532_v56, 0.0 }
 0x527   : > { %v12526_v18 = vpop.f32.mrb[39].mxu0 }
 0x528   : > { %v6597_v49 = vmul.f32 0.2, %v6533_v32  ;;  %v6376_v0 = vadd.f32 %v12524_v36, %v16372_v63  ;;  %v12527_v15 = vadd.f32 %v12526_v18, %v12525_v47  ;;  %vm6565_vm7 = vcmp.gt.f32.partialorder %v6533_v32, 0.0 }
 0x529   : > { %v6628_v35 = vsel %vm6564_vm6, %v6532_v56, %v6596_v57 }
 0x52a   : > { %v6496_v42 = vadd.f32 %v6376_v0, %v16180_v11  ;;  %v6379_v34 = vadd.f32 %v12527_v15, %v16378_v43  ;;  %v6629_v27 = vsel %vm6565_vm7, %v6533_v32, %v6597_v49 }
 0x52b   : > { %v6660_v8 = vpack.c.bf16 %v6629_v27, %v6628_v35 }
 0x52c   : > { %v6534_v23 = vadd.f32 %v16533_v45, %v6496_v42  ;;  %v6497_v5 = vadd.f32 %v6379_v34, %v16187_v16  ;;  %v12528_v61 = vpop.f32.mrb[40].mxu0 }
 0x52d   : > { %v12529_v50 = vpop.f32.mrb[41].mxu0  ;;  %v6855_v51 = vshrl.u32 %v6660_v8, 16  ;;  %v6858_v46 = vshll.u32 %v6660_v8, 16  ;;  %7655 = vmatprep.mubr.bf16.mxu1 %v6660_v8 }
 0x52e   : > { %v6598_v59 = vmul.f32 0.2, %v6534_v23  ;;  %v6535_v63 = vadd.f32 %v16533_v45, %v6497_v5  ;;  %v12530_v12 = vadd.f32 %v12529_v50, %v12528_v61  ;;  %v12531_v36 = vpop.f32.mrb[42].mxu0  ;;  %vm6566_vm8 = vcmp.gt.f32.partialorder %v6534_v23, 0.0 }
 0x52f   : > { %v12532_v11 = vpop.f32.mrb[43].mxu0  ;;  %v6857_v43 = vrot.slane %v6855_v51, 7  ;;  %v6921_v56 = vrot.slane %v6858_v46, 1 }
 0x530   : > { %vm6567_vm9 = vcmp.gt.f32.partialorder %v6535_v63, 0.0  ;;  %v6599_v57 = vmul.f32 0.2, %v6535_v63  ;;  %v6384_v32 = vadd.f32 %v12530_v12, %v16384_v7  ;;  %v12533_v47 = vadd.f32 %v12532_v11, %v12531_v36  ;;  %v13513_v7 = vld [vmem:[%s18975_s5 + $0x208] sm:$0xff]  }
 0x531   : > { %v6860_v16 = vor.u32 %v6858_v46, %v6857_v43  ;;  %v6922_v18 = vor.u32 %v6921_v56, %v6855_v51  ;;  %v6630_v49 = vsel %vm6566_vm8, %v6534_v23, %v6598_v59 }
 0x532   : > { %v6631_v0 = vsel %vm6567_vm9, %v6535_v63, %v6599_v57  ;;  %v6498_v15 = vadd.f32 %v6384_v32, %v16193_v40  ;;  %v6387_v42 = vadd.f32 %v12533_v47, %v16393_v13 }
 0x533   : > { %v16551_v35 = vsel %vm13976_vm5, 0, %v6860_v16  ;;  %v16555_v5 = vsel %vm13787_vm2, %v6922_v18, 0  ;;  %v16557_v61 = vpack.c.bf16 %v6631_v0, %v6630_v49 }
 0x534   : > { %v6536_v23 = vadd.f32 %v16533_v45, %v6498_v15  ;;  %v12534_v50 = vpop.f32.mrb[44].mxu0  ;;  %7656 = vmatmul.mubr.bf16.gmra.mrb[36].mxu1 %v16551_v35  ;;  %7841 = vmatprep.mubr.bf16.mxu0 %v16555_v5  ;;  %v6499_v40 = vadd.f32 %v6387_v42, %v16197_v48  ;;  %v13516_v48 = vld [vmem:[%s18975_s5 + $0x210] sm:$0xff]  }
 0x535   : > { %v12535_v13 = vpop.f32.mrb[45].mxu0  ;;  %7663 = vmatprep.mubr.bf16.mxu1 %v16557_v61  ;;  %7842 = vmatmul.mubr.bf16.vlgmr.msra.gmra.mrb[96].mxu0 %v6660_v8  ;;  %v6862_v51 = vshrl.u32 %v16557_v61, 16  ;;  %v6865_v46 = vshll.u32 %v16557_v61, 16 }
 0x536   : > { %v12536_v59 = vadd.f32 %v12535_v13, %v12534_v50  ;;  %v12537_v63 = vpop.f32.mrb[46].mxu0  ;;  %13157 = vmatpush3.bf16.msra.mxu0 %v16481_v6  ;;  %v6600_v12 = vmul.f32 0.2, %v6536_v23  ;;  %v6537_v36 = vadd.f32 %v16533_v45, %v6499_v40  ;;  %vm6568_vm10 = vcmp.gt.f32.partialorder %v6536_v23, 0.0 }
 0x537   : > { %v12538_v11 = vpop.f32.mrb[47].mxu0  ;;  %v6864_v43 = vrot.slane %v6862_v51, 7  ;;  %v6923_v56 = vrot.slane %v6865_v46, 1  ;;  %13158 = vmatprep.subr.bf16.mxu0 %v13513_v7 }
 0x538   : > { %v6392_v8 = vadd.f32 %v12536_v59, %v16411_v60  ;;  %v12539_v57 = vadd.f32 %v12538_v11, %v12537_v63  ;;  %vm6569_vm11 = vcmp.gt.f32.partialorder %v6537_v36, 0.0  ;;  %v6601_v32 = vmul.f32 0.2, %v6537_v36  ;;  %v13517_v60 = vld [vmem:[%s18975_s5 + $0x218] sm:$0xff]  }
 0x539   : > { %v6867_v47 = vor.u32 %v6865_v46, %v6864_v43  ;;  %v6924_v16 = vor.u32 %v6923_v56, %v6862_v51  ;;  %v6632_v49 = vsel %vm6568_vm10, %v6536_v23, %v6600_v12  ;;  %v13520_v12 = vld [vmem:[%s18975_s5 + $0x220] sm:$0xff]  }
 0x53a   : > { %v6500_v6 = vadd.f32 %v6392_v8, %v16206_v41  ;;  %v6395_v18 = vadd.f32 %v12539_v57, %v16420_v52  ;;  %13159 = vmatpush3.bf16.msra.mxu0 %v13513_v7  ;;  %v6633_v0 = vsel %vm6569_vm11, %v6537_v36, %v6601_v32 }
 0x53b   : > { %v16579_v15 = vsel %vm13976_vm5, 0, %v6867_v47  ;;  %v16583_v42 = vsel %vm13787_vm2, %v6924_v16, 0  ;;  %13160 = vmatprep.subr.bf16.mxu0 %v13516_v48  ;;  %v16592_v23 = vpack.c.bf16 %v6633_v0, %v6632_v49 }
 0x53c   : > { %v6538_v41 = vadd.f32 %v16533_v45, %v6500_v6  ;;  %v6501_v52 = vadd.f32 %v6395_v18, %v16213_v4  ;;  %v12540_v7 = vpop.f32.mrb[48].mxu0  ;;  %7664 = vmatmul.mubr.bf16.gmra.mrb[40].mxu1 %v16579_v15  ;;  %7849 = vmatprep.mubr.bf16.mxu0 %v16583_v42 }
 0x53d   : > { %v12541_v50 = vpop.f32.mrb[49].mxu0  ;;  %7850 = vmatmul.mubr.bf16.gmra.mrb[100].mxu0 %v16557_v61  ;;  %7671 = vmatprep.mubr.bf16.mxu1 %v16592_v23  ;;  %v6869_v59 = vshrl.u32 %v16592_v23, 16  ;;  %v6872_v63 = vshll.u32 %v16592_v23, 16 }
 0x53e   : > { %v6602_v40 = vmul.f32 0.2, %v6538_v41  ;;  %v6539_v13 = vadd.f32 %v16533_v45, %v6501_v52  ;;  %v12542_v51 = vadd.f32 %v12541_v50, %v12540_v7  ;;  %v12543_v46 = vpop.f32.mrb[50].mxu0  ;;  %13161 = vmatpush3.bf16.msra.mxu0 %v13516_v48  ;;  %vm6570_vm12 = vcmp.gt.f32.partialorder %v6538_v41, 0.0 }
 0x53f   : > { %v12544_v4 = vpop.f32.mrb[51].mxu0  ;;  %13162 = vmatprep.subr.bf16.mxu0 %v13517_v60  ;;  %v6871_v56 = vrot.slane %v6869_v59, 7  ;;  %v6925_v8 = vrot.slane %v6872_v63, 1 }
 0x540   : > { %vm6571_vm13 = vcmp.gt.f32.partialorder %v6539_v13, 0.0  ;;  %v6603_v36 = vmul.f32 0.2, %v6539_v13  ;;  %v6400_v11 = vadd.f32 %v12542_v51, %v16435_v26  ;;  %v12545_v43 = vadd.f32 %v12544_v4, %v12543_v46 }
 0x541   : > { %v6634_v57 = vsel %vm6570_vm12, %v6538_v41, %v6602_v40  ;;  %v6874_v16 = vor.u32 %v6872_v63, %v6871_v56  ;;  %v6926_v6 = vor.u32 %v6925_v8, %v6869_v59  ;;  %v13521_v41 = vld [vmem:[%s18975_s5 + $0x228] sm:$0xff]  }
 0x542   : > { %v6635_v48 = vsel %vm6571_vm13, %v6539_v13, %v6603_v36  ;;  %v6502_v32 = vadd.f32 %v6400_v11, %v16219_v53  ;;  %13163 = vmatpush3.bf16.msra.mxu0 %v13517_v60  ;;  %v6403_v47 = vadd.f32 %v12545_v43, %v16438_v62  ;;  %v13524_v43 = vld [vmem:[%s18975_s5 + $0x230] sm:$0xff]  }
 0x543   : > { %v16605_v18 = vpack.c.bf16 %v6635_v48, %v6634_v57  ;;  %13164 = vmatprep.subr.bf16.mxu0 %v13520_v12  ;;  %v16611_v52 = vsel %vm13976_vm5, 0, %v6874_v16  ;;  %v16615_v53 = vsel %vm13787_vm2, %v6926_v6, 0 }
 0x544   : > { %v6540_v49 = vadd.f32 %v16533_v45, %v6502_v32  ;;  %v12546_v0 = vpop.f32.mrb[52].mxu0  ;;  %v6503_v26 = vadd.f32 %v6403_v47, %v16221_v29  ;;  %7672 = vmatmul.mubr.bf16.gmra.mrb[44].mxu1 %v16611_v52  ;;  %7857 = vmatprep.mubr.bf16.mxu0 %v16615_v53 }
 0x545   : > { %v12547_v60 = vpop.f32.mrb[53].mxu0  ;;  %v6876_v62 = vshrl.u32 %v16605_v18, 16  ;;  %v6879_v50 = vshll.u32 %v16605_v18, 16  ;;  %7679 = vmatprep.mubr.bf16.mxu1 %v16605_v18  ;;  %7858 = vmatmul.mubr.bf16.gmra.mrb[104].mxu0 %v16592_v23 }
 0x546   : > { %v12548_v29 = vadd.f32 %v12547_v60, %v12546_v0  ;;  %v12549_v7 = vpop.f32.mrb[54].mxu0  ;;  %v6604_v40 = vmul.f32 0.2, %v6540_v49  ;;  %v6541_v13 = vadd.f32 %v16533_v45, %v6503_v26  ;;  %vm6572_vm14 = vcmp.gt.f32.partialorder %v6540_v49, 0.0  ;;  %13165 = vmatpush3.bf16.msra.mxu0 %v13520_v12 }
 0x547   : > { %v12550_v51 = vpop.f32.mrb[55].mxu0  ;;  %v6878_v46 = vrot.slane %v6876_v62, 7  ;;  %v6927_v63 = vrot.slane %v6879_v50, 1  ;;  %13166 = vmatprep.subr.bf16.mxu0 %v13521_v41 }
 0x548   : > { %v6408_v4 = vadd.f32 %v12548_v29, %v16446_v9  ;;  %v12551_v59 = vadd.f32 %v12550_v51, %v12549_v7  ;;  %vm6573_vm15 = vcmp.gt.f32.partialorder %v6541_v13, 0.0  ;;  %v6605_v36 = vmul.f32 0.2, %v6541_v13 }
 0x549   : > { %v6881_v11 = vor.u32 %v6879_v50, %v6878_v46  ;;  %v6928_v57 = vor.u32 %v6927_v63, %v6876_v62  ;;  %v6636_v48 = vsel %vm6572_vm14, %v6540_v49, %v6604_v40 }
 0x54a   : > { %v6504_v56 = vadd.f32 %v6408_v4, %v16230_v22  ;;  %v6411_v8 = vadd.f32 %v12551_v59, %v16448_v19  ;;  %v6637_v32 = vsel %vm6573_vm15, %v6541_v13, %v6605_v36  ;;  %13167 = vmatpush3.bf16.msra.mxu0 %v13521_v41  ;;  %v13525_v19 = vld [vmem:[%s18975_s5 + $0x238] sm:$0xff]  }
 0x54b   : > { %v16635_v9 = vsel %vm13976_vm5, 0, %v6881_v11  ;;  %v16641_v6 = vsel %vm13787_vm2, %v6928_v57, 0  ;;  %v16643_v0 = vpack.c.bf16 %v6637_v32, %v6636_v48  ;;  %13168 = vmatprep.subr.bf16.mxu0 %v13524_v43 }
 0x54c   : > { %v6542_v12 = vadd.f32 %v16533_v45, %v6504_v56  ;;  %v6505_v47 = vadd.f32 %v6411_v8, %v16235_v31  ;;  %v12552_v16 = vpop.f32.mrb[56].mxu0  ;;  %7865 = vmatprep.mubr.bf16.mxu0 %v16641_v6  ;;  %7680 = vmatmul.mubr.bf16.gmra.mrb[48].mxu1 %v16635_v9 }
 0x54d   : > { %v12553_v22 = vpop.f32.mrb[57].mxu0  ;;  %7687 = vmatprep.mubr.bf16.mxu1 %v16643_v0  ;;  %7866 = vmatmul.mubr.bf16.gmra.mrb[108].mxu0 %v16605_v18  ;;  %v6883_v41 = vshrl.u32 %v16643_v0, 16  ;;  %v6886_v29 = vshll.u32 %v16643_v0, 16 }
 0x54e   : > { %v6606_v49 = vmul.f32 0.2, %v6542_v12  ;;  %v6543_v26 = vadd.f32 %v16533_v45, %v6505_v47  ;;  %v12554_v31 = vadd.f32 %v12553_v22, %v12552_v16  ;;  %v12555_v60 = vpop.f32.mrb[58].mxu0  ;;  %vm6574_vm0 = vcmp.gt.f32.partialorder %v6542_v12, 0.0  ;;  %13169 = vmatpush3.bf16.msra.mxu0 %v13524_v43 }
 0x54f   : > { %v12556_v62 = vpop.f32.mrb[59].mxu0  ;;  %v6885_v13 = vrot.slane %v6883_v41, 7  ;;  %v6929_v51 = vrot.slane %v6886_v29, 1  ;;  %13170 = vmatprep.subr.bf16.mxu0 %v13525_v19 }
 0x550   : > { %vm6575_vm1 = vcmp.gt.f32.partialorder %v6543_v26, 0.0  ;;  %v6607_v7 = vmul.f32 0.2, %v6543_v26  ;;  %v6416_v50 = vadd.f32 %v12554_v31, %v16456_v33  ;;  %v12557_v40 = vadd.f32 %v12556_v62, %v12555_v60 }
 0x551   : > { %v6638_v46 = vsel %vm6574_vm0, %v6542_v12, %v6606_v49  ;;  %v6888_v36 = vor.u32 %v6886_v29, %v6885_v13  ;;  %v6930_v11 = vor.u32 %v6929_v51, %v6883_v41 }
 0x552   : > { %v6639_v4 = vsel %vm6575_vm1, %v6543_v26, %v6607_v7  ;;  %v6506_v59 = vadd.f32 %v6416_v50, %v16241_v17  ;;  %v6419_v63 = vadd.f32 %v12557_v40, %v16458_v44  ;;  %13171 = vmatpush3.bf16.msra.mxu0 %v13525_v19 }
 0x553   : > { %v16658_v56 = vpack.c.bf16 %v6639_v4, %v6638_v46  ;;  %v16664_v43 = vsel %vm13976_vm5, 0, %v6888_v36  ;;  %v16668_v48 = vsel %vm13787_vm2, %v6930_v11, 0  ;;  %12948 = vmatprep.subr.bf16.mxu0 %v16402_v30 }
 0x554   : > { %v6544_v8 = vadd.f32 %v16533_v45, %v6506_v59  ;;  %v12558_v57 = vpop.f32.mrb[60].mxu0  ;;  %v6507_v33 = vadd.f32 %v6419_v63, %v16243_v39  ;;  %7688 = vmatmul.mubr.bf16.gmra.mrb[52].mxu1 %v16664_v43  ;;  %7873 = vmatprep.mubr.bf16.mxu0 %v16668_v48 }
 0x555   : > { %19470 = vst [vmem:[#allocation65_spill] sm:$0xff] %v16658_v56  ;;  %v12559_v17 = vpop.f32.mrb[61].mxu0  ;;  %v6890_v44 = vshrl.u32 %v16658_v56, 16  ;;  %v6893_v39 = vshll.u32 %v16658_v56, 16  ;;  %7695 = vmatprep.mubr.bf16.mxu1 %v16658_v56  ;;  %7874 = vmatmul.mubr.bf16.gmra.mrb[112].mxu0 %v16643_v0 }
 0x556   : > { %v12560_v32 = vadd.f32 %v12559_v17, %v12558_v57  ;;  %v12561_v12 = vpop.f32.mrb[62].mxu0  ;;  %v6608_v47 = vmul.f32 0.2, %v6544_v8  ;;  %v6545_v16 = vadd.f32 %v16533_v45, %v6507_v33  ;;  %vm6576_vm3 = vcmp.gt.f32.partialorder %v6544_v8, 0.0 }
 0x557   : > { %v12562_v22 = vpop.f32.mrb[63].mxu0  ;;  %v6892_v19 = vrot.slane %v6890_v44, 7  ;;  %v6931_v26 = vrot.slane %v6893_v39, 1 }
 0x558   : > { %v6424_v30 = vadd.f32 %v12560_v32, %v16466_v28  ;;  %v12563_v49 = vadd.f32 %v12562_v22, %v12561_v12  ;;  %vm6577_vm4 = vcmp.gt.f32.partialorder %v6545_v16, 0.0  ;;  %v6609_v31 = vmul.f32 0.2, %v6545_v16 }
 0x559   : > { %v6895_v60 = vor.u32 %v6893_v39, %v6892_v19  ;;  %v6932_v29 = vor.u32 %v6931_v26, %v6890_v44  ;;  %v6640_v7 = vsel %vm6576_vm3, %v6544_v8, %v6608_v47 }
 0x55a   : > { %v6508_v62 = vadd.f32 %v6424_v30, %v16252_v37  ;;  %v6427_v41 = vadd.f32 %v12563_v49, %v16468_v10  ;;  %v6641_v50 = vsel %vm6577_vm4, %v6545_v16, %v6609_v31 }
 0x55b   : > { %v16683_v40 = vsel %vm13976_vm5, 0, %v6895_v60  ;;  %v16689_v46 = vsel %vm13787_vm2, %v6932_v29, 0  ;;  %v16691_v4 = vpack.c.bf16 %v6641_v50, %v6640_v7 }
 0x55c   : > { %v6546_v13 = vadd.f32 %v16533_v45, %v6508_v62  ;;  %v6509_v28 = vadd.f32 %v6427_v41, %v16257_v54  ;;  %v12564_v51 = vpop.f32.mrb[64].mxu0  ;;  %7881 = vmatprep.mubr.bf16.mxu0 %v16689_v46  ;;  %7696 = vmatmul.mubr.bf16.gmra.mrb[56].mxu1 %v16683_v40 }
 0x55d   : > { %19471 = vst [vmem:[#allocation64_spill] sm:$0xff] %v16691_v4  ;;  %v12565_v37 = vpop.f32.mrb[65].mxu0  ;;  %7703 = vmatprep.mubr.bf16.mxu1 %v16691_v4  ;;  %7882 = vmatmul.mubr.bf16.gmra.mrb[116].mxu0 %v16658_v56  ;;  %v6897_v11 = vshrl.u32 %v16691_v4, 16  ;;  %v6900_v8 = vshll.u32 %v16691_v4, 16 }
 0x55e   : > { %v6610_v10 = vmul.f32 0.2, %v6546_v13  ;;  %v6547_v59 = vadd.f32 %v16533_v45, %v6509_v28  ;;  %v12566_v63 = vadd.f32 %v12565_v37, %v12564_v51  ;;  %v12567_v36 = vpop.f32.mrb[66].mxu0  ;;  %vm6578_vm6 = vcmp.gt.f32.partialorder %v6546_v13, 0.0 }
 0x55f   : > { %v12568_v54 = vpop.f32.mrb[67].mxu0  ;;  %v6899_v44 = vrot.slane %v6897_v11, 7  ;;  %v6933_v32 = vrot.slane %v6900_v8, 1 }
 0x560   : > { %vm6579_vm7 = vcmp.gt.f32.partialorder %v6547_v59, 0.0  ;;  %v6611_v57 = vmul.f32 0.2, %v6547_v59  ;;  %v6432_v33 = vadd.f32 %v12566_v63, %v16476_v3  ;;  %v12569_v17 = vadd.f32 %v12568_v54, %v12567_v36 }
 0x561   : > { %v6642_v12 = vsel %vm6578_vm6, %v6546_v13, %v6610_v10  ;;  %v6902_v19 = vor.u32 %v6900_v8, %v6899_v44  ;;  %v6934_v30 = vor.u32 %v6933_v32, %v6897_v11  ;;  %v16732_v11 = vld [vmem:[%s18975_s5 + $0x180] sm:$0xff]   ;;  %v16745_v44 = vld [vmem:[%s18975_s5 + $0x1c8] sm:$0xff]  }
 0x562   : > { %v6643_v39 = vsel %vm6579_vm7, %v6547_v59, %v6611_v57  ;;  %v6510_v47 = vadd.f32 %v6432_v33, %v16263_v21  ;;  %v6435_v22 = vadd.f32 %v12569_v17, %v16483_v1  ;;  %v19472_v59 = vld [vmem:[#allocation44_spill] sm:$0xff]  ;;  %v19474_v57 = vld [vmem:[#allocation15_spill] sm:$0xff] }
 0x563   : > { %v16702_v16 = vpack.c.bf16 %v6643_v39, %v6642_v12  ;;  %v16709_v3 = vsel %vm13976_vm5, 0, %v6902_v19  ;;  %v16713_v60 = vsel %vm13787_vm2, %v6934_v30, 0 }
 0x564   : > { %v6548_v49 = vadd.f32 %v16533_v45, %v6510_v47  ;;  %v12570_v26 = vpop.f32.mrb[68].mxu0  ;;  %v6511_v31 = vadd.f32 %v6435_v22, %v16265_v20  ;;  %7704 = vmatmul.mubr.bf16.gmra.mrb[60].mxu1 %v16709_v3  ;;  %7889 = vmatprep.mubr.bf16.mxu0 %v16713_v60  ;;  %v19475_v47 = vld [vmem:[#allocation112_spill] sm:$0xff] }
 0x565   : > { %v12571_v21 = vpop.f32.mrb[69].mxu0  ;;  %v19150_v41 = vshll.u32 %v16702_v16, 16  ;;  %7744 = vmatprep.mubr.bf16.mxu1 %v16551_v35  ;;  %7890 = vmatmul.mubr.bf16.gmra.mrb[120].mxu0 %v16691_v4  ;;  %v19151_v50 = vshrl.u32 %v16702_v16, 16 }
 0x566   : > { %v12572_v1 = vadd.f32 %v12571_v21, %v12570_v26  ;;  %v12573_v62 = vpop.f32.mrb[70].mxu0  ;;  %v6612_v29 = vmul.f32 0.2, %v6548_v49  ;;  %v6549_v20 = vadd.f32 %v16533_v45, %v6511_v31  ;;  %vm6580_vm8 = vcmp.gt.f32.partialorder %v6548_v49, 0.0  ;;  %v19476_v31 = vld [vmem:[#allocation43_spill] sm:$0xff] }
 0x567   : > { %v12574_v7 = vpop.f32.mrb[71].mxu0  ;;  %v7045_v51 = vrot.slane %v19150_v41, 1 }
 0x568   : > { %v6440_v13 = vadd.f32 %v12572_v1, %v16492_v55  ;;  %v12575_v28 = vadd.f32 %v12574_v7, %v12573_v62  ;;  %vm6581_vm9 = vcmp.gt.f32.partialorder %v6549_v20, 0.0  ;;  %v6613_v37 = vmul.f32 0.2, %v6549_v20  ;;  %v16763_v1 = vld [vmem:[%s18975_s5 + $0x1d0] sm:$0xff]   ;;  %v19477_v7 = vld [vmem:[#allocation19_spill] sm:$0xff] }
 0x569   : > { %v7046_v35 = vor.u32 %v7045_v51, %v19151_v50  ;;  %v6644_v36 = vsel %vm6580_vm8, %v6548_v49, %v6612_v29  ;;  %v16755_v49 = vld [vmem:[%s18975_s5 + $0x188] sm:$0xff]   ;;  %v19478_v51 = vld [vmem:[#allocation50_spill] sm:$0xff] }
 0x56a   : > { %v6512_v10 = vadd.f32 %v6440_v13, %v16274_v25  ;;  %v6443_v63 = vadd.f32 %v12575_v28, %v19472_v59  ;;  %v6645_v54 = vsel %vm6581_vm9, %v6549_v20, %v6613_v37 }
 0x56b   : > { %v16734_v55 = vpack.c.bf16 %v6645_v54, %v6644_v36  ;;  %v16740_v25 = vsel %vm13787_vm2, %v7046_v35, 0  ;;  %v16781_v35 = vld [vmem:[%s18975_s5 + $0x1d8] sm:$0xff]  }
 0x56c   : > { %v6550_v8 = vadd.f32 %v16533_v45, %v6512_v10  ;;  %v6513_v33 = vadd.f32 %v6443_v63, %v19474_v57  ;;  %v12576_v17 = vpop.f32.mrb[72].mxu0  ;;  %7897 = vmatprep.mubr.bf16.mxu0 %v16740_v25  ;;  %7745 = vmatmul.mubr.bf16.vlgmr.msra.gmra.mrb[64].mxu1 %v19475_v47  ;;  %v16774_v10 = vld [vmem:[%s18975_s5 + $0x190] sm:$0xff]   ;;  %v19488_v47 = vld [vmem:[#allocation60_spill] sm:$0xff] }
 0x56d   : > { %19473 = vst [vmem:[#allocation71_spill] sm:$0xff] %v16734_v55  ;;  %v12577_v32 = vpop.f32.mrb[73].mxu0  ;;  %12805 = vmatpush3.bf16.msra.mxu1 %v16732_v11  ;;  %7752 = vmatprep.mubr.bf16.mxu1 %v16579_v15  ;;  %v19479_v36 = vld [vmem:[#allocation18_spill] sm:$0xff] }
 0x56e   : > { %v6614_v12 = vmul.f32 0.2, %v6550_v8  ;;  %v6551_v39 = vadd.f32 %v16533_v45, %v6513_v33  ;;  %v12578_v22 = vadd.f32 %v12577_v32, %v12576_v17  ;;  %v12579_v19 = vpop.f32.mrb[74].mxu0  ;;  %vm6582_vm10 = vcmp.gt.f32.partialorder %v6550_v8, 0.0  ;;  %7898 = vmatmul.mubr.bf16.gmra.mrb[124].mxu0 %v16702_v16  ;;  %12806 = vmatprep.subr.bf16.mxu1 %v16745_v44 }
 0x56f   : > { %v12580_v30 = vpop.f32.mrb[75].mxu0  ;;  %13172 = vmatprep.mubr.bf16.mxu0 %v16583_v42 }
 0x570   : > { %vm6583_vm11 = vcmp.gt.f32.partialorder %v6551_v39, 0.0  ;;  %v6615_v26 = vmul.f32 0.2, %v6551_v39  ;;  %v6448_v21 = vadd.f32 %v12578_v22, %v19476_v31  ;;  %v12581_v62 = vadd.f32 %v12580_v30, %v12579_v19  ;;  %v19480_v22 = vld [vmem:[#allocation49_spill] sm:$0xff]  ;;  %v16799_v30 = vld [vmem:[%s18975_s5 + $0x1e0] sm:$0xff]  }
 0x571   : > { %v6646_v29 = vsel %vm6582_vm10, %v6550_v8, %v6614_v12  ;;  %12807 = vmatpush3.bf16.msra.mxu1 %v16755_v49  ;;  %v13540_v31 = vld [vmem:[%s18975_s5 + $0x80] sm:$0xff]  }
 0x572   : > { %v6647_v20 = vsel %vm6583_vm11, %v6551_v39, %v6615_v26  ;;  %v6514_v13 = vadd.f32 %v6448_v21, %v19477_v7  ;;  %v6451_v37 = vadd.f32 %v12581_v62, %v19478_v51  ;;  %12808 = vmatprep.subr.bf16.mxu1 %v16763_v1  ;;  %v16791_v39 = vld [vmem:[%s18975_s5 + $0x198] sm:$0xff]   ;;  %v12628_v21 = vpop.f32.mrb[32].mxu1 }
 0x573   : > { %v16767_v28 = vpack.c.bf16 %v6647_v20, %v6646_v29  ;;  %v19481_v62 = vld [vmem:[#allocation23_spill] sm:$0xff]  ;;  %v19482_v20 = vld [vmem:[#allocation54_spill] sm:$0xff] }
 0x574   : > { %v6552_v59 = vadd.f32 %v16533_v45, %v6514_v13  ;;  %v12582_v63 = vpop.f32.mrb[76].mxu0  ;;  %v6515_v54 = vadd.f32 %v6451_v37, %v19479_v36  ;;  %7753 = vmatmul.mubr.bf16.gmra.mrb[68].mxu1 %v16555_v5  ;;  %v13541_v13 = vld [vmem:[%s18975_s5 + $0xc8] sm:$0xff]  }
 0x575   : > { %v12583_v8 = vpop.f32.mrb[77].mxu0  ;;  %7760 = vmatprep.mubr.bf16.mxu1 %v16611_v52  ;;  %12809 = vmatpush3.bf16.msra.mxu1 %v16774_v10 }
 0x576   : > { %v12584_v57 = vadd.f32 %v12583_v8, %v12582_v63  ;;  %v12585_v33 = vpop.f32.mrb[78].mxu0  ;;  %v6616_v17 = vmul.f32 0.2, %v6552_v59  ;;  %v6553_v32 = vadd.f32 %v16533_v45, %v6515_v54  ;;  %vm6584_vm12 = vcmp.gt.f32.partialorder %v6552_v59, 0.0  ;;  %13173 = vmatmul.mubr.bf16.vlgmr.msra.gmra.mrb[128].mxu0 %v16615_v53  ;;  %12810 = vmatprep.subr.bf16.mxu1 %v16781_v35  ;;  %v16815_v63 = vld [vmem:[%s18975_s5 + $0x1a0] sm:$0xff]   ;;  %v19483_v8 = vld [vmem:[#allocation22_spill] sm:$0xff] }
 0x577   : > { %v12586_v12 = vpop.f32.mrb[79].mxu0  ;;  %13176 = vmatprep.mubr.bf16.mxu0 %v16641_v6  ;;  %12949 = vmatpush3.bf16.msra.mxu0 %v13540_v31 }
 0x578   : > { %v6456_v19 = vadd.f32 %v12584_v57, %v19480_v22  ;;  %v12587_v5 = vadd.f32 %v12586_v12, %v12585_v33  ;;  %vm6585_vm13 = vcmp.gt.f32.partialorder %v6553_v32, 0.0  ;;  %v6617_v26 = vmul.f32 0.2, %v6553_v32  ;;  %12950 = vmatprep.subr.bf16.mxu0 %v13541_v13  ;;  %v16848_v13 = vld [vmem:[%s18975_s5 + $0x1f0] sm:$0xff]  }
 0x579   : > { %v6648_v51 = vsel %vm6584_vm12, %v6552_v59, %v6616_v17  ;;  %12811 = vmatpush3.bf16.msra.mxu1 %v16791_v39  ;;  %v16825_v59 = vld [vmem:[%s18975_s5 + $0x1e8] sm:$0xff]  }
 0x57a   : > { %v6516_v29 = vadd.f32 %v6456_v19, %v19481_v62  ;;  %v6459_v7 = vadd.f32 %v12587_v5, %v19482_v20  ;;  %v6649_v37 = vsel %vm6585_vm13, %v6553_v32, %v6617_v26  ;;  %12812 = vmatprep.subr.bf16.mxu1 %v16799_v30  ;;  %v13542_v17 = vld [vmem:[%s18975_s5 + $0x88] sm:$0xff]   ;;  %v13543_v5 = vld [vmem:[%s18975_s5 + $0xd0] sm:$0xff]  }
 0x57b   : > { %v16817_v36 = vpack.c.bf16 %v6649_v37, %v6648_v51  ;;  %12951 = vmatpush3.bf16.msra.mxu0 %v13542_v17  ;;  %v16840_v62 = vld [vmem:[%s18975_s5 + $0x1a8] sm:$0xff]   ;;  %v13544_v37 = vld [vmem:[%s18975_s5 + $0x90] sm:$0xff]  }
 0x57c   : > { %v6554_v54 = vadd.f32 %v16533_v45, %v6516_v29  ;;  %v6517_v57 = vadd.f32 %v6459_v7, %v19483_v8  ;;  %v12588_v33 = vpop.f32.mrb[80].mxu0  ;;  %7761 = vmatmul.mubr.bf16.gmra.mrb[72].mxu1 %v16583_v42  ;;  %12952 = vmatprep.subr.bf16.mxu0 %v13543_v5  ;;  %v12629_v29 = vpop.f32.mrb[33].mxu1  ;;  %v19484_v20 = vld [vmem:[#allocation53_spill] sm:$0xff] }
 0x57d   : > { %v12589_v32 = vpop.f32.mrb[81].mxu0  ;;  %7768 = vmatprep.mubr.bf16.mxu1 %v16635_v9  ;;  %12813 = vmatpush3.bf16.msra.mxu1 %v16815_v63  ;;  %v12631_v51 = vpop.f32.mrb[34].mxu1 }
 0x57e   : > { %v6618_v12 = vmul.f32 0.2, %v6554_v54  ;;  %v6555_v22 = vadd.f32 %v16533_v45, %v6517_v57  ;;  %v12590_v19 = vadd.f32 %v12589_v32, %v12588_v33  ;;  %v12591_v26 = vpop.f32.mrb[82].mxu0  ;;  %vm6586_vm14 = vcmp.gt.f32.partialorder %v6554_v54, 0.0  ;;  %13177 = vmatmul.mubr.bf16.gmra.mrb[132].mxu0 %v16668_v48  ;;  %12814 = vmatprep.subr.bf16.mxu1 %v16825_v59  ;;  %v12632_v33 = vpop.f32.mrb[35].mxu1 }
 0x57f   : > { %v12592_v31 = vpop.f32.mrb[83].mxu0  ;;  %13180 = vmatprep.mubr.bf16.mxu0 %v16689_v46  ;;  %12953 = vmatpush3.bf16.msra.mxu0 %v13544_v37  ;;  %v16854_v57 = vadd.f32 %v12629_v29, %v12628_v21  ;;  %v16861_v41 = vadd.f32 %v12632_v33, %v12631_v51  ;;  %v7123_v21 = vshrl.u32 %v16734_v55, 16 }
 0x580   : > { %vm6587_vm15 = vcmp.gt.f32.partialorder %v6555_v22, 0.0  ;;  %v6619_v42 = vmul.f32 0.2, %v6555_v22  ;;  %v6464_v7 = vadd.f32 %v12590_v19, %v19484_v20  ;;  %v12593_v8 = vadd.f32 %v12592_v31, %v12591_v26  ;;  %v19486_v19 = vld [vmem:[#allocation27_spill] sm:$0xff]  ;;  %v19489_v31 = vld [vmem:[#allocation26_spill] sm:$0xff] }
 0x581   : > { %19485 = vst [vmem:[#allocation70_spill] sm:$0xff] %v16854_v57  ;;  %v6650_v17 = vsel %vm6586_vm14, %v6554_v54, %v6618_v12  ;;  %v13545_v20 = vld [vmem:[%s18975_s5 + $0xd8] sm:$0xff]   ;;  %19487 = vst [vmem:[#allocation93_spill] sm:$0xff] %v16861_v41  ;;  %v7126_v26 = vshll.u32 %v16734_v55, 16  ;;  %12815 = vmatpush3.bf16.msra.mxu1 %v16840_v62  ;;  %v16872_v54 = vld [vmem:[%s18975_s5 + $0x1b0] sm:$0xff]  }
 0x582   : > { %v6651_v32 = vsel %vm6587_vm15, %v6555_v22, %v6619_v42  ;;  %v6518_v5 = vadd.f32 %v6464_v7, %v19486_v19  ;;  %12954 = vmatprep.subr.bf16.mxu0 %v13545_v20  ;;  %v6467_v37 = vadd.f32 %v12593_v8, %v19488_v47  ;;  %12816 = vmatprep.subr.bf16.mxu1 %v16848_v13  ;;  %v16879_v47 = vld [vmem:[%s18975_s5 + $0x1f8] sm:$0xff]   ;;  %v13547_v8 = vld [vmem:[%s18975_s5 + $0xe0] sm:$0xff]   ;;  %v7125_v20 = vrot.slane %v7123_v21, 7 }
 0x583   : > { %v16863_v50 = vpack.c.bf16 %v6651_v32, %v6650_v17  ;;  %v13546_v42 = vld [vmem:[%s18975_s5 + $0x98] sm:$0xff]  }
 0x584   : > { %v6556_v12 = vadd.f32 %v16533_v45, %v6518_v5  ;;  %v12594_v22 = vpop.f32.mrb[84].mxu0  ;;  %v6519_v29 = vadd.f32 %v6467_v37, %v19489_v31  ;;  %12955 = vmatpush3.bf16.msra.mxu0 %v13546_v42  ;;  %7769 = vmatmul.mubr.bf16.gmra.mrb[76].mxu1 %v16615_v53  ;;  %v7159_v5 = vrot.slane %v7126_v26, 1  ;;  %v16895_v53 = vld [vmem:[%s18975_s5 + $0x1b8] sm:$0xff]   ;;  %v19490_v42 = vld [vmem:[#allocation33_spill] sm:$0xff]  ;;  %v7128_v57 = vor.u32 %v7126_v26, %v7125_v20 }
 0x585   : > { %v12595_v7 = vpop.f32.mrb[85].mxu0  ;;  %12956 = vmatprep.subr.bf16.mxu0 %v13547_v8  ;;  %7776 = vmatprep.mubr.bf16.mxu1 %v16664_v43  ;;  %v19491_v8 = vld [vmem:[#allocation59_spill] sm:$0xff] }
 0x586   : > { %v12596_v51 = vadd.f32 %v12595_v7, %v12594_v22  ;;  %v12597_v33 = vpop.f32.mrb[86].mxu0  ;;  %v6620_v17 = vmul.f32 0.2, %v6556_v12  ;;  %v6557_v32 = vadd.f32 %v16533_v45, %v6519_v29  ;;  %12817 = vmatpush3.bf16.msra.mxu1 %v16872_v54  ;;  %vm6588_vm0 = vcmp.gt.f32.partialorder %v6556_v12, 0.0  ;;  %13181 = vmatmul.mubr.bf16.gmra.mrb[136].mxu0 %v16713_v60  ;;  %v13548_v29 = vld [vmem:[%s18975_s5 + $0xa0] sm:$0xff]  }
 0x587   : > { %v12598_v19 = vpop.f32.mrb[87].mxu0  ;;  %12818 = vmatprep.subr.bf16.mxu1 %v16879_v47  ;;  %13184 = vmatprep.mubr.bf16.mxu0 %v16740_v25 }
 0x588   : > { %v6472_v37 = vadd.f32 %v12596_v51, %v16517_v2  ;;  %v12599_v22 = vadd.f32 %v12598_v19, %v12597_v33  ;;  %vm6589_vm1 = vcmp.gt.f32.partialorder %v6557_v32, 0.0  ;;  %v6621_v31 = vmul.f32 0.2, %v6557_v32  ;;  %12957 = vmatpush3.bf16.msra.mxu0 %v13548_v29  ;;  %v13549_v2 = vld [vmem:[%s18975_s5 + $0xe8] sm:$0xff]  }
 0x589   : > { %12958 = vmatprep.subr.bf16.mxu0 %v13549_v2  ;;  %v6652_v51 = vsel %vm6588_vm0, %v6556_v12, %v6620_v17  ;;  %v7160_v19 = vor.u32 %v7159_v5, %v7123_v21  ;;  %v19492_v29 = vld [vmem:[#allocation32_spill] sm:$0xff]  ;;  %v13553_v2 = vld [vmem:[%s18975_s5 + $0xb0] sm:$0xff]  }
 0x58a   : > { %v6520_v7 = vadd.f32 %v6472_v37, %v19490_v42  ;;  %v6475_v41 = vadd.f32 %v12599_v22, %v19491_v8  ;;  %v6653_v33 = vsel %vm6589_vm1, %v6557_v32, %v6621_v31  ;;  %12819 = vmatpush3.bf16.msra.mxu1 %v16895_v53  ;;  %v8188_v22 = vshrl.u32 %v16767_v28, 16  ;;  %v13550_v42 = vld [vmem:[%s18975_s5 + $0x40] sm:$0xff]   ;;  %v13551_v21 = vld [vmem:[%s18975_s5 + $0xa8] sm:$0xff]   ;;  %v13552_v32 = vld [vmem:[%s18975_s5 + $0xf0] sm:$0xff]  }
 0x58b   : > { %v16910_v55 = vpack.c.bf16 %v6653_v33, %v6652_v51  ;;  %12884 = vmatprep.subr.bf16.mxu1 %v13550_v42  ;;  %v16929_v20 = vsel %vm13787_vm2, %v7160_v19, 0  ;;  %v16933_v31 = vsel %vm13976_vm5, 0, %v7128_v57  ;;  %v19493_v19 = vld [vmem:[#allocation37_spill] sm:$0xff] }
 0x58c   : > { %v6558_v4 = vadd.f32 %v16533_v45, %v6520_v7  ;;  %v6521_v56 = vadd.f32 %v6475_v41, %v19492_v29  ;;  %v12600_v37 = vpop.f32.mrb[88].mxu0  ;;  %12959 = vmatpush3.bf16.msra.mxu0 %v13551_v21  ;;  %7777 = vmatmul.mubr.bf16.gmra.mrb[80].mxu1 %v16641_v6  ;;  %v8190_v8 = vrot.slane %v8188_v22, 7 }
 0x58d   : > { %v12601_v26 = vpop.f32.mrb[89].mxu0  ;;  %12960 = vmatprep.subr.bf16.mxu0 %v13552_v32  ;;  %7784 = vmatprep.mubr.bf16.mxu1 %v16683_v40 }
 0x58e   : > { %v6622_v12 = vmul.f32 0.2, %v6558_v4  ;;  %v6559_v17 = vadd.f32 %v16533_v45, %v6521_v56  ;;  %v12602_v41 = vadd.f32 %v12601_v26, %v12600_v37  ;;  %v12603_v5 = vpop.f32.mrb[90].mxu0  ;;  %vm6590_vm3 = vcmp.gt.f32.partialorder %v6558_v4, 0.0  ;;  %13185 = vmatmul.mubr.bf16.gmra.mrb[140].mxu0 %v16929_v20 }
 0x58f   : > { %v12604_v56 = vpop.f32.mrb[91].mxu0  ;;  %8634 = vmatprep.mubr.bf16.mxu0 %v16933_v31  ;;  %v8191_v37 = vshll.u32 %v16767_v28, 16  ;;  %v8195_v26 = vshrl.u32 %v16817_v36, 16 }
 0x590   : > { %vm6591_vm4 = vcmp.gt.f32.partialorder %v6559_v17, 0.0  ;;  %v6623_v6 = vmul.f32 0.2, %v6559_v17  ;;  %v6480_v7 = vadd.f32 %v12602_v41, %v16521_v58  ;;  %12961 = vmatpush3.bf16.msra.mxu0 %v13553_v2  ;;  %v12605_v51 = vadd.f32 %v12604_v56, %v12603_v5  ;;  %v13554_v58 = vld [vmem:[%s18975_s5 + $0xf8] sm:$0xff]  }
 0x591   : > { %v6654_v57 = vsel %vm6590_vm3, %v6558_v4, %v6622_v12  ;;  %12962 = vmatprep.subr.bf16.mxu0 %v13554_v58  ;;  %v8193_v4 = vor.u32 %v8191_v37, %v8190_v8  ;;  %v19494_v12 = vld [vmem:[#allocation36_spill] sm:$0xff]  ;;  %v13555_v5 = vld [vmem:[%s18975_s5 + $0xb8] sm:$0xff]  }
 0x592   : > { %v6655_v33 = vsel %vm6591_vm4, %v6559_v17, %v6623_v6  ;;  %v6522_v29 = vadd.f32 %v6480_v7, %v19493_v19  ;;  %v6483_v21 = vadd.f32 %v12605_v51, %v16523_v14  ;;  %v19495_v14 = vshrl.u32 %v16702_v16, 16  ;;  %v13556_v51 = vld [vmem:[%s18975_s5 + $0x1c0] sm:$0xff]  }
 0x593   : > { %v16948_v42 = vpack.c.bf16 %v6655_v33, %v6654_v57  ;;  %v8197_v19 = vrot.slane %v8195_v26, 7 }
 0x594   : > { %v6560_v41 = vadd.f32 %v16533_v45, %v6522_v29  ;;  %v12606_v32 = vpop.f32.mrb[92].mxu0  ;;  %v6523_v17 = vadd.f32 %v6483_v21, %v19494_v12  ;;  %12963 = vmatpush3.bf16.msra.mxu0 %v13555_v5  ;;  %7785 = vmatmul.mubr.bf16.gmra.mrb[84].mxu1 %v16668_v48  ;;  %v7011_v2 = vrot.slane %v19495_v14, 7  ;;  %v16971_v29 = vsel %vm13976_vm5, 0, %v8193_v4  ;;  %v19496_v12 = vld [vmem:[#allocation42_spill] sm:$0xff] }
 0x595   : > { %v12607_v56 = vpop.f32.mrb[93].mxu0  ;;  %13076 = vmatprep.subr.bf16.mxu0 %v13556_v51  ;;  %7792 = vmatprep.mubr.bf16.mxu1 %v16709_v3  ;;  %v19498_v51 = vld [vmem:[#allocation41_spill] sm:$0xff] }
 0x596   : > { %v12608_v6 = vadd.f32 %v12607_v56, %v12606_v32  ;;  %v12609_v7 = vpop.f32.mrb[94].mxu0  ;;  %v6624_v8 = vmul.f32 0.2, %v6560_v41  ;;  %v6561_v57 = vadd.f32 %v16533_v45, %v6523_v17  ;;  %vm6592_vm6 = vcmp.gt.f32.partialorder %v6560_v41, 0.0 }
 0x597   : > { %v12610_v33 = vpop.f32.mrb[95].mxu0  ;;  %8635 = vmatmul.mubr.bf16.vlgmr.msra.gmra.mrb[144].mxu0 %v16740_v25  ;;  %v8198_v32 = vshll.u32 %v16817_v36, 16 }
 0x598   : > { %v6488_v48 = vadd.f32 %v12608_v6, %v16525_v24  ;;  %v12611_v58 = vadd.f32 %v12610_v33, %v12609_v7  ;;  %vm6593_vm7 = vcmp.gt.f32.partialorder %v6561_v57, 0.0  ;;  %v6625_v21 = vmul.f32 0.2, %v6561_v57  ;;  %8642 = vmatprep.mubr.bf16.mxu0 %v16971_v29  ;;  %13077 = vmatpush3.bf16.msra.mxu0 %v16732_v11 }
 0x599   : > { %v19497_v24 = vshll.u32 %v16702_v16, 16  ;;  %13078 = vmatprep.subr.bf16.mxu0 %v16745_v44  ;;  %v6656_v4 = vsel %vm6592_vm6, %v6560_v41, %v6624_v8  ;;  %v8200_v6 = vor.u32 %v8198_v32, %v8197_v19  ;;  %v8202_v11 = vshrl.u32 %v16863_v50, 16 }
 0x59a   : > { %v6524_v17 = vadd.f32 %v6488_v48, %v19496_v12  ;;  %v6491_v5 = vadd.f32 %v12611_v58, %v16527_v38  ;;  %v6657_v56 = vsel %vm6593_vm7, %v6561_v57, %v6625_v21  ;;  %v8249_v41 = vrot.slane %v8191_v37, 1 }
 0x59b   : > { %v7014_v25 = vor.u32 %v19497_v24, %v7011_v2  ;;  %v16981_v7 = vpack.c.bf16 %v6657_v56, %v6656_v4  ;;  %v8209_v58 = vshrl.u32 %v16910_v55, 16  ;;  %v13557_v24 = vld [vmem:[%s18975_s5] sm:$0xff]   ;;  %v13560_v56 = vld [vmem:[%s18975_s5 + $0x50] sm:$0xff]  }
 0x59c   : > { %v6562_v14 = vadd.f32 %v16533_v45, %v6524_v17  ;;  %v6525_v33 = vadd.f32 %v6491_v5, %v19498_v51  ;;  %13079 = vmatpush3.bf16.msra.mxu0 %v16755_v49  ;;  %7793 = vmatmul.mubr.bf16.gmra.mrb[88].mxu1 %v16689_v46  ;;  %v16998_v49 = vsel %vm13976_vm5, 0, %v8200_v6  ;;  %v8250_v37 = vor.u32 %v8249_v41, %v8188_v22 }
 0x59d   : > { %v16991_v44 = vsel %vm13976_vm5, 0, %v7014_v25  ;;  %13080 = vmatprep.subr.bf16.mxu0 %v16763_v1  ;;  %v8205_v1 = vshll.u32 %v16863_v50, 16  ;;  %v8216_v5 = vshrl.u32 %v16948_v42, 16  ;;  %v13559_v25 = vld [vmem:[%s18975_s5 + $0x8] sm:$0xff]   ;;  %v8223_v6 = vshrl.u32 %v16981_v7, 16 }
 0x59e   : > { %v6626_v48 = vmul.f32 0.2, %v6562_v14  ;;  %v6563_v38 = vadd.f32 %v16533_v45, %v6525_v33  ;;  %vm6594_vm8 = vcmp.gt.f32.partialorder %v6562_v14, 0.0  ;;  %7800 = vmatprep.mubr.bf16.mxu1 %v16991_v44  ;;  %v8204_v45 = vrot.slane %v8202_v11, 7 }
 0x59f   : > { %8643 = vmatmul.mubr.bf16.gmra.mrb[148].mxu0 %v16929_v20 }
 0x5a0   : > { %vm6595_vm9 = vcmp.gt.f32.partialorder %v6563_v38, 0.0  ;;  %v6627_v2 = vmul.f32 0.2, %v6563_v38  ;;  %8650 = vmatprep.mubr.bf16.mxu0 %v16998_v49  ;;  %13081 = vmatpush3.bf16.msra.mxu0 %v16774_v10  ;;  %v6658_v46 = vsel %vm6594_vm8, %v6562_v14, %v6626_v48  ;;  %v8207_v19 = vor.u32 %v8205_v1, %v8204_v45  ;;  %v13561_v14 = vld [vmem:[%s18975_s5 + $0x10] sm:$0xff]   ;;  %v13565_v45 = vld [vmem:[%s18975_s5 + $0x20] sm:$0xff]  }
 0x5a1   : > { %13082 = vmatprep.subr.bf16.mxu0 %v16781_v35  ;;  %v8251_v10 = vrot.slane %v8198_v32, 1  ;;  %v17016_v35 = vsel %vm13787_vm2, %v8250_v37, 0 }
 0x5a2   : > { %v6659_v8 = vsel %vm6595_vm9, %v6563_v38, %v6627_v2  ;;  %v13564_v38 = vld [vmem:[%s18975_s5 + $0x60] sm:$0xff]  }
 0x5a3   : > { %v17006_v57 = vpack.c.bf16 %v6659_v8, %v6658_v46  ;;  %v8252_v32 = vor.u32 %v8251_v10, %v8195_v26  ;;  %v19499_v10 = vld [vmem:[#allocation65_spill] sm:$0xff] }
 0x5a4   : > { %13083 = vmatpush3.bf16.msra.mxu0 %v16791_v39  ;;  %7801 = vmatmul.mubr.bf16.gmra.mrb[92].mxu1 %v16713_v60  ;;  %v17024_v39 = vsel %vm13976_vm5, 0, %v8207_v19  ;;  %v8211_v60 = vrot.slane %v8209_v58, 7  ;;  %v13568_v19 = vld [vmem:[%s18975_s5 + $0x70] sm:$0xff]  }
 0x5a5   : > { %v8340_v21 = vshll.u32 %v17006_v57, 16  ;;  %13084 = vmatprep.subr.bf16.mxu0 %v16799_v30  ;;  %7938 = vmatprep.mubr.bf16.mxu1 %v16557_v61  ;;  %v8337_v22 = vshrl.u32 %v17006_v57, 16  ;;  %v8212_v30 = vshll.u32 %v16910_v55, 16 }
 0x5a7   : > { %v8373_v12 = vrot.slane %v8340_v21, 1  ;;  %8651 = vmatmul.mubr.bf16.gmra.mrb[152].mxu0 %v17016_v35  ;;  %v8214_v17 = vor.u32 %v8212_v30, %v8211_v60 }
 0x5a8   : > { %8658 = vmatprep.mubr.bf16.mxu0 %v17024_v39  ;;  %13085 = vmatpush3.bf16.msra.mxu0 %v16815_v63  ;;  %v8253_v63 = vrot.slane %v8205_v1, 1  ;;  %v13567_v1 = vld [vmem:[%s18975_s5 + $0x28] sm:$0xff]  }
 0x5a9   : > { %v17030_v61 = vor.u32 %v8373_v12, %v8337_v22  ;;  %13086 = vmatprep.subr.bf16.mxu0 %v16825_v59  ;;  %v17046_v59 = vsel %vm13787_vm2, %v8252_v32, 0  ;;  %v13569_v12 = vld [vmem:[%s18975_s5 + $0x30] sm:$0xff]   ;;  %v13572_v32 = vld [vmem:[%s18975_s5 + $0x140] sm:$0xff]  }
 0x5aa   : > { %v8254_v26 = vor.u32 %v8253_v63, %v8202_v11  ;;  %v13563_v11 = vld [vmem:[%s18975_s5 + $0x18] sm:$0xff]   ;;  %v13574_v63 = vld [vmem:[%s18975_s5 + $0x148] sm:$0xff]  }
 0x5ac   : > { %13087 = vmatpush3.bf16.msra.mxu0 %v16840_v62  ;;  %7939 = vmatmul.mubr.bf16.vlgmr.msra.gmra.mrb[96].mxu1 %v16579_v15  ;;  %v17051_v62 = vsel %vm13976_vm5, 0, %v8214_v17  ;;  %v13558_v15 = vld [vmem:[%s18975_s5 + $0x48] sm:$0xff]  }
 0x5ad   : > { %13088 = vmatprep.subr.bf16.mxu0 %v16848_v13  ;;  %12885 = vmatpush3.bf16.msra.mxu1 %v13557_v24  ;;  %v8218_v13 = vrot.slane %v8216_v5, 7  ;;  %v19500_v17 = vld [vmem:[#allocation64_spill] sm:$0xff]  ;;  %v13577_v24 = vld [vmem:[%s18975_s5 + $0x110] sm:$0xff]  }
 0x5ae   : > { %7946 = vmatprep.mubr.bf16.mxu1 %v16592_v23  ;;  %12886 = vmatprep.subr.bf16.mxu1 %v13558_v15  ;;  %v8219_v23 = vshll.u32 %v16948_v42, 16  ;;  %v13578_v15 = vld [vmem:[%s18975_s5 + $0x158] sm:$0xff]  }
 0x5af   : > { %8659 = vmatmul.mubr.bf16.gmra.mrb[156].mxu0 %v17046_v59 }
 0x5b0   : > { %8666 = vmatprep.mubr.bf16.mxu0 %v17051_v62  ;;  %13089 = vmatpush3.bf16.msra.mxu0 %v16872_v54  ;;  %v8221_v4 = vor.u32 %v8219_v23, %v8218_v13  ;;  %v8255_v54 = vrot.slane %v8212_v30, 1  ;;  %v8257_v41 = vrot.slane %v8219_v23, 1  ;;  %v13571_v30 = vld [vmem:[%s18975_s5 + $0x38] sm:$0xff]   ;;  %v13580_v13 = vld [vmem:[%s18975_s5 + $0x160] sm:$0xff]  }
 0x5b1   : > { %13090 = vmatprep.subr.bf16.mxu0 %v16879_v47  ;;  %12887 = vmatpush3.bf16.msra.mxu1 %v13559_v25  ;;  %v17072_v47 = vsel %vm13787_vm2, %v8254_v26, 0  ;;  %v13581_v23 = vld [vmem:[%s18975_s5 + $0x120] sm:$0xff]   ;;  %v13582_v26 = vld [vmem:[%s18975_s5 + $0x168] sm:$0xff]   ;;  %v13584_v25 = vld [vmem:[%s18975_s5 + $0x170] sm:$0xff]  }
 0x5b2   : > { %12888 = vmatprep.subr.bf16.mxu1 %v13560_v56  ;;  %v17080_v51 = vsel %vm13976_vm5, 0, %v8221_v4  ;;  %v8256_v33 = vor.u32 %v8255_v54, %v8209_v58  ;;  %v8258_v8 = vor.u32 %v8257_v41, %v8216_v5  ;;  %v13585_v56 = vld [vmem:[%s18975_s5 + $0x130] sm:$0xff]  }
 0x5b4   : > { %13091 = vmatpush3.bf16.msra.mxu0 %v16895_v53  ;;  %7947 = vmatmul.mubr.bf16.gmra.mrb[100].mxu1 %v16611_v52  ;;  %v8225_v53 = vrot.slane %v8223_v6, 7  ;;  %v8226_v52 = vshll.u32 %v16981_v7, 16  ;;  %v17097_v2 = vsel %vm13787_vm2, %v8256_v33, 0 }
 0x5b5   : > { %7954 = vmatprep.mubr.bf16.mxu1 %v16605_v18  ;;  %12889 = vmatpush3.bf16.msra.mxu1 %v13561_v14  ;;  %v13562_v18 = vld [vmem:[%s18975_s5 + $0x58] sm:$0xff]  }
 0x5b6   : > { %12890 = vmatprep.subr.bf16.mxu1 %v13562_v18  ;;  %v8228_v48 = vor.u32 %v8226_v52, %v8225_v53  ;;  %v8259_v58 = vrot.slane %v8226_v52, 1  ;;  %v13586_v14 = vld [vmem:[%s18975_s5 + $0x178] sm:$0xff]   ;;  %v19502_v52 = vmov 0  }
 0x5b7   : > { %8667 = vmatmul.mubr.bf16.gmra.mrb[160].mxu0 %v17072_v47 }
 0x5b8   : > { %8674 = vmatprep.mubr.bf16.mxu0 %v17080_v51  ;;  %v17105_v46 = vsel %vm13976_vm5, 0, %v8228_v48  ;;  %v8260_v60 = vor.u32 %v8259_v58, %v8223_v6 }
 0x5b9   : > { %12891 = vmatpush3.bf16.msra.mxu1 %v13563_v11 }
 0x5ba   : > { %12892 = vmatprep.subr.bf16.mxu1 %v13564_v38  ;;  %v17149_v5 = vsel %vm13787_vm2, %v8260_v60, 0 }
 0x5bc   : > { %7955 = vmatmul.mubr.bf16.gmra.mrb[104].mxu1 %v16635_v9  ;;  %v8339_v9 = vrot.slane %v8337_v22, 7  ;;  %v17125_v22 = vsel %vm13787_vm2, %v8258_v8, 0 }
 0x5bd   : > { %7962 = vmatprep.mubr.bf16.mxu1 %v16643_v0  ;;  %12893 = vmatpush3.bf16.msra.mxu1 %v13565_v45  ;;  %v13566_v0 = vld [vmem:[%s18975_s5 + $0x68] sm:$0xff]   ;;  %v13587_v45 = vld [vmem:[%s18975_s5 + $0x138] sm:$0xff]  }
 0x5be   : > { %12894 = vmatprep.subr.bf16.mxu1 %v13566_v0  ;;  %v8342_v37 = vor.u32 %v8340_v21, %v8339_v9  ;;  %v13588_v0 = vld [vmem:[%s18975_s5 + $0x200] sm:$0xff]  }
 0x5bf   : > { %8675 = vmatmul.mubr.bf16.gmra.mrb[164].mxu0 %v17097_v2 }
 0x5c0   : > { %8682 = vmatprep.mubr.bf16.mxu0 %v17105_v46  ;;  %v17133_v21 = vsel %vm13976_vm5, 0, %v8342_v37 }
 0x5c1   : > { %12895 = vmatpush3.bf16.msra.mxu1 %v13567_v1 }
 0x5c2   : > { %12896 = vmatprep.subr.bf16.mxu1 %v13568_v19  ;;  %v19503_v19 = vld [vmem:[#allocation77_spill] sm:$0xff] }
 0x5c4   : > { %7963 = vmatmul.mubr.bf16.gmra.mrb[108].mxu1 %v16664_v43  ;;  %v13570_v43 = vld [vmem:[%s18975_s5 + $0x78] sm:$0xff]  }
 0x5c5   : > { %7970 = vmatprep.mubr.bf16.mxu1 %v19499_v10  ;;  %12897 = vmatpush3.bf16.msra.mxu1 %v13569_v12 }
 0x5c6   : > { %12898 = vmatprep.subr.bf16.mxu1 %v13570_v43 }
 0x5c7   : > { %8683 = vmatmul.mubr.bf16.gmra.mrb[168].mxu0 %v17125_v22 }
 0x5c8   : > { %8690 = vmatprep.mubr.bf16.mxu0 %v17133_v21 }
 0x5c9   : > { %12899 = vmatpush3.bf16.msra.mxu1 %v13571_v30 }
 0x5ca   : > { %13012 = vmatprep.subr.bf16.mxu1 %v13572_v32 }
 0x5cc   : > { %7971 = vmatmul.mubr.bf16.gmra.mrb[112].mxu1 %v16683_v40  ;;  %v19501_v40 = vld [vmem:[#allocation71_spill] sm:$0xff] }
 0x5cd   : > { %7978 = vmatprep.mubr.bf16.mxu1 %v19500_v17 }
 0x5cf   : > { %8691 = vmatmul.mubr.bf16.gmra.mrb[172].mxu0 %v17149_v5 }
 0x5d0   : > { %8828 = vmatprep.mubr.bf16.mxu0 %v16767_v28 }
 0x5d4   : > { %7979 = vmatmul.mubr.bf16.gmra.mrb[116].mxu1 %v16709_v3  ;;  %v13573_v3 = vld [vmem:[%s18975_s5 + $0x100] sm:$0xff]  }
 0x5d5   : > { %7986 = vmatprep.mubr.bf16.mxu1 %v16702_v16 }
 0x5d7   : > { %8829 = vmatmul.mubr.bf16.vlgmr.msra.gmra.mrb[176].mxu0 %v16971_v29 }
 0x5d8   : > { %8836 = vmatprep.mubr.bf16.mxu0 %v16817_v36 }
 0x5dc   : > { %7987 = vmatmul.mubr.bf16.gmra.mrb[120].mxu1 %v16991_v44 }
 0x5dd   : > { %7994 = vmatprep.mubr.bf16.mxu1 %v19501_v40 }
 0x5df   : > { %8837 = vmatmul.mubr.bf16.gmra.mrb[180].mxu0 %v16998_v49 }
 0x5e0   : > { %8844 = vmatprep.mubr.bf16.mxu0 %v16863_v50 }
 0x5e4   : > { %7995 = vmatmul.mubr.bf16.gmra.mrb[124].mxu1 %v16933_v31 }
 0x5e5   : > { %8537 = vmatprep.mubr.bf16.mxu1 %v16702_v16  ;;  %v13575_v16 = vld [vmem:[%s18975_s5 + $0x108] sm:$0xff]  }
 0x5e7   : > { %8845 = vmatmul.mubr.bf16.gmra.mrb[184].mxu0 %v17024_v39 }
 0x5e8   : > { %8852 = vmatprep.mubr.bf16.mxu0 %v16910_v55 }
 0x5ec   : > { %8538 = vmatmul.mubr.bf16.vlgmr.msra.gmra.mrb[128].mxu1 %v16991_v44  ;;  %v13576_v44 = vld [vmem:[%s18975_s5 + $0x150] sm:$0xff]  }
 0x5ed   : > { %13013 = vmatpush3.bf16.msra.mxu1 %v13573_v3  ;;  %8545 = vmatprep.mubr.bf16.mxu1 %v19501_v40 }
 0x5ee   : > { %13014 = vmatprep.subr.bf16.mxu1 %v13574_v63 }
 0x5ef   : > { %8853 = vmatmul.mubr.bf16.gmra.mrb[188].mxu0 %v17051_v62 }
 0x5f0   : > { %8860 = vmatprep.mubr.bf16.mxu0 %v16948_v42 }
 0x5f1   : > { %13015 = vmatpush3.bf16.msra.mxu1 %v13575_v16 }
 0x5f2   : > { %13016 = vmatprep.subr.bf16.mxu1 %v13576_v44 }
 0x5f4   : > { %8546 = vmatmul.mubr.bf16.gmra.mrb[132].mxu1 %v16933_v31  ;;  %v13579_v31 = vld [vmem:[%s18975_s5 + $0x118] sm:$0xff]  }
 0x5f5   : > { %8553 = vmatprep.mubr.bf16.mxu1 %v16767_v28  ;;  %13017 = vmatpush3.bf16.msra.mxu1 %v13577_v24 }
 0x5f6   : > { %13018 = vmatprep.subr.bf16.mxu1 %v13578_v15 }
 0x5f7   : > { %8861 = vmatmul.mubr.bf16.gmra.mrb[192].mxu0 %v17080_v51 }
 0x5f8   : > { %8868 = vmatprep.mubr.bf16.mxu0 %v16981_v7 }
 0x5f9   : > { %13019 = vmatpush3.bf16.msra.mxu1 %v13579_v31 }
 0x5fa   : > { %13020 = vmatprep.subr.bf16.mxu1 %v13580_v13 }
 0x5fc   : > { %8554 = vmatmul.mubr.bf16.gmra.mrb[136].mxu1 %v16971_v29  ;;  %v13583_v29 = vld [vmem:[%s18975_s5 + $0x128] sm:$0xff]  }
 0x5fd   : > { %8561 = vmatprep.mubr.bf16.mxu1 %v16817_v36  ;;  %13021 = vmatpush3.bf16.msra.mxu1 %v13581_v23 }
 0x5fe   : > { %13022 = vmatprep.subr.bf16.mxu1 %v13582_v26 }
 0x5ff   : > { %8869 = vmatmul.mubr.bf16.gmra.mrb[196].mxu0 %v17105_v46 }
 0x600   : > { %8876 = vmatprep.mubr.bf16.mxu0 %v17006_v57 }
 0x601   : > { %13023 = vmatpush3.bf16.msra.mxu1 %v13583_v29 }
 0x602   : > { %13024 = vmatprep.subr.bf16.mxu1 %v13584_v25 }
 0x604   : > { %8562 = vmatmul.mubr.bf16.gmra.mrb[140].mxu1 %v16998_v49 }
 0x605   : > { %8569 = vmatprep.mubr.bf16.mxu1 %v16863_v50  ;;  %13025 = vmatpush3.bf16.msra.mxu1 %v13585_v56 }
 0x606   : > { %13026 = vmatprep.subr.bf16.mxu1 %v13586_v14 }
 0x607   : > { %v12634_v4 = vpop.f32.mrb[36].mxu1  ;;  %8877 = vmatmul.mubr.bf16.gmra.mrb[200].mxu0 %v17133_v21 }
 0x608   : > { %v12635_v6 = vpop.f32.mrb[37].mxu1  ;;  %v12756_v54 = vpop.f32.mrb[96].mxu0  ;;  %8884 = vmatprep.mubr.bf16.mxu0 %v19502_v52 }
 0x609   : > { %v17222_v53 = vadd.f32 %v12635_v6, %v12634_v4  ;;  %v12637_v49 = vpop.f32.mrb[38].mxu1  ;;  %v12757_v18 = vpop.f32.mrb[97].mxu0  ;;  %13027 = vmatpush3.bf16.msra.mxu1 %v13587_v45 }
 0x60a   : > { %v17225_v33 = vadd.f32 %v12757_v18, %v12756_v54  ;;  %v12638_v11 = vpop.f32.mrb[39].mxu1  ;;  %v12759_v48 = vpop.f32.mrb[98].mxu0  ;;  %13188 = vmatprep.subr.bf16.mxu1 %v13588_v0 }
 0x60b   : > { %v17227_v38 = vadd.f32 %v12638_v11, %v12637_v49  ;;  %v12760_v41 = vpop.f32.mrb[99].mxu0 }
 0x60c   : > { %v17232_v9 = vadd.f32 %v12760_v41, %v12759_v48  ;;  %8570 = vmatmul.mubr.bf16.gmra.mrb[144].mxu1 %v17024_v39 }
 0x60d   : > { %8577 = vmatprep.mubr.bf16.mxu1 %v16910_v55 }
 0x60f   : > { %v12640_v8 = vpop.f32.mrb[40].mxu1  ;;  %8885 = vmatmul.mubr.bf16.gmra.mrb[204].mxu0 %v19503_v19 }
 0x610   : > { %v12641_v1 = vpop.f32.mrb[41].mxu1  ;;  %v12762_v37 = vpop.f32.mrb[100].mxu0 }
 0x611   : > { %v17240_v58 = vadd.f32 %v12641_v1, %v12640_v8  ;;  %v12643_v10 = vpop.f32.mrb[42].mxu1  ;;  %v12763_v12 = vpop.f32.mrb[101].mxu0 }
 0x612   : > { %v17242_v21 = vadd.f32 %v12763_v12, %v12762_v37  ;;  %v12644_v43 = vpop.f32.mrb[43].mxu1  ;;  %v12765_v60 = vpop.f32.mrb[102].mxu0 }
 0x613   : > { %v17244_v30 = vadd.f32 %v12644_v43, %v12643_v10  ;;  %v12766_v32 = vpop.f32.mrb[103].mxu0 }
 0x614   : > { %v17246_v17 = vadd.f32 %v12766_v32, %v12765_v60  ;;  %8578 = vmatmul.mubr.bf16.gmra.mrb[148].mxu1 %v17051_v62 }
 0x615   : > { %8585 = vmatprep.mubr.bf16.mxu1 %v16948_v42 }
 0x617   : > { %v12646_v39 = vpop.f32.mrb[44].mxu1 }
 0x618   : > { %v12647_v3 = vpop.f32.mrb[45].mxu1  ;;  %v12768_v63 = vpop.f32.mrb[104].mxu0 }
 0x619   : > { %v17250_v16 = vadd.f32 %v12647_v3, %v12646_v39  ;;  %v12649_v44 = vpop.f32.mrb[46].mxu1  ;;  %v12769_v24 = vpop.f32.mrb[105].mxu0 }
 0x61a   : > { %v17252_v15 = vadd.f32 %v12769_v24, %v12768_v63  ;;  %v12650_v31 = vpop.f32.mrb[47].mxu1  ;;  %v12771_v13 = vpop.f32.mrb[106].mxu0 }
 0x61b   : > { %v17254_v23 = vadd.f32 %v12650_v31, %v12649_v44  ;;  %v12772_v26 = vpop.f32.mrb[107].mxu0 }
 0x61c   : > { %v17256_v29 = vadd.f32 %v12772_v26, %v12771_v13  ;;  %8586 = vmatmul.mubr.bf16.gmra.mrb[152].mxu1 %v17080_v51 }
 0x61d   : > { %8593 = vmatprep.mubr.bf16.mxu1 %v16981_v7 }
 0x61f   : > { %v12652_v62 = vpop.f32.mrb[48].mxu1 }
 0x620   : > { %v12653_v25 = vpop.f32.mrb[49].mxu1  ;;  %v12774_v4 = vpop.f32.mrb[108].mxu0 }
 0x621   : > { %v17260_v56 = vadd.f32 %v12653_v25, %v12652_v62  ;;  %v12655_v6 = vpop.f32.mrb[50].mxu1  ;;  %v12775_v54 = vpop.f32.mrb[109].mxu0 }
 0x622   : > { %v17262_v14 = vadd.f32 %v12775_v54, %v12774_v4  ;;  %v12656_v49 = vpop.f32.mrb[51].mxu1  ;;  %v12777_v18 = vpop.f32.mrb[110].mxu0  ;;  %v13591_v54 = vld [vmem:[%s18975_s5 + $0x218] sm:$0xff]  }
 0x623   : > { %v17264_v11 = vadd.f32 %v12656_v49, %v12655_v6  ;;  %v12778_v48 = vpop.f32.mrb[111].mxu0 }
 0x624   : > { %v17266_v41 = vadd.f32 %v12778_v48, %v12777_v18  ;;  %8594 = vmatmul.mubr.bf16.gmra.mrb[156].mxu1 %v17105_v46 }
 0x625   : > { %8731 = vmatprep.mubr.bf16.mxu1 %v16929_v20  ;;  %v13589_v20 = vld [vmem:[%s18975_s5 + $0x208] sm:$0xff]  }
 0x627   : > { %v12658_v51 = vpop.f32.mrb[52].mxu1 }
 0x628   : > { %v12659_v45 = vpop.f32.mrb[53].mxu1  ;;  %v12780_v8 = vpop.f32.mrb[112].mxu0 }
 0x629   : > { %v17270_v1 = vadd.f32 %v12659_v45, %v12658_v51  ;;  %v12661_v37 = vpop.f32.mrb[54].mxu1  ;;  %v12781_v10 = vpop.f32.mrb[113].mxu0 }
 0x62a   : > { %v17272_v12 = vadd.f32 %v12781_v10, %v12780_v8  ;;  %v12662_v43 = vpop.f32.mrb[55].mxu1  ;;  %v12783_v60 = vpop.f32.mrb[114].mxu0 }
 0x62b   : > { %v17274_v32 = vadd.f32 %v12662_v43, %v12661_v37  ;;  %v12784_v39 = vpop.f32.mrb[115].mxu0  ;;  %v13592_v43 = vld [vmem:[%s18975_s5 + $0x220] sm:$0xff]  }
 0x62c   : > { %v17276_v3 = vadd.f32 %v12784_v39, %v12783_v60  ;;  %8732 = vmatmul.mubr.bf16.vlgmr.msra.gmra.mrb[160].mxu1 %v19501_v40 }
 0x62d   : > { %13189 = vmatpush3.bf16.msra.mxu1 %v13588_v0  ;;  %8739 = vmatprep.mubr.bf16.mxu1 %v17016_v35  ;;  %v13590_v0 = vld [vmem:[%s18975_s5 + $0x210] sm:$0xff]  }
 0x62e   : > { %13190 = vmatprep.subr.bf16.mxu1 %v13589_v20 }
 0x62f   : > { %v12664_v46 = vpop.f32.mrb[56].mxu1 }
 0x630   : > { %v12665_v63 = vpop.f32.mrb[57].mxu1  ;;  %v12786_v44 = vpop.f32.mrb[116].mxu0 }
 0x631   : > { %v17283_v24 = vadd.f32 %v12665_v63, %v12664_v46  ;;  %v12667_v31 = vpop.f32.mrb[58].mxu1  ;;  %v12787_v13 = vpop.f32.mrb[117].mxu0  ;;  %13191 = vmatpush3.bf16.msra.mxu1 %v13589_v20  ;;  %v17315_v46 = vld [vmem:[%s18976_s6] ss:$0 sm:$0xff]  ;;  %v13593_v63 = vld [vmem:[%s18975_s5 + $0x228] sm:$0xff]  }
 0x632   : > { %v17285_v26 = vadd.f32 %v12787_v13, %v12786_v44  ;;  %v12668_v62 = vpop.f32.mrb[59].mxu1  ;;  %v12789_v40 = vpop.f32.mrb[118].mxu0  ;;  %13192 = vmatprep.subr.bf16.mxu1 %v13590_v0  ;;  %v19504_v13 = vld [vmem:[#allocation70_spill] sm:$0xff] }
 0x633   : > { %v17290_v25 = vadd.f32 %v12668_v62, %v12667_v31  ;;  %v12790_v4 = vpop.f32.mrb[119].mxu0  ;;  %v7650_v62 = vadd.f32 %v19504_v13, %v17315_v46 }
 0x634   : > { %v17292_v6 = vadd.f32 %v12790_v4, %v12789_v40  ;;  %8740 = vmatmul.mubr.bf16.gmra.mrb[164].mxu1 %v16767_v28 }
 0x635   : > { %8747 = vmatprep.mubr.bf16.mxu1 %v17046_v59  ;;  %13193 = vmatpush3.bf16.msra.mxu1 %v13590_v0 }
 0x636   : > { %13194 = vmatprep.subr.bf16.mxu1 %v13591_v54 }
 0x637   : > { %v12670_v49 = vpop.f32.mrb[60].mxu1 }
 0x638   : > { %v12671_v18 = vpop.f32.mrb[61].mxu1  ;;  %v12792_v48 = vpop.f32.mrb[120].mxu0 }
 0x639   : > { %v17299_v51 = vadd.f32 %v12671_v18, %v12670_v49  ;;  %v12673_v45 = vpop.f32.mrb[62].mxu1  ;;  %v12793_v8 = vpop.f32.mrb[121].mxu0  ;;  %13195 = vmatpush3.bf16.msra.mxu1 %v13591_v54  ;;  %v13594_v49 = vld [vmem:[%s18975_s5 + $0x230] sm:$0xff]  }
 0x63a   : > { %v17301_v37 = vadd.f32 %v12793_v8, %v12792_v48  ;;  %v12674_v10 = vpop.f32.mrb[63].mxu1  ;;  %v12795_v28 = vpop.f32.mrb[122].mxu0  ;;  %13196 = vmatprep.subr.bf16.mxu1 %v13592_v43  ;;  %v19505_v18 = vld [vmem:[#allocation93_spill] sm:$0xff] }
 0x63b   : > { %v17306_v60 = vadd.f32 %v12674_v10, %v12673_v45  ;;  %v12796_v39 = vpop.f32.mrb[123].mxu0  ;;  %v7653_v48 = vadd.f32 %v19505_v18, %v17315_v46 }
 0x63c   : > { %v17308_v20 = vadd.f32 %v12796_v39, %v12795_v28  ;;  %8748 = vmatmul.mubr.bf16.gmra.mrb[168].mxu1 %v16817_v36 }
 0x63d   : > { %8755 = vmatprep.mubr.bf16.mxu1 %v17072_v47  ;;  %13197 = vmatpush3.bf16.msra.mxu1 %v13592_v43 }
 0x63e   : > { %13198 = vmatprep.subr.bf16.mxu1 %v13593_v63 }
 0x63f   : > { %v12692_v44 = vpop.f32.mrb[64].mxu1 }
 0x640   : > { %v12693_v31 = vpop.f32.mrb[65].mxu1 }
 0x641   : > { %v12694_v40 = vadd.f32 %v12693_v31, %v12692_v44  ;;  %v12798_v36 = vpop.f32.mrb[124].mxu0  ;;  %v12695_v0 = vpop.f32.mrb[66].mxu1  ;;  %13199 = vmatpush3.bf16.msra.mxu1 %v13593_v63  ;;  %v13595_v31 = vld [vmem:[%s18975_s5 + $0x238] sm:$0xff]  }
 0x642   : > { %v12799_v4 = vpop.f32.mrb[125].mxu0  ;;  %v12696_v54 = vpop.f32.mrb[67].mxu1  ;;  %13200 = vmatprep.subr.bf16.mxu1 %v13594_v49 }
 0x643   : > { %v7747_v45 = vadd.f32 %v12694_v40, %v7650_v62  ;;  %v17327_v8 = vadd.f32 %v12799_v4, %v12798_v36  ;;  %v12697_v10 = vadd.f32 %v12696_v54, %v12695_v0  ;;  %v12801_v28 = vpop.f32.mrb[126].mxu0 }
 0x644   : > { %v12802_v43 = vpop.f32.mrb[127].mxu0  ;;  %8756 = vmatmul.mubr.bf16.gmra.mrb[172].mxu1 %v16863_v50  ;;  %v7658_v50 = vadd.f32 %v17222_v53, %v17315_v46 }
 0x645   : > { %v7750_v39 = vadd.f32 %v12697_v10, %v7653_v48  ;;  %v17330_v63 = vadd.f32 %v12802_v43, %v12801_v28  ;;  %8763 = vmatprep.mubr.bf16.mxu1 %v17097_v2  ;;  %13201 = vmatpush3.bf16.msra.mxu1 %v13594_v49  ;;  %v17334_v44 = vadd.f32 %v17225_v33, %v7747_v45 }
 0x646   : > { %13202 = vmatprep.subr.bf16.mxu1 %v13595_v31  ;;  %v7661_v49 = vadd.f32 %v17227_v38, %v17315_v46  ;;  %v7666_v38 = vadd.f32 %v17240_v58, %v17315_v46 }
 0x647   : > { %v12698_v13 = vpop.f32.mrb[68].mxu1  ;;  %v17340_v62 = vadd.f32 %v17232_v9, %v7750_v39 }
 0x648   : > { %v12699_v40 = vpop.f32.mrb[69].mxu1 }
 0x649   : > { %v12700_v36 = vadd.f32 %v12699_v40, %v12698_v13  ;;  %v17344_v0 = vpop.f32.mrb[128].mxu0  ;;  %v12701_v4 = vpop.f32.mrb[70].mxu1  ;;  %13203 = vmatpush3.bf16.msra.mxu1 %v13595_v31 }
 0x64a   : > { %v17346_v33 = vpop.f32.mrb[129].mxu0  ;;  %v12702_v54 = vpop.f32.mrb[71].mxu1 }
 0x64b   : > { %v7755_v18 = vadd.f32 %v12700_v36, %v7658_v50  ;;  %v12703_v48 = vadd.f32 %v12702_v54, %v12701_v4  ;;  %v17350_v45 = vpop.f32.mrb[130].mxu0  ;;  %v7669_v36 = vadd.f32 %v17244_v30, %v17315_v46  ;;  %v7674_v30 = vadd.f32 %v17250_v16, %v17315_v46 }
 0x64c   : > { %v17352_v9 = vpop.f32.mrb[131].mxu0  ;;  %8764 = vmatmul.mubr.bf16.gmra.mrb[176].mxu1 %v16910_v55  ;;  %v17398_v16 = vsel %vm13787_vm2, %v17030_v61, 0 }
 0x64d   : > { %v7758_v53 = vadd.f32 %v12703_v48, %v7661_v49  ;;  %8771 = vmatprep.mubr.bf16.mxu1 %v17125_v22  ;;  %v17357_v10 = vadd.f32 %v17242_v21, %v7755_v18 }
 0x64f   : > { %v12704_v28 = vpop.f32.mrb[72].mxu1  ;;  %v17360_v43 = vadd.f32 %v17246_v17, %v7758_v53 }
 0x650   : > { %v12705_v39 = vpop.f32.mrb[73].mxu1 }
 0x651   : > { %v12706_v31 = vadd.f32 %v12705_v39, %v12704_v28  ;;  %v17364_v13 = vpop.f32.mrb[132].mxu0  ;;  %v12707_v40 = vpop.f32.mrb[74].mxu1 }
 0x652   : > { %v17366_v50 = vpop.f32.mrb[133].mxu0  ;;  %v12708_v55 = vpop.f32.mrb[75].mxu1 }
 0x653   : > { %v7763_v21 = vadd.f32 %v12706_v31, %v7666_v38  ;;  %v12709_v4 = vadd.f32 %v12708_v55, %v12707_v40  ;;  %v17370_v54 = vpop.f32.mrb[134].mxu0  ;;  %v7677_v40 = vadd.f32 %v17254_v23, %v17315_v46 }
 0x654   : > { %v17372_v17 = vpop.f32.mrb[135].mxu0  ;;  %8772 = vmatmul.mubr.bf16.gmra.mrb[180].mxu1 %v16948_v42 }
 0x655   : > { %v7766_v49 = vadd.f32 %v12709_v4, %v7669_v36  ;;  %8779 = vmatprep.mubr.bf16.mxu1 %v17149_v5  ;;  %v17377_v58 = vadd.f32 %v17252_v15, %v7763_v21 }
 0x657   : > { %v12710_v18 = vpop.f32.mrb[76].mxu1  ;;  %v17380_v48 = vadd.f32 %v17256_v29, %v7766_v49 }
 0x658   : > { %v12711_v53 = vpop.f32.mrb[77].mxu1 }
 0x659   : > { %v12712_v28 = vadd.f32 %v12711_v53, %v12710_v18  ;;  %v17384_v39 = vpop.f32.mrb[136].mxu0  ;;  %v12713_v38 = vpop.f32.mrb[78].mxu1  ;;  %v7682_v53 = vadd.f32 %v17260_v56, %v17315_v46 }
 0x65a   : > { %v17386_v31 = vpop.f32.mrb[137].mxu0  ;;  %v12714_v42 = vpop.f32.mrb[79].mxu1 }
 0x65b   : > { %v7771_v15 = vadd.f32 %v12712_v28, %v7674_v30  ;;  %v12715_v55 = vadd.f32 %v12714_v42, %v12713_v38  ;;  %v17390_v36 = vpop.f32.mrb[138].mxu0  ;;  %v7685_v42 = vadd.f32 %v17264_v11, %v17315_v46  ;;  %v7690_v11 = vadd.f32 %v17270_v1, %v17315_v46 }
 0x65c   : > { %v17392_v29 = vpop.f32.mrb[139].mxu0  ;;  %8780 = vmatmul.mubr.bf16.gmra.mrb[184].mxu1 %v16981_v7 }
 0x65d   : > { %v7774_v21 = vadd.f32 %v12715_v55, %v7677_v40  ;;  %8787 = vmatprep.mubr.bf16.mxu1 %v17398_v16  ;;  %v17402_v4 = vadd.f32 %v17262_v14, %v7771_v15 }
 0x65f   : > { %v12716_v23 = vpop.f32.mrb[80].mxu1  ;;  %v17405_v49 = vadd.f32 %v17266_v41, %v7774_v21 }
 0x660   : > { %v12717_v18 = vpop.f32.mrb[81].mxu1 }
 0x661   : > { %v12718_v7 = vadd.f32 %v12717_v18, %v12716_v23  ;;  %v17409_v30 = vpop.f32.mrb[140].mxu0  ;;  %v12719_v28 = vpop.f32.mrb[82].mxu1 }
 0x662   : > { %19506 = vst [vmem:[#allocation17_spill] sm:$0xff] %v17409_v30  ;;  %v17411_v61 = vpop.f32.mrb[141].mxu0  ;;  %v12720_v38 = vpop.f32.mrb[83].mxu1 }
 0x663   : > { %v7779_v14 = vadd.f32 %v12718_v7, %v7682_v53  ;;  %v12721_v40 = vadd.f32 %v12720_v38, %v12719_v28  ;;  %v17415_v15 = vpop.f32.mrb[142].mxu0 }
 0x664   : > { %19507 = vst [vmem:[#allocation94_spill] sm:$0xff] %v17415_v15  ;;  %v17417_v41 = vpop.f32.mrb[143].mxu0  ;;  %8788 = vmatmul.mubr.bf16.gmra.mrb[188].mxu1 %v17006_v57  ;;  %v7693_v57 = vadd.f32 %v17274_v32, %v17315_v46 }
 0x665   : > { %v7782_v55 = vadd.f32 %v12721_v40, %v7685_v42  ;;  %13204 = vmatprep.mubr.bf16.mxu1 %v17016_v35  ;;  %v17422_v56 = vadd.f32 %v17272_v12, %v7779_v14 }
 0x667   : > { %v12722_v21 = vpop.f32.mrb[84].mxu1  ;;  %v17425_v23 = vadd.f32 %v17276_v3, %v7782_v55 }
 0x668   : > { %v12723_v18 = vpop.f32.mrb[85].mxu1 }
 0x669   : > { %v12724_v53 = vadd.f32 %v12723_v18, %v12722_v21  ;;  %v12725_v28 = vpop.f32.mrb[86].mxu1 }
 0x66a   : > { %v12964_v7 = vpop.f32.mrb[144].mxu0  ;;  %v12726_v15 = vpop.f32.mrb[87].mxu1 }
 0x66b   : > { %v12965_v38 = vpop.f32.mrb[145].mxu0  ;;  %v7787_v35 = vadd.f32 %v12724_v53, %v7690_v11  ;;  %v12727_v12 = vadd.f32 %v12726_v15, %v12725_v28  ;;  %v7698_v15 = vadd.f32 %v17283_v24, %v17315_v46 }
 0x66c   : > { %v17431_v42 = vadd.f32 %v12965_v38, %v12964_v7  ;;  %v12967_v14 = vpop.f32.mrb[146].mxu0  ;;  %13205 = vmatmul.mubr.bf16.vlgmr.msra.gmra.mrb[192].mxu1 %v17046_v59  ;;  %v7701_v38 = vadd.f32 %v17290_v25, %v17315_v46 }
 0x66d   : > { %v12968_v40 = vpop.f32.mrb[147].mxu0  ;;  %v7790_v3 = vadd.f32 %v12727_v12, %v7693_v57  ;;  %13208 = vmatprep.mubr.bf16.mxu1 %v17072_v47  ;;  %v17438_v1 = vadd.f32 %v17285_v26, %v7787_v35 }
 0x66e   : > { %19508 = vst [vmem:[#allocation20_spill] sm:$0xff] %v17431_v42  ;;  %v17434_v55 = vadd.f32 %v12968_v40, %v12967_v14 }
 0x66f   : > { %v12728_v21 = vpop.f32.mrb[88].mxu1  ;;  %v17441_v18 = vadd.f32 %v17292_v6, %v7790_v3 }
 0x670   : > { %19509 = vst [vmem:[#allocation96_spill] sm:$0xff] %v17434_v55  ;;  %v12729_v32 = vpop.f32.mrb[89].mxu1 }
 0x671   : > { %v12730_v11 = vadd.f32 %v12729_v32, %v12728_v21  ;;  %v12731_v7 = vpop.f32.mrb[90].mxu1  ;;  %v7706_v21 = vadd.f32 %v17299_v51, %v17315_v46 }
 0x672   : > { %v12970_v53 = vpop.f32.mrb[148].mxu0  ;;  %v12732_v28 = vpop.f32.mrb[91].mxu1 }
 0x673   : > { %v12971_v59 = vpop.f32.mrb[149].mxu0  ;;  %v7795_v47 = vadd.f32 %v12730_v11, %v7698_v15  ;;  %v12733_v26 = vadd.f32 %v12732_v28, %v12731_v7  ;;  %v7709_v7 = vadd.f32 %v17306_v60, %v17315_v46 }
 0x674   : > { %v17447_v57 = vadd.f32 %v12971_v59, %v12970_v53  ;;  %v12973_v35 = vpop.f32.mrb[150].mxu0  ;;  %13209 = vmatmul.mubr.bf16.gmra.mrb[196].mxu1 %v17097_v2 }
 0x675   : > { %v12974_v12 = vpop.f32.mrb[151].mxu0  ;;  %v7798_v6 = vadd.f32 %v12733_v26, %v7701_v38  ;;  %13212 = vmatprep.mubr.bf16.mxu1 %v17125_v22  ;;  %v17454_v24 = vadd.f32 %v17301_v37, %v7795_v47 }
 0x676   : > { %19510 = vst [vmem:[#allocation21_spill] sm:$0xff] %v17447_v57  ;;  %v17450_v14 = vadd.f32 %v12974_v12, %v12973_v35 }
 0x677   : > { %v12734_v40 = vpop.f32.mrb[92].mxu1  ;;  %v17457_v3 = vadd.f32 %v17308_v20, %v7798_v6 }
 0x678   : > { %19511 = vst [vmem:[#allocation97_spill] sm:$0xff] %v17450_v14  ;;  %v12735_v25 = vpop.f32.mrb[93].mxu1 }
 0x679   : > { %v12736_v32 = vadd.f32 %v12735_v25, %v12734_v40  ;;  %v12737_v11 = vpop.f32.mrb[94].mxu1 }
 0x67a   : > { %v12976_v15 = vpop.f32.mrb[152].mxu0  ;;  %v12738_v53 = vpop.f32.mrb[95].mxu1 }
 0x67b   : > { %v12977_v2 = vpop.f32.mrb[153].mxu0  ;;  %v7803_v22 = vadd.f32 %v12736_v32, %v7706_v21  ;;  %v12739_v37 = vadd.f32 %v12738_v53, %v12737_v11  ;;  %v19516_v21 = vld [vmem:[#allocation10_spill] sm:$0xff] }
 0x67c   : > { %v17463_v59 = vadd.f32 %v12977_v2, %v12976_v15  ;;  %v12979_v28 = vpop.f32.mrb[154].mxu0  ;;  %13213 = vmatmul.mubr.bf16.gmra.mrb[200].mxu1 %v17149_v5  ;;  %v17478_v5 = vld [vmem:[%s18977_s7] sm:$0xff]  ;;  %v9939_v15 = vsub.s32 4, %v19516_v21 }
 0x67d   : > { %v12980_v38 = vpop.f32.mrb[155].mxu0  ;;  %v7806_v20 = vadd.f32 %v12739_v37, %v7709_v7  ;;  %13216 = vmatprep.mubr.bf16.mxu1 %v17398_v16  ;;  %v17470_v51 = vadd.f32 %v17327_v8, %v7803_v22  ;;  %v19156_v16 = vunpack.c.h.bf16 %v19503_v19  ;;  %v19517_v8 = vsub.s32 0, %v19516_v21  ;;  %v19521_v37 = vld [vmem:[#allocation112_spill] sm:$0xff] }
 0x67e   : > { %19512 = vst [vmem:[#allocation24_spill] sm:$0xff] %v17463_v59  ;;  %v17466_v47 = vadd.f32 %v12980_v38, %v12979_v28  ;;  %v19522_v28 = vsub.s32 1, %v19516_v21 }
 0x67f   : > { %19514 = vst [vmem:[#allocation25_spill] sm:$0xff] %v17470_v51  ;;  %v12820_v26 = vpop.f32.mrb[96].mxu1  ;;  %v17473_v35 = vadd.f32 %v17330_v63, %v7806_v20  ;;  %v17484_v32 = vrot.slane %v17478_v5, %v19517_v8  ;;  %v17487_v63 = vunpack.c.h.bf16 %v19502_v52  ;;  %v9515_v20 = vsub.s32 2, %v19516_v21 }
 0x680   : > { %19513 = vst [vmem:[#allocation102_spill] sm:$0xff] %v17466_v47  ;;  %v12821_v60 = vpop.f32.mrb[97].mxu1  ;;  %v17497_v38 = vrot.slane %v17478_v5, %v19522_v28  ;;  %v10039_v47 = vsub.s32 5, %v19516_v21 }
 0x681   : > { %19515 = vst [vmem:[#allocation103_spill] sm:$0xff] %v17473_v35  ;;  %v12822_v46 = vadd.f32 %v12821_v60, %v12820_v26  ;;  %v12823_v6 = vpop.f32.mrb[98].mxu1  ;;  %19518 = vst [vmem:[#allocation28_spill] sm:$0xff] %v17484_v32  ;;  %v19159_v26 = vunpack.c.l.bf16 %v19503_v19  ;;  %v17502_v60 = vunpack.c.l.bf16 %v19502_v52  ;;  %v10463_v19 = vsub.s32 7, %v19516_v21 }
 0x682   : > { %v12982_v12 = vpop.f32.mrb[156].mxu0  ;;  %v12824_v25 = vpop.f32.mrb[99].mxu1  ;;  %19519 = vst [vmem:[#allocation106_spill] sm:$0xff] %v17487_v63 }
 0x683   : > { %v12983_v40 = vpop.f32.mrb[157].mxu0  ;;  %v7941_v11 = vadd.f32 %v12822_v46, %v17334_v44  ;;  %v12825_v53 = vadd.f32 %v12824_v25, %v12823_v6  ;;  %19523 = vst [vmem:[#allocation107_spill] sm:$0xff] %v17502_v60  ;;  %v9318_v6 = vmul.f32 %v17484_v32, %v19156_v16  ;;  %v17514_v25 = vrot.slane %v17478_v5, %v9939_v15 }
 0x684   : > { %v17491_v2 = vadd.f32 %v12983_v40, %v12982_v12  ;;  %v12985_v7 = vpop.f32.mrb[158].mxu0  ;;  %13217 = vmatmul.mubr.bf16.gmra.mrb[204].mxu1 %v19521_v37  ;;  %v9418_v40 = vmul.f32 %v17497_v38, %v17487_v63  ;;  %v9417_v15 = vmul.f32 %v17497_v38, %v17502_v60 }
 0x685   : > { %v12986_v22 = vpop.f32.mrb[159].mxu0  ;;  %v8038_v44 = vadd.f32 %v17346_v33, %v7941_v11  ;;  %v7944_v46 = vadd.f32 %v12825_v53, %v17340_v62  ;;  %v17519_v11 = vrot.slane %v17478_v5, %v9515_v20  ;;  %v9839_v53 = vsub.s32 3, %v19516_v21 }
 0x686   : > { %19520 = vst [vmem:[#allocation29_spill] sm:$0xff] %v17491_v2  ;;  %v17506_v12 = vadd.f32 %v12986_v22, %v12985_v7  ;;  %v9317_v7 = vmul.f32 %v17484_v32, %v19159_v26  ;;  %v9450_v2 = vadd.f32 %v9418_v40, %v9318_v6  ;;  %v19526_v33 = vunpack.c.h.bf16 %v19521_v37 }
 0x687   : > { %vm8100_vm10 = vcmp.gt.f32.partialorder %v8038_v44, 0.0  ;;  %v8116_v8 = vmul.f32 0.2, %v8038_v44  ;;  %v8041_v52 = vadd.f32 %v17352_v9, %v7944_v46  ;;  %v12826_v28 = vpop.f32.mrb[100].mxu1  ;;  %v17540_v6 = vrot.slane %v17478_v5, %v9839_v53 }
 0x688   : > { %19524 = vst [vmem:[#allocation30_spill] sm:$0xff] %v17506_v12  ;;  %v12827_v62 = vpop.f32.mrb[101].mxu1  ;;  %v9449_v40 = vadd.f32 %v9417_v15, %v9317_v7  ;;  %v10363_v53 = vsub.s32 6, %v19516_v21 }
 0x689   : > { %vm8101_vm11 = vcmp.gt.f32.partialorder %v8041_v52, 0.0  ;;  %v8117_v22 = vmul.f32 0.2, %v8041_v52  ;;  %v12828_v16 = vadd.f32 %v12827_v62, %v12826_v28  ;;  %v12829_v46 = vpop.f32.mrb[102].mxu1  ;;  %v8132_v63 = vsel %vm8100_vm10, %v8038_v44, %v8116_v8 }
 0x68a   : > { %v12988_v9 = vpop.f32.mrb[160].mxu0  ;;  %v12830_v12 = vpop.f32.mrb[103].mxu1  ;;  %v9518_v44 = vmul.f32 %v17519_v11, %v19526_v33  ;;  %v17552_v33 = vrot.slane %v17478_v5, %v10039_v47 }
 0x68b   : > { %v12989_v20 = vpop.f32.mrb[161].mxu0  ;;  %v8133_v26 = vsel %vm8101_vm11, %v8041_v52, %v8117_v22  ;;  %v7949_v59 = vadd.f32 %v12828_v16, %v17357_v10  ;;  %v12831_v14 = vadd.f32 %v12830_v12, %v12829_v46  ;;  %v19528_v16 = vunpack.c.l.bf16 %v19521_v37 }
 0x68c   : > { %v17532_v60 = vadd.f32 %v12989_v20, %v12988_v9  ;;  %v12991_v28 = vpop.f32.mrb[162].mxu0  ;;  %v17534_v62 = vpack.c.bf16 %v8133_v26, %v8132_v63  ;;  %v9550_v9 = vadd.f32 %v9518_v44, %v9450_v2 }
 0x68d   : > { %v12992_v57 = vpop.f32.mrb[163].mxu0  ;;  %v8046_v8 = vadd.f32 %v17344_v0, %v7949_v59  ;;  %v7952_v52 = vadd.f32 %v12831_v14, %v17360_v43  ;;  %v9517_v63 = vmul.f32 %v17519_v11, %v19528_v16 }
 0x68e   : > { %19525 = vst [vmem:[#allocation109_spill] sm:$0xff] %v17532_v60  ;;  %v17544_v10 = vadd.f32 %v12992_v57, %v12991_v28  ;;  %v9081_v26 = vshrl.u32 %v17534_v62, 16  ;;  %v9084_v12 = vshll.u32 %v17534_v62, 16  ;;  %v17557_v57 = vrot.slane %v17478_v5, %v10463_v19 }
 0x68f   : > { %vm8102_vm12 = vcmp.gt.f32.partialorder %v8046_v8, 0.0  ;;  %v8118_v7 = vmul.f32 0.2, %v8046_v8  ;;  %v8049_v0 = vadd.f32 %v17350_v45, %v7952_v52  ;;  %v12832_v43 = vpop.f32.mrb[104].mxu1  ;;  %v9384_v22 = vunpack.c.h.bf16 %v17534_v62 }
 0x690   : > { %19527 = vst [vmem:[#allocation31_spill] sm:$0xff] %v17544_v10  ;;  %19529 = vst [vmem:[#allocation110_spill] sm:$0xff] %v17557_v57  ;;  %v9083_v14 = vrot.slane %v9081_v26, 7  ;;  %v12833_v59 = vpop.f32.mrb[105].mxu1  ;;  %v9219_v15 = vrot.slane %v9084_v12, 1  ;;  %v17560_v16 = vadd.f32 %v9517_v63, %v9449_v40  ;;  %v17564_v10 = vrot.slane %v17478_v5, %v10363_v53 }
 0x691   : > { %vm8103_vm13 = vcmp.gt.f32.partialorder %v8049_v0, 0.0  ;;  %v8119_v46 = vmul.f32 0.2, %v8049_v0  ;;  %v12834_v47 = vadd.f32 %v12833_v59, %v12832_v43  ;;  %v12835_v28 = vpop.f32.mrb[106].mxu1  ;;  %v8134_v45 = vsel %vm8102_vm12, %v8046_v8, %v8118_v7 }
 0x692   : > { %v12994_v20 = vpop.f32.mrb[164].mxu0  ;;  %v9086_v21 = vor.u32 %v9084_v12, %v9083_v14  ;;  %v12836_v37 = vpop.f32.mrb[107].mxu1  ;;  %v9220_v19 = vor.u32 %v9219_v15, %v9081_v26  ;;  %19530 = vst [vmem:[#allocation34_spill] sm:$0xff] %v17564_v10  ;;  %v17576_v8 = vmul.f32 %v17497_v38, %v9384_v22  ;;  %v9383_v5 = vunpack.c.l.bf16 %v17534_v62 }
 0x693   : > { %v12995_v52 = vpop.f32.mrb[165].mxu0  ;;  %v8135_v60 = vsel %vm8103_vm13, %v8049_v0, %v8119_v46  ;;  %v7957_v55 = vadd.f32 %v12834_v47, %v17377_v58  ;;  %v12837_v44 = vadd.f32 %v12836_v37, %v12835_v28  ;;  %v9942_v7 = vmul.f32 %v17514_v25, %v9384_v22 }
 0x694   : > { %v17567_v2 = vadd.f32 %v12995_v52, %v12994_v20  ;;  %v12997_v43 = vpop.f32.mrb[166].mxu0  ;;  %v17569_v59 = vpack.c.bf16 %v8135_v60, %v8134_v45  ;;  %v17573_v63 = vsel %vm13976_vm5, 0, %v9086_v21  ;;  %v17588_v21 = vsel %vm13787_vm2, %v9220_v19, 0 }
 0x695   : > { %v12998_v40 = vpop.f32.mrb[167].mxu0  ;;  %v8054_v26 = vadd.f32 %v17366_v50, %v7957_v55  ;;  %v7960_v58 = vadd.f32 %v12837_v44, %v17380_v48  ;;  %v19163_v37 = vunpack.c.h.bf16 %v17573_v63  ;;  %v17599_v47 = vmul.f32 %v17497_v38, %v9383_v5 }
 0x696   : > { %19531 = vst [vmem:[#allocation35_spill] sm:$0xff] %v17567_v2  ;;  %v17581_v12 = vadd.f32 %v12998_v40, %v12997_v43  ;;  %v9088_v60 = vshrl.u32 %v17569_v59, 16  ;;  %v9091_v53 = vshll.u32 %v17569_v59, 16  ;;  %v17596_v46 = vunpack.c.h.bf16 %v17569_v59 }
 0x697   : > { %vm8104_vm14 = vcmp.gt.f32.partialorder %v8054_v26, 0.0  ;;  %v8120_v62 = vmul.f32 0.2, %v8054_v26  ;;  %v8057_v50 = vadd.f32 %v17372_v17, %v7960_v58  ;;  %v12838_v55 = vpop.f32.mrb[108].mxu1  ;;  %v9842_v48 = vmul.f32 %v17540_v6, %v19163_v37 }
 0x698   : > { %19532 = vst [vmem:[#allocation39_spill] sm:$0xff] %v17581_v12  ;;  %v12839_v0 = vpop.f32.mrb[109].mxu1  ;;  %v9090_v14 = vrot.slane %v9088_v60, 7  ;;  %v9221_v15 = vrot.slane %v9091_v53, 1  ;;  %v9484_v17 = vunpack.c.h.bf16 %v17588_v21 }
 0x699   : > { %vm8105_vm15 = vcmp.gt.f32.partialorder %v8057_v50, 0.0  ;;  %v8121_v22 = vmul.f32 0.2, %v8057_v50  ;;  %v12840_v20 = vadd.f32 %v12839_v0, %v12838_v55  ;;  %v12841_v45 = vpop.f32.mrb[110].mxu1  ;;  %v8136_v52 = vsel %vm8104_vm14, %v8054_v26, %v8120_v62 }
 0x69a   : > { %v13000_v28 = vpop.f32.mrb[168].mxu0  ;;  %v12842_v44 = vpop.f32.mrb[111].mxu1  ;;  %v9093_v43 = vor.u32 %v9091_v53, %v9090_v14  ;;  %v9222_v40 = vor.u32 %v9221_v15, %v9088_v60  ;;  %v9874_v58 = vadd.f32 %v9842_v48, %v9550_v9  ;;  %v10042_v48 = vmul.f32 %v17552_v33, %v9484_v17 }
 0x69b   : > { %v13001_v19 = vpop.f32.mrb[169].mxu0  ;;  %v8137_v37 = vsel %vm8105_vm15, %v8057_v50, %v8121_v22  ;;  %v7965_v12 = vadd.f32 %v12840_v20, %v17402_v4  ;;  %v12843_v42 = vadd.f32 %v12842_v44, %v12841_v45  ;;  %v9941_v14 = vmul.f32 %v17514_v25, %v9383_v5 }
 0x69c   : > { %v17604_v2 = vadd.f32 %v13001_v19, %v13000_v28  ;;  %v13003_v30 = vpop.f32.mrb[170].mxu0  ;;  %v17606_v35 = vpack.c.bf16 %v8137_v37, %v8136_v52  ;;  %v9203_v0 = vsel %vm13976_vm5, 0, %v9093_v43  ;;  %v9267_v26 = vsel %vm13787_vm2, %v9222_v40, 0 }
 0x69d   : > { %v13004_v55 = vpop.f32.mrb[171].mxu0  ;;  %v9974_v62 = vadd.f32 %v9942_v7, %v9874_v58  ;;  %v8062_v60 = vadd.f32 %v17364_v13, %v7965_v12  ;;  %v7968_v9 = vadd.f32 %v12843_v42, %v17405_v49  ;;  %v17616_v4 = vunpack.c.h.bf16 %v9203_v0  ;;  %v17632_v42 = vld [vmem:[%s18977_s7 + $0x8] ss:$0 sm:$0xff] }
 0x69e   : > { %19533 = vst [vmem:[#allocation40_spill] sm:$0xff] %v17604_v2  ;;  %v17614_v53 = vadd.f32 %v13004_v55, %v13003_v30  ;;  %v17620_v37 = vmul.f32 %v17497_v38, %v17596_v46  ;;  %v17622_v50 = vunpack.c.h.bf16 %v9267_v26  ;;  %v17635_v15 = vmul.f32 %v17519_v11, %v9484_v17 }
 0x69f   : > { %vm8106_vm0 = vcmp.gt.f32.partialorder %v8062_v60, 0.0  ;;  %v8122_v7 = vmul.f32 0.2, %v8062_v60  ;;  %v8065_v13 = vadd.f32 %v17370_v54, %v7968_v9  ;;  %v12844_v12 = vpop.f32.mrb[112].mxu1  ;;  %v10366_v49 = vmul.f32 %v17564_v10, %v17616_v4 }
 0x6a0   : > { %19534 = vst [vmem:[#allocation45_spill] sm:$0xff] %v17614_v53  ;;  %v12845_v30 = vpop.f32.mrb[113].mxu1  ;;  %v10074_v22 = vadd.f32 %v10042_v48, %v9974_v62  ;;  %v10466_v5 = vmul.f32 %v17557_v57, %v17596_v46  ;;  %v9283_v20 = vunpack.c.l.bf16 %v17573_v63  ;;  %v17642_v19 = vmul.f32 %v17519_v11, %v17622_v50 }
 0x6a1   : > { %vm8107_vm1 = vcmp.gt.f32.partialorder %v8065_v13, 0.0  ;;  %v8123_v54 = vmul.f32 0.2, %v8065_v13  ;;  %v12846_v28 = vadd.f32 %v12845_v30, %v12844_v12  ;;  %v12847_v52 = vpop.f32.mrb[114].mxu1  ;;  %v8138_v44 = vsel %vm8106_vm0, %v8062_v60, %v8122_v7 }
 0x6a2   : > { %v13006_v45 = vpop.f32.mrb[172].mxu0  ;;  %19535 = vst [vmem:[#allocation47_spill] sm:$0xff] %v17642_v19  ;;  %v12848_v17 = vpop.f32.mrb[115].mxu1  ;;  %v10398_v40 = vadd.f32 %v10366_v49, %v10074_v22  ;;  %v17646_v58 = vunpack.c.l.bf16 %v17569_v59  ;;  %v9483_v55 = vunpack.c.l.bf16 %v17588_v21  ;;  %v10566_v60 = vmul.f32 %v17632_v42, %v17622_v50 }
 0x6a3   : > { %v13007_v43 = vpop.f32.mrb[173].mxu0  ;;  %v8139_v62 = vsel %vm8107_vm1, %v8065_v13, %v8123_v54  ;;  %v7973_v9 = vadd.f32 %v12846_v28, %v17422_v56  ;;  %v12849_v12 = vadd.f32 %v12848_v17, %v12847_v52  ;;  %v17656_v7 = vunpack.c.l.bf16 %v9203_v0 }
 0x6a4   : > { %v17650_v48 = vadd.f32 %v13007_v43, %v13006_v45  ;;  %v13009_v30 = vpop.f32.mrb[174].mxu0  ;;  %v17652_v53 = vpack.c.bf16 %v8139_v62, %v8138_v44  ;;  %v10498_v51 = vadd.f32 %v10466_v5, %v10398_v40  ;;  %v17664_v56 = vmul.f32 %v17484_v32, %v17616_v4 }
 0x6a5   : > { %v13010_v2 = vpop.f32.mrb[175].mxu0  ;;  %v8070_v59 = vadd.f32 %v17386_v31, %v7973_v9  ;;  %v7976_v21 = vadd.f32 %v12849_v12, %v17425_v23  ;;  %v17668_v22 = vmul.f32 %v17497_v38, %v17646_v58  ;;  %v17670_v5 = vunpack.c.l.bf16 %v9267_v26 }
 0x6a6   : > { %19536 = vst [vmem:[#allocation51_spill] sm:$0xff] %v17650_v48  ;;  %v17660_v13 = vadd.f32 %v13010_v2, %v13009_v30  ;;  %v10598_v49 = vadd.f32 %v10566_v60, %v10498_v51  ;;  %v9841_v0 = vmul.f32 %v17540_v6, %v9283_v20  ;;  %v10041_v2 = vmul.f32 %v17552_v33, %v9483_v55 }
 0x6a7   : > { %19538 = vst [vmem:[#allocation55_spill] sm:$0xff] %v17668_v22  ;;  %vm8108_vm3 = vcmp.gt.f32.partialorder %v8070_v59, 0.0  ;;  %v8124_v54 = vmul.f32 0.2, %v8070_v59  ;;  %v8073_v31 = vadd.f32 %v17392_v29, %v7976_v21  ;;  %v12850_v23 = vpop.f32.mrb[116].mxu1  ;;  %v10365_v51 = vmul.f32 %v17564_v10, %v17656_v7 }
 0x6a8   : > { %19537 = vst [vmem:[#allocation52_spill] sm:$0xff] %v17660_v13  ;;  %10631 = vadd.xlane.f32.xlu1 %v10598_v49  ;;  %v9873_v28 = vadd.f32 %v9841_v0, %v17560_v16  ;;  %v10465_v45 = vmul.f32 %v17557_v57, %v17646_v58  ;;  %v12851_v26 = vpop.f32.mrb[117].mxu1  ;;  %v9095_v52 = vshrl.u32 %v17606_v35, 16  ;;  %v9098_v16 = vshll.u32 %v17606_v35, 16 }
 0x6a9   : > { %v8140_v44 = vsel %vm8108_vm3, %v8070_v59, %v8124_v54  ;;  %vm8109_vm4 = vcmp.gt.f32.partialorder %v8073_v31, 0.0  ;;  %v8125_v43 = vmul.f32 0.2, %v8073_v31  ;;  %v12852_v17 = vadd.f32 %v12851_v26, %v12850_v23  ;;  %v12853_v40 = vpop.f32.mrb[118].mxu1 }
 0x6aa   : > { %v13092_v29 = vpop.f32.mrb[176].mxu0  ;;  %v9973_v62 = vadd.f32 %v9941_v14, %v9873_v28  ;;  %v12854_v12 = vpop.f32.mrb[119].mxu1  ;;  %v9097_v30 = vrot.slane %v9095_v52, 7  ;;  %v9319_v60 = vmul.f32 %v17484_v32, %v9283_v20  ;;  %v9223_v14 = vrot.slane %v9098_v16, 1 }
 0x6ab   : > { %v13093_v9 = vpop.f32.mrb[177].mxu0  ;;  %v8141_v21 = vsel %vm8109_vm4, %v8073_v31, %v8125_v43  ;;  %v7981_v49 = vadd.f32 %v12852_v17, %v17438_v1  ;;  %v12855_v13 = vadd.f32 %v12854_v12, %v12853_v40  ;;  %v17693_v20 = vunpack.c.l.bf16 %v17606_v35 }
 0x6ac   : > { %v17684_v0 = vadd.f32 %v13093_v9, %v13092_v29  ;;  %v13095_v59 = vpop.f32.mrb[178].mxu0  ;;  %v17686_v54 = vpack.c.bf16 %v8141_v21, %v8140_v44  ;;  %v10073_v23 = vadd.f32 %v10041_v2, %v9973_v62  ;;  %v9100_v48 = vor.u32 %v9098_v16, %v9097_v30 }
 0x6ad   : > { %v13096_v26 = vpop.f32.mrb[179].mxu0  ;;  %v8078_v28 = vadd.f32 %v17384_v39, %v7981_v49  ;;  %v7984_v22 = vadd.f32 %v12855_v13, %v17441_v18  ;;  %v9224_v43 = vor.u32 %v9223_v14, %v9095_v52  ;;  %v9451_v44 = vadd.f32 %v17599_v47, %v9319_v60 }
 0x6ae   : > { %19539 = vst [vmem:[#allocation12_spill] sm:$0xff] %v17684_v0  ;;  %v17690_v19 = vadd.f32 %v13096_v26, %v13095_v59  ;;  %v10397_v1 = vadd.f32 %v10365_v51, %v10073_v23  ;;  %v9204_v31 = vsel %vm13976_vm5, 0, %v9100_v48  ;;  %v9519_v2 = vmul.f32 %v17519_v11, %v9483_v55 }
 0x6af   : > { %v10565_v17 = vmul.f32 %v17632_v42, %v17670_v5  ;;  %v8126_v39 = vmul.f32 0.2, %v8078_v28  ;;  %v8081_v18 = vadd.f32 %v17390_v36, %v7984_v22  ;;  %v12856_v13 = vpop.f32.mrb[120].mxu1  ;;  %vm8110_vm6 = vcmp.gt.f32.partialorder %v8078_v28, 0.0 }
 0x6b0   : > { %19540 = vst [vmem:[#allocation56_spill] sm:$0xff] %v17690_v19  ;;  %v10497_v29 = vadd.f32 %v10465_v45, %v10397_v1  ;;  %v9268_v51 = vsel %vm13787_vm2, %v9224_v43, 0  ;;  %v17704_v40 = vunpack.c.l.bf16 %v9204_v31  ;;  %v12857_v48 = vpop.f32.mrb[121].mxu1  ;;  %v17708_v47 = vmul.f32 %v17519_v11, %v17670_v5 }
 0x6b1   : > { %v17712_v55 = vmul.f32 %v17484_v32, %v17656_v7  ;;  %vm8111_vm7 = vcmp.gt.f32.partialorder %v8081_v18, 0.0  ;;  %v8127_v52 = vmul.f32 0.2, %v8081_v18  ;;  %v12859_v22 = vpop.f32.mrb[122].mxu1  ;;  %v17716_v62 = vmul.f32 %v17497_v38, %v17693_v20 }
 0x6b2   : > { %v13098_v36 = vpop.f32.mrb[180].mxu0  ;;  %v10597_v45 = vadd.f32 %v10565_v17, %v10497_v29  ;;  %v9551_v9 = vadd.f32 %v9519_v2, %v9451_v44  ;;  %v9843_v12 = vmul.f32 %v17540_v6, %v17656_v7  ;;  %v12860_v16 = vpop.f32.mrb[123].mxu1  ;;  %v8142_v60 = vsel %vm8110_vm6, %v8078_v28, %v8126_v39 }
 0x6b3   : > { %v13099_v30 = vpop.f32.mrb[181].mxu0  ;;  %v8143_v21 = vsel %vm8111_vm7, %v8081_v18, %v8127_v52  ;;  %v17721_v49 = vunpack.c.l.bf16 %v9268_v51  ;;  %v9943_v59 = vmul.f32 %v17514_v25, %v17646_v58  ;;  %v10043_v1 = vmul.f32 %v17552_v33, %v17670_v5 }
 0x6b4   : > { %v13101_v23 = vpop.f32.mrb[182].mxu0  ;;  %10629 = vadd.xlane.f32.xlu0 %v10597_v45  ;;  %v17725_v26 = vpack.c.bf16 %v8143_v21, %v8142_v60  ;;  %v9875_v14 = vadd.f32 %v9843_v12, %v9551_v9  ;;  %v10367_v7 = vmul.f32 %v17564_v10, %v17704_v40  ;;  %v12858_v44 = vadd.f32 %v12857_v48, %v12856_v13 }
 0x6b5   : > { %v13102_v43 = vpop.f32.mrb[183].mxu0  ;;  %v17731_v28 = vadd.f32 %v13099_v30, %v13098_v36  ;;  %v12861_v2 = vadd.f32 %v12860_v16, %v12859_v22  ;;  %v9288_v58 = vunpack.c.h.bf16 %v9204_v31  ;;  %v19543_v18 = vunpack.c.h.bf16 %v17573_v63 }
 0x6b6   : > { %v17733_v17 = vadd.f32 %v13102_v43, %v13101_v23  ;;  %v9975_v39 = vadd.f32 %v9943_v59, %v9875_v14  ;;  %v9388_v52 = vunpack.c.h.bf16 %v17606_v35  ;;  %v17741_v5 = vmul.f32 %v17484_v32, %v17704_v40 }
 0x6b7   : > { %19541 = vst [vmem:[#allocation11_spill] sm:$0xff] %v17731_v28  ;;  %v9320_v29 = vmul.f32 %v17484_v32, %v19543_v18  ;;  %v10467_v13 = vmul.f32 %v17557_v57, %v17693_v20  ;;  %v7989_v48 = vadd.f32 %v12858_v44, %v17454_v24  ;;  %v7992_v36 = vadd.f32 %v12861_v2, %v17457_v3  ;;  %v17747_v22 = vpop.f32.mrb[124].mxu1 }
 0x6b8   : > { %19542 = vst [vmem:[#allocation57_spill] sm:$0xff] %v17733_v17  ;;  %v17751_v63 = vmul.f32 %v17519_v11, %v17721_v49  ;;  %v10075_v31 = vadd.f32 %v10043_v1, %v9975_v39  ;;  %v9844_v45 = vmul.f32 %v17540_v6, %v17616_v4  ;;  %v17756_v9 = vpop.f32.mrb[125].mxu1  ;;  %v10567_v12 = vmul.f32 %v17632_v42, %v17721_v49 }
 0x6b9   : > { %v9452_v35 = vadd.f32 %v17576_v8, %v9320_v29  ;;  %v8086_v24 = vadd.f32 %v17411_v61, %v7989_v48  ;;  %v8089_v3 = vadd.f32 %v17417_v41, %v7992_v36  ;;  %v9488_v30 = vunpack.c.h.bf16 %v9268_v51  ;;  %v17764_v60 = vpop.f32.mrb[126].mxu1 }
 0x6ba   : > { %v17762_v16 = vpop.f32.mrb[184].mxu0  ;;  %v10399_v21 = vadd.f32 %v10367_v7, %v10075_v31  ;;  %v17767_v8 = vmul.f32 %v17484_v32, %v9288_v58  ;;  %v17770_v4 = vmul.f32 %v17497_v38, %v9388_v52  ;;  %v17775_v14 = vpop.f32.mrb[127].mxu1  ;;  %v9944_v7 = vmul.f32 %v17514_v25, %v17596_v46 }
 0x6bb   : > { %v9552_v59 = vadd.f32 %v17635_v15, %v9452_v35  ;;  %v17773_v23 = vpop.f32.mrb[185].mxu0  ;;  %vm8112_vm8 = vcmp.gt.f32.partialorder %v8086_v24, 0.0  ;;  %v8128_v61 = vmul.f32 0.2, %v8086_v24  ;;  %vm8113_vm9 = vcmp.gt.f32.partialorder %v8089_v3, 0.0 }
 0x6bc   : > { %v8129_v41 = vmul.f32 0.2, %v8089_v3  ;;  %v10499_v51 = vadd.f32 %v10467_v13, %v10399_v21  ;;  %v10044_v43 = vmul.f32 %v17552_v33, %v17622_v50  ;;  %v17781_v44 = vpop.f32.mrb[186].mxu0  ;;  %v9102_v39 = vshrl.u32 %v17652_v53, 16 }
 0x6bd   : > { %v9876_v1 = vadd.f32 %v9844_v45, %v9552_v59  ;;  %v8144_v2 = vsel %vm8112_vm8, %v8086_v24, %v8128_v61  ;;  %v9105_v18 = vshll.u32 %v17652_v53, 16  ;;  %v17785_v29 = vpop.f32.mrb[187].mxu0  ;;  %v10368_v31 = vmul.f32 %v17564_v10, %v9288_v58 }
 0x6be   : > { %v8145_v15 = vsel %vm8113_vm9, %v8089_v3, %v8129_v41  ;;  %v10599_v48 = vadd.f32 %v10567_v12, %v10499_v51  ;;  %v9104_v46 = vrot.slane %v9102_v39, 7  ;;  %v9454_v50 = vadd.f32 %v17620_v37, %v17664_v56  ;;  %v19545_v37 = vld [vmem:[#allocation47_spill] sm:$0xff] }
 0x6bf   : > { %v17787_v36 = vpack.c.bf16 %v8145_v15, %v8144_v2  ;;  %v9976_v13 = vadd.f32 %v9944_v7, %v9876_v1  ;;  %v9225_v35 = vrot.slane %v9105_v18, 1  ;;  %v9846_v45 = vmul.f32 %v17540_v6, %v9288_v58  ;;  %v17793_v24 = vpop.f32.mrb[128].mxu1 }
 0x6c0   : > { %10633 = vadd.xlane.f32.xlu0 %v10599_v48  ;;  %v17796_v3 = vmul.f32 %v17519_v11, %v9488_v30  ;;  %v10468_v12 = vmul.f32 %v17557_v57, %v9388_v52  ;;  %v10568_v59 = vmul.f32 %v17632_v42, %v9488_v30  ;;  %v17800_v61 = vpop.f32.mrb[129].mxu1  ;;  %v9107_v41 = vor.u32 %v9105_v18, %v9104_v46  ;;  %v19546_v48 = vld [vmem:[#allocation55_spill] sm:$0xff] }
 0x6c1   : > { %19544 = vst [vmem:[#allocation14_spill] sm:$0xff] %v17787_v36  ;;  %v10076_v21 = vadd.f32 %v10044_v43, %v9976_v13  ;;  %v9226_v51 = vor.u32 %v9225_v35, %v9102_v39  ;;  %v17803_v1 = vunpack.c.h.bf16 %v17652_v53  ;;  %v9554_v56 = vadd.f32 %v19545_v37, %v9454_v50  ;;  %v17808_v7 = vpop.f32.mrb[130].mxu1 }
 0x6c2   : > { %v17806_v58 = vpop.f32.mrb[188].mxu0  ;;  %v9946_v43 = vmul.f32 %v17514_v25, %v9388_v52  ;;  %v17812_v15 = vunpack.c.l.bf16 %v17652_v53  ;;  %v9453_v13 = vadd.f32 %v19546_v48, %v17712_v55  ;;  %v17818_v39 = vpop.f32.mrb[131].mxu1  ;;  %v9205_v46 = vsel %vm13976_vm5, 0, %v9107_v41 }
 0x6c3   : > { %v10400_v2 = vadd.f32 %v10368_v31, %v10076_v21  ;;  %v17816_v18 = vpop.f32.mrb[189].mxu0  ;;  %v9269_v35 = vsel %vm13787_vm2, %v9226_v51, 0  ;;  %v9878_v50 = vadd.f32 %v9846_v45, %v9554_v56  ;;  %v9845_v52 = vmul.f32 %v17540_v6, %v17704_v40 }
 0x6c4   : > { %v17826_v31 = vpop.f32.mrb[190].mxu0  ;;  %v9290_v21 = vunpack.c.h.bf16 %v9205_v46  ;;  %v17828_v37 = vunpack.c.h.bf16 %v9269_v35  ;;  %v17830_v55 = vunpack.c.l.bf16 %v9205_v46  ;;  %v17836_v41 = vmul.f32 %v17497_v38, %v17803_v1 }
 0x6c5   : > { %v10500_v53 = vadd.f32 %v10468_v12, %v10400_v2  ;;  %v17832_v48 = vpop.f32.mrb[191].mxu0  ;;  %v9978_v19 = vadd.f32 %v9946_v43, %v9878_v50  ;;  %v10046_v45 = vmul.f32 %v17552_v33, %v9488_v30  ;;  %v10470_v40 = vmul.f32 %v17557_v57, %v17803_v1 }
 0x6c6   : > { %v10370_v12 = vmul.f32 %v17564_v10, %v9290_v21  ;;  %v9553_v56 = vadd.f32 %v17708_v47, %v9453_v13  ;;  %v9945_v2 = vmul.f32 %v17514_v25, %v17693_v20  ;;  %v17846_v46 = vmul.f32 %v17484_v32, %v9290_v21 }
 0x6c7   : > { %v10600_v51 = vadd.f32 %v10568_v59, %v10500_v53  ;;  %v10078_v17 = vadd.f32 %v10046_v45, %v9978_v19  ;;  %v17850_v43 = vmul.f32 %v17497_v38, %v17812_v15  ;;  %v17852_v30 = vunpack.c.l.bf16 %v9269_v35  ;;  %v17854_v50 = vpop.f32.mrb[132].mxu1 }
 0x6c8   : > { %v10570_v59 = vmul.f32 %v17632_v42, %v17828_v37  ;;  %v9877_v47 = vadd.f32 %v9845_v52, %v9553_v56  ;;  %v10045_v20 = vmul.f32 %v17552_v33, %v17721_v49  ;;  %v10369_v13 = vmul.f32 %v17564_v10, %v17830_v55  ;;  %v17862_v19 = vpop.f32.mrb[133].mxu1 }
 0x6c9   : > { %10635 = vadd.xlane.f32.xlu0 %v10600_v51  ;;  %v10402_v53 = vadd.f32 %v10370_v12, %v10078_v17  ;;  %v10469_v35 = vmul.f32 %v17557_v57, %v17812_v15  ;;  %v12864_v45 = vadd.f32 %v17756_v9, %v17747_v22  ;;  %v17870_v51 = vadd.f32 %v17773_v23, %v17762_v16  ;;  %v17874_v56 = vpop.f32.mrb[134].mxu1  ;;  %v19553_v23 = vld [vmem:[#allocation25_spill] sm:$0xff] }
 0x6ca   : > { %v17872_v52 = vpop.f32.mrb[192].mxu0  ;;  %19549 = vst [vmem:[#allocation62_spill] sm:$0xff] %v17874_v56  ;;  %v9977_v49 = vadd.f32 %v9945_v2, %v9877_v47  ;;  %v12867_v0 = vadd.f32 %v17775_v14, %v17764_v60  ;;  %v17880_v17 = vadd.f32 %v17785_v29, %v17781_v44  ;;  %v9109_v12 = vshrl.u32 %v17686_v54, 16  ;;  %v17885_v22 = vpop.f32.mrb[135].mxu1  ;;  %v19555_v14 = vld [vmem:[#allocation103_spill] sm:$0xff] }
 0x6cb   : > { %19547 = vst [vmem:[#allocation58_spill] sm:$0xff] %v17870_v51  ;;  %19548 = vst [vmem:[#allocation13_spill] sm:$0xff] %v17872_v52  ;;  %v17883_v28 = vpop.f32.mrb[193].mxu0  ;;  %v10502_v9 = vadd.f32 %v10470_v40, %v10402_v53  ;;  %v10569_v16 = vmul.f32 %v17632_v42, %v17852_v30  ;;  %v7997_v51 = vadd.f32 %v12864_v45, %v19553_v23  ;;  %v9112_v2 = vshll.u32 %v17686_v54, 16  ;;  %v19556_v40 = vld [vmem:[#allocation17_spill] sm:$0xff]  ;;  %v19557_v23 = vld [vmem:[#allocation94_spill] sm:$0xff] }
 0x6cc   : > { %19550 = vst [vmem:[#allocation16_spill] sm:$0xff] %v17880_v17  ;;  %19551 = vst [vmem:[#allocation63_spill] sm:$0xff] %v17883_v28  ;;  %v17891_v47 = vpop.f32.mrb[194].mxu0  ;;  %v10077_v60 = vadd.f32 %v10045_v20, %v9977_v49  ;;  %v8000_v44 = vadd.f32 %v12867_v0, %v19555_v14  ;;  %v9111_v29 = vrot.slane %v9109_v12, 7  ;;  %v9456_v17 = vadd.f32 %v17770_v4, %v17767_v8 }
 0x6cd   : > { %19552 = vst [vmem:[#allocation68_spill] sm:$0xff] %v17885_v22  ;;  %19554 = vst [vmem:[#allocation69_spill] sm:$0xff] %v17891_v47  ;;  %v17896_v36 = vpop.f32.mrb[195].mxu0  ;;  %v10602_v22 = vadd.f32 %v10570_v59, %v10502_v9  ;;  %v8094_v53 = vadd.f32 %v19556_v40, %v7997_v51  ;;  %v9227_v56 = vrot.slane %v9112_v2, 1  ;;  %v17900_v28 = vunpack.c.h.bf16 %v17686_v54 }
 0x6ce   : > { %v10401_v45 = vadd.f32 %v10369_v13, %v10077_v60  ;;  %v8097_v52 = vadd.f32 %v19557_v23, %v8000_v44  ;;  %v9114_v47 = vor.u32 %v9112_v2, %v9111_v29  ;;  %v9556_v20 = vadd.f32 %v17796_v3, %v9456_v17 }
 0x6cf   : > { %10639 = vadd.xlane.f32.xlu0 %v10602_v22  ;;  %vm8114_vm10 = vcmp.gt.f32.partialorder %v8094_v53, 0.0  ;;  %v8130_v0 = vmul.f32 0.2, %v8094_v53  ;;  %v9228_v49 = vor.u32 %v9227_v56, %v9109_v12  ;;  %v9848_v8 = vmul.f32 %v17540_v6, %v9290_v21  ;;  %v17905_v4 = vpop.f32.mrb[136].mxu1 }
 0x6d0   : > { %v10501_v59 = vadd.f32 %v10469_v35, %v10401_v45  ;;  %vm8115_vm11 = vcmp.gt.f32.partialorder %v8097_v52, 0.0  ;;  %v8131_v51 = vmul.f32 0.2, %v8097_v52  ;;  %v9206_v9 = vsel %vm13976_vm5, 0, %v9114_v47  ;;  %v17909_v13 = vpop.f32.mrb[137].mxu1 }
 0x6d1   : > { %v8146_v60 = vsel %vm8114_vm10, %v8094_v53, %v8130_v0  ;;  %v9270_v3 = vsel %vm13787_vm2, %v9228_v49, 0  ;;  %v17913_v17 = vunpack.c.h.bf16 %v9206_v9  ;;  %v9880_v22 = vadd.f32 %v9848_v8, %v9556_v20  ;;  %v17917_v21 = vpop.f32.mrb[138].mxu1 }
 0x6d2   : > { %v17915_v56 = vpop.f32.mrb[196].mxu0  ;;  %v10601_v12 = vadd.f32 %v10569_v16, %v10501_v59  ;;  %v8147_v35 = vsel %vm8115_vm11, %v8097_v52, %v8131_v51  ;;  %v17919_v2 = vunpack.c.h.bf16 %v9270_v3  ;;  %v9948_v47 = vmul.f32 %v17514_v25, %v17803_v1  ;;  %v17925_v44 = vpop.f32.mrb[139].mxu1 }
 0x6d3   : > { %v17923_v14 = vpop.f32.mrb[197].mxu0  ;;  %v9526_v29 = vmul.f32 %v17519_v11, %v17828_v37  ;;  %v17931_v40 = vmul.f32 %v17484_v32, %v17830_v55  ;;  %v17935_v16 = vmul.f32 %v17519_v11, %v17852_v30  ;;  %v17937_v52 = vpack.c.bf16 %v8147_v35, %v8146_v60 }
 0x6d4   : > { %v17939_v53 = vpop.f32.mrb[198].mxu0  ;;  %10637 = vadd.xlane.f32.xlu1 %v10601_v12  ;;  %v17943_v1 = vmul.f32 %v17497_v38, %v17900_v28  ;;  %v9980_v45 = vadd.f32 %v9948_v47, %v9880_v22  ;;  %v10048_v23 = vmul.f32 %v17552_v33, %v17828_v37  ;;  %v10372_v20 = vmul.f32 %v17564_v10, %v17913_v17 }
 0x6d5   : > { %19558 = vst [vmem:[#allocation73_spill] sm:$0xff] %v17937_v52  ;;  %v17949_v0 = vpop.f32.mrb[199].mxu0  ;;  %v17953_v49 = vmul.f32 %v17484_v32, %v17913_v17  ;;  %v9291_v8 = vunpack.c.l.bf16 %v9206_v9  ;;  %v17956_v59 = vunpack.c.l.bf16 %v17686_v54  ;;  %v9455_v51 = vadd.f32 %v17716_v62, %v17741_v5 }
 0x6d6   : > { %v17962_v60 = vmul.f32 %v17519_v11, %v17919_v2  ;;  %v10080_v37 = vadd.f32 %v10048_v23, %v9980_v45  ;;  %v10472_v22 = vmul.f32 %v17557_v57, %v17900_v28  ;;  %v9847_v12 = vmul.f32 %v17540_v6, %v17830_v55 }
 0x6d7   : > { %v10572_v9 = vmul.f32 %v17632_v42, %v17919_v2  ;;  %v17970_v35 = vunpack.c.l.bf16 %v9270_v3  ;;  %v9555_v54 = vadd.f32 %v17751_v63, %v9455_v51  ;;  %v9947_v62 = vmul.f32 %v17514_v25, %v17812_v15  ;;  %v17975_v5 = vpop.f32.mrb[140].mxu1 }
 0x6d8   : > { %19559 = vst [vmem:[#allocation76_spill] sm:$0xff] %v17975_v5  ;;  %v10404_v47 = vadd.f32 %v10372_v20, %v10080_v37  ;;  %v17978_v45 = vmul.f32 %v17484_v32, %v9291_v8  ;;  %v17982_v23 = vmul.f32 %v17497_v38, %v17956_v59  ;;  %v10047_v55 = vmul.f32 %v17552_v33, %v17852_v30  ;;  %v17986_v3 = vpop.f32.mrb[141].mxu1 }
 0x6d9   : > { %v9879_v52 = vadd.f32 %v9847_v12, %v9555_v54  ;;  %v12902_v63 = vadd.f32 %v17800_v61, %v17793_v24  ;;  %v17992_v15 = vadd.f32 %v17816_v18, %v17806_v58  ;;  %v12905_v20 = vadd.f32 %v17818_v39, %v17808_v7  ;;  %v17998_v37 = vpop.f32.mrb[142].mxu1 }
 0x6da   : > { %v17996_v51 = vpop.f32.mrb[200].mxu0  ;;  %19561 = vst [vmem:[#allocation78_spill] sm:$0xff] %v17998_v37  ;;  %v10504_v5 = vadd.f32 %v10472_v22, %v10404_v47  ;;  %v18002_v30 = vadd.f32 %v17832_v48, %v17826_v31  ;;  %v9116_v12 = vshrl.u32 %v17725_v26, 16  ;;  %v9119_v24 = vshll.u32 %v17725_v26, 16  ;;  %v18008_v58 = vpop.f32.mrb[143].mxu1 }
 0x6db   : > { %19560 = vst [vmem:[#allocation74_spill] sm:$0xff] %v17992_v15  ;;  %v18006_v61 = vpop.f32.mrb[201].mxu0  ;;  %19563 = vst [vmem:[#allocation79_spill] sm:$0xff] %v18008_v58  ;;  %v18012_v7 = vmul.f32 %v17519_v11, %v17970_v35  ;;  %v9979_v18 = vadd.f32 %v9947_v62, %v9879_v52  ;;  %v10371_v39 = vmul.f32 %v17564_v10, %v9291_v8  ;;  %v18028_v52 = vld [vmem:[%s18976_s6] ss:$0 sm:$0xff] }
 0x6dc   : > { %19562 = vst [vmem:[#allocation75_spill] sm:$0xff] %v18002_v30  ;;  %v10471_v22 = vmul.f32 %v17557_v57, %v17956_v59  ;;  %v18017_v31 = vpop.f32.mrb[202].mxu0  ;;  %v10604_v48 = vadd.f32 %v10572_v9, %v10504_v5  ;;  %v9118_v54 = vrot.slane %v9116_v12, 7  ;;  %v9229_v47 = vrot.slane %v9119_v24, 1 }
 0x6dd   : > { %19564 = vst [vmem:[#allocation80_spill] sm:$0xff] %v18017_v31  ;;  %v9458_v30 = vadd.f32 %v17836_v41, %v17846_v46  ;;  %v18021_v15 = vpop.f32.mrb[203].mxu0  ;;  %v10079_v58 = vadd.f32 %v10047_v55, %v9979_v18  ;;  %v10571_v37 = vmul.f32 %v17632_v42, %v17970_v35  ;;  %v18031_v62 = vadd.f32 %v18028_v52, %v12902_v63 }
 0x6de   : > { %19565 = vst [vmem:[#allocation81_spill] sm:$0xff] %v18021_v15  ;;  %v9850_v9 = vmul.f32 %v17540_v6, %v17913_v17  ;;  %10643 = vadd.xlane.f32.xlu0 %v10604_v48  ;;  %v9121_v5 = vor.u32 %v9119_v24, %v9118_v54  ;;  %v9230_v41 = vor.u32 %v9229_v47, %v9116_v12  ;;  %v18036_v46 = vunpack.c.h.bf16 %v17725_v26 }
 0x6df   : > { %19566 = vst [vmem:[#allocation82_spill] sm:$0xff] %v18031_v62  ;;  %v9558_v55 = vadd.f32 %v9526_v29, %v9458_v30  ;;  %v10403_v18 = vadd.f32 %v10371_v39, %v10079_v58  ;;  %v18039_v15 = vadd.f32 %v18028_v52, %v12905_v20  ;;  %v9950_v31 = vmul.f32 %v17514_v25, %v17900_v28  ;;  %v18045_v62 = vpop.f32.mrb[144].mxu1 }
 0x6e0   : > { %v9457_v63 = vadd.f32 %v17850_v43, %v17931_v40  ;;  %v9207_v17 = vsel %vm13976_vm5, 0, %v9121_v5  ;;  %v9271_v12 = vsel %vm13787_vm2, %v9230_v41, 0  ;;  %v18052_v29 = vunpack.c.l.bf16 %v17725_v26  ;;  %v18054_v20 = vpop.f32.mrb[145].mxu1 }
 0x6e1   : > { %19567 = vst [vmem:[#allocation83_spill] sm:$0xff] %v18039_v15  ;;  %v9882_v24 = vadd.f32 %v9850_v9, %v9558_v55  ;;  %19568 = vst [vmem:[#allocation84_spill] sm:$0xff] %v18054_v20  ;;  %v10503_v30 = vadd.f32 %v10471_v22, %v10403_v18  ;;  %v9294_v58 = vunpack.c.h.bf16 %v9207_v17  ;;  %v9494_v28 = vunpack.c.h.bf16 %v9271_v12  ;;  %v18057_v43 = vpop.f32.mrb[146].mxu1  ;;  %v19582_v20 = vld [vmem:[#allocation14_spill] sm:$0xff] }
 0x6e2   : > { %v9849_v39 = vmul.f32 %v17540_v6, %v9291_v8  ;;  %19569 = vst [vmem:[#allocation85_spill] sm:$0xff] %v18057_v43  ;;  %v18059_v40 = vpop.f32.mrb[204].mxu0  ;;  %v18063_v48 = vmul.f32 %v17497_v38, %v18036_v46  ;;  %v10050_v26 = vmul.f32 %v17552_v33, %v17919_v2  ;;  %v9293_v47 = vunpack.c.l.bf16 %v9207_v17  ;;  %v18067_v9 = vpop.f32.mrb[147].mxu1  ;;  %v19579_v43 = vld [vmem:[#allocation68_spill] sm:$0xff] }
 0x6e3   : > { %19570 = vst [vmem:[#allocation86_spill] sm:$0xff] %v18059_v40  ;;  %v9982_v54 = vadd.f32 %v9950_v31, %v9882_v24  ;;  %19571 = vst [vmem:[#allocation87_spill] sm:$0xff] %v18067_v9  ;;  %v18069_v22 = vpop.f32.mrb[205].mxu0  ;;  %v10603_v5 = vadd.f32 %v10571_v37, %v10503_v30  ;;  %v10374_v8 = vmul.f32 %v17564_v10, %v9294_v58  ;;  %v18084_v17 = vunpack.c.l.bf16 %v9271_v12  ;;  %v19576_v40 = vld [vmem:[#allocation63_spill] sm:$0xff]  ;;  %v19578_v9 = vld [vmem:[#allocation62_spill] sm:$0xff] }
 0x6e4   : > { %19572 = vst [vmem:[#allocation88_spill] sm:$0xff] %v18069_v22  ;;  %v10474_v41 = vmul.f32 %v17557_v57, %v18036_v46  ;;  %v9557_v55 = vadd.f32 %v17935_v16, %v9457_v63  ;;  %v18075_v18 = vpop.f32.mrb[206].mxu0  ;;  %v18078_v31 = vmul.f32 %v17484_v32, %v9294_v58  ;;  %v18082_v2 = vmul.f32 %v17497_v38, %v18052_v29 }
 0x6e5   : > { %19573 = vst [vmem:[#allocation89_spill] sm:$0xff] %v18075_v18  ;;  %v10082_v24 = vadd.f32 %v10050_v26, %v9982_v54  ;;  %v18086_v37 = vpop.f32.mrb[207].mxu0  ;;  %10641 = vadd.xlane.f32.xlu1 %v10603_v5  ;;  %v18089_v30 = vmul.f32 %v17519_v11, %v9494_v28  ;;  %v10574_v16 = vmul.f32 %v17632_v42, %v9494_v28  ;;  %v19575_v5 = vld [vmem:[#allocation13_spill] sm:$0xff] }
 0x6e6   : > { %19574 = vst [vmem:[#allocation90_spill] sm:$0xff] %v18086_v37  ;;  %v9881_v63 = vadd.f32 %v9849_v39, %v9557_v55  ;;  %v9949_v18 = vmul.f32 %v17514_v25, %v17956_v59  ;;  %v10049_v54 = vmul.f32 %v17552_v33, %v17970_v35  ;;  %v10373_v26 = vmul.f32 %v17564_v10, %v9293_v47  ;;  %v19580_v55 = vld [vmem:[#allocation69_spill] sm:$0xff] }
 0x6e7   : > { %v10406_v22 = vadd.f32 %v10374_v8, %v10082_v24  ;;  %v12908_v12 = vadd.f32 %v17862_v19, %v17854_v50  ;;  %v18101_v15 = vadd.f32 %v19576_v40, %v19575_v5  ;;  %v12911_v39 = vadd.f32 %v19579_v43, %v19578_v9  ;;  %v18109_v8 = vpop.f32.mrb[148].mxu1 }
 0x6e8   : > { %v9981_v37 = vadd.f32 %v9949_v18, %v9881_v63  ;;  %v18107_v59 = vadd.f32 %v17896_v36, %v19580_v55  ;;  %v18112_v24 = vmul.f32 %v17484_v32, %v9293_v47  ;;  %v9123_v50 = vshrl.u32 %v19582_v20, 16  ;;  %v18116_v18 = vpop.f32.mrb[149].mxu1  ;;  %v19594_v27 = vld [vmem:[#allocation84_spill] sm:$0xff] }
 0x6e9   : > { %19577 = vst [vmem:[#allocation91_spill] sm:$0xff] %v18101_v15  ;;  %v10506_v35 = vadd.f32 %v10474_v41, %v10406_v22  ;;  %v9126_v19 = vshll.u32 %v19582_v20, 16  ;;  %19583 = vst [vmem:[#allocation38_spill] sm:$0xff] %v18116_v18  ;;  %v18120_v40 = vmul.f32 %v17519_v11, %v18084_v17  ;;  %v10473_v36 = vmul.f32 %v17557_v57, %v18052_v29  ;;  %v18126_v22 = vpop.f32.mrb[150].mxu1 }
 0x6ea   : > { %19581 = vst [vmem:[#allocation92_spill] sm:$0xff] %v18107_v59  ;;  %v10081_v43 = vadd.f32 %v10049_v54, %v9981_v37  ;;  %v9460_v9 = vadd.f32 %v17943_v1, %v17953_v49  ;;  %v9125_v63 = vrot.slane %v9123_v50, 7  ;;  %v9852_v55 = vmul.f32 %v17540_v6, %v9294_v58  ;;  %v18129_v59 = vpop.f32.mrb[151].mxu1 }
 0x6eb   : > { %v10606_v41 = vadd.f32 %v10574_v16, %v10506_v35  ;;  %v9231_v5 = vrot.slane %v9126_v19, 1  ;;  %19584 = vst [vmem:[#allocation46_spill] sm:$0xff] %v18129_v59  ;;  %v10573_v18 = vmul.f32 %v17632_v42, %v18084_v17  ;;  %v18134_v37 = vadd.f32 %v18028_v52, %v12908_v12 }
 0x6ec   : > { %v10405_v15 = vadd.f32 %v10373_v26, %v10081_v43  ;;  %v9560_v54 = vadd.f32 %v17962_v60, %v9460_v9  ;;  %v9128_v1 = vor.u32 %v9126_v19, %v9125_v63  ;;  %v18138_v16 = vunpack.c.h.bf16 %v19582_v20 }
 0x6ed   : > { %10647 = vadd.xlane.f32.xlu0 %v10606_v41  ;;  %v9232_v49 = vor.u32 %v9231_v5, %v9123_v50  ;;  %v9952_v58 = vmul.f32 %v17514_v25, %v18036_v46  ;;  %v10052_v26 = vmul.f32 %v17552_v33, %v9494_v28  ;;  %v9459_v43 = vadd.f32 %v17982_v23, %v17978_v45 }
 0x6ee   : > { %v10505_v35 = vadd.f32 %v10473_v36, %v10405_v15  ;;  %v9884_v59 = vadd.f32 %v9852_v55, %v9560_v54  ;;  %v9208_v12 = vsel %vm13976_vm5, 0, %v9128_v1  ;;  %v18150_v50 = vunpack.c.l.bf16 %v19582_v20 }
 0x6ef   : > { %v9272_v60 = vsel %vm13787_vm2, %v9232_v49, 0  ;;  %v9851_v19 = vmul.f32 %v17540_v6, %v9293_v47  ;;  %v9296_v46 = vunpack.c.h.bf16 %v9208_v12  ;;  %v18153_v41 = vpop.f32.mrb[152].mxu1  ;;  %v18156_v28 = vadd.f32 %v18028_v52, %v12911_v39 }
 0x6f0   : > { %v10605_v9 = vadd.f32 %v10573_v18, %v10505_v35  ;;  %v9496_v15 = vunpack.c.h.bf16 %v9272_v60  ;;  %v9984_v36 = vadd.f32 %v9952_v58, %v9884_v59  ;;  %v18160_v45 = vmul.f32 %v17497_v38, %v18138_v16  ;;  %v18163_v20 = vpop.f32.mrb[153].mxu1 }
 0x6f1   : > { %v9295_v23 = vunpack.c.l.bf16 %v9208_v12  ;;  %v9559_v63 = vadd.f32 %v18012_v7, %v9459_v43  ;;  %v10376_v18 = vmul.f32 %v17564_v10, %v9296_v46  ;;  %v10476_v59 = vmul.f32 %v17557_v57, %v18138_v16  ;;  %v18170_v5 = vpop.f32.mrb[154].mxu1 }
 0x6f2   : > { %10645 = vadd.xlane.f32.xlu1 %v10605_v9  ;;  %v10084_v47 = vadd.f32 %v10052_v26, %v9984_v36  ;;  %v9951_v39 = vmul.f32 %v17514_v25, %v18052_v29  ;;  %v18173_v55 = vmul.f32 %v17484_v32, %v9296_v46  ;;  %v18177_v7 = vmul.f32 %v17497_v38, %v18150_v50  ;;  %v18181_v49 = vpop.f32.mrb[155].mxu1 }
 0x6f3   : > { %v18179_v54 = vunpack.c.l.bf16 %v9272_v60  ;;  %v9883_v1 = vadd.f32 %v9851_v19, %v9559_v63  ;;  %v18184_v58 = vmul.f32 %v17519_v11, %v9496_v15  ;;  %v10576_v29 = vmul.f32 %v17632_v42, %v9496_v15 }
 0x6f4   : > { %v10408_v35 = vadd.f32 %v10376_v18, %v10084_v47  ;;  %v10051_v26 = vmul.f32 %v17552_v33, %v18084_v17  ;;  %v10375_v12 = vmul.f32 %v17564_v10, %v9295_v23  ;;  %v12914_v9 = vadd.f32 %v17909_v13, %v17905_v4  ;;  %v19587_v47 = vld [vmem:[#allocation73_spill] sm:$0xff] }
 0x6f5   : > { %v9983_v43 = vadd.f32 %v9951_v39, %v9883_v1  ;;  %v18194_v60 = vadd.f32 %v17923_v14, %v17915_v56  ;;  %v12917_v36 = vadd.f32 %v17925_v44, %v17917_v21  ;;  %v18200_v63 = vadd.f32 %v17949_v0, %v17939_v53 }
 0x6f6   : > { %v10508_v19 = vadd.f32 %v10476_v59, %v10408_v35  ;;  %v9130_v17 = vshrl.u32 %v19587_v47, 16  ;;  %v18204_v18 = vmul.f32 %v17484_v32, %v9295_v23  ;;  %v18208_v4 = vmul.f32 %v17519_v11, %v18179_v54 }
 0x6f7   : > { %19585 = vst [vmem:[#allocation48_spill] sm:$0xff] %v18194_v60  ;;  %19586 = vst [vmem:[#allocation95_spill] sm:$0xff] %v18200_v63  ;;  %v10083_v13 = vadd.f32 %v10051_v26, %v9983_v43  ;;  %v9133_v56 = vshll.u32 %v19587_v47, 16  ;;  %v10475_v21 = vmul.f32 %v17557_v57, %v18150_v50  ;;  %v9462_v53 = vadd.f32 %v18063_v48, %v18078_v31  ;;  %v18215_v0 = vpop.f32.mrb[156].mxu1 }
 0x6f8   : > { %19588 = vst [vmem:[#allocation98_spill] sm:$0xff] %v18208_v4  ;;  %v10608_v14 = vadd.f32 %v10576_v29, %v10508_v19  ;;  %v9132_v44 = vrot.slane %v9130_v17, 7  ;;  %v10575_v39 = vmul.f32 %v17632_v42, %v18179_v54  ;;  %v9854_v35 = vmul.f32 %v17540_v6, %v9296_v46  ;;  %v18220_v26 = vpop.f32.mrb[157].mxu1 }
 0x6f9   : > { %v10407_v59 = vadd.f32 %v10375_v12, %v10083_v13  ;;  %v9233_v1 = vrot.slane %v9133_v56, 1  ;;  %v18223_v29 = vadd.f32 %v18028_v52, %v12914_v9  ;;  %v18226_v19 = vunpack.c.h.bf16 %v19587_v47  ;;  %v12945_v31 = vpop.f32.mrb[158].mxu1 }
 0x6fa   : > { %10651 = vadd.xlane.f32.xlu0 %v10608_v14  ;;  %v9135_v43 = vor.u32 %v9133_v56, %v9132_v44  ;;  %v9562_v48 = vadd.f32 %v18089_v30, %v9462_v53  ;;  %v9954_v63 = vmul.f32 %v17514_v25, %v18138_v16  ;;  %v10054_v46 = vmul.f32 %v17552_v33, %v9496_v15  ;;  %v12946_v60 = vpop.f32.mrb[159].mxu1 }
 0x6fb   : > { %v10507_v12 = vadd.f32 %v10475_v21, %v10407_v59  ;;  %v9234_v13 = vor.u32 %v9233_v1, %v9130_v17  ;;  %v9461_v56 = vadd.f32 %v18082_v2, %v18112_v24  ;;  %v9853_v44 = vmul.f32 %v17540_v6, %v9295_v23 }
 0x6fc   : > { %v9209_v14 = vsel %vm13976_vm5, 0, %v9135_v43  ;;  %v9886_v9 = vadd.f32 %v9854_v35, %v9562_v48  ;;  %v18246_v53 = vunpack.c.l.bf16 %v19587_v47  ;;  %v18251_v2 = vadd.f32 %v18028_v52, %v12917_v36 }
 0x6fd   : > { %v10607_v4 = vadd.f32 %v10575_v39, %v10507_v12  ;;  %v9273_v30 = vsel %vm13787_vm2, %v9234_v13, 0  ;;  %v18239_v17 = vunpack.c.h.bf16 %v9209_v14  ;;  %v18241_v21 = vunpack.c.l.bf16 %v9209_v14 }
 0x6fe   : > { %v18243_v16 = vunpack.c.h.bf16 %v9273_v30  ;;  %v9986_v15 = vadd.f32 %v9954_v63, %v9886_v9  ;;  %v18248_v59 = vunpack.c.l.bf16 %v9273_v30  ;;  %v10478_v23 = vmul.f32 %v17557_v57, %v18226_v19  ;;  %v19589_v9 = vld [vmem:[#allocation76_spill] sm:$0xff] }
 0x6ff   : > { %10649 = vadd.xlane.f32.xlu1 %v10607_v4  ;;  %v10378_v24 = vmul.f32 %v17564_v10, %v18239_v17  ;;  %v9561_v39 = vadd.f32 %v18120_v40, %v9461_v56  ;;  %v18260_v63 = vmul.f32 %v17484_v32, %v18239_v17  ;;  %v18266_v36 = vmul.f32 %v17484_v32, %v18241_v21  ;;  %v13028_v4 = vpop.f32.mrb[160].mxu1  ;;  %v19592_v32 = vld [vmem:[#allocation80_spill] sm:$0xff] }
 0x700   : > { %v10086_v47 = vadd.f32 %v10054_v46, %v9986_v15  ;;  %v10578_v1 = vmul.f32 %v17632_v42, %v18243_v16  ;;  %v9953_v43 = vmul.f32 %v17514_v25, %v18150_v50  ;;  %v10053_v40 = vmul.f32 %v17552_v33, %v18179_v54  ;;  %v13029_v12 = vpop.f32.mrb[161].mxu1  ;;  %v19590_v54 = vld [vmem:[#allocation78_spill] sm:$0xff]  ;;  %v19591_v15 = vld [vmem:[#allocation79_spill] sm:$0xff] }
 0x701   : > { %v9885_v35 = vadd.f32 %v9853_v44, %v9561_v39  ;;  %v10377_v48 = vmul.f32 %v17564_v10, %v18241_v21  ;;  %v10477_v46 = vmul.f32 %v17557_v57, %v18246_v53  ;;  %v10577_v14 = vmul.f32 %v17632_v42, %v18248_v59  ;;  %v13031_v44 = vpop.f32.mrb[162].mxu1 }
 0x702   : > { %v10410_v13 = vadd.f32 %v10378_v24, %v10086_v47  ;;  %v12920_v56 = vadd.f32 %v17986_v3, %v19589_v9  ;;  %v18282_v50 = vadd.f32 %v18006_v61, %v17996_v51  ;;  %v12923_v39 = vadd.f32 %v19591_v15, %v19590_v54  ;;  %v19593_v24 = vld [vmem:[#allocation81_spill] sm:$0xff]  ;;  %v13032_v57 = vpop.f32.mrb[163].mxu1  ;;  %v19597_v61 = vld [vmem:[#allocation38_spill] sm:$0xff] }
 0x703   : > { %v9985_v30 = vadd.f32 %v9953_v43, %v9885_v35  ;;  %v18288_v47 = vadd.f32 %v19593_v24, %v19592_v32  ;;  %v12926_v3 = vadd.f32 %v19594_v27, %v18045_v62  ;;  %v19595_v9 = vld [vmem:[#allocation85_spill] sm:$0xff]  ;;  %v19596_v35 = vld [vmem:[#allocation87_spill] sm:$0xff]  ;;  %v12932_v54 = vadd.f32 %v19597_v61, %v18109_v8  ;;  %v19598_v15 = vld [vmem:[#allocation46_spill] sm:$0xff] }
 0x704   : > { %v10510_v10 = vadd.f32 %v10478_v23, %v10410_v13  ;;  %v8564_v42 = vadd.f32 %v18028_v52, %v12920_v56  ;;  %v12929_v43 = vadd.f32 %v19596_v35, %v19595_v9  ;;  %v8567_v51 = vadd.f32 %v18028_v52, %v12923_v39  ;;  %v19600_v39 = vld [vmem:[#allocation20_spill] sm:$0xff] }
 0x705   : > { %v10085_v34 = vadd.f32 %v10053_v40, %v9985_v30  ;;  %v12935_v32 = vadd.f32 %v19598_v15, %v18126_v22  ;;  %v8572_v23 = vadd.f32 %v18028_v52, %v12926_v3  ;;  %v12938_v27 = vadd.f32 %v18163_v20, %v18153_v41  ;;  %v19602_v35 = vld [vmem:[#allocation96_spill] sm:$0xff] }
 0x706   : > { %v10610_v24 = vadd.f32 %v10578_v1, %v10510_v10  ;;  %v8575_v13 = vadd.f32 %v18028_v52, %v12929_v43  ;;  %v8580_v56 = vadd.f32 %v18028_v52, %v12932_v54  ;;  %v12941_v30 = vadd.f32 %v18181_v49, %v18170_v5  ;;  %v19599_v1 = vld [vmem:[#allocation82_spill] sm:$0xff] }
 0x707   : > { %v10409_v62 = vadd.f32 %v10377_v48, %v10085_v34  ;;  %v8583_v40 = vadd.f32 %v18028_v52, %v12935_v32  ;;  %v8588_v8 = vadd.f32 %v18028_v52, %v12938_v27  ;;  %v12944_v10 = vadd.f32 %v18220_v26, %v18215_v0  ;;  %v13034_v9 = vpop.f32.mrb[164].mxu1  ;;  %v19601_v48 = vld [vmem:[#allocation83_spill] sm:$0xff]  ;;  %v19603_v0 = vld [vmem:[#allocation21_spill] sm:$0xff] }
 0x708   : > { %10655 = vadd.xlane.f32.xlu0 %v10610_v24  ;;  %v12947_v22 = vadd.f32 %v12946_v60, %v12945_v31  ;;  %v8637_v3 = vadd.f32 %v19600_v39, %v19599_v1  ;;  %v8591_v34 = vadd.f32 %v18028_v52, %v12941_v30  ;;  %v13030_v20 = vadd.f32 %v13029_v12, %v13028_v4  ;;  %v13035_v61 = vpop.f32.mrb[165].mxu1  ;;  %v19609_v1 = vld [vmem:[#allocation109_spill] sm:$0xff] }
 0x709   : > { %v10509_v41 = vadd.f32 %v10477_v46, %v10409_v62  ;;  %v8640_v43 = vadd.f32 %v19602_v35, %v19601_v48  ;;  %v8596_v5 = vadd.f32 %v18028_v52, %v12944_v10  ;;  %v13033_v54 = vadd.f32 %v13032_v57, %v13031_v44  ;;  %v13037_v26 = vpop.f32.mrb[166].mxu1  ;;  %v19604_v46 = vld [vmem:[#allocation97_spill] sm:$0xff]  ;;  %v19605_v62 = vld [vmem:[#allocation24_spill] sm:$0xff]  ;;  %v19606_v10 = vld [vmem:[#allocation102_spill] sm:$0xff] }
 0x70a   : > { %v8599_v49 = vadd.f32 %v18028_v52, %v12947_v22  ;;  %v8645_v60 = vadd.f32 %v19603_v0, %v18134_v37  ;;  %v8734_v15 = vadd.f32 %v13030_v20, %v8637_v3  ;;  %v13036_v32 = vadd.f32 %v13035_v61, %v13034_v9  ;;  %v13038_v4 = vpop.f32.mrb[167].mxu1  ;;  %v19607_v44 = vld [vmem:[#allocation29_spill] sm:$0xff]  ;;  %v19608_v22 = vld [vmem:[#allocation30_spill] sm:$0xff] }
 0x70b   : > { %v10609_v31 = vadd.f32 %v10577_v14, %v10509_v41  ;;  %v8648_v24 = vadd.f32 %v19604_v46, %v18156_v28  ;;  %v8737_v12 = vadd.f32 %v13033_v54, %v8640_v43  ;;  %v13039_v27 = vadd.f32 %v13038_v4, %v13037_v26  ;;  %v19610_v28 = vld [vmem:[#allocation31_spill] sm:$0xff]  ;;  %v19614_v43 = vld [vmem:[#allocation45_spill] sm:$0xff]  ;;  %v19617_v0 = vld [vmem:[#allocation86_spill] sm:$0xff] }
 0x70c   : > { %v8653_v30 = vadd.f32 %v19605_v62, %v18223_v29  ;;  %v8656_v52 = vadd.f32 %v19606_v10, %v18251_v2  ;;  %v8742_v57 = vadd.f32 %v13036_v32, %v8645_v60  ;;  %v8661_v37 = vadd.f32 %v19607_v44, %v8564_v42  ;;  %v19611_v41 = vld [vmem:[#allocation35_spill] sm:$0xff]  ;;  %v19613_v2 = vld [vmem:[#allocation40_spill] sm:$0xff]  ;;  %v19619_v26 = vld [vmem:[#allocation89_spill] sm:$0xff] }
 0x70d   : > { %10653 = vadd.xlane.f32.xlu1 %v10609_v31  ;;  %v8664_v14 = vadd.f32 %v19608_v22, %v8567_v51  ;;  %v18329_v39 = vadd.f32 %v19609_v1, %v8572_v23  ;;  %v8745_v3 = vadd.f32 %v13039_v27, %v8648_v24  ;;  %v18332_v9 = vadd.f32 %v19610_v28, %v8575_v13  ;;  %v19612_v29 = vld [vmem:[#allocation39_spill] sm:$0xff]  ;;  %v19616_v23 = vld [vmem:[#allocation52_spill] sm:$0xff]  ;;  %v19623_v24 = vld [vmem:[#allocation57_spill] sm:$0xff] }
 0x70e   : > { %v18335_v20 = vadd.f32 %v19611_v41, %v8580_v56  ;;  %v18338_v48 = vadd.f32 %v19612_v29, %v8583_v40  ;;  %v18341_v35 = vadd.f32 %v19613_v2, %v8588_v8  ;;  %v18344_v42 = vadd.f32 %v19614_v43, %v8591_v34  ;;  %v19615_v51 = vld [vmem:[#allocation51_spill] sm:$0xff]  ;;  %v19618_v60 = vld [vmem:[#allocation88_spill] sm:$0xff]  ;;  %v19620_v40 = vld [vmem:[#allocation90_spill] sm:$0xff] }
 0x70f   : > { %v18347_v61 = vadd.f32 %v19615_v51, %v8596_v5  ;;  %v18350_v54 = vadd.f32 %v19616_v23, %v8599_v49  ;;  %v13040_v13 = vpop.f32.mrb[168].mxu1  ;;  %v18354_v56 = vadd.f32 %v19618_v60, %v19617_v0  ;;  %v18358_v31 = vadd.f32 %v19620_v40, %v19619_v26  ;;  %v19621_v8 = vld [vmem:[#allocation11_spill] sm:$0xff]  ;;  %v19622_v34 = vld [vmem:[#allocation12_spill] sm:$0xff]  ;;  %v19625_v29 = vld [vmem:[#allocation98_spill] sm:$0xff] }
 0x710   : > { %v18361_v32 = vadd.f32 %v19621_v8, %v8742_v57  ;;  %v18364_v46 = vadd.f32 %v19622_v34, %v8734_v15  ;;  %v13041_v5 = vpop.f32.mrb[169].mxu1  ;;  %v18367_v4 = vadd.f32 %v19623_v24, %v8745_v3  ;;  %v19624_v49 = vld [vmem:[#allocation56_spill] sm:$0xff]  ;;  %v9464_v62 = vadd.f32 %v18160_v45, %v18173_v55 }
 0x711   : > { %v18370_v27 = vadd.f32 %v19624_v49, %v8737_v12  ;;  %v9856_v10 = vmul.f32 %v17540_v6, %v18239_v17  ;;  %v9434_v57 = vmul.f32 %v17497_v38, %v18226_v19  ;;  %v9433_v15 = vmul.f32 %v17497_v38, %v18246_v53  ;;  %v13043_v22 = vpop.f32.mrb[170].mxu1 }
 0x712   : > { %v13042_v44 = vadd.f32 %v13041_v5, %v13040_v13  ;;  %v9463_v1 = vadd.f32 %v18177_v7, %v18204_v18  ;;  %v9534_v12 = vmul.f32 %v17519_v11, %v18243_v16  ;;  %v9533_v45 = vmul.f32 %v17519_v11, %v18248_v59  ;;  %v13044_v55 = vpop.f32.mrb[171].mxu1 }
 0x713   : > { %v9564_v17 = vadd.f32 %v18184_v58, %v9464_v62  ;;  %v9855_v3 = vmul.f32 %v17540_v6, %v18241_v21  ;;  %v13045_v41 = vadd.f32 %v13044_v55, %v13043_v22  ;;  %v9466_v43 = vadd.f32 %v9434_v57, %v18260_v63  ;;  %v19626_v58 = vld [vmem:[#allocation58_spill] sm:$0xff] }
 0x714   : > { %v8750_v28 = vadd.f32 %v13042_v44, %v8653_v30  ;;  %v9563_v2 = vadd.f32 %v19625_v29, %v9463_v1  ;;  %v9956_v7 = vmul.f32 %v17514_v25, %v18226_v19  ;;  %v9955_v18 = vmul.f32 %v17514_v25, %v18246_v53  ;;  %v19627_v19 = vld [vmem:[#allocation16_spill] sm:$0xff]  ;;  %v19629_v1 = vld [vmem:[#allocation75_spill] sm:$0xff] }
 0x715   : > { %v9888_v51 = vadd.f32 %v9856_v10, %v9564_v17  ;;  %v9465_v23 = vadd.f32 %v9433_v15, %v18266_v36  ;;  %v8753_v13 = vadd.f32 %v13045_v41, %v8656_v52  ;;  %v18399_v30 = vadd.f32 %v9534_v12, %v9466_v43  ;;  %v19628_v15 = vld [vmem:[#allocation74_spill] sm:$0xff]  ;;  %v19630_v29 = vld [vmem:[#allocation91_spill] sm:$0xff] }
 0x716   : > { %v18397_v0 = vadd.f32 %v19626_v58, %v8750_v28  ;;  %v9887_v21 = vadd.f32 %v9855_v3, %v9563_v2  ;;  %v10056_v63 = vmul.f32 %v17552_v33, %v18243_v16  ;;  %v10055_v36 = vmul.f32 %v17552_v33, %v18248_v59  ;;  %v19631_v2 = vld [vmem:[#allocation92_spill] sm:$0xff] }
 0x717   : > { %v9988_v60 = vadd.f32 %v9956_v7, %v9888_v51  ;;  %v18403_v26 = vadd.f32 %v9533_v45, %v9465_v23  ;;  %v13046_v40 = vpop.f32.mrb[172].mxu1  ;;  %v18406_v8 = vadd.f32 %v19627_v19, %v8753_v13 }
 0x718   : > { %v9987_v53 = vadd.f32 %v9955_v18, %v9887_v21  ;;  %v13047_v52 = vpop.f32.mrb[173].mxu1 }
 0x719   : > { %v18410_v34 = vadd.f32 %v10056_v63, %v9988_v60  ;;  %v13048_v5 = vadd.f32 %v13047_v52, %v13046_v40  ;;  %v13049_v24 = vpop.f32.mrb[174].mxu1  ;;  %v19633_v63 = vld [vmem:[#allocation95_spill] sm:$0xff] }
 0x71a   : > { %v18412_v49 = vadd.f32 %v10055_v36, %v9987_v53  ;;  %v13050_v62 = vpop.f32.mrb[175].mxu1 }
 0x71b   : > { %v8758_v10 = vadd.f32 %v13048_v5, %v8661_v37  ;;  %v13051_v16 = vadd.f32 %v13050_v62, %v13049_v24 }
 0x71d   : > { %v8761_v57 = vadd.f32 %v13051_v16, %v8664_v14  ;;  %v18415_v44 = vadd.f32 %v19628_v15, %v8758_v10 }
 0x71f   : > { %v13052_v22 = vpop.f32.mrb[176].mxu1  ;;  %v18418_v12 = vadd.f32 %v19629_v1, %v8761_v57 }
 0x720   : > { %v13053_v45 = vpop.f32.mrb[177].mxu1 }
 0x721   : > { %v13054_v59 = vadd.f32 %v13053_v45, %v13052_v22  ;;  %v13055_v55 = vpop.f32.mrb[178].mxu1 }
 0x722   : > { %v13056_v17 = vpop.f32.mrb[179].mxu1 }
 0x723   : > { %v8766_v3 = vadd.f32 %v13054_v59, %v18329_v39  ;;  %v13057_v28 = vadd.f32 %v13056_v17, %v13055_v55  ;;  %v19632_v39 = vld [vmem:[#allocation48_spill] sm:$0xff] }
 0x725   : > { %v8769_v41 = vadd.f32 %v13057_v28, %v18332_v9  ;;  %v18423_v37 = vadd.f32 %v19630_v29, %v8766_v3 }
 0x727   : > { %v13058_v14 = vpop.f32.mrb[180].mxu1  ;;  %v18426_v43 = vadd.f32 %v19631_v2, %v8769_v41 }
 0x728   : > { %v13059_v51 = vpop.f32.mrb[181].mxu1 }
 0x729   : > { %v13060_v7 = vadd.f32 %v13059_v51, %v13058_v14  ;;  %v13061_v18 = vpop.f32.mrb[182].mxu1 }
 0x72a   : > { %v13062_v23 = vpop.f32.mrb[183].mxu1 }
 0x72b   : > { %v8774_v13 = vadd.f32 %v13060_v7, %v18335_v20  ;;  %v13063_v58 = vadd.f32 %v13062_v23, %v13061_v18 }
 0x72d   : > { %v8777_v21 = vadd.f32 %v13063_v58, %v18338_v48  ;;  %v18431_v60 = vadd.f32 %v19632_v39, %v8774_v13 }
 0x72f   : > { %v13064_v9 = vpop.f32.mrb[184].mxu1  ;;  %v18434_v40 = vadd.f32 %v19633_v63, %v8777_v21 }
 0x730   : > { %v13065_v19 = vpop.f32.mrb[185].mxu1 }
 0x731   : > { %v13066_v53 = vadd.f32 %v13065_v19, %v13064_v9  ;;  %v13067_v36 = vpop.f32.mrb[186].mxu1 }
 0x732   : > { %v13068_v52 = vpop.f32.mrb[187].mxu1 }
 0x733   : > { %v8782_v5 = vadd.f32 %v13066_v53, %v18341_v35  ;;  %v13069_v24 = vadd.f32 %v13068_v52, %v13067_v36 }
 0x735   : > { %v8785_v62 = vadd.f32 %v13069_v24, %v18344_v42  ;;  %v18439_v20 = vadd.f32 %v18282_v50, %v8782_v5 }
 0x737   : > { %v13070_v48 = vpop.f32.mrb[188].mxu1  ;;  %v18442_v10 = vadd.f32 %v18288_v47, %v8785_v62 }
 0x738   : > { %v13071_v16 = vpop.f32.mrb[189].mxu1 }
 0x739   : > { %v13072_v57 = vadd.f32 %v13071_v16, %v13070_v48  ;;  %v13073_v15 = vpop.f32.mrb[190].mxu1 }
 0x73a   : > { %v13074_v22 = vpop.f32.mrb[191].mxu1 }
 0x73b   : > { %v8790_v1 = vadd.f32 %v13072_v57, %v18347_v61  ;;  %v13075_v45 = vadd.f32 %v13074_v22, %v13073_v15 }
 0x73d   : > { %v8793_v59 = vadd.f32 %v13075_v45, %v18350_v54  ;;  %v18447_v35 = vadd.f32 %v18354_v56, %v8790_v1 }
 0x73f   : > { %v13206_v42 = vpop.f32.mrb[192].mxu1  ;;  %v18450_v50 = vadd.f32 %v18358_v31, %v8793_v59 }
 0x740   : > { %v8936_v55 = vadd.f32 %v13206_v42, %v18361_v32  ;;  %v8927_v47 = vpop.f32.mrb[193].mxu1 }
 0x741   : > { %v8928_v17 = vadd.f32 %v8927_v47, %v18364_v46  ;;  %v13207_v3 = vpop.f32.mrb[194].mxu1 }
 0x742   : > { %v9008_v28 = vmul.f32 0.2, %v8936_v55  ;;  %v8939_v41 = vadd.f32 %v13207_v3, %v18367_v4  ;;  %v8930_v61 = vpop.f32.mrb[195].mxu1  ;;  %vm8992_vm12 = vcmp.gt.f32.partialorder %v8936_v55, 0.0 }
 0x743   : > { %v9006_v29 = vmul.f32 0.2, %v8928_v17  ;;  %v8931_v54 = vadd.f32 %v8930_v61, %v18370_v27  ;;  %vm8990_vm13 = vcmp.gt.f32.partialorder %v8928_v17, 0.0 }
 0x744   : > { %vm8993_vm14 = vcmp.gt.f32.partialorder %v8939_v41, 0.0  ;;  %v9009_v56 = vmul.f32 0.2, %v8939_v41  ;;  %v9024_v14 = vsel %vm8992_vm12, %v8936_v55, %v9008_v28 }
 0x745   : > { %vm8991_vm15 = vcmp.gt.f32.partialorder %v8931_v54, 0.0  ;;  %v9007_v31 = vmul.f32 0.2, %v8931_v54  ;;  %v9022_v32 = vsel %vm8990_vm13, %v8928_v17, %v9006_v29 }
 0x746   : > { %v9025_v2 = vsel %vm8993_vm14, %v8939_v41, %v9009_v56  ;;  %vm10916_vm14 = vcmask 1042434  }
 0x747   : > { %v18456_v51 = vpack.c.bf16 %v9025_v2, %v9024_v14  ;;  %v9023_v46 = vsel %vm8991_vm15, %v8931_v54, %v9007_v31  ;;  %v13210_v7 = vpop.f32.mrb[196].mxu1  ;;  %vm10918_vm15 = vcmask 1043459  }
 0x748   : > { %v9038_v18 = vpack.c.bf16 %v9023_v46, %v9022_v32  ;;  %v8952_v4 = vadd.f32 %v13210_v7, %v18415_v44  ;;  %v8943_v23 = vpop.f32.mrb[197].mxu1 }
 0x749   : > { %v9144_v13 = vshrl.u32 %v18456_v51, 16  ;;  %v8944_v27 = vadd.f32 %v8943_v23, %v18397_v0  ;;  %v13211_v58 = vpop.f32.mrb[198].mxu1  ;;  %v9147_v5 = vshll.u32 %v18456_v51, 16  ;;  %v18481_v54 = vunpack.c.h.bf16 %v18456_v51 }
 0x74a   : > { %v9137_v21 = vshrl.u32 %v9038_v18, 16  ;;  %v8946_v39 = vpop.f32.mrb[199].mxu1  ;;  %v9140_v63 = vshll.u32 %v9038_v18, 16  ;;  %v9012_v19 = vmul.f32 0.2, %v8952_v4  ;;  %v8955_v53 = vadd.f32 %v13211_v58, %v18418_v12 }
 0x74b   : > { %v9146_v9 = vrot.slane %v9144_v13, 7  ;;  %vm8996_vm0 = vcmp.gt.f32.partialorder %v8952_v4, 0.0  ;;  %v9010_v52 = vmul.f32 0.2, %v8944_v27  ;;  %v8947_v44 = vadd.f32 %v8946_v39, %v18406_v8 }
 0x74c   : > { %v9139_v36 = vrot.slane %v9137_v21, 7  ;;  %vm8994_vm1 = vcmp.gt.f32.partialorder %v8944_v27, 0.0  ;;  %vm8997_vm3 = vcmp.gt.f32.partialorder %v8955_v53, 0.0  ;;  %v9013_v0 = vmul.f32 0.2, %v8955_v53 }
 0x74d   : > { %vm8995_vm4 = vcmp.gt.f32.partialorder %v8947_v44, 0.0  ;;  %v9011_v62 = vmul.f32 0.2, %v8947_v44  ;;  %v9149_v48 = vor.u32 %v9147_v5, %v9146_v9  ;;  %v9028_v16 = vsel %vm8996_vm0, %v8952_v4, %v9012_v19 }
 0x74e   : > { %v9142_v24 = vor.u32 %v9140_v63, %v9139_v36  ;;  %v9029_v57 = vsel %vm8997_vm3, %v8955_v53, %v9013_v0  ;;  %v9235_v12 = vrot.slane %v9140_v63, 1  ;;  %v9026_v22 = vsel %vm8994_vm1, %v8944_v27, %v9010_v52 }
 0x74f   : > { %v13214_v15 = vpop.f32.mrb[200].mxu1  ;;  %v18468_v1 = vpack.c.bf16 %v9029_v57, %v9028_v16  ;;  %v9027_v45 = vsel %vm8995_vm4, %v8947_v44, %v9011_v62  ;;  %v18476_v61 = vunpack.c.h.bf16 %v9038_v18  ;;  %v18478_v29 = vunpack.c.l.bf16 %v9038_v18 }
 0x750   : > { %v8968_v8 = vadd.f32 %v13214_v15, %v18431_v60  ;;  %v8959_v59 = vpop.f32.mrb[201].mxu1  ;;  %v18471_v42 = vpack.c.bf16 %v9027_v45, %v9026_v22  ;;  %v9210_v28 = vsel %vm13976_vm5, 0, %v9142_v24  ;;  %v9236_v41 = vor.u32 %v9235_v12, %v9137_v21  ;;  %v19637_v15 = vld [vmem:[#allocation28_spill] sm:$0xff] }
 0x751   : > { %v8960_v55 = vadd.f32 %v8959_v59, %v18423_v37  ;;  %v13215_v47 = vpop.f32.mrb[202].mxu1  ;;  %v18487_v37 = vsel %vm13976_vm5, 0, %v9149_v48  ;;  %v9158_v14 = vshrl.u32 %v18468_v1, 16  ;;  %v18490_v32 = vunpack.c.h.bf16 %v9210_v28  ;;  %v19636_v48 = vld [vmem:[#allocation34_spill] sm:$0xff] }
 0x752   : > { %v8962_v17 = vpop.f32.mrb[203].mxu1  ;;  %v9016_v56 = vmul.f32 0.2, %v8968_v8  ;;  %v8971_v60 = vadd.f32 %v13215_v47, %v18434_v40  ;;  %vm9000_vm6 = vcmp.gt.f32.partialorder %v8968_v8, 0.0  ;;  %v9161_v7 = vshll.u32 %v18468_v1, 16 }
 0x753   : > { %v8963_v31 = vadd.f32 %v8962_v17, %v18426_v43  ;;  %v9014_v2 = vmul.f32 0.2, %v8960_v55  ;;  %vm8998_vm7 = vcmp.gt.f32.partialorder %v8960_v55, 0.0  ;;  %v9151_v40 = vshrl.u32 %v18471_v42, 16 }
 0x754   : > { %vm9001_vm8 = vcmp.gt.f32.partialorder %v8971_v60, 0.0  ;;  %v9017_v46 = vmul.f32 0.2, %v8971_v60  ;;  %v9274_v23 = vsel %vm13787_vm2, %v9236_v41, 0  ;;  %v9154_v27 = vshll.u32 %v18471_v42, 16  ;;  %v19638_v41 = vld [vmem:[#allocation110_spill] sm:$0xff] }
 0x755   : > { %vm8999_vm9 = vcmp.gt.f32.partialorder %v8963_v31, 0.0  ;;  %v9015_v18 = vmul.f32 0.2, %v8963_v31  ;;  %v9032_v58 = vsel %vm9000_vm6, %v8968_v8, %v9016_v56  ;;  %v9030_v63 = vsel %vm8998_vm7, %v8960_v55, %v9014_v2 }
 0x756   : > { %v9033_v21 = vsel %vm9001_vm8, %v8971_v60, %v9017_v46  ;;  %v9160_v44 = vrot.slane %v9158_v14, 7  ;;  %v10380_v16 = vmul.f32 %v19636_v48, %v18490_v32  ;;  %v18512_v12 = vmul.f32 %v19637_v15, %v18490_v32 }
 0x757   : > { %v13218_v43 = vpop.f32.mrb[204].mxu1  ;;  %v18498_v19 = vpack.c.bf16 %v9033_v21, %v9032_v58  ;;  %v9031_v53 = vsel %vm8999_vm9, %v8963_v31, %v9015_v18  ;;  %v9299_v55 = vunpack.c.l.bf16 %v9210_v28  ;;  %v10480_v56 = vmul.f32 %v19638_v41, %v18476_v61 }
 0x758   : > { %v8984_v39 = vadd.f32 %v13218_v43, %v18447_v35  ;;  %v8975_v9 = vpop.f32.mrb[205].mxu1  ;;  %v18503_v0 = vpack.c.bf16 %v9031_v53, %v9030_v63  ;;  %v9153_v35 = vrot.slane %v9151_v40, 7  ;;  %v10412_v17 = vadd.f32 %v10380_v16, %v18410_v34 }
 0x759   : > { %v8976_v36 = vadd.f32 %v8975_v9, %v18439_v20  ;;  %v13219_v52 = vpop.f32.mrb[206].mxu1  ;;  %v18516_v20 = vmul.f32 %v17497_v38, %v18476_v61  ;;  %v9172_v22 = vshrl.u32 %v18498_v19, 16  ;;  %v9499_v21 = vunpack.c.l.bf16 %v9274_v23 }
 0x75a   : > { %v8987_v24 = vadd.f32 %v13219_v52, %v18450_v50  ;;  %v8978_v62 = vpop.f32.mrb[207].mxu1  ;;  %v9020_v57 = vmul.f32 0.2, %v8984_v39  ;;  %vm9004_vm10 = vcmp.gt.f32.partialorder %v8984_v39, 0.0  ;;  %v9500_v50 = vunpack.c.h.bf16 %v9274_v23 }
 0x75b   : > { %v9018_v45 = vmul.f32 0.2, %v8976_v36  ;;  %v8979_v59 = vadd.f32 %v8978_v62, %v18442_v10  ;;  %v9165_v47 = vshrl.u32 %v18503_v0, 16  ;;  %vm9002_vm12 = vcmp.gt.f32.partialorder %v8976_v36, 0.0  ;;  %v18531_v10 = vld [vmem:[%s18977_s7 + $0x8] ss:$0 sm:$0xff] }
 0x75c   : > { %vm9005_vm11 = vcmp.gt.f32.partialorder %v8987_v24, 0.0  ;;  %v9021_v8 = vmul.f32 0.2, %v8987_v24  ;;  %v9036_v60 = vsel %vm9004_vm10, %v8984_v39, %v9020_v57  ;;  %v9174_v46 = vrot.slane %v9172_v22, 7 }
 0x75d   : > { %vm9003_vm13 = vcmp.gt.f32.partialorder %v8979_v59, 0.0  ;;  %v9019_v2 = vmul.f32 0.2, %v8979_v59  ;;  %v10512_v43 = vadd.f32 %v10480_v56, %v10412_v17  ;;  %v10580_v34 = vmul.f32 %v18531_v10, %v9500_v50 }
 0x75e   : > { %v9037_v31 = vsel %vm9005_vm11, %v8987_v24, %v9021_v8  ;;  %v9034_v28 = vsel %vm9002_vm12, %v8976_v36, %v9018_v45  ;;  %v10379_v39 = vmul.f32 %v19636_v48, %v9299_v55  ;;  %v9167_v9 = vrot.slane %v9165_v47, 7 }
 0x75f   : > { %v18526_v18 = vpack.c.bf16 %v9037_v31, %v9036_v60  ;;  %v9035_v58 = vsel %vm9003_vm13, %v8979_v59, %v9019_v2  ;;  %v10612_v53 = vadd.f32 %v10580_v34, %v10512_v43  ;;  %v9237_v52 = vrot.slane %v9147_v5, 1 }
 0x760   : > { %v18537_v63 = vpack.c.bf16 %v9035_v58, %v9034_v28  ;;  %v18543_v24 = vor.u32 %v9161_v7, %v9160_v44  ;;  %v9156_v36 = vor.u32 %v9154_v27, %v9153_v35  ;;  %v10411_v23 = vadd.f32 %v10379_v39, %v18412_v49 }
 0x761   : > { %v10479_v62 = vmul.f32 %v19638_v41, %v18478_v29  ;;  %v9175_v16 = vshll.u32 %v18498_v19, 16  ;;  %v9168_v57 = vshll.u32 %v18503_v0, 16  ;;  %10659 = vadd.xlane.f32.xlu0 %v10612_v53  ;;  %v9238_v5 = vor.u32 %v9237_v52, %v9144_v13 }
 0x762   : > { %v9179_v45 = vshrl.u32 %v18537_v63, 16  ;;  %v9536_v44 = vmul.f32 %v17519_v11, %v9500_v50  ;;  %v10579_v35 = vmul.f32 %v18531_v10, %v9499_v21  ;;  %v9858_v49 = vmul.f32 %v17540_v6, %v18490_v32 }
 0x763   : > { %v10511_v8 = vadd.f32 %v10479_v62, %v10411_v23  ;;  %v18561_v59 = vor.u32 %v9175_v16, %v9174_v46  ;;  %v18565_v17 = vor.u32 %v9168_v57, %v9167_v9  ;;  %v9335_v56 = vmul.f32 %v19637_v15, %v9299_v55 }
 0x764   : > { %v9302_v13 = vunpack.c.h.bf16 %v18487_v37  ;;  %v9275_v31 = vsel %vm13787_vm2, %v9238_v5, 0  ;;  %v9890_v2 = vadd.f32 %v9858_v49, %v18399_v30  ;;  %v9958_v32 = vmul.f32 %v17514_v25, %v18476_v61 }
 0x765   : > { %v10611_v60 = vadd.f32 %v10579_v35, %v10511_v8  ;;  %v9706_v46 = vshll.u32 %v18526_v18, 16  ;;  %v9181_v43 = vrot.slane %v9179_v45, 7  ;;  %v9435_v34 = vmul.f32 %v17497_v38, %v18478_v29 }
 0x766   : > { %v9535_v28 = vmul.f32 %v17519_v11, %v9499_v21  ;;  %v9182_v58 = vshll.u32 %v18537_v63, 16  ;;  %v9990_v39 = vadd.f32 %v9958_v32, %v9890_v2  ;;  %v10058_v9 = vmul.f32 %v17552_v33, %v9500_v50 }
 0x767   : > { %10657 = vadd.xlane.f32.xlu1 %v10611_v60  ;;  %v9857_v30 = vmul.f32 %v17540_v6, %v9299_v55  ;;  %v9338_v61 = vmul.f32 %v19637_v15, %v9302_v13  ;;  %v9438_v53 = vmul.f32 %v17497_v38, %v18481_v54  ;;  %v9502_v52 = vunpack.c.h.bf16 %v9275_v31 }
 0x768   : > { %v10382_v23 = vmul.f32 %v19636_v48, %v9302_v13  ;;  %v10090_v62 = vadd.f32 %v10058_v9, %v9990_v39  ;;  %v9301_v5 = vunpack.c.l.bf16 %v18487_v37  ;;  %v9957_v35 = vmul.f32 %v17514_v25, %v18478_v29 }
 0x769   : > { %v9889_v8 = vadd.f32 %v9857_v30, %v18403_v26  ;;  %v18593_v50 = vor.u32 %v9182_v58, %v9181_v43  ;;  %v10482_v55 = vmul.f32 %v19638_v41, %v18481_v54  ;;  %v9401_v49 = vunpack.c.l.bf16 %v18456_v51 }
 0x76a   : > { %v9239_v60 = vrot.slane %v9154_v27, 1  ;;  %v10414_v2 = vadd.f32 %v10382_v23, %v10090_v62  ;;  %v10057_v37 = vmul.f32 %v17552_v33, %v9499_v21  ;;  %v9212_v26 = vsel %vm13976_vm5, 0, %v9156_v36 }
 0x76b   : > { %v9989_v32 = vadd.f32 %v9957_v35, %v9889_v8  ;;  %v9538_v29 = vmul.f32 %v17519_v11, %v9502_v52  ;;  %v9501_v39 = vunpack.c.l.bf16 %v9275_v31  ;;  %v9468_v9 = vadd.f32 %v18516_v20, %v18512_v12 }
 0x76c   : > { %v9240_v43 = vor.u32 %v9239_v60, %v9151_v40  ;;  %v10514_v51 = vadd.f32 %v10482_v55, %v10414_v2  ;;  %v10582_v30 = vmul.f32 %v18531_v10, %v9502_v52  ;;  %v10381_v23 = vmul.f32 %v19636_v48, %v9301_v5 }
 0x76d   : > { %v10089_v27 = vadd.f32 %v10057_v37, %v9989_v32  ;;  %v10481_v21 = vmul.f32 %v19638_v41, %v9401_v49  ;;  %v9304_v62 = vunpack.c.h.bf16 %v9212_v26  ;;  %v9568_v8 = vadd.f32 %v9536_v44, %v9468_v9 }
 0x76e   : > { %v9860_v36 = vmul.f32 %v17540_v6, %v9302_v13  ;;  %v10614_v35 = vadd.f32 %v10582_v30, %v10514_v51  ;;  %v9276_v40 = vsel %vm13787_vm2, %v9240_v43, 0  ;;  %v9404_v60 = vunpack.c.h.bf16 %v18471_v42 }
 0x76f   : > { %v10413_v31 = vadd.f32 %v10381_v23, %v10089_v27  ;;  %v9337_v12 = vmul.f32 %v19637_v15, %v9301_v5  ;;  %v9960_v55 = vmul.f32 %v17514_v25, %v18481_v54  ;;  %v9467_v2 = vadd.f32 %v9435_v34, %v9335_v56 }
 0x770   : > { %v9892_v20 = vadd.f32 %v9860_v36, %v9568_v8  ;;  %10663 = vadd.xlane.f32.xlu0 %v10614_v35  ;;  %v9437_v32 = vmul.f32 %v17497_v38, %v9401_v49  ;;  %v9537_v44 = vmul.f32 %v17519_v11, %v9501_v39  ;;  %v10581_v37 = vmul.f32 %v18531_v10, %v9501_v39 }
 0x771   : > { %v10513_v13 = vadd.f32 %v10481_v21, %v10413_v31  ;;  %v9504_v9 = vunpack.c.h.bf16 %v9276_v40  ;;  %v10060_v43 = vmul.f32 %v17552_v33, %v9502_v52  ;;  %v9567_v30 = vadd.f32 %v9535_v28, %v9467_v2 }
 0x772   : > { %v9992_v51 = vadd.f32 %v9960_v55, %v9892_v20  ;;  %v9340_v23 = vmul.f32 %v19637_v15, %v9304_v62  ;;  %v9440_v8 = vmul.f32 %v17497_v38, %v9404_v60  ;;  %v9859_v54 = vmul.f32 %v17540_v6, %v9301_v5 }
 0x773   : > { %v10613_v27 = vadd.f32 %v10581_v37, %v10513_v13  ;;  %v10384_v34 = vmul.f32 %v19636_v48, %v9304_v62  ;;  %v10484_v36 = vmul.f32 %v19638_v41, %v9404_v60  ;;  %v9303_v21 = vunpack.c.l.bf16 %v9212_v26 }
 0x774   : > { %v10092_v56 = vadd.f32 %v10060_v43, %v9992_v51  ;;  %v9403_v35 = vunpack.c.l.bf16 %v18471_v42  ;;  %v9891_v31 = vadd.f32 %v9859_v54, %v9567_v30  ;;  %v9959_v52 = vmul.f32 %v17514_v25, %v9401_v49 }
 0x775   : > { %10661 = vadd.xlane.f32.xlu1 %v10613_v27  ;;  %v9241_v28 = vrot.slane %v9161_v7, 1  ;;  %v9540_v20 = vmul.f32 %v17519_v11, %v9504_v9  ;;  %v9213_v5 = vsel %vm13976_vm5, 0, %v18543_v24  ;;  %v9470_v2 = vadd.f32 %v9438_v53, %v9338_v61 }
 0x776   : > { %v10416_v55 = vadd.f32 %v10384_v34, %v10092_v56  ;;  %v9991_v13 = vadd.f32 %v9959_v52, %v9891_v31  ;;  %v10059_v26 = vmul.f32 %v17552_v33, %v9501_v39  ;;  %v9862_v37 = vmul.f32 %v17540_v6, %v9304_v62 }
 0x777   : > { %v9242_v42 = vor.u32 %v9241_v28, %v9158_v14  ;;  %v10584_v51 = vmul.f32 %v18531_v10, %v9504_v9  ;;  %v9503_v7 = vunpack.c.l.bf16 %v9276_v40  ;;  %v9570_v43 = vadd.f32 %v9538_v29, %v9470_v2 }
 0x778   : > { %v10516_v49 = vadd.f32 %v10484_v36, %v10416_v55  ;;  %v9339_v30 = vmul.f32 %v19637_v15, %v9303_v21  ;;  %v10091_v27 = vadd.f32 %v10059_v26, %v9991_v13  ;;  %v10383_v54 = vmul.f32 %v19636_v48, %v9303_v21 }
 0x779   : > { %v9306_v24 = vunpack.c.h.bf16 %v9213_v5  ;;  %v9277_v53 = vsel %vm13787_vm2, %v9242_v42, 0  ;;  %v9894_v39 = vadd.f32 %v9862_v37, %v9570_v43  ;;  %v9962_v14 = vmul.f32 %v17514_v25, %v9404_v60 }
 0x77a   : > { %v10616_v61 = vadd.f32 %v10584_v51, %v10516_v49  ;;  %v10415_v56 = vadd.f32 %v10383_v54, %v10091_v27  ;;  %v10483_v62 = vmul.f32 %v19638_v41, %v9403_v35  ;;  %v9406_v34 = vunpack.c.h.bf16 %v18468_v1 }
 0x77b   : > { %v9469_v40 = vadd.f32 %v9437_v32, %v9337_v12  ;;  %v9439_v29 = vmul.f32 %v17497_v38, %v9403_v35  ;;  %v9539_v36 = vmul.f32 %v17519_v11, %v9503_v7  ;;  %v9994_v31 = vadd.f32 %v9962_v14, %v9894_v39 }
 0x77c   : > { %10667 = vadd.xlane.f32.xlu0 %v10616_v61  ;;  %v10062_v52 = vmul.f32 %v17552_v33, %v9504_v9  ;;  %v10515_v28 = vadd.f32 %v10483_v62, %v10415_v56  ;;  %v10583_v55 = vmul.f32 %v18531_v10, %v9503_v7  ;;  %v18652_v2 = vmul.f32 %v19637_v15, %v9306_v24 }
 0x77d   : > { %v9506_v60 = vunpack.c.h.bf16 %v9277_v53  ;;  %v10386_v26 = vmul.f32 %v19636_v48, %v9306_v24  ;;  %v9569_v42 = vadd.f32 %v9537_v44, %v9469_v40  ;;  %v9861_v12 = vmul.f32 %v17540_v6, %v9303_v21 }
 0x77e   : > { %v10094_v13 = vadd.f32 %v10062_v52, %v9994_v31  ;;  %v10615_v32 = vadd.f32 %v10583_v55, %v10515_v28  ;;  %v9442_v37 = vmul.f32 %v17497_v38, %v9406_v34  ;;  %v10486_v49 = vmul.f32 %v19638_v41, %v9406_v34 }
 0x77f   : > { %v9305_v51 = vunpack.c.l.bf16 %v9213_v5  ;;  %v9405_v43 = vunpack.c.l.bf16 %v18468_v1  ;;  %v9893_v27 = vadd.f32 %v9861_v12, %v9569_v42  ;;  %v9961_v54 = vmul.f32 %v17514_v25, %v9403_v35 }
 0x780   : > { %v10418_v9 = vadd.f32 %v10386_v26, %v10094_v13  ;;  %10665 = vadd.xlane.f32.xlu1 %v10615_v32  ;;  %v9542_v61 = vmul.f32 %v17519_v11, %v9506_v60  ;;  %v9214_v44 = vsel %vm13976_vm5, 0, %v18565_v17  ;;  %v9243_v21 = vrot.slane %v9168_v57, 1 }
 0x781   : > { %v9472_v39 = vadd.f32 %v9440_v8, %v9340_v23  ;;  %v10586_v5 = vmul.f32 %v18531_v10, %v9506_v60  ;;  %v9993_v56 = vadd.f32 %v9961_v54, %v9893_v27  ;;  %v10061_v1 = vmul.f32 %v17552_v33, %v9503_v7 }
 0x782   : > { %v10518_v14 = vadd.f32 %v10486_v49, %v10418_v9  ;;  %v9505_v62 = vunpack.c.l.bf16 %v9277_v53  ;;  %v9244_v35 = vor.u32 %v9243_v21, %v9165_v47  ;;  %v9864_v31 = vmul.f32 %v17540_v6, %v9306_v24 }
 0x783   : > { %v9572_v40 = vadd.f32 %v9540_v20, %v9472_v39  ;;  %v10093_v28 = vadd.f32 %v10061_v1, %v9993_v56  ;;  %v10385_v17 = vmul.f32 %v19636_v48, %v9305_v51  ;;  %v9308_v55 = vunpack.c.h.bf16 %v9214_v44 }
 0x784   : > { %v10618_v52 = vadd.f32 %v10586_v5, %v10518_v14  ;;  %v9341_v57 = vmul.f32 %v19637_v15, %v9305_v51  ;;  %v9278_v23 = vsel %vm13787_vm2, %v9244_v35, 0  ;;  %v9964_v7 = vmul.f32 %v17514_v25, %v9406_v34 }
 0x785   : > { %v9896_v8 = vadd.f32 %v9864_v31, %v9572_v40  ;;  %v10417_v53 = vadd.f32 %v10385_v17, %v10093_v28  ;;  %v10485_v47 = vmul.f32 %v19638_v41, %v9405_v43  ;;  %v9408_v20 = vunpack.c.h.bf16 %v18503_v0 }
 0x786   : > { %10671 = vadd.xlane.f32.xlu0 %v10618_v52  ;;  %v9471_v24 = vadd.f32 %v9439_v29, %v9339_v30  ;;  %v9441_v13 = vmul.f32 %v17497_v38, %v9405_v43  ;;  %v9541_v26 = vmul.f32 %v17519_v11, %v9505_v62  ;;  %v10064_v12 = vmul.f32 %v17552_v33, %v9506_v60 }
 0x787   : > { %v9996_v42 = vadd.f32 %v9964_v7, %v9896_v8  ;;  %v10517_v32 = vadd.f32 %v10485_v47, %v10417_v53  ;;  %v10585_v49 = vmul.f32 %v18531_v10, %v9505_v62  ;;  %v18683_v9 = vmul.f32 %v19637_v15, %v9308_v55 }
 0x788   : > { %v9508_v34 = vunpack.c.h.bf16 %v9278_v23  ;;  %v10388_v54 = vmul.f32 %v19636_v48, %v9308_v55  ;;  %v9571_v21 = vadd.f32 %v9539_v36, %v9471_v24  ;;  %v9863_v30 = vmul.f32 %v17540_v6, %v9305_v51 }
 0x789   : > { %v10096_v27 = vadd.f32 %v10064_v12, %v9996_v42  ;;  %v10617_v29 = vadd.f32 %v10585_v49, %v10517_v32  ;;  %v9444_v39 = vmul.f32 %v17497_v38, %v9408_v20  ;;  %v10488_v14 = vmul.f32 %v19638_v41, %v9408_v20 }
 0x78a   : > { %v9307_v5 = vunpack.c.l.bf16 %v9214_v44  ;;  %v9407_v56 = vunpack.c.l.bf16 %v18503_v0  ;;  %v9895_v1 = vadd.f32 %v9863_v30, %v9571_v21  ;;  %v9963_v35 = vmul.f32 %v17514_v25, %v9405_v43 }
 0x78b   : > { %v10420_v60 = vadd.f32 %v10388_v54, %v10096_v27  ;;  %10669 = vadd.xlane.f32.xlu1 %v10617_v29  ;;  %v10588_v40 = vmul.f32 %v18531_v10, %v9508_v34  ;;  %v10063_v31 = vmul.f32 %v17552_v33, %v9505_v62  ;;  %v9245_v36 = vrot.slane %v9175_v16, 1 }
 0x78c   : > { %v9474_v51 = vadd.f32 %v9442_v37, %v18652_v2  ;;  %v9995_v28 = vadd.f32 %v9963_v35, %v9895_v1  ;;  %v9215_v44 = vsel %vm13976_vm5, 0, %v18561_v59  ;;  %v9866_v0 = vmul.f32 %v17540_v6, %v9308_v55 }
 0x78d   : > { %v10520_v52 = vadd.f32 %v10488_v14, %v10420_v60  ;;  %v9343_v43 = vmul.f32 %v19637_v15, %v9307_v5  ;;  %v9507_v17 = vunpack.c.l.bf16 %v9278_v23  ;;  %v9246_v8 = vor.u32 %v9245_v36, %v9172_v22 }
 0x78e   : > { %v9574_v62 = vadd.f32 %v9542_v61, %v9474_v51  ;;  %v9544_v7 = vmul.f32 %v17519_v11, %v9508_v34  ;;  %v10095_v53 = vadd.f32 %v10063_v31, %v9995_v28  ;;  %v10387_v2 = vmul.f32 %v19636_v48, %v9307_v5 }
 0x78f   : > { %v10620_v16 = vadd.f32 %v10588_v40, %v10520_v52  ;;  %v10487_v37 = vmul.f32 %v19638_v41, %v9407_v56  ;;  %v9310_v47 = vunpack.c.h.bf16 %v9215_v44  ;;  %v9966_v59 = vmul.f32 %v17514_v25, %v9408_v20 }
 0x790   : > { %v9898_v24 = vadd.f32 %v9866_v0, %v9574_v62  ;;  %v10419_v55 = vadd.f32 %v10387_v2, %v10095_v53  ;;  %v9279_v23 = vsel %vm13787_vm2, %v9246_v8, 0  ;;  %v9410_v22 = vunpack.c.h.bf16 %v18498_v19 }
 0x791   : > { %10675 = vadd.xlane.f32.xlu0 %v10620_v16  ;;  %v9473_v61 = vadd.f32 %v9441_v13, %v9341_v57  ;;  %v9443_v42 = vmul.f32 %v17497_v38, %v9407_v56  ;;  %v10066_v32 = vmul.f32 %v17552_v33, %v9508_v34  ;;  %v9865_v49 = vmul.f32 %v17540_v6, %v9307_v5 }
 0x792   : > { %v9998_v12 = vadd.f32 %v9966_v59, %v9898_v24  ;;  %v9543_v27 = vmul.f32 %v17519_v11, %v9507_v17  ;;  %v10519_v54 = vadd.f32 %v10487_v37, %v10419_v55  ;;  %v10587_v20 = vmul.f32 %v18531_v10, %v9507_v17 }
 0x793   : > { %v9309_v21 = vunpack.c.l.bf16 %v9215_v44  ;;  %v9510_v30 = vunpack.c.h.bf16 %v9279_v23  ;;  %v10390_v14 = vmul.f32 %v19636_v48, %v9310_v47  ;;  %v9573_v60 = vadd.f32 %v9541_v26, %v9473_v61 }
 0x794   : > { %v10098_v29 = vadd.f32 %v10066_v32, %v9998_v12  ;;  %v10619_v1 = vadd.f32 %v10587_v20, %v10519_v54  ;;  %v9346_v57 = vmul.f32 %v19637_v15, %v9310_v47  ;;  %v9446_v13 = vmul.f32 %v17497_v38, %v9410_v22 }
 0x795   : > { %v10490_v34 = vmul.f32 %v19638_v41, %v9410_v22  ;;  %v9409_v5 = vunpack.c.l.bf16 %v18498_v19  ;;  %v9897_v40 = vadd.f32 %v9865_v49, %v9573_v60  ;;  %v9965_v31 = vmul.f32 %v17514_v25, %v9407_v56 }
 0x796   : > { %v10422_v35 = vadd.f32 %v10390_v14, %v10098_v29  ;;  %10673 = vadd.xlane.f32.xlu1 %v10619_v1  ;;  %v18722_v36 = vmul.f32 %v19637_v15, %v9309_v21  ;;  %v9216_v26 = vsel %vm13976_vm5, 0, %v18593_v50  ;;  %v9247_v51 = vrot.slane %v9182_v58, 1 }
 0x797   : > { %v9476_v52 = vadd.f32 %v9444_v39, %v18683_v9  ;;  %v10590_v44 = vmul.f32 %v18531_v10, %v9510_v30  ;;  %v9997_v19 = vadd.f32 %v9965_v31, %v9897_v40  ;;  %v10065_v0 = vmul.f32 %v17552_v33, %v9507_v17 }
 0x798   : > { %v10522_v28 = vadd.f32 %v10490_v34, %v10422_v35  ;;  %v9509_v56 = vunpack.c.l.bf16 %v9279_v23  ;;  %v9248_v8 = vor.u32 %v9247_v51, %v9179_v45  ;;  %v9868_v16 = vmul.f32 %v17540_v6, %v9310_v47 }
 0x799   : > { %v9576_v62 = vadd.f32 %v9544_v7, %v9476_v52  ;;  %v10097_v50 = vadd.f32 %v10065_v0, %v9997_v19  ;;  %v10389_v2 = vmul.f32 %v19636_v48, %v9309_v21  ;;  %v9312_v58 = vunpack.c.h.bf16 %v9216_v26 }
 0x79a   : > { %v10622_v53 = vadd.f32 %v10590_v44, %v10522_v28  ;;  %v9546_v9 = vmul.f32 %v17519_v11, %v9510_v30  ;;  %v9280_v39 = vsel %vm13787_vm2, %v9248_v8, 0  ;;  %v9968_v17 = vmul.f32 %v17514_v25, %v9410_v22 }
 0x79b   : > { %v9900_v37 = vadd.f32 %v9868_v16, %v9576_v62  ;;  %v10421_v24 = vadd.f32 %v10389_v2, %v10097_v50  ;;  %v10489_v45 = vmul.f32 %v19638_v41, %v9409_v5  ;;  %v9412_v7 = vunpack.c.h.bf16 %v18537_v63 }
 0x79c   : > { %10679 = vadd.xlane.f32.xlu0 %v10622_v53  ;;  %v9475_v47 = vadd.f32 %v9443_v42, %v9343_v43  ;;  %v9445_v59 = vmul.f32 %v17497_v38, %v9409_v5  ;;  %v9545_v55 = vmul.f32 %v17519_v11, %v9509_v56  ;;  %v10068_v61 = vmul.f32 %v17552_v33, %v9510_v30 }
 0x79d   : > { %v10000_v23 = vadd.f32 %v9968_v17, %v9900_v37  ;;  %v10521_v12 = vadd.f32 %v10489_v45, %v10421_v24  ;;  %v10589_v32 = vmul.f32 %v18531_v10, %v9509_v56  ;;  %v18747_v49 = vmul.f32 %v19637_v15, %v9312_v58 }
 0x79e   : > { %v9512_v22 = vunpack.c.h.bf16 %v9280_v39  ;;  %v10392_v20 = vmul.f32 %v19636_v48, %v9312_v58  ;;  %v9575_v29 = vadd.f32 %v9543_v27, %v9475_v47  ;;  %v9867_v43 = vmul.f32 %v17540_v6, %v9309_v21 }
 0x79f   : > { %v10100_v54 = vadd.f32 %v10068_v61, %v10000_v23  ;;  %v10621_v42 = vadd.f32 %v10589_v32, %v10521_v12  ;;  %v10492_v14 = vmul.f32 %v19638_v41, %v9412_v7  ;;  %v9311_v60 = vunpack.c.l.bf16 %v9216_v26 }
 0x7a0   : > { %v9411_v1 = vunpack.c.l.bf16 %v18537_v63  ;;  %v9899_v34 = vadd.f32 %v9867_v43, %v9575_v29  ;;  %v9967_v35 = vmul.f32 %v17514_v25, %v9409_v5  ;;  %v9478_v40 = vadd.f32 %v9446_v13, %v9346_v57 }
 0x7a1   : > { %v10424_v30 = vadd.f32 %v10392_v20, %v10100_v54  ;;  %10677 = vadd.xlane.f32.xlu1 %v10621_v42  ;;  %v10592_v31 = vmul.f32 %v18531_v10, %v9512_v22  ;;  %v9703_v51 = vshrl.u32 %v18526_v18, 16  ;;  %v9771_v27 = vrot.slane %v9706_v46, 1 }
 0x7a2   : > { %v9870_v21 = vmul.f32 %v17540_v6, %v9312_v58  ;;  %v9999_v28 = vadd.f32 %v9967_v35, %v9899_v34  ;;  %v10067_v26 = vmul.f32 %v17552_v33, %v9509_v56  ;;  %v9578_v63 = vadd.f32 %v9546_v9, %v9478_v40 }
 0x7a3   : > { %v10524_v52 = vadd.f32 %v10492_v14, %v10424_v30  ;;  %v9511_v44 = vunpack.c.l.bf16 %v9280_v39  ;;  %v10391_v19 = vmul.f32 %v19636_v48, %v9311_v60  ;;  %v9705_v5 = vrot.slane %v9703_v51, 7 }
 0x7a4   : > { %v9772_v57 = vor.u32 %v9771_v27, %v9703_v51  ;;  %v10099_v0 = vadd.f32 %v10067_v26, %v9999_v28  ;;  %v9902_v8 = vadd.f32 %v9870_v21, %v9578_v63  ;;  %v9970_v62 = vmul.f32 %v17514_v25, %v9412_v7 }
 0x7a5   : > { %v10624_v13 = vadd.f32 %v10592_v31, %v10524_v52  ;;  %v9448_v16 = vmul.f32 %v17497_v38, %v9412_v7  ;;  %v9708_v53 = vor.u32 %v9706_v46, %v9705_v5  ;;  %v9477_v50 = vadd.f32 %v9445_v59, %v18722_v36 }
 0x7a6   : > { %v9869_v56 = vmul.f32 %v17540_v6, %v9311_v60  ;;  %v10423_v2 = vadd.f32 %v10391_v19, %v10099_v0  ;;  %v10491_v58 = vmul.f32 %v19638_v41, %v9411_v1  ;;  %v10002_v9 = vadd.f32 %v9970_v62, %v9902_v8 }
 0x7a7   : > { %10683 = vadd.xlane.f32.xlu0 %v10624_v13  ;;  %v10070_v39 = vmul.f32 %v17552_v33, %v9512_v22  ;;  %v10591_v37 = vmul.f32 %v18531_v10, %v9511_v44  ;;  %v9740_v17 = vsel %vm13976_vm5, 0, %v9708_v53  ;;  %v9804_v24 = vsel %vm13787_vm2, %v9772_v57, 0  ;;  %v19639_v57 = vld [vmem:[#allocation77_spill] sm:$0xff] }
 0x7a8   : > { %v9577_v46 = vadd.f32 %v9545_v55, %v9477_v50  ;;  %v10523_v45 = vadd.f32 %v10491_v58, %v10423_v2  ;;  %v9836_v36 = vunpack.c.h.bf16 %v9740_v17  ;;  %v9936_v7 = vunpack.c.h.bf16 %v18526_v18  ;;  %v19642_v50 = vld [vmem:[#allocation106_spill] sm:$0xff]  ;;  %v19643_v58 = vld [vmem:[#allocation107_spill] sm:$0xff] }
 0x7a9   : > { %v10102_v47 = vadd.f32 %v10070_v39, %v10002_v9  ;;  %v9347_v59 = vmul.f32 %v19637_v15, %v9311_v60  ;;  %v9835_v23 = vunpack.c.l.bf16 %v9740_v17  ;;  %v9969_v12 = vmul.f32 %v17514_v25, %v9411_v1 }
 0x7aa   : > { %v9901_v61 = vadd.f32 %v9869_v56, %v9577_v46  ;;  %v9548_v32 = vmul.f32 %v17519_v11, %v9512_v22  ;;  %v10623_v54 = vadd.f32 %v10591_v37, %v10523_v45  ;;  %v10036_v3 = vunpack.c.h.bf16 %v9804_v24  ;;  %v19644_v37 = vld [vmem:[#allocation112_spill] sm:$0xff] }
 0x7ab   : > { %v10394_v20 = vmul.f32 %v19636_v48, %v9836_v36  ;;  %v9447_v4 = vmul.f32 %v17497_v38, %v9411_v1  ;;  %v9935_v55 = vunpack.c.l.bf16 %v18526_v18  ;;  %v10069_v43 = vmul.f32 %v17552_v33, %v9511_v44 }
 0x7ac   : > { %v10001_v29 = vadd.f32 %v9969_v12, %v9901_v61  ;;  %v9547_v42 = vmul.f32 %v17519_v11, %v9511_v44  ;;  %10681 = vadd.xlane.f32.xlu1 %v10623_v54  ;;  %v10494_v14 = vmul.f32 %v19638_v41, %v9936_v7  ;;  %v9480_v60 = vadd.f32 %v9448_v16, %v18747_v49 }
 0x7ad   : > { %v10426_v15 = vadd.f32 %v10394_v20, %v10102_v47  ;;  %v10035_v22 = vunpack.c.l.bf16 %v9804_v24  ;;  %v10393_v34 = vmul.f32 %v19636_v48, %v9835_v23  ;;  %v9479_v35 = vadd.f32 %v9447_v4, %v9347_v59  ;;  %v11597_v59 = vld [vmem:[#allocation4] ss:$0 sm:$0xff] }
 0x7ae   : > { %v10101_v30 = vadd.f32 %v10069_v43, %v10001_v29  ;;  %v9872_v38 = vmul.f32 %v17540_v6, %v9836_v36  ;;  %v10594_v18 = vmul.f32 %v18531_v10, %v10036_v3  ;;  %v9580_v40 = vadd.f32 %v9548_v32, %v9480_v60 }
 0x7af   : > { %v10526_v1 = vadd.f32 %v10494_v14, %v10426_v15  ;;  %v9871_v31 = vmul.f32 %v17540_v6, %v9835_v23  ;;  %v10493_v51 = vmul.f32 %v19638_v41, %v9935_v55  ;;  %v9579_v27 = vadd.f32 %v9547_v42, %v9479_v35  ;;  %v10632_v23 = vpop.xlane.xlu1 %10631 }
 0x7b0   : > { %v10425_v11 = vadd.f32 %v10393_v34, %v10101_v30  ;;  %v9972_v21 = vmul.f32 %v17514_v25, %v9936_v7  ;;  %v9904_v52 = vadd.f32 %v9872_v38, %v9580_v40  ;;  %v9971_v28 = vmul.f32 %v17514_v25, %v9935_v55 }
 0x7b1   : > { %v10626_v49 = vadd.f32 %v10594_v18, %v10526_v1  ;;  %v10593_v63 = vmul.f32 %v18531_v10, %v10035_v22  ;;  %v9903_v44 = vadd.f32 %v9871_v31, %v9579_v27  ;;  %v10072_v19 = vmul.f32 %v17552_v33, %v10036_v3 }
 0x7b2   : > { %v10525_v26 = vadd.f32 %v10493_v51, %v10425_v11  ;;  %v10004_v5 = vadd.f32 %v9972_v21, %v9904_v52  ;;  %v19640_v6 = vunpack.c.h.bf16 %v19639_v57  ;;  %v10071_v0 = vmul.f32 %v17552_v33, %v10035_v22 }
 0x7b3   : > { %10687 = vadd.xlane.f32.xlu0 %v10626_v49  ;;  %v10003_v62 = vadd.f32 %v9971_v28, %v9903_v44  ;;  %v19641_v16 = vunpack.c.l.bf16 %v19639_v57  ;;  %v10496_v56 = vmul.f32 %v19638_v41, %v19642_v50  ;;  %v10495_v9 = vmul.f32 %v19638_v41, %v19643_v58  ;;  %v10630_v41 = vpop.xlane.xlu0 %10629  ;;  %v10638_v61 = vpop.xlane.xlu1 %10637 }
 0x7b4   : > { %v10396_v13 = vmul.f32 %v19636_v48, %v19640_v6  ;;  %v10625_v8 = vadd.f32 %v10593_v63, %v10525_v26  ;;  %v10104_v53 = vadd.f32 %v10072_v19, %v10004_v5  ;;  %v19645_v17 = vunpack.c.h.bf16 %v19644_v37  ;;  %v19648_v63 = vld [vmem:[#allocation10_spill] sm:$0xff] }
 0x7b5   : > { %v10395_v25 = vmul.f32 %v19636_v48, %v19641_v16  ;;  %v10103_v2 = vadd.f32 %v10071_v0, %v10003_v62  ;;  %v19646_v46 = vunpack.c.l.bf16 %v19644_v37  ;;  %v19647_v27 = vlaneseq }
 0x7b6   : > { %10685 = vadd.xlane.f32.xlu1 %v10625_v8  ;;  %v10428_v39 = vadd.f32 %v10396_v13, %v10104_v53  ;;  %v10596_v33 = vmul.f32 %v18531_v10, %v19645_v17  ;;  %vm10777_vm2 = vcmask 130112   ;;  %vm10914_vm5 = vcmask 1041409  }
 0x7b7   : > { %v10427_v24 = vadd.f32 %v10395_v25, %v10103_v2  ;;  %v10595_v45 = vmul.f32 %v18531_v10, %v19646_v46  ;;  %v10634_v12 = vpop.xlane.xlu0 %10633  ;;  %v10642_v32 = vpop.xlane.xlu1 %10641  ;;  %v10767_v21 = vand.u32 127, %v19647_v27  ;;  %vm10920_vm0 = vcmask 1044484  }
 0x7b8   : > { %v10528_v48 = vadd.f32 %v10496_v56, %v10428_v39  ;;  %vm10922_vm1 = vcmask 1045509   ;;  %vm10924_vm3 = vcmask 1046534   ;;  %vm10926_vm4 = vcmask 1047559  }
 0x7b9   : > { %v10527_v36 = vadd.f32 %v10495_v9, %v10427_v24  ;;  %v10772_v52 = vadd.s32 4294967288, %v10767_v21  ;;  %v18813_v44 = vsub.s32 %v10767_v21, %v19648_v63  ;;  %vm10937_vm6 = vcmask 130048  }
 0x7ba   : > { %v10628_v7 = vadd.f32 %v10596_v33, %v10528_v48 }
 0x7bb   : > { %v10627_v47 = vadd.f32 %v10595_v45, %v10527_v36  ;;  %v10646_v54 = vpop.xlane.xlu1 %10645  ;;  %v10636_v3 = vpop.xlane.xlu0 %10635  ;;  %v18816_v19 = vsub.s32 %v10772_v52, %v19648_v63 }
 0x7bc   : > { %10691 = vadd.xlane.f32.xlu0 %v10628_v7 }
 0x7bd   : > { %10689 = vadd.xlane.f32.xlu1 %v10627_v47 }
 0x7bf   : > { %v10650_v20 = vpop.xlane.xlu1 %10649  ;;  %v10640_v4 = vpop.xlane.xlu0 %10639 }
 0x7c3   : > { %v10654_v55 = vpop.xlane.xlu1 %10653  ;;  %v10644_v29 = vpop.xlane.xlu0 %10643 }
 0x7c7   : > { %v10648_v43 = vpop.xlane.xlu0 %10647 }
 0x7cb   : > { %v10652_v15 = vpop.xlane.xlu0 %10651 }
 0x7ce   : > { %10699 = vperm.xlu1 %13266, %v11597_v59  }
 0x7cf   : > { %v10656_v60 = vpop.xlane.xlu0 %10655 }
 0x7ee   : > { %v10660_v22 = vpop.xlane.xlu0 %10659 }
 0x7f4   : > { %v10658_v10 = vpop.xlane.xlu1 %10657 }
 0x7fd   : > { %v10664_v34 = vpop.xlane.xlu0 %10663 }
 0x802   : > { %v10662_v42 = vpop.xlane.xlu1 %10661 }
 0x809   : > { %v10668_v38 = vpop.xlane.xlu0 %10667 }
 0x80d   : > { %v10666_v14 = vpop.xlane.xlu1 %10665 }
 0x813   : > { %v10672_v18 = vpop.xlane.xlu0 %10671 }
 0x818   : > { %v10670_v30 = vpop.xlane.xlu1 %10669 }
 0x81e   : > { %v10676_v31 = vpop.xlane.xlu0 %10675 }
 0x823   : > { %v10674_v35 = vpop.xlane.xlu1 %10673 }
 0x829   : > { %v10680_v51 = vpop.xlane.xlu0 %10679 }
 0x82e   : > { %v10678_v1 = vpop.xlane.xlu1 %10677 }
 0x834   : > { %v10684_v28 = vpop.xlane.xlu0 %10683 }
 0x839   : > { %v10682_v40 = vpop.xlane.xlu1 %10681 }
 0x840   : > { %v10688_v25 = vpop.xlane.xlu0 %10687 }
 0x843   : > { %v10686_v11 = vpop.xlane.xlu1 %10685 }
 0x84a   : > { %v10690_v49 = vpop.xlane.xlu1 %10689 }
 0x84e   : > { %v10700_v26 = vpop.permute.xlu1 %10699 }
 0x84f   : > { %v10702_v5 = vadd.f32 %v10700_v26, %v10630_v41  ;;  %v10703_v57 = vadd.f32 %v10700_v26, %v10632_v23  ;;  %v10704_v6 = vadd.f32 %v10700_v26, %v10634_v12  ;;  %v10705_v13 = vadd.f32 %v10700_v26, %v10636_v3  ;;  %v10692_v3 = vpop.xlane.xlu0 %10691 }
 0x850   : > { %v10706_v0 = vadd.f32 %v10700_v26, %v10638_v61  ;;  %v10707_v8 = vadd.f32 %v10700_v26, %v10640_v4  ;;  %v10708_v62 = vadd.f32 %v10700_v26, %v10642_v32  ;;  %v10709_v16 = vadd.f32 %v10700_v26, %v10644_v29 }
 0x851   : > { %v18818_v53 = vadd.f32 %v10700_v26, %v10646_v54  ;;  %v18820_v50 = vadd.f32 %v10700_v26, %v10648_v43  ;;  %v18822_v56 = vadd.f32 %v10700_v26, %v10650_v20  ;;  %v18824_v2 = vadd.f32 %v10700_v26, %v10652_v15 }
 0x852   : > { %v18826_v58 = vadd.f32 %v10700_v26, %v10654_v55  ;;  %v18828_v9 = vadd.f32 %v10700_v26, %v10656_v60  ;;  %v18830_v39 = vadd.f32 %v10700_v26, %v10658_v10  ;;  %v18832_v37 = vadd.f32 %v10700_v26, %v10660_v22 }
 0x853   : > { %v10718_v17 = vadd.f32 %v10700_v26, %v10662_v42  ;;  %v10719_v33 = vadd.f32 %v10700_v26, %v10664_v34  ;;  %v10720_v24 = vadd.f32 %v10700_v26, %v10666_v14  ;;  %v10721_v46 = vadd.f32 %v10700_v26, %v10668_v38 }
 0x854   : > { %v10722_v45 = vadd.f32 %v10700_v26, %v10670_v30  ;;  %v10723_v48 = vadd.f32 %v10700_v26, %v10672_v18  ;;  %v10724_v36 = vadd.f32 %v10700_v26, %v10674_v35  ;;  %v10725_v7 = vadd.f32 %v10700_v26, %v10676_v31 }
 0x855   : > { %v10771_v47 = vrot.slane %v10702_v5, %v18813_v44  ;;  %v10776_v59 = vrot.slane %v10703_v57, %v18816_v19  ;;  %v10782_v23 = vrot.slane %v10704_v6, %v18813_v44  ;;  %v10786_v41 = vrot.slane %v10705_v13, %v18816_v19 }
 0x856   : > { %v10791_v61 = vrot.slane %v10706_v0, %v18813_v44  ;;  %v10795_v12 = vrot.slane %v10707_v8, %v18816_v19  ;;  %v10800_v32 = vrot.slane %v10708_v62, %v18813_v44  ;;  %v10804_v54 = vrot.slane %v10709_v16, %v18816_v19 }
 0x857   : > { %v10726_v20 = vadd.f32 %v10700_v26, %v10678_v1  ;;  %v10727_v4 = vadd.f32 %v10700_v26, %v10680_v51  ;;  %v10728_v55 = vadd.f32 %v10700_v26, %v10682_v40  ;;  %v10729_v29 = vadd.f32 %v10700_v26, %v10684_v28 }
 0x858   : > { %v10730_v10 = vadd.f32 %v10700_v26, %v10686_v11  ;;  %v10731_v43 = vadd.f32 %v10700_v26, %v10688_v25  ;;  %v18842_v42 = vadd.f32 %v10700_v26, %v10690_v49  ;;  %v18844_v15 = vadd.f32 %v10700_v26, %v10692_v3 }
 0x859   : > { %v10778_v14 = vsel %vm10777_vm2, %v10776_v59, %v10771_v47  ;;  %v10787_v60 = vsel %vm10777_vm2, %v10786_v41, %v10782_v23  ;;  %v10809_v22 = vrot.slane %v18818_v53, %v18813_v44  ;;  %v10813_v30 = vrot.slane %v18820_v50, %v18816_v19 }
 0x85a   : > { %v10796_v34 = vsel %vm10777_vm2, %v10795_v12, %v10791_v61  ;;  %v10805_v35 = vsel %vm10777_vm2, %v10804_v54, %v10800_v32  ;;  %v10845_v38 = vrot.slane %v10718_v17, %v18813_v44  ;;  %v10849_v1 = vrot.slane %v10719_v33, %v18816_v19 }
 0x85b   : > { %v10818_v18 = vrot.slane %v18822_v56, %v18813_v44  ;;  %v10854_v40 = vrot.slane %v10720_v24, %v18813_v44  ;;  %v10858_v31 = vrot.slane %v10721_v46, %v18816_v19  ;;  %v10863_v11 = vrot.slane %v10722_v45, %v18813_v44 }
 0x85c   : > { %v10822_v51 = vrot.slane %v18824_v2, %v18816_v19  ;;  %v10827_v27 = vrot.slane %v18826_v58, %v18813_v44  ;;  %v10867_v21 = vrot.slane %v10723_v48, %v18816_v19  ;;  %v10872_v49 = vrot.slane %v10724_v36, %v18813_v44 }
 0x85d   : > { %v10831_v52 = vrot.slane %v18828_v9, %v18816_v19  ;;  %v10850_v28 = vsel %vm10777_vm2, %v10849_v1, %v10845_v38  ;;  %v10859_v26 = vsel %vm10777_vm2, %v10858_v31, %v10854_v40  ;;  %v10876_v63 = vrot.slane %v10725_v7, %v18816_v19 }
 0x85e   : > { %v10836_v5 = vrot.slane %v18830_v39, %v18813_v44  ;;  %v10868_v57 = vsel %vm10777_vm2, %v10867_v21, %v10863_v11  ;;  %v10881_v6 = vrot.slane %v10726_v20, %v18813_v44  ;;  %v10885_v13 = vrot.slane %v10727_v4, %v18816_v19 }
 0x85f   : > { %v10840_v0 = vrot.slane %v18832_v37, %v18816_v19  ;;  %v10890_v8 = vrot.slane %v10728_v55, %v18813_v44  ;;  %v10894_v62 = vrot.slane %v10729_v29, %v18816_v19  ;;  %v10899_v16 = vrot.slane %v10730_v10, %v18813_v44 }
 0x860   : > { %v10877_v25 = vsel %vm10777_vm2, %v10876_v63, %v10872_v49  ;;  %v10903_v53 = vrot.slane %v10731_v43, %v18816_v19  ;;  %v10915_v50 = vsel %vm10914_vm5, %v10787_v60, %v10778_v14  ;;  %v10928_v56 = vsel %vm10914_vm5, %v10859_v26, %v10850_v28 }
 0x861   : > { %v10908_v2 = vrot.slane %v18842_v42, %v18813_v44  ;;  %v10912_v58 = vrot.slane %v18844_v15, %v18816_v19  ;;  %v10917_v9 = vsel %vm10916_vm14, %v10796_v34, %v10915_v50  ;;  %v10929_v39 = vsel %vm10916_vm14, %v10868_v57, %v10928_v56 }
 0x862   : > { %v10814_v37 = vsel %vm10777_vm2, %v10813_v30, %v10809_v22  ;;  %v10886_v17 = vsel %vm10777_vm2, %v10885_v13, %v10881_v6  ;;  %v10919_v33 = vsel %vm10918_vm15, %v10805_v35, %v10917_v9  ;;  %v10930_v24 = vsel %vm10918_vm15, %v10877_v25, %v10929_v39 }
 0x863   : > { %v10823_v44 = vsel %vm10777_vm2, %v10822_v51, %v10818_v18  ;;  %v10895_v46 = vsel %vm10777_vm2, %v10894_v62, %v10890_v8  ;;  %v10921_v19 = vsel %vm10920_vm0, %v10814_v37, %v10919_v33  ;;  %v10931_v45 = vsel %vm10920_vm0, %v10886_v17, %v10930_v24 }
 0x864   : > { %v10832_v48 = vsel %vm10777_vm2, %v10831_v52, %v10827_v27  ;;  %v10904_v36 = vsel %vm10777_vm2, %v10903_v53, %v10899_v16  ;;  %v10923_v7 = vsel %vm10922_vm1, %v10823_v44, %v10921_v19  ;;  %v10932_v47 = vsel %vm10922_vm1, %v10895_v46, %v10931_v45 }
 0x865   : > { %v10841_v59 = vsel %vm10777_vm2, %v10840_v0, %v10836_v5  ;;  %v10913_v23 = vsel %vm10777_vm2, %v10912_v58, %v10908_v2  ;;  %v10925_v41 = vsel %vm10924_vm3, %v10832_v48, %v10923_v7  ;;  %v10933_v61 = vsel %vm10924_vm3, %v10904_v36, %v10932_v47 }
 0x866   : > { %v10927_v12 = vsel %vm10926_vm4, %v10841_v59, %v10925_v41  ;;  %v10934_v32 = vsel %vm10926_vm4, %v10913_v23, %v10933_v61 }
 0x867   : > { %10938 = vst.msk [vmem:[%s327_s25] sm:$0xff] %vm10937_vm6, %v10927_v12  ;;  %10939 = vst.msk [vmem:[%s327_s25 + $0x8] sm:$0xff] %vm10937_vm6, %v10934_v32 }
 0x868   : > { %13611 = shalt.err (!%p13608_p3)
}
 0x869   : > { %s13612_s23 = scalar_lea.hbm %s18914_s15, 256  ;;  %s13616_s25 = scalar_lea.hbm %s18979_s9, 512 }
 0x86a   : > { %p13613_p4 = scmp.ne.s32.totalorder %s18914_s15, %s13612_s23  ;;  %p13617_p9 = scmp.lt.u32.totalorder %s18914_s15, %s18979_s9 }
 0x86b   : > { %p13618_p10 = scmp.lt.u32.totalorder %s13616_s25, %s13612_s23  ;;  %p13620_p12 = scmp.lt.u32.totalorder %s13612_s23, %s18914_s15 }
 0x86c   : > { %p13614_p7 = pnand %p13613_p4, %p13760_p5 }
 0x86d   : > { %p13619_p11 = por %p13618_p10, %p13617_p9 }
 0x86e   : > { %p13615_p8 = pneg %p13614_p7 }
 0x86f   : > { %p13621_p13 = por %p13620_p12, %p13619_p11 }
 0x871   : > { %p13622_p0 = pnand %p13621_p13, %p13615_p8 }
 0x873   : > { %13625 = shalt.err (!%p13622_p0)
}
 0x874   : > { %s13668_s27 = smov 128  }
 0x875   : > { %13221 = dma.vmem_to_hbm [thread:$0]  (%p13760_p5), %s18920_s26, 256, %s18914_s15, %s18928_s17, %s13668_s27, %s13668_s27, %s13663_s28  }
 0x876 PF: > { %p13227_p1 = scmp.ge.s32.totalorder %s13660_s14, 2  ;;  %s10969_s18 = sand.u32 1, %s13648_s11  }
 0x877   : > { %s10970_s30 = scalar_lea.sflag [#allocation6], %s10969_s18 }
 0x878   : > { %p13224_p2 = pnand %p13227_p1, %p13764_p6 }
 0x87a   : > { %13643 = dma.done.wait (!%p13224_p2), %s10970_s30, 256  }
 0x87b   : > { %13645 = vsyncadd (!%p13224_p2), %s10970_s30, 4294967040  ;;  %p21_p3 = scmp.ge.s32.totalorder %s13747_s16, 4   ;;  %s19649_s11 = smov %s13652_s12 }
 0x87c   : > { %s19650_s12 = smov %s13656_s13  ;;  %s19651_s13 = smov %s13758_s19 }
 0x87d   : > { %s19652_s14 = smov %s13747_s16  ;;  %23 = sbr.rel (!%p21_p3) target bundleno = 6 (0x6), region = 110 }
 0x884   :  { %10975 = vsyncpa [#allocation6], 1 }
 0x885   :  { %10977 = vsyncpa [#allocation6 + $0x1], 1 }

</bundles_post_ra>
